<compile_context>
chip_gen: v7x
topology: tpu7x:2x2x1
jax: 0.10.0
libtpu: 0.0.40
codegen_flags: <defaults>
</compile_context>

<pallas_src>
import math
import functools

import jax
import jax.numpy as jnp
from jax import lax
from jax.experimental import pallas as pl
from jax.experimental.pallas import tpu as pltpu

# ---- module constants (from nn.py) -------------------------------------------------
LEVELS = 17
LTC_SPARSITY = 0.8
PRED_VARS = 'uwind vwind air shum'.split()
VAR_N = len(PRED_VARS)            # 4
PRED_N = 4                        # LiquidOperator(pred_n=4)

UNITS = 3 * LEVELS                # AutoNCP(3*LEVELS, LEVELS) -> 51 state neurons
SENSORY = LEVELS                  # LTC input size (17)
MOTOR = LEVELS                    # AutoNCP output size (17)
ODE_UNFOLDS = 6                   # ncps LTCCell default
EPSILON = 1e-8                    # ncps LTCCell default

INTERM = VAR_N * LEVELS                      # 68
MID_TILE = (LEVELS + INTERM) // 2            # 42
CROSS_IN = VAR_N * INTERM                    # 272
MID_CROSS = (CROSS_IN + INTERM) // 2         # 170
OUT_DIM = VAR_N * LEVELS                     # 68


# =====================================================================================
# Fused whole-model kernel
# =====================================================================================
def _fused_kernel(B, L,
                  x_ref,
                  pw1_ref, pb1_ref, pw2_ref, pb2_ref,
                  inw_ref, inb_ref,
                  sw_ref, smu_ref, ssig_ref, serev_ref, smask_ref,
                  w_ref, mu_ref, sigma_ref, erev_ref, mask_ref,
                  gleak_ref, vleak_ref, cm_ref,
                  ow_ref, ob_ref,
                  wt1_ref, bt1_ref, wt2_ref, bt2_ref, wt3_ref, bt3_ref,
                  wc1_ref, bc1_ref, wc2_ref, bc2_ref, wc3_ref, bc3_ref,
                  o_ref,
                  h_scr, rs_scr):
    f32 = jnp.float32
    sp = jax.nn.softplus
    sigm = jax.nn.sigmoid

    # ---- 1. preproc VarEncoder: Linear(68,68) -> Sigmoid -> Linear(68,68) ----------
    x = x_ref[...]
    h1 = sigm(jnp.dot(x, pw1_ref[...], preferred_element_type=f32) + pb1_ref[...])
    h = jnp.dot(h1, pw2_ref[...], preferred_element_type=f32) + pb2_ref[...]
    h_scr[...] = h                                    # (B, 68) staged for dynamic row loads

    # ---- 2. hoisted, loop-invariant LTC parameter prep -----------------------------
    # synaptic matrices are [var, pre, post]: reductions over 'pre' are axis=1 sums and
    # the state stays a lane-major (V, U) vector (only relayout is the gate broadcast).
    w_eff = sp(w_ref[...]) * mask_ref[...]            # (V, U, U)
    werev = w_eff * erev_ref[...]
    mu = mu_ref[...]
    sigma = sigma_ref[...]

    sw_eff = sp(sw_ref[...]) * smask_ref[...]         # (V, S, U)
    swerev = sw_eff * serev_ref[...]
    smu = smu_ref[...]
    ssig = ssig_ref[...]

    gleak = sp(gleak_ref[...])                        # (V, U)
    gl_vl = gleak * vleak_ref[...]
    cm_t = sp(cm_ref[...]) * float(ODE_UNFOLDS)       # cm / (elapsed_time / unfolds), dt=1
    den_base = cm_t + gleak

    in_w = inw_ref[...]                               # (V, S)
    in_b = inb_ref[...]
    ow = ow_ref[...]                                  # (V, M)
    ob = ob_ref[...]

    # ---- 3. time recurrence, all 4 LTC cells batched over the leading var axis -----
    def step(t, s):                                   # s: (V, U) lane-major state
        t_src = jnp.minimum(t, B - 1)                 # repeat last timestep pred_n times
        row = h_scr[pl.ds(t_src, 1), :]               # (1, 68)
        xt = jnp.concatenate(
            [row[:, v * SENSORY:(v + 1) * SENSORY] for v in range(VAR_N)], axis=0)  # (V, S)
        inp = xt * in_w + in_b                        # ncps affine input mapping

        # sensory synapses (state independent -> outside the unfold loop)
        sgate = sigm(ssig * (inp[:, :, None] - smu))               # (V, S, U)
        sens_num = jnp.sum(swerev * sgate, axis=1)                 # (V, U)
        sens_den = jnp.sum(sw_eff * sgate, axis=1)                 # (V, U)

        # fused ODE solver (6 unfolds, statically unrolled)
        for _ in range(ODE_UNFOLDS):
            gate = sigm(sigma * (s[:, :, None] - mu))              # (V, U, U)
            num = cm_t * s + gl_vl + jnp.sum(werev * gate, axis=1) + sens_num
            den = den_base + jnp.sum(w_eff * gate, axis=1) + sens_den
            s = num / (den + EPSILON)

        # affine output mapping of the motor neurons; store variable-major rows
        y = s[:, :MOTOR] * ow + ob                                 # (V, M)
        for v in range(VAR_N):
            rs_scr[pl.ds(v * L + t, 1), :] = y[v:v + 1, :]
        return s

    lax.fori_loop(0, L, step, jnp.zeros((VAR_N, UNITS), f32))

    # ---- 4. CrossConnector: per-tile MLP then cross MLP ----------------------------
    tile_in = rs_scr[...]                                          # (V*L, 17), var-major rows
    t1 = sigm(jnp.dot(tile_in, wt1_ref[...], preferred_element_type=f32) + bt1_ref[...])
    t2 = sigm(jnp.dot(t1, wt2_ref[...], preferred_element_type=f32) + bt2_ref[...])
    t3 = sigm(jnp.dot(t2, wt3_ref[...], preferred_element_type=f32) + bt3_ref[...])  # (V*L, 68)

    # Flatten(-2,-1): row t of the cross input is [var0 | var1 | var2 | var3] features
    cross_in = jnp.concatenate(
        [t3[v * L:(v + 1) * L, :] for v in range(VAR_N)], axis=1)                   # (L, 272)

    c1 = sigm(jnp.dot(cross_in, wc1_ref[...], preferred_element_type=f32) + bc1_ref[...])
    c2 = sigm(jnp.dot(c1, wc2_ref[...], preferred_element_type=f32) + bc2_ref[...])
    out = jnp.dot(c2, wc3_ref[...], preferred_element_type=f32) + bc3_ref[...]      # (L, 68)
    o_ref[...] = out.astype(o_ref.dtype)


def liquid_operator_forward(params, x):
    """x: (B, VAR_N*LEVELS) f32 -> (B + PRED_N, VAR_N*LEVELS) f32 (single fused kernel)."""
    B = x.shape[0]
    L = B + PRED_N
    f32 = jnp.float32
    p = params
    ltc = p['ltc']

    def wb(name):
        W, b = p[name]
        return W, b.reshape(1, -1)

    pw1, pb1 = wb('pre1')
    pw2, pb2 = wb('pre2')
    wt1, bt1 = wb('tile1')
    wt2, bt2 = wb('tile2')
    wt3, bt3 = wb('tile3')
    wc1, bc1 = wb('cross1')
    wc2, bc2 = wb('cross2')
    wc3, bc3 = wb('cross3')

    args = [
        x,
        pw1, pb1, pw2, pb2,
        ltc['input_w'], ltc['input_b'],
        ltc['sensory_w'], ltc['sensory_mu'], ltc['sensory_sigma'],
        ltc['sensory_erev'], ltc['sensory_mask'],
        ltc['w'], ltc['mu'], ltc['sigma'], ltc['erev'], ltc['mask'],
        ltc['gleak'], ltc['vleak'], ltc['cm'],
        ltc['output_w'], ltc['output_b'],
        wt1, bt1, wt2, bt2, wt3, bt3,
        wc1, bc1, wc2, bc2, wc3, bc3,
    ]

    kernel = functools.partial(_fused_kernel, B, L)
    # TODO(synk): on v7x a 2-way core split (2 LTC chains per TensorCore) could halve the
    # serial recurrence latency; single fused call keeps it simple and optimal for v5e/v6e.
    return pl.pallas_call(
        kernel,
        out_shape=jax.ShapeDtypeStruct((L, OUT_DIM), f32),
        scratch_shapes=[
            pltpu.VMEM((B, OUT_DIM), f32),          # staged preproc output (sequence source)
            pltpu.VMEM((VAR_N * L, MOTOR), f32),    # LTC motor outputs, variable-major
        ],
    )(*args)


# =====================================================================================
# Deterministic parameter initialization (synthetic weights; no checkpoint load).
# =====================================================================================
def _uniform(key, shape, lo, hi):
    return jax.random.uniform(key, shape, jnp.float32, lo, hi)


def _init_linear(key, fan_in, fan_out):
    kw, kb = jax.random.split(key)
    bound = 1.0 / math.sqrt(fan_in)
    W = jax.random.uniform(kw, (fan_in, fan_out), jnp.float32, -bound, bound)
    b = jax.random.uniform(kb, (fan_out,), jnp.float32, -bound, bound)
    return W, b


def _init_ltc_params(key):
    ks = jax.random.split(key, 13)
    V, U, S, M = VAR_N, UNITS, SENSORY, MOTOR
    p = {}
    p['gleak'] = _uniform(ks[0], (V, U), 0.001, 1.0)
    p['vleak'] = _uniform(ks[1], (V, U), -0.2, 0.2)
    p['cm'] = _uniform(ks[2], (V, U), 0.4, 0.6)
    # synaptic matrices stored [var, pre, post] (matches ncps LTCCell layout)
    p['w'] = _uniform(ks[3], (V, U, U), 0.001, 1.0)
    p['sigma'] = _uniform(ks[4], (V, U, U), 3.0, 8.0)
    p['mu'] = _uniform(ks[5], (V, U, U), 0.3, 0.8)
    p['erev'] = jnp.where(jax.random.bernoulli(ks[6], 0.5, (V, U, U)), 1.0, -1.0).astype(jnp.float32)
    # TODO(synk): AutoNCP's structured random wiring graph (sensory->inter->command->motor
    # fan-outs at sparsity 0.8) is approximated with an i.i.d. Bernoulli mask of matching density.
    p['mask'] = jax.random.bernoulli(ks[7], 1.0 - LTC_SPARSITY, (V, U, U)).astype(jnp.float32)
    p['sensory_w'] = _uniform(ks[8], (V, S, U), 0.001, 1.0)
    p['sensory_sigma'] = _uniform(ks[9], (V, S, U), 3.0, 8.0)
    p['sensory_mu'] = _uniform(ks[10], (V, S, U), 0.3, 0.8)
    p['sensory_erev'] = jnp.where(jax.random.bernoulli(ks[11], 0.5, (V, S, U)), 1.0, -1.0).astype(jnp.float32)
    p['sensory_mask'] = jax.random.bernoulli(ks[12], 1.0 - LTC_SPARSITY, (V, S, U)).astype(jnp.float32)
    # ncps affine input/output mapping init (w=1, b=0)
    p['input_w'] = jnp.ones((V, S), jnp.float32)
    p['input_b'] = jnp.zeros((V, S), jnp.float32)
    p['output_w'] = jnp.ones((V, M), jnp.float32)
    p['output_b'] = jnp.zeros((V, M), jnp.float32)
    return p


def init_model_params(key):
    keys = jax.random.split(key, 9)
    params = {
        # VarEncoder (preproc): Linear(68,68) -> Sigmoid -> Linear(68,68)
        'pre1': _init_linear(keys[0], INTERM, INTERM),
        'pre2': _init_linear(keys[1], INTERM, INTERM),
        # CrossConnector per-tile MLP: 17 -> 17 -> 42 -> 68 (sigmoid after each)
        'tile1': _init_linear(keys[2], LEVELS, LEVELS),
        'tile2': _init_linear(keys[3], LEVELS, MID_TILE),
        'tile3': _init_linear(keys[4], MID_TILE, INTERM),
        # CrossConnector cross MLP: 272 -> 272 -> 170 -> 68
        'cross1': _init_linear(keys[5], CROSS_IN, CROSS_IN),
        'cross2': _init_linear(keys[6], CROSS_IN, MID_CROSS),
        'cross3': _init_linear(keys[7], MID_CROSS, OUT_DIM),
        # 4 independent LTC cells (batched over the leading var axis)
        'ltc': _init_ltc_params(keys[8]),
    }
    return params


if __name__ == "__main__":
    key = jax.random.PRNGKey(0)
    kp, kx = jax.random.split(key)
    params = init_model_params(kp)

    B = 8
    x = jax.random.normal(kx, (B, VAR_N * LEVELS), jnp.float32)          # (8, 68)

    fwd = jax.jit(liquid_operator_forward)
    out = jax.block_until_ready(fwd(params, x))

    assert out.shape == (B + PRED_N, VAR_N * LEVELS), out.shape          # (12, 68)
    assert bool(jnp.all(jnp.isfinite(out)))
    print("KERNEL_OK")
</pallas_src>

<mosaic_0001>
module attributes {stable_mosaic.version = 11 : i64} {
  func.func @_fused_kernel(%arg0: memref<8x68xf32, #tpu.memory_space<vmem>>, %arg1: memref<68x68xf32, #tpu.memory_space<vmem>>, %arg2: memref<1x68xf32, #tpu.memory_space<vmem>>, %arg3: memref<68x68xf32, #tpu.memory_space<vmem>>, %arg4: memref<1x68xf32, #tpu.memory_space<vmem>>, %arg5: memref<4x17xf32, #tpu.memory_space<vmem>>, %arg6: memref<4x17xf32, #tpu.memory_space<vmem>>, %arg7: memref<4x17x51xf32, #tpu.memory_space<vmem>>, %arg8: memref<4x17x51xf32, #tpu.memory_space<vmem>>, %arg9: memref<4x17x51xf32, #tpu.memory_space<vmem>>, %arg10: memref<4x17x51xf32, #tpu.memory_space<vmem>>, %arg11: memref<4x17x51xf32, #tpu.memory_space<vmem>>, %arg12: memref<4x51x51xf32, #tpu.memory_space<vmem>>, %arg13: memref<4x51x51xf32, #tpu.memory_space<vmem>>, %arg14: memref<4x51x51xf32, #tpu.memory_space<vmem>>, %arg15: memref<4x51x51xf32, #tpu.memory_space<vmem>>, %arg16: memref<4x51x51xf32, #tpu.memory_space<vmem>>, %arg17: memref<4x51xf32, #tpu.memory_space<vmem>>, %arg18: memref<4x51xf32, #tpu.memory_space<vmem>>, %arg19: memref<4x51xf32, #tpu.memory_space<vmem>>, %arg20: memref<4x17xf32, #tpu.memory_space<vmem>>, %arg21: memref<4x17xf32, #tpu.memory_space<vmem>>, %arg22: memref<17x17xf32, #tpu.memory_space<vmem>>, %arg23: memref<1x17xf32, #tpu.memory_space<vmem>>, %arg24: memref<17x42xf32, #tpu.memory_space<vmem>>, %arg25: memref<1x42xf32, #tpu.memory_space<vmem>>, %arg26: memref<42x68xf32, #tpu.memory_space<vmem>>, %arg27: memref<1x68xf32, #tpu.memory_space<vmem>>, %arg28: memref<272x272xf32, #tpu.memory_space<vmem>>, %arg29: memref<1x272xf32, #tpu.memory_space<vmem>>, %arg30: memref<272x170xf32, #tpu.memory_space<vmem>>, %arg31: memref<1x170xf32, #tpu.memory_space<vmem>>, %arg32: memref<170x68xf32, #tpu.memory_space<vmem>>, %arg33: memref<1x68xf32, #tpu.memory_space<vmem>>, %arg34: memref<12x68xf32, #tpu.memory_space<vmem>>, %arg35: memref<8x68xf32, #tpu.memory_space<vmem>>, %arg36: memref<48x17xf32, #tpu.memory_space<vmem>>) attributes {dimension_semantics = [], scalar_prefetch = 0 : i64, scratch_operands = 2 : i64, tpu.core_type = #tpu.core_type<tc>} {
    %c0 = arith.constant 0 : index
    %c0_0 = arith.constant 0 : index
    %0 = vector.load %arg0[%c0, %c0_0] : memref<8x68xf32, #tpu.memory_space<vmem>>, vector<8x68xf32>
    %c0_1 = arith.constant 0 : index
    %c0_2 = arith.constant 0 : index
    %1 = vector.load %arg1[%c0_1, %c0_2] : memref<68x68xf32, #tpu.memory_space<vmem>>, vector<68x68xf32>
    %cst = arith.constant dense<0.000000e+00> : vector<8x68xf32>
    %2 = tpu.matmul %0, %1, %cst {dimension_numbers = #tpu.dot_dimension_numbers<[1], [0], [0], [1], [0, 0, 1, 1], [], []>} : vector<8x68xf32>, vector<68x68xf32>, vector<8x68xf32> -> vector<8x68xf32>
    %c0_3 = arith.constant 0 : index
    %c0_4 = arith.constant 0 : index
    %3 = vector.load %arg2[%c0_3, %c0_4] : memref<1x68xf32, #tpu.memory_space<vmem>>, vector<1x68xf32>
    %4 = vector.broadcast %3 : vector<1x68xf32> to vector<8x68xf32>
    %5 = arith.addf %2, %4 : vector<8x68xf32>
    %6 = arith.negf %5 : vector<8x68xf32>
    %7 = math.exp %6 : vector<8x68xf32>
    %cst_5 = arith.constant 1.000000e+00 : f32
    %8 = vector.broadcast %cst_5 : f32 to vector<8x68xf32>
    %9 = arith.addf %8, %7 : vector<8x68xf32>
    %10 = arith.divf %8, %9 : vector<8x68xf32>
    %c0_6 = arith.constant 0 : index
    %c0_7 = arith.constant 0 : index
    %11 = vector.load %arg3[%c0_6, %c0_7] : memref<68x68xf32, #tpu.memory_space<vmem>>, vector<68x68xf32>
    %cst_8 = arith.constant dense<0.000000e+00> : vector<8x68xf32>
    %12 = tpu.matmul %10, %11, %cst_8 {dimension_numbers = #tpu.dot_dimension_numbers<[1], [0], [0], [1], [0, 0, 1, 1], [], []>} : vector<8x68xf32>, vector<68x68xf32>, vector<8x68xf32> -> vector<8x68xf32>
    %c0_9 = arith.constant 0 : index
    %c0_10 = arith.constant 0 : index
    %13 = vector.load %arg4[%c0_9, %c0_10] : memref<1x68xf32, #tpu.memory_space<vmem>>, vector<1x68xf32>
    %14 = vector.broadcast %13 : vector<1x68xf32> to vector<8x68xf32>
    %15 = arith.addf %12, %14 : vector<8x68xf32>
    %c0_11 = arith.constant 0 : index
    %c0_12 = arith.constant 0 : index
    %16 = vector.load %arg35[%c0_11, %c0_12] : memref<8x68xf32, #tpu.memory_space<vmem>>, vector<8x68xf32>
    tpu.vector_store %arg35[%c0_11, %c0_12], %15 {strides = array<i32>} : memref<8x68xf32, #tpu.memory_space<vmem>>, vector<8x68xf32>,
    %c0_13 = arith.constant 0 : index
    %c0_14 = arith.constant 0 : index
    %c0_15 = arith.constant 0 : index
    %17 = vector.load %arg12[%c0_13, %c0_14, %c0_15] : memref<4x51x51xf32, #tpu.memory_space<vmem>>, vector<4x51x51xf32>
    %cst_16 = arith.constant 0.000000e+00 : f32
    %18 = vector.broadcast %cst_16 : f32 to vector<4x51x51xf32>
    %19 = arith.maximumf %17, %18 : vector<4x51x51xf32>
    %20 = vector.broadcast %cst_16 : f32 to vector<4x51x51xf32>
    %21 = arith.subf %17, %20 : vector<4x51x51xf32>
    %22 = arith.cmpf one, %21, %21 : vector<4x51x51xf32>
    %23 = vector.broadcast %cst_16 : f32 to vector<4x51x51xf32>
    %24 = arith.addf %17, %23 : vector<4x51x51xf32>
    %25 = math.absf %21 : vector<4x51x51xf32>
    %cst_17 = arith.constant 0.000000e+00 : f32
    %26 = vector.broadcast %cst_17 : f32 to vector<4x51x51xf32>
    %27 = arith.subf %26, %25 : vector<4x51x51xf32>
    %28 = math.exp %27 : vector<4x51x51xf32>
    %29 = math.log1p %28 : vector<4x51x51xf32>
    %30 = arith.addf %19, %29 : vector<4x51x51xf32>
    %31 = arith.select %22, %24, %30 : vector<4x51x51xi1>, vector<4x51x51xf32>
    %c0_18 = arith.constant 0 : index
    %c0_19 = arith.constant 0 : index
    %c0_20 = arith.constant 0 : index
    %32 = vector.load %arg16[%c0_18, %c0_19, %c0_20] : memref<4x51x51xf32, #tpu.memory_space<vmem>>, vector<4x51x51xf32>
    %33 = arith.mulf %31, %32 : vector<4x51x51xf32>
    %c0_21 = arith.constant 0 : index
    %c0_22 = arith.constant 0 : index
    %c0_23 = arith.constant 0 : index
    %34 = vector.load %arg15[%c0_21, %c0_22, %c0_23] : memref<4x51x51xf32, #tpu.memory_space<vmem>>, vector<4x51x51xf32>
    %35 = arith.mulf %33, %34 : vector<4x51x51xf32>
    %c0_24 = arith.constant 0 : index
    %c0_25 = arith.constant 0 : index
    %c0_26 = arith.constant 0 : index
    %36 = vector.load %arg13[%c0_24, %c0_25, %c0_26] : memref<4x51x51xf32, #tpu.memory_space<vmem>>, vector<4x51x51xf32>
    %c0_27 = arith.constant 0 : index
    %c0_28 = arith.constant 0 : index
    %c0_29 = arith.constant 0 : index
    %37 = vector.load %arg14[%c0_27, %c0_28, %c0_29] : memref<4x51x51xf32, #tpu.memory_space<vmem>>, vector<4x51x51xf32>
    %c0_30 = arith.constant 0 : index
    %c0_31 = arith.constant 0 : index
    %c0_32 = arith.constant 0 : index
    %38 = vector.load %arg7[%c0_30, %c0_31, %c0_32] : memref<4x17x51xf32, #tpu.memory_space<vmem>>, vector<4x17x51xf32>
    %cst_33 = arith.constant 0.000000e+00 : f32
    %39 = vector.broadcast %cst_33 : f32 to vector<4x17x51xf32>
    %40 = arith.maximumf %38, %39 : vector<4x17x51xf32>
    %41 = vector.broadcast %cst_33 : f32 to vector<4x17x51xf32>
    %42 = arith.subf %38, %41 : vector<4x17x51xf32>
    %43 = arith.cmpf one, %42, %42 : vector<4x17x51xf32>
    %44 = vector.broadcast %cst_33 : f32 to vector<4x17x51xf32>
    %45 = arith.addf %38, %44 : vector<4x17x51xf32>
    %46 = math.absf %42 : vector<4x17x51xf32>
    %cst_34 = arith.constant 0.000000e+00 : f32
    %47 = vector.broadcast %cst_34 : f32 to vector<4x17x51xf32>
    %48 = arith.subf %47, %46 : vector<4x17x51xf32>
    %49 = math.exp %48 : vector<4x17x51xf32>
    %50 = math.log1p %49 : vector<4x17x51xf32>
    %51 = arith.addf %40, %50 : vector<4x17x51xf32>
    %52 = arith.select %43, %45, %51 : vector<4x17x51xi1>, vector<4x17x51xf32>
    %c0_35 = arith.constant 0 : index
    %c0_36 = arith.constant 0 : index
    %c0_37 = arith.constant 0 : index
    %53 = vector.load %arg11[%c0_35, %c0_36, %c0_37] : memref<4x17x51xf32, #tpu.memory_space<vmem>>, vector<4x17x51xf32>
    %54 = arith.mulf %52, %53 : vector<4x17x51xf32>
    %c0_38 = arith.constant 0 : index
    %c0_39 = arith.constant 0 : index
    %c0_40 = arith.constant 0 : index
    %55 = vector.load %arg10[%c0_38, %c0_39, %c0_40] : memref<4x17x51xf32, #tpu.memory_space<vmem>>, vector<4x17x51xf32>
    %56 = arith.mulf %54, %55 : vector<4x17x51xf32>
    %c0_41 = arith.constant 0 : index
    %c0_42 = arith.constant 0 : index
    %c0_43 = arith.constant 0 : index
    %57 = vector.load %arg8[%c0_41, %c0_42, %c0_43] : memref<4x17x51xf32, #tpu.memory_space<vmem>>, vector<4x17x51xf32>
    %c0_44 = arith.constant 0 : index
    %c0_45 = arith.constant 0 : index
    %c0_46 = arith.constant 0 : index
    %58 = vector.load %arg9[%c0_44, %c0_45, %c0_46] : memref<4x17x51xf32, #tpu.memory_space<vmem>>, vector<4x17x51xf32>
    %c0_47 = arith.constant 0 : index
    %c0_48 = arith.constant 0 : index
    %59 = vector.load %arg17[%c0_47, %c0_48] : memref<4x51xf32, #tpu.memory_space<vmem>>, vector<4x51xf32>
    %cst_49 = arith.constant 0.000000e+00 : f32
    %60 = vector.broadcast %cst_49 : f32 to vector<4x51xf32>
    %61 = arith.maximumf %59, %60 : vector<4x51xf32>
    %62 = vector.broadcast %cst_49 : f32 to vector<4x51xf32>
    %63 = arith.subf %59, %62 : vector<4x51xf32>
    %64 = arith.cmpf one, %63, %63 : vector<4x51xf32>
    %65 = vector.broadcast %cst_49 : f32 to vector<4x51xf32>
    %66 = arith.addf %59, %65 : vector<4x51xf32>
    %67 = math.absf %63 : vector<4x51xf32>
    %cst_50 = arith.constant 0.000000e+00 : f32
    %68 = vector.broadcast %cst_50 : f32 to vector<4x51xf32>
    %69 = arith.subf %68, %67 : vector<4x51xf32>
    %70 = math.exp %69 : vector<4x51xf32>
    %71 = math.log1p %70 : vector<4x51xf32>
    %72 = arith.addf %61, %71 : vector<4x51xf32>
    %73 = arith.select %64, %66, %72 : vector<4x51xi1>, vector<4x51xf32>
    %c0_51 = arith.constant 0 : index
    %c0_52 = arith.constant 0 : index
    %74 = vector.load %arg18[%c0_51, %c0_52] : memref<4x51xf32, #tpu.memory_space<vmem>>, vector<4x51xf32>
    %75 = arith.mulf %73, %74 : vector<4x51xf32>
    %c0_53 = arith.constant 0 : index
    %c0_54 = arith.constant 0 : index
    %76 = vector.load %arg19[%c0_53, %c0_54] : memref<4x51xf32, #tpu.memory_space<vmem>>, vector<4x51xf32>
    %cst_55 = arith.constant 0.000000e+00 : f32
    %77 = vector.broadcast %cst_55 : f32 to vector<4x51xf32>
    %78 = arith.maximumf %76, %77 : vector<4x51xf32>
    %79 = vector.broadcast %cst_55 : f32 to vector<4x51xf32>
    %80 = arith.subf %76, %79 : vector<4x51xf32>
    %81 = arith.cmpf one, %80, %80 : vector<4x51xf32>
    %82 = vector.broadcast %cst_55 : f32 to vector<4x51xf32>
    %83 = arith.addf %76, %82 : vector<4x51xf32>
    %84 = math.absf %80 : vector<4x51xf32>
    %cst_56 = arith.constant 0.000000e+00 : f32
    %85 = vector.broadcast %cst_56 : f32 to vector<4x51xf32>
    %86 = arith.subf %85, %84 : vector<4x51xf32>
    %87 = math.exp %86 : vector<4x51xf32>
    %88 = math.log1p %87 : vector<4x51xf32>
    %89 = arith.addf %78, %88 : vector<4x51xf32>
    %90 = arith.select %81, %83, %89 : vector<4x51xi1>, vector<4x51xf32>
    %cst_57 = arith.constant 6.000000e+00 : f32
    %91 = vector.broadcast %cst_57 : f32 to vector<4x51xf32>
    %92 = arith.mulf %90, %91 : vector<4x51xf32>
    %93 = arith.addf %92, %73 : vector<4x51xf32>
    %c0_58 = arith.constant 0 : index
    %c0_59 = arith.constant 0 : index
    %94 = vector.load %arg5[%c0_58, %c0_59] : memref<4x17xf32, #tpu.memory_space<vmem>>, vector<4x17xf32>
    %c0_60 = arith.constant 0 : index
    %c0_61 = arith.constant 0 : index
    %95 = vector.load %arg6[%c0_60, %c0_61] : memref<4x17xf32, #tpu.memory_space<vmem>>, vector<4x17xf32>
    %c0_62 = arith.constant 0 : index
    %c0_63 = arith.constant 0 : index
    %96 = vector.load %arg20[%c0_62, %c0_63] : memref<4x17xf32, #tpu.memory_space<vmem>>, vector<4x17xf32>
    %c0_64 = arith.constant 0 : index
    %c0_65 = arith.constant 0 : index
    %97 = vector.load %arg21[%c0_64, %c0_65] : memref<4x17xf32, #tpu.memory_space<vmem>>, vector<4x17xf32>
    %cst_66 = arith.constant 0.000000e+00 : f32
    %98 = vector.broadcast %cst_66 : f32 to vector<4x51xf32>
    %c0_i32 = arith.constant 0 : i32
    %c12_i32 = arith.constant 12 : i32
    %99 = arith.addi %c0_i32, %c12_i32 : i32
    %c1_i32 = arith.constant 1 : i32
    %100 = scf.for %arg37 = %c0_i32 to %99 step %c1_i32 iter_args(%arg38 = %98) -> (vector<4x51xf32>)  : i32 {
      %c7_i32 = arith.constant 7 : i32
      %163 = arith.minsi %arg37, %c7_i32 : i32
      %164 = arith.index_cast %163 : i32 to index
      %c0_107 = arith.constant 0 : index
      %165 = vector.load %arg35[%164, %c0_107] : memref<8x68xf32, #tpu.memory_space<vmem>>, vector<1x68xf32>
      %166 = vector.extract_strided_slice %165 {offsets = [0, 0], sizes = [1, 17], strides = [1, 1]} : vector<1x68xf32> to vector<1x17xf32>
      %167 = vector.extract_strided_slice %165 {offsets = [0, 17], sizes = [1, 17], strides = [1, 1]} : vector<1x68xf32> to vector<1x17xf32>
      %168 = vector.extract_strided_slice %165 {offsets = [0, 34], sizes = [1, 17], strides = [1, 1]} : vector<1x68xf32> to vector<1x17xf32>
      %169 = vector.extract_strided_slice %165 {offsets = [0, 51], sizes = [1, 17], strides = [1, 1]} : vector<1x68xf32> to vector<1x17xf32>
      %170 = tpu.concatenate %166, %167, %168, %169 in 0 : vector<1x17xf32>, vector<1x17xf32>, vector<1x17xf32>, vector<1x17xf32> -> vector<4x17xf32>
      %171 = arith.mulf %170, %94 : vector<4x17xf32>
      %172 = arith.addf %171, %95 : vector<4x17xf32>
      %173 = vector.shape_cast %172 : vector<4x17xf32> to vector<4x17x1xf32>
      %174 = vector.broadcast %173 : vector<4x17x1xf32> to vector<4x17x51xf32>
      %175 = arith.subf %174, %57 : vector<4x17x51xf32>
      %176 = arith.mulf %58, %175 : vector<4x17x51xf32>
      %177 = arith.negf %176 : vector<4x17x51xf32>
      %178 = math.exp %177 : vector<4x17x51xf32>
      %cst_108 = arith.constant 1.000000e+00 : f32
      %179 = vector.broadcast %cst_108 : f32 to vector<4x17x51xf32>
      %180 = arith.addf %179, %178 : vector<4x17x51xf32>
      %181 = arith.divf %179, %180 : vector<4x17x51xf32>
      %182 = arith.mulf %56, %181 : vector<4x17x51xf32>
      %cst_109 = arith.constant dense<0.000000e+00> : vector<4x51xf32>
      %183 = vector.multi_reduction <add>, %182, %cst_109 [1] : vector<4x17x51xf32> to vector<4x51xf32>
      %184 = arith.mulf %54, %181 : vector<4x17x51xf32>
      %cst_110 = arith.constant dense<0.000000e+00> : vector<4x51xf32>
      %185 = vector.multi_reduction <add>, %184, %cst_110 [1] : vector<4x17x51xf32> to vector<4x51xf32>
      %186 = vector.shape_cast %arg38 : vector<4x51xf32> to vector<4x51x1xf32>
      %187 = vector.broadcast %186 : vector<4x51x1xf32> to vector<4x51x51xf32>
      %188 = arith.subf %187, %36 : vector<4x51x51xf32>
      %189 = arith.mulf %37, %188 : vector<4x51x51xf32>
      %190 = arith.negf %189 : vector<4x51x51xf32>
      %191 = math.exp %190 : vector<4x51x51xf32>
      %cst_111 = arith.constant 1.000000e+00 : f32
      %192 = vector.broadcast %cst_111 : f32 to vector<4x51x51xf32>
      %193 = arith.addf %192, %191 : vector<4x51x51xf32>
      %194 = arith.divf %192, %193 : vector<4x51x51xf32>
      %195 = arith.mulf %92, %arg38 : vector<4x51xf32>
      %196 = arith.addf %195, %75 : vector<4x51xf32>
      %197 = arith.mulf %35, %194 : vector<4x51x51xf32>
      %cst_112 = arith.constant dense<0.000000e+00> : vector<4x51xf32>
      %198 = vector.multi_reduction <add>, %197, %cst_112 [1] : vector<4x51x51xf32> to vector<4x51xf32>
      %199 = arith.addf %196, %198 : vector<4x51xf32>
      %200 = arith.addf %199, %183 : vector<4x51xf32>
      %201 = arith.mulf %33, %194 : vector<4x51x51xf32>
      %cst_113 = arith.constant dense<0.000000e+00> : vector<4x51xf32>
      %202 = vector.multi_reduction <add>, %201, %cst_113 [1] : vector<4x51x51xf32> to vector<4x51xf32>
      %203 = arith.addf %93, %202 : vector<4x51xf32>
      %204 = arith.addf %203, %185 : vector<4x51xf32>
      %cst_114 = arith.constant 9.99999993E-9 : f32
      %205 = vector.broadcast %cst_114 : f32 to vector<4x51xf32>
      %206 = arith.addf %204, %205 : vector<4x51xf32>
      %207 = arith.divf %200, %206 : vector<4x51xf32>
      %208 = vector.shape_cast %207 : vector<4x51xf32> to vector<4x51x1xf32>
      %209 = vector.broadcast %208 : vector<4x51x1xf32> to vector<4x51x51xf32>
      %210 = arith.subf %209, %36 : vector<4x51x51xf32>
      %211 = arith.mulf %37, %210 : vector<4x51x51xf32>
      %212 = arith.negf %211 : vector<4x51x51xf32>
      %213 = math.exp %212 : vector<4x51x51xf32>
      %cst_115 = arith.constant 1.000000e+00 : f32
      %214 = vector.broadcast %cst_115 : f32 to vector<4x51x51xf32>
      %215 = arith.addf %214, %213 : vector<4x51x51xf32>
      %216 = arith.divf %214, %215 : vector<4x51x51xf32>
      %217 = arith.mulf %92, %207 : vector<4x51xf32>
      %218 = arith.addf %217, %75 : vector<4x51xf32>
      %219 = arith.mulf %35, %216 : vector<4x51x51xf32>
      %cst_116 = arith.constant dense<0.000000e+00> : vector<4x51xf32>
      %220 = vector.multi_reduction <add>, %219, %cst_116 [1] : vector<4x51x51xf32> to vector<4x51xf32>
      %221 = arith.addf %218, %220 : vector<4x51xf32>
      %222 = arith.addf %221, %183 : vector<4x51xf32>
      %223 = arith.mulf %33, %216 : vector<4x51x51xf32>
      %cst_117 = arith.constant dense<0.000000e+00> : vector<4x51xf32>
      %224 = vector.multi_reduction <add>, %223, %cst_117 [1] : vector<4x51x51xf32> to vector<4x51xf32>
      %225 = arith.addf %93, %224 : vector<4x51xf32>
      %226 = arith.addf %225, %185 : vector<4x51xf32>
      %cst_118 = arith.constant 9.99999993E-9 : f32
      %227 = vector.broadcast %cst_118 : f32 to vector<4x51xf32>
      %228 = arith.addf %226, %227 : vector<4x51xf32>
      %229 = arith.divf %222, %228 : vector<4x51xf32>
      %230 = vector.shape_cast %229 : vector<4x51xf32> to vector<4x51x1xf32>
      %231 = vector.broadcast %230 : vector<4x51x1xf32> to vector<4x51x51xf32>
      %232 = arith.subf %231, %36 : vector<4x51x51xf32>
      %233 = arith.mulf %37, %232 : vector<4x51x51xf32>
      %234 = arith.negf %233 : vector<4x51x51xf32>
      %235 = math.exp %234 : vector<4x51x51xf32>
      %cst_119 = arith.constant 1.000000e+00 : f32
      %236 = vector.broadcast %cst_119 : f32 to vector<4x51x51xf32>
      %237 = arith.addf %236, %235 : vector<4x51x51xf32>
      %238 = arith.divf %236, %237 : vector<4x51x51xf32>
      %239 = arith.mulf %92, %229 : vector<4x51xf32>
      %240 = arith.addf %239, %75 : vector<4x51xf32>
      %241 = arith.mulf %35, %238 : vector<4x51x51xf32>
      %cst_120 = arith.constant dense<0.000000e+00> : vector<4x51xf32>
      %242 = vector.multi_reduction <add>, %241, %cst_120 [1] : vector<4x51x51xf32> to vector<4x51xf32>
      %243 = arith.addf %240, %242 : vector<4x51xf32>
      %244 = arith.addf %243, %183 : vector<4x51xf32>
      %245 = arith.mulf %33, %238 : vector<4x51x51xf32>
      %cst_121 = arith.constant dense<0.000000e+00> : vector<4x51xf32>
      %246 = vector.multi_reduction <add>, %245, %cst_121 [1] : vector<4x51x51xf32> to vector<4x51xf32>
      %247 = arith.addf %93, %246 : vector<4x51xf32>
      %248 = arith.addf %247, %185 : vector<4x51xf32>
      %cst_122 = arith.constant 9.99999993E-9 : f32
      %249 = vector.broadcast %cst_122 : f32 to vector<4x51xf32>
      %250 = arith.addf %248, %249 : vector<4x51xf32>
      %251 = arith.divf %244, %250 : vector<4x51xf32>
      %252 = vector.shape_cast %251 : vector<4x51xf32> to vector<4x51x1xf32>
      %253 = vector.broadcast %252 : vector<4x51x1xf32> to vector<4x51x51xf32>
      %254 = arith.subf %253, %36 : vector<4x51x51xf32>
      %255 = arith.mulf %37, %254 : vector<4x51x51xf32>
      %256 = arith.negf %255 : vector<4x51x51xf32>
      %257 = math.exp %256 : vector<4x51x51xf32>
      %cst_123 = arith.constant 1.000000e+00 : f32
      %258 = vector.broadcast %cst_123 : f32 to vector<4x51x51xf32>
      %259 = arith.addf %258, %257 : vector<4x51x51xf32>
      %260 = arith.divf %258, %259 : vector<4x51x51xf32>
      %261 = arith.mulf %92, %251 : vector<4x51xf32>
      %262 = arith.addf %261, %75 : vector<4x51xf32>
      %263 = arith.mulf %35, %260 : vector<4x51x51xf32>
      %cst_124 = arith.constant dense<0.000000e+00> : vector<4x51xf32>
      %264 = vector.multi_reduction <add>, %263, %cst_124 [1] : vector<4x51x51xf32> to vector<4x51xf32>
      %265 = arith.addf %262, %264 : vector<4x51xf32>
      %266 = arith.addf %265, %183 : vector<4x51xf32>
      %267 = arith.mulf %33, %260 : vector<4x51x51xf32>
      %cst_125 = arith.constant dense<0.000000e+00> : vector<4x51xf32>
      %268 = vector.multi_reduction <add>, %267, %cst_125 [1] : vector<4x51x51xf32> to vector<4x51xf32>
      %269 = arith.addf %93, %268 : vector<4x51xf32>
      %270 = arith.addf %269, %185 : vector<4x51xf32>
      %cst_126 = arith.constant 9.99999993E-9 : f32
      %271 = vector.broadcast %cst_126 : f32 to vector<4x51xf32>
      %272 = arith.addf %270, %271 : vector<4x51xf32>
      %273 = arith.divf %266, %272 : vector<4x51xf32>
      %274 = vector.shape_cast %273 : vector<4x51xf32> to vector<4x51x1xf32>
      %275 = vector.broadcast %274 : vector<4x51x1xf32> to vector<4x51x51xf32>
      %276 = arith.subf %275, %36 : vector<4x51x51xf32>
      %277 = arith.mulf %37, %276 : vector<4x51x51xf32>
      %278 = arith.negf %277 : vector<4x51x51xf32>
      %279 = math.exp %278 : vector<4x51x51xf32>
      %cst_127 = arith.constant 1.000000e+00 : f32
      %280 = vector.broadcast %cst_127 : f32 to vector<4x51x51xf32>
      %281 = arith.addf %280, %279 : vector<4x51x51xf32>
      %282 = arith.divf %280, %281 : vector<4x51x51xf32>
      %283 = arith.mulf %92, %273 : vector<4x51xf32>
      %284 = arith.addf %283, %75 : vector<4x51xf32>
      %285 = arith.mulf %35, %282 : vector<4x51x51xf32>
      %cst_128 = arith.constant dense<0.000000e+00> : vector<4x51xf32>
      %286 = vector.multi_reduction <add>, %285, %cst_128 [1] : vector<4x51x51xf32> to vector<4x51xf32>
      %287 = arith.addf %284, %286 : vector<4x51xf32>
      %288 = arith.addf %287, %183 : vector<4x51xf32>
      %289 = arith.mulf %33, %282 : vector<4x51x51xf32>
      %cst_129 = arith.constant dense<0.000000e+00> : vector<4x51xf32>
      %290 = vector.multi_reduction <add>, %289, %cst_129 [1] : vector<4x51x51xf32> to vector<4x51xf32>
      %291 = arith.addf %93, %290 : vector<4x51xf32>
      %292 = arith.addf %291, %185 : vector<4x51xf32>
      %cst_130 = arith.constant 9.99999993E-9 : f32
      %293 = vector.broadcast %cst_130 : f32 to vector<4x51xf32>
      %294 = arith.addf %292, %293 : vector<4x51xf32>
      %295 = arith.divf %288, %294 : vector<4x51xf32>
      %296 = vector.shape_cast %295 : vector<4x51xf32> to vector<4x51x1xf32>
      %297 = vector.broadcast %296 : vector<4x51x1xf32> to vector<4x51x51xf32>
      %298 = arith.subf %297, %36 : vector<4x51x51xf32>
      %299 = arith.mulf %37, %298 : vector<4x51x51xf32>
      %300 = arith.negf %299 : vector<4x51x51xf32>
      %301 = math.exp %300 : vector<4x51x51xf32>
      %cst_131 = arith.constant 1.000000e+00 : f32
      %302 = vector.broadcast %cst_131 : f32 to vector<4x51x51xf32>
      %303 = arith.addf %302, %301 : vector<4x51x51xf32>
      %304 = arith.divf %302, %303 : vector<4x51x51xf32>
      %305 = arith.mulf %92, %295 : vector<4x51xf32>
      %306 = arith.addf %305, %75 : vector<4x51xf32>
      %307 = arith.mulf %35, %304 : vector<4x51x51xf32>
      %cst_132 = arith.constant dense<0.000000e+00> : vector<4x51xf32>
      %308 = vector.multi_reduction <add>, %307, %cst_132 [1] : vector<4x51x51xf32> to vector<4x51xf32>
      %309 = arith.addf %306, %308 : vector<4x51xf32>
      %310 = arith.addf %309, %183 : vector<4x51xf32>
      %311 = arith.mulf %33, %304 : vector<4x51x51xf32>
      %cst_133 = arith.constant dense<0.000000e+00> : vector<4x51xf32>
      %312 = vector.multi_reduction <add>, %311, %cst_133 [1] : vector<4x51x51xf32> to vector<4x51xf32>
      %313 = arith.addf %93, %312 : vector<4x51xf32>
      %314 = arith.addf %313, %185 : vector<4x51xf32>
      %cst_134 = arith.constant 9.99999993E-9 : f32
      %315 = vector.broadcast %cst_134 : f32 to vector<4x51xf32>
      %316 = arith.addf %314, %315 : vector<4x51xf32>
      %317 = arith.divf %310, %316 : vector<4x51xf32>
      %318 = vector.extract_strided_slice %317 {offsets = [0, 0], sizes = [4, 17], strides = [1, 1]} : vector<4x51xf32> to vector<4x17xf32>
      %319 = arith.mulf %318, %96 : vector<4x17xf32>
      %320 = arith.addf %319, %97 : vector<4x17xf32>
      %321 = vector.extract_strided_slice %320 {offsets = [0, 0], sizes = [1, 17], strides = [1, 1]} : vector<4x17xf32> to vector<1x17xf32>
      %c0_i32_135 = arith.constant 0 : i32
      %322 = arith.addi %c0_i32_135, %arg37 : i32
      %323 = arith.index_cast %322 : i32 to index
      %c0_136 = arith.constant 0 : index
      %324 = vector.load %arg36[%323, %c0_136] : memref<48x17xf32, #tpu.memory_space<vmem>>, vector<1x17xf32>
      tpu.vector_store %arg36[%323, %c0_136], %321 {strides = array<i32>} : memref<48x17xf32, #tpu.memory_space<vmem>>, vector<1x17xf32>,
      %325 = vector.extract_strided_slice %320 {offsets = [1, 0], sizes = [1, 17], strides = [1, 1]} : vector<4x17xf32> to vector<1x17xf32>
      %c12_i32_137 = arith.constant 12 : i32
      %326 = arith.addi %c12_i32_137, %arg37 : i32
      %327 = arith.index_cast %326 : i32 to index
      %c0_138 = arith.constant 0 : index
      %328 = vector.load %arg36[%327, %c0_138] : memref<48x17xf32, #tpu.memory_space<vmem>>, vector<1x17xf32>
      tpu.vector_store %arg36[%327, %c0_138], %325 {strides = array<i32>} : memref<48x17xf32, #tpu.memory_space<vmem>>, vector<1x17xf32>,
      %329 = vector.extract_strided_slice %320 {offsets = [2, 0], sizes = [1, 17], strides = [1, 1]} : vector<4x17xf32> to vector<1x17xf32>
      %c24_i32 = arith.constant 24 : i32
      %330 = arith.addi %c24_i32, %arg37 : i32
      %331 = arith.index_cast %330 : i32 to index
      %c0_139 = arith.constant 0 : index
      %332 = vector.load %arg36[%331, %c0_139] : memref<48x17xf32, #tpu.memory_space<vmem>>, vector<1x17xf32>
      tpu.vector_store %arg36[%331, %c0_139], %329 {strides = array<i32>} : memref<48x17xf32, #tpu.memory_space<vmem>>, vector<1x17xf32>,
      %333 = vector.extract_strided_slice %320 {offsets = [3, 0], sizes = [1, 17], strides = [1, 1]} : vector<4x17xf32> to vector<1x17xf32>
      %c36_i32 = arith.constant 36 : i32
      %334 = arith.addi %c36_i32, %arg37 : i32
      %335 = arith.index_cast %334 : i32 to index
      %c0_140 = arith.constant 0 : index
      %336 = vector.load %arg36[%335, %c0_140] : memref<48x17xf32, #tpu.memory_space<vmem>>, vector<1x17xf32>
      tpu.vector_store %arg36[%335, %c0_140], %333 {strides = array<i32>} : memref<48x17xf32, #tpu.memory_space<vmem>>, vector<1x17xf32>,
      scf.yield %317 : vector<4x51xf32>
    }
    %c12_i32_67 = arith.constant 12 : i32
    %c0_68 = arith.constant 0 : index
    %c0_69 = arith.constant 0 : index
    %101 = vector.load %arg36[%c0_68, %c0_69] : memref<48x17xf32, #tpu.memory_space<vmem>>, vector<48x17xf32>
    %c0_70 = arith.constant 0 : index
    %c0_71 = arith.constant 0 : index
    %102 = vector.load %arg22[%c0_70, %c0_71] : memref<17x17xf32, #tpu.memory_space<vmem>>, vector<17x17xf32>
    %cst_72 = arith.constant dense<0.000000e+00> : vector<48x17xf32>
    %103 = tpu.matmul %101, %102, %cst_72 {dimension_numbers = #tpu.dot_dimension_numbers<[1], [0], [0], [1], [0, 0, 1, 1], [], []>} : vector<48x17xf32>, vector<17x17xf32>, vector<48x17xf32> -> vector<48x17xf32>
    %c0_73 = arith.constant 0 : index
    %c0_74 = arith.constant 0 : index
    %104 = vector.load %arg23[%c0_73, %c0_74] : memref<1x17xf32, #tpu.memory_space<vmem>>, vector<1x17xf32>
    %105 = vector.broadcast %104 : vector<1x17xf32> to vector<48x17xf32>
    %106 = arith.addf %103, %105 : vector<48x17xf32>
    %107 = arith.negf %106 : vector<48x17xf32>
    %108 = math.exp %107 : vector<48x17xf32>
    %cst_75 = arith.constant 1.000000e+00 : f32
    %109 = vector.broadcast %cst_75 : f32 to vector<48x17xf32>
    %110 = arith.addf %109, %108 : vector<48x17xf32>
    %111 = arith.divf %109, %110 : vector<48x17xf32>
    %c0_76 = arith.constant 0 : index
    %c0_77 = arith.constant 0 : index
    %112 = vector.load %arg24[%c0_76, %c0_77] : memref<17x42xf32, #tpu.memory_space<vmem>>, vector<17x42xf32>
    %cst_78 = arith.constant dense<0.000000e+00> : vector<48x42xf32>
    %113 = tpu.matmul %111, %112, %cst_78 {dimension_numbers = #tpu.dot_dimension_numbers<[1], [0], [0], [1], [0, 0, 1, 1], [], []>} : vector<48x17xf32>, vector<17x42xf32>, vector<48x42xf32> -> vector<48x42xf32>
    %c0_79 = arith.constant 0 : index
    %c0_80 = arith.constant 0 : index
    %114 = vector.load %arg25[%c0_79, %c0_80] : memref<1x42xf32, #tpu.memory_space<vmem>>, vector<1x42xf32>
    %115 = vector.broadcast %114 : vector<1x42xf32> to vector<48x42xf32>
    %116 = arith.addf %113, %115 : vector<48x42xf32>
    %117 = arith.negf %116 : vector<48x42xf32>
    %118 = math.exp %117 : vector<48x42xf32>
    %cst_81 = arith.constant 1.000000e+00 : f32
    %119 = vector.broadcast %cst_81 : f32 to vector<48x42xf32>
    %120 = arith.addf %119, %118 : vector<48x42xf32>
    %121 = arith.divf %119, %120 : vector<48x42xf32>
    %c0_82 = arith.constant 0 : index
    %c0_83 = arith.constant 0 : index
    %122 = vector.load %arg26[%c0_82, %c0_83] : memref<42x68xf32, #tpu.memory_space<vmem>>, vector<42x68xf32>
    %cst_84 = arith.constant dense<0.000000e+00> : vector<48x68xf32>
    %123 = tpu.matmul %121, %122, %cst_84 {dimension_numbers = #tpu.dot_dimension_numbers<[1], [0], [0], [1], [0, 0, 1, 1], [], []>} : vector<48x42xf32>, vector<42x68xf32>, vector<48x68xf32> -> vector<48x68xf32>
    %c0_85 = arith.constant 0 : index
    %c0_86 = arith.constant 0 : index
    %124 = vector.load %arg27[%c0_85, %c0_86] : memref<1x68xf32, #tpu.memory_space<vmem>>, vector<1x68xf32>
    %125 = vector.broadcast %124 : vector<1x68xf32> to vector<48x68xf32>
    %126 = arith.addf %123, %125 : vector<48x68xf32>
    %127 = arith.negf %126 : vector<48x68xf32>
    %128 = math.exp %127 : vector<48x68xf32>
    %cst_87 = arith.constant 1.000000e+00 : f32
    %129 = vector.broadcast %cst_87 : f32 to vector<48x68xf32>
    %130 = arith.addf %129, %128 : vector<48x68xf32>
    %131 = arith.divf %129, %130 : vector<48x68xf32>
    %132 = vector.extract_strided_slice %131 {offsets = [0, 0], sizes = [12, 68], strides = [1, 1]} : vector<48x68xf32> to vector<12x68xf32>
    %133 = vector.extract_strided_slice %131 {offsets = [12, 0], sizes = [12, 68], strides = [1, 1]} : vector<48x68xf32> to vector<12x68xf32>
    %134 = vector.extract_strided_slice %131 {offsets = [24, 0], sizes = [12, 68], strides = [1, 1]} : vector<48x68xf32> to vector<12x68xf32>
    %135 = vector.extract_strided_slice %131 {offsets = [36, 0], sizes = [12, 68], strides = [1, 1]} : vector<48x68xf32> to vector<12x68xf32>
    %136 = tpu.concatenate %132, %133, %134, %135 in 1 : vector<12x68xf32>, vector<12x68xf32>, vector<12x68xf32>, vector<12x68xf32> -> vector<12x272xf32>
    %c0_88 = arith.constant 0 : index
    %c0_89 = arith.constant 0 : index
    %137 = vector.load %arg28[%c0_88, %c0_89] : memref<272x272xf32, #tpu.memory_space<vmem>>, vector<272x272xf32>
    %cst_90 = arith.constant dense<0.000000e+00> : vector<12x272xf32>
    %138 = tpu.matmul %136, %137, %cst_90 {dimension_numbers = #tpu.dot_dimension_numbers<[1], [0], [0], [1], [0, 0, 1, 1], [], []>} : vector<12x272xf32>, vector<272x272xf32>, vector<12x272xf32> -> vector<12x272xf32>
    %c0_91 = arith.constant 0 : index
    %c0_92 = arith.constant 0 : index
    %139 = vector.load %arg29[%c0_91, %c0_92] : memref<1x272xf32, #tpu.memory_space<vmem>>, vector<1x272xf32>
    %140 = vector.broadcast %139 : vector<1x272xf32> to vector<12x272xf32>
    %141 = arith.addf %138, %140 : vector<12x272xf32>
    %142 = arith.negf %141 : vector<12x272xf32>
    %143 = math.exp %142 : vector<12x272xf32>
    %cst_93 = arith.constant 1.000000e+00 : f32
    %144 = vector.broadcast %cst_93 : f32 to vector<12x272xf32>
    %145 = arith.addf %144, %143 : vector<12x272xf32>
    %146 = arith.divf %144, %145 : vector<12x272xf32>
    %c0_94 = arith.constant 0 : index
    %c0_95 = arith.constant 0 : index
    %147 = vector.load %arg30[%c0_94, %c0_95] : memref<272x170xf32, #tpu.memory_space<vmem>>, vector<272x170xf32>
    %cst_96 = arith.constant dense<0.000000e+00> : vector<12x170xf32>
    %148 = tpu.matmul %146, %147, %cst_96 {dimension_numbers = #tpu.dot_dimension_numbers<[1], [0], [0], [1], [0, 0, 1, 1], [], []>} : vector<12x272xf32>, vector<272x170xf32>, vector<12x170xf32> -> vector<12x170xf32>
    %c0_97 = arith.constant 0 : index
    %c0_98 = arith.constant 0 : index
    %149 = vector.load %arg31[%c0_97, %c0_98] : memref<1x170xf32, #tpu.memory_space<vmem>>, vector<1x170xf32>
    %150 = vector.broadcast %149 : vector<1x170xf32> to vector<12x170xf32>
    %151 = arith.addf %148, %150 : vector<12x170xf32>
    %152 = arith.negf %151 : vector<12x170xf32>
    %153 = math.exp %152 : vector<12x170xf32>
    %cst_99 = arith.constant 1.000000e+00 : f32
    %154 = vector.broadcast %cst_99 : f32 to vector<12x170xf32>
    %155 = arith.addf %154, %153 : vector<12x170xf32>
    %156 = arith.divf %154, %155 : vector<12x170xf32>
    %c0_100 = arith.constant 0 : index
    %c0_101 = arith.constant 0 : index
    %157 = vector.load %arg32[%c0_100, %c0_101] : memref<170x68xf32, #tpu.memory_space<vmem>>, vector<170x68xf32>
    %cst_102 = arith.constant dense<0.000000e+00> : vector<12x68xf32>
    %158 = tpu.matmul %156, %157, %cst_102 {dimension_numbers = #tpu.dot_dimension_numbers<[1], [0], [0], [1], [0, 0, 1, 1], [], []>} : vector<12x170xf32>, vector<170x68xf32>, vector<12x68xf32> -> vector<12x68xf32>
    %c0_103 = arith.constant 0 : index
    %c0_104 = arith.constant 0 : index
    %159 = vector.load %arg33[%c0_103, %c0_104] : memref<1x68xf32, #tpu.memory_space<vmem>>, vector<1x68xf32>
    %160 = vector.broadcast %159 : vector<1x68xf32> to vector<12x68xf32>
    %161 = arith.addf %158, %160 : vector<12x68xf32>
    %c0_105 = arith.constant 0 : index
    %c0_106 = arith.constant 0 : index
    %162 = vector.load %arg34[%c0_105, %c0_106] : memref<12x68xf32, #tpu.memory_space<vmem>>, vector<12x68xf32>
    tpu.vector_store %arg34[%c0_105, %c0_106], %161 {strides = array<i32>} : memref<12x68xf32, #tpu.memory_space<vmem>>, vector<12x68xf32>,
    return
  }
}

</mosaic_0001>

<bundles_post_ra>
// kernel: liquid_operator_forward.1
= control target key start
LH: loop header
LB: loop body
LE: loop exit
PB: predicated region body
PF: predicated region fallthrough
CT: control target
= control target key end

     0   :  { %s8517_s6 = smov 1   ;;  %s8518_s10 = smov 2   ;;  %s12575_s0 = inlined_call_operand.smem [shape: u32[35], index: -1, kind: input, shape index: {}] }
   0x1   :  { %s8571_s5 = sld [smem:[%s12575_s0]]   ;;  %s8519_s14 = smov 3  }
   0x2   :  { %s8576_s9 = sld [smem:[%s12575_s0 + %s8517_s6]]   ;;  %s8520_s18 = smov 4  }
   0x3   :  { %s8581_s13 = sld [smem:[%s12575_s0 + %s8518_s10]]   ;;  %s8521_s22 = smov 5  }
   0x4   :  { %s8586_s17 = sld [smem:[%s12575_s0 + %s8519_s14]]   ;;  %s8522_s26 = smov 6  }
   0x5   :  { %s8591_s21 = sld [smem:[%s12575_s0 + %s8520_s18]]   ;;  %s8523_s30 = smov 7  }
   0x6   :  { %s8596_s25 = sld [smem:[%s12575_s0 + %s8521_s22]]   ;;  %s8524_s4 = smov 8  }
   0x7   :  { %s8601_s29 = sld [smem:[%s12575_s0 + %s8522_s26]]   ;;  %s8525_s10 = smov 9  }
   0x8   :  { %s8606_s3 = sld [smem:[%s12575_s0 + %s8523_s30]]   ;;  %s8526_s15 = smov 10  }
   0x9   :  { %s8611_s8 = sld [smem:[%s12575_s0 + %s8524_s4]]   ;;  %s8527_s20 = smov 11  }
   0xa   :  { %s8616_s14 = sld [smem:[%s12575_s0 + %s8525_s10]]   ;;  %s8528_s26 = smov 12  }
   0xb   :  { %12903 = sst [smem:[#allocation7_spill]] %s8591_s21  ;;  %s8529_s1 = smov 13  }
   0xc   :  { %s8621_s19 = sld [smem:[%s12575_s0 + %s8526_s15]]   ;;  %s8530_s7 = smov 14  }
   0xd   :  { %s8626_s24 = sld [smem:[%s12575_s0 + %s8527_s20]]   ;;  %s8531_s15 = smov 15  }
   0xe   :  { %12904 = sst [smem:[#allocation8_spill]] %s8606_s3  ;;  %s8532_s22 = smov 16  }
   0xf   :  { %s8631_s30 = sld [smem:[%s12575_s0 + %s8528_s26]]   ;;  %s8533_s28 = smov 17  }
  0x10   :  { %s8636_s6 = sld [smem:[%s12575_s0 + %s8529_s1]]  }
  0x11   :  { %s8641_s12 = sld [smem:[%s12575_s0 + %s8530_s7]]   ;;  %s8534_s7 = smov 18  }
  0x12   :  { %12905 = sst [smem:[#allocation9_spill]] %s8621_s19 }
  0x13   :  { %12906 = sst [smem:[#allocation10_spill]] %s8626_s24 }
  0x14   :  { %s8646_s20 = sld [smem:[%s12575_s0 + %s8531_s15]]   ;;  %s8535_s15 = smov 19  }
  0x15   :  { %s8651_s27 = sld [smem:[%s12575_s0 + %s8532_s22]]   ;;  %s8536_s22 = smov 20  }
  0x16   :  { %s8656_s4 = sld [smem:[%s12575_s0 + %s8533_s28]]   ;;  %s8537_s28 = smov 21  }
  0x17   :  { %s8661_s19 = sld [smem:[%s12575_s0 + %s8534_s7]]   ;;  %s8538_s7 = smov 22  }
  0x18   :  { %s8666_s24 = sld [smem:[%s12575_s0 + %s8535_s15]]   ;;  %s8539_s15 = smov 23  }
  0x19   :  { %s8671_s21 = sld [smem:[%s12575_s0 + %s8536_s22]]   ;;  %s8540_s22 = smov 24  }
  0x1a   :  { %12907 = sst [smem:[#allocation11_spill]] %s8646_s20 }
  0x1b   :  { %s8691_s3 = sld [smem:[%s12575_s0 + %s8540_s22]]   ;;  %s8544_s22 = smov 28  }
  0x1c   :  { %12908 = sst [smem:[#allocation12_spill]] %s8656_s4 }
  0x1d   :  { %12909 = sst [smem:[#allocation13_spill]] %s8661_s19 }
  0x1e   :  { %12910 = sst [smem:[#allocation14_spill]] %s8666_s24 }
  0x1f   :  { %s8676_s4 = sld [smem:[%s12575_s0 + %s8537_s28]]   ;;  %s8541_s28 = smov 25  }
  0x20   :  { %s8681_s19 = sld [smem:[%s12575_s0 + %s8538_s7]]   ;;  %s8542_s7 = smov 26  }
  0x21   :  { %s8686_s24 = sld [smem:[%s12575_s0 + %s8539_s15]]   ;;  %s8543_s15 = smov 27  }
  0x22   :  { %12913 = sst [smem:[#allocation17_spill]] %s8691_s3 }
  0x23   :  { %s8696_s20 = sld [smem:[%s12575_s0 + %s8541_s28]]   ;;  %s8545_s28 = smov 29  }
  0x24   :  { %s8711_s3 = sld [smem:[%s12575_s0 + %s8544_s22]]   ;;  %s8548_s22 = smov 32  }
  0x26   :  { %12911 = sst [smem:[#allocation15_spill]] %s8681_s19 }
  0x27   :  { %12912 = sst [smem:[#allocation16_spill]] %s8686_s24 }
  0x28   :  { %s8701_s19 = sld [smem:[%s12575_s0 + %s8542_s7]]   ;;  %s8546_s7 = smov 30  }
  0x29   :  { %12914 = sst [smem:[#allocation18_spill]] %s8696_s20 }
  0x2a   :  { %s8706_s24 = sld [smem:[%s12575_s0 + %s8543_s15]]   ;;  %s8547_s15 = smov 31  }
  0x2b   :  { %12917 = sst [smem:[#allocation21_spill]] %s8711_s3 }
  0x2c   :  { %s8716_s20 = sld [smem:[%s12575_s0 + %s8545_s28]]   ;;  %s8549_s28 = smov 33  }
  0x2d   :  { %s8731_s3 = sld [smem:[%s12575_s0 + %s8548_s22]]  }
  0x2e   :  { %12915 = sst [smem:[#allocation19_spill]] %s8701_s19 }
  0x2f   :  { %s8721_s19 = sld [smem:[%s12575_s0 + %s8546_s7]]   ;;  %s8550_s7 = smov 34  }
  0x30   :  { %12916 = sst [smem:[#allocation20_spill]] %s8706_s24 }
  0x31   :  { %s8726_s24 = sld [smem:[%s12575_s0 + %s8547_s15]]  }
  0x32   :  { %12918 = sst [smem:[#allocation22_spill]] %s8716_s20 }
  0x33   :  { %s8736_s20 = sld [smem:[%s12575_s0 + %s8549_s28]]  }
  0x35   :  { %12919 = sst [smem:[#allocation23_spill]] %s8721_s19 }
  0x36   :  { %s8741_s19 = sld [smem:[%s12575_s0 + %s8550_s7]]  }
  0x37   :  { %74 = vsyncpa [#allocation5], 0  ;;  %v144_v0 = vld [vmem:[%s8576_s9] sm:$0xff]  ;;  %v145_v1 = vld [vmem:[%s8576_s9 + $0x8] sm:$0xff]  ;;  %v12587_v2 = vmov 0.0|0.0   ;;  %vm8552_vm0 = vmmov 0  }
  0x38   :  { %7098 = vmatprep.subr.bf16.mxu0 %v12587_v2  ;;  %v7099_v3 = vpack.c.bf16 %v145_v1, %v144_v0  ;;  %v146_v4 = vld [vmem:[%s8576_s9 + $0x10] sm:$0xff]  ;;  %v147_v5 = vld [vmem:[%s8576_s9 + $0x18] sm:$0xff]  ;;  %7110 = vmatprep.subr.bf16.mxu1 %v12587_v2  ;;  %v12585_v6 = vmov 0.0   ;;  %v148_v8 = vld [vmem:[%s8576_s9 + $0x20] sm:$0xff]  ;;  %vm12671_vm1 = vcmask 1043456   ;;  %vm12672_vm2 = vcmask 556032  }
  0x39   :  { %7016 = vmatprep.mubr.msk.f32.mxu0 %vm8552_vm0, %v12585_v6  ;;  %7037 = vmatprep.mubr.msk.f32.mxu1 %vm8552_vm0, %v12585_v6  ;;  %v7102_v7 = vpack.c.bf16 %v147_v5, %v146_v4  ;;  %v149_v9 = vld [vmem:[%s8576_s9 + $0x28] sm:$0xff]  ;;  %v150_v11 = vld [vmem:[%s8576_s9 + $0x30] sm:$0xff]  ;;  %v151_v12 = vld [vmem:[%s8576_s9 + $0x38] sm:$0xff]  ;;  %s13312_s0 = sld [smem:[#allocation11_spill]] }
  0x3a   :  { %7100 = vmatpush3.bf16.msra.mxu0 %v7099_v3  ;;  %v7105_v10 = vpack.c.bf16 %v149_v9, %v148_v8  ;;  %v7108_v13 = vpack.c.bf16 %v151_v12, %v150_v11  ;;  %v152_v14 = vld [vmem:[%s8576_s9 + $0x40] sm:$0xf]  ;;  %v245_v17 = vld [vmem:[%s8586_s17 + $0x8] sm:$0xff]  ;;  %v246_v19 = vld [vmem:[%s8586_s17 + $0x10] sm:$0xff]  ;;  %s13369_s9 = sld [smem:[#allocation12_spill]] }
  0x3b   :  { %7101 = vmatprep.subr.bf16.mxu0 %v12587_v2  ;;  %v143_v15 = vld [vmem:[%s8571_s5] sm:$0xff]  ;;  %v247_v20 = vld [vmem:[%s8586_s17 + $0x18] sm:$0xff]  ;;  %v249_v23 = vld [vmem:[%s8586_s17 + $0x28] sm:$0xff]  ;;  %s13353_s5 = sld [smem:[#allocation8_spill]] }
  0x3c   :  { %v244_v16 = vld [vmem:[%s8586_s17] sm:$0xff]  ;;  %v7114_v21 = vpack.c.bf16 %v247_v20, %v246_v19  ;;  %v250_v25 = vld [vmem:[%s8586_s17 + $0x30] sm:$0xff]  ;;  %v251_v26 = vld [vmem:[%s8586_s17 + $0x38] sm:$0xff] }
  0x3d   :  { %v7111_v18 = vpack.c.bf16 %v245_v17, %v244_v16  ;;  %v248_v22 = vld [vmem:[%s8586_s17 + $0x20] sm:$0xff]  ;;  %v7120_v27 = vpack.c.bf16 %v251_v26, %v250_v25  ;;  %v8783_v38 = vld [vmem:[%s8631_s30 + $0x8] sm:$0xff]  ;;  %v8786_v39 = vld [vmem:[%s8631_s30 + $0x10] sm:$0xff] }
  0x3e   :  { %7103 = vmatpush3.bf16.msra.mxu0 %v7102_v7  ;;  %v7117_v24 = vpack.c.bf16 %v249_v23, %v248_v22  ;;  %v252_v28 = vld [vmem:[%s8586_s17 + $0x40] sm:$0xf]  ;;  %12920 = vst [vmem:[#allocation24_spill] sm:$0xff] %v8783_v38  ;;  %12921 = vst [vmem:[#allocation25_spill] sm:$0xff] %v8786_v39  ;;  %v8790_v41 = vld [vmem:[%s8631_s30 + $0x18] sm:$0xff]  ;;  %s13371_s17 = sld [smem:[#allocation7_spill]] }
  0x3f   :  { %7104 = vmatprep.subr.bf16.mxu0 %v12587_v2  ;;  %7112 = vmatpush3.bf16.msra.mxu1 %v7111_v18  ;;  %v6654_v29 = vld [vmem:[%s8581_s13] ss:$0 sm:$0xff]  ;;  %12922 = vst [vmem:[#allocation26_spill] sm:$0xff] %v8790_v41  ;;  %v8796_v43 = vld [vmem:[%s8631_s30 + $0x28] sm:$0xff]  ;;  %v8799_v44 = vld [vmem:[%s8631_s30 + $0x30] sm:$0x7] }
  0x40   :  { %7113 = vmatprep.subr.bf16.mxu1 %v12587_v2  ;;  %v8780_v37 = vld [vmem:[%s8631_s30] sm:$0xff]  ;;  %12924 = vst [vmem:[#allocation28_spill] sm:$0xff] %v8796_v43  ;;  %12925 = vst [vmem:[#allocation29_spill] sm:$0xff] %v8799_v44  ;;  %v8802_v45 = vld [vmem:[%s8631_s30 + $0x38] sm:$0xff]  ;;  %v450_v46 = vand.u32 2147483647, %v8783_v38 }
  0x41   :  { %v449_v40 = vand.u32 2147483647, %v8780_v37  ;;  %v8793_v42 = vld [vmem:[%s8631_s30 + $0x20] sm:$0xff]  ;;  %12926 = vst [vmem:[#allocation30_spill] sm:$0xff] %v8802_v45  ;;  %v8809_v48 = vld [vmem:[%s8631_s30 + $0x48] sm:$0xff]  ;;  %v8812_v49 = vld [vmem:[%s8631_s30 + $0x50] sm:$0xff] }
  0x42   :  { %7106 = vmatpush3.bf16.msra.mxu0 %v7105_v10  ;;  %12923 = vst [vmem:[#allocation27_spill] sm:$0xff] %v8793_v42  ;;  %v8806_v47 = vld [vmem:[%s8631_s30 + $0x40] sm:$0xff]  ;;  %12928 = vst [vmem:[#allocation32_spill] sm:$0xff] %v8809_v48  ;;  %v451_v50 = vand.u32 2147483647, %v8786_v39  ;;  %v8816_v51 = vld [vmem:[%s8631_s30 + $0x58] sm:$0xff] }
  0x43   :  { %7107 = vmatprep.subr.bf16.mxu0 %v12587_v2  ;;  %7115 = vmatpush3.bf16.msra.mxu1 %v7114_v21  ;;  %12927 = vst [vmem:[#allocation31_spill] sm:$0xff] %v8806_v47  ;;  %12929 = vst [vmem:[#allocation33_spill] sm:$0xff] %v8812_v49  ;;  %v8819_v52 = vld [vmem:[%s8631_s30 + $0x60] sm:$0xff]  ;;  %v8822_v53 = vld [vmem:[%s8631_s30 + $0x68] sm:$0x7]  ;;  %v477_v54 = vsub.f32 0.0, %v449_v40 }
  0x44   :  { %7116 = vmatprep.subr.bf16.mxu1 %v12587_v2  ;;  %12930 = vst [vmem:[#allocation34_spill] sm:$0xff] %v8816_v51  ;;  %12931 = vst [vmem:[#allocation35_spill] sm:$0xff] %v8819_v52  ;;  %v8825_v55 = vld [vmem:[%s8631_s30 + $0x70] sm:$0xff]  ;;  %v8828_v56 = vld [vmem:[%s8631_s30 + $0x78] sm:$0xff]  ;;  %v452_v58 = vand.u32 2147483647, %v8790_v41 }
  0x45   :  { %12932 = vst [vmem:[#allocation36_spill] sm:$0xff] %v8822_v53  ;;  %12933 = vst [vmem:[#allocation37_spill] sm:$0xff] %v8825_v55  ;;  %v8831_v57 = vld [vmem:[%s8631_s30 + $0x80] sm:$0xff]  ;;  %v453_v59 = vand.u32 2147483647, %v8793_v42  ;;  %v8836_v60 = vld [vmem:[%s8631_s30 + $0x88] sm:$0xff] }
  0x46   :  { %7109 = vmatpush3.bf16.msra.mxu0 %v7108_v13  ;;  %12934 = vst [vmem:[#allocation38_spill] sm:$0xff] %v8828_v56  ;;  %12935 = vst [vmem:[#allocation39_spill] sm:$0xff] %v8831_v57  ;;  %v8839_v61 = vld [vmem:[%s8631_s30 + $0x90] sm:$0xff]  ;;  %v8842_v62 = vld [vmem:[%s8631_s30 + $0x98] sm:$0xff]  ;;  %v454_v63 = vand.u32 2147483647, %v8796_v43 }
  0x47   :  { %7014 = vmatprep.subr.mxu0 %v12585_v6  ;;  %7118 = vmatpush3.bf16.msra.mxu1 %v7117_v24  ;;  %12936 = vst [vmem:[#allocation40_spill] sm:$0xff] %v8836_v60  ;;  %12937 = vst [vmem:[#allocation41_spill] sm:$0xff] %v8839_v61  ;;  %v478_v0 = vsub.f32 0.0, %v450_v46  ;;  %v8846_v1 = vld [vmem:[%s8631_s30 + $0xa0] sm:$0x7]  ;;  %v8849_v3 = vld [vmem:[%s8631_s30 + $0xa8] sm:$0xff] }
  0x48   :  { %7119 = vmatprep.subr.bf16.mxu1 %v12587_v2  ;;  %12938 = vst [vmem:[#allocation42_spill] sm:$0xff] %v8842_v62  ;;  %12939 = vst [vmem:[#allocation43_spill] sm:$0xff] %v8846_v1  ;;  %v8852_v4 = vld [vmem:[%s8631_s30 + $0xb0] sm:$0xff]  ;;  %v455_v5 = vand.u32 2147483647, %v8799_v44  ;;  %v479_v8 = vsub.f32 0.0, %v451_v50 }
  0x49   :  { %12940 = vst [vmem:[#allocation44_spill] sm:$0xff] %v8849_v3  ;;  %12941 = vst [vmem:[#allocation45_spill] sm:$0xff] %v8852_v4  ;;  %v456_v7 = vand.u32 2147483647, %v8802_v45  ;;  %v8857_v9 = vld [vmem:[%s8631_s30 + $0xb8] sm:$0xff]  ;;  %v8860_v10 = vld [vmem:[%s8631_s30 + $0xc0] sm:$0xff] }
  0x4a   :  { %7015 = vmatpush3.msk.msra.mxu0 %vm12671_vm1, %v152_v14  ;;  %12942 = vst [vmem:[#allocation46_spill] sm:$0xff] %v8857_v9  ;;  %12943 = vst [vmem:[#allocation47_spill] sm:$0xff] %v8860_v10  ;;  %v8863_v11 = vld [vmem:[%s8631_s30 + $0xc8] sm:$0xff]  ;;  %v457_v12 = vand.u32 2147483647, %v8806_v47  ;;  %v483_v40 = vsub.f32 0.0, %v455_v5 }
  0x4b   :  { %7017 = vmatmul.mubr.msk.f32.vlgmr.msra.gmra.mrb[0].mxu0 %vm12672_vm2, %v143_v15  ;;  %7121 = vmatpush3.bf16.msra.mxu1 %v7120_v27  ;;  %12944 = vst [vmem:[#allocation48_spill] sm:$0xff] %v8863_v11  ;;  %v458_v13 = vand.u32 2147483647, %v8809_v48  ;;  %v459_v14 = vand.u32 2147483647, %v8812_v49  ;;  %v8869_v15 = vld [vmem:[%s8631_s30 + $0xd0] sm:$0xff] }
  0x4c   :  { %7035 = vmatprep.subr.mxu1 %v12585_v6  ;;  %12945 = vst [vmem:[#allocation49_spill] sm:$0xff] %v8869_v15  ;;  %v8872_v16 = vld [vmem:[%s8631_s30 + $0xd8] sm:$0x7]  ;;  %v460_v17 = vand.u32 2147483647, %v8816_v51  ;;  %v484_v46 = vsub.f32 0.0, %v456_v7 }
  0x4d   :  { %12946 = vst [vmem:[#allocation50_spill] sm:$0xff] %v8872_v16  ;;  %v461_v18 = vand.u32 2147483647, %v8819_v52  ;;  %v462_v19 = vand.u32 2147483647, %v8822_v53  ;;  %v485_v50 = vsub.f32 0.0, %v457_v12 }
  0x4e   :  { %v463_v20 = vand.u32 2147483647, %v8825_v55  ;;  %v464_v21 = vand.u32 2147483647, %v8828_v56  ;;  %v465_v22 = vand.u32 2147483647, %v8831_v57 }
  0x4f   :  { %7036 = vmatpush3.msk.msra.mxu1 %vm12671_vm1, %v252_v28  ;;  %v466_v23 = vand.u32 2147483647, %v8836_v60  ;;  %v467_v24 = vand.u32 2147483647, %v8839_v61  ;;  %v468_v25 = vand.u32 2147483647, %v8842_v62 }
  0x50   :  { %v469_v26 = vand.u32 2147483647, %v8846_v1  ;;  %v470_v27 = vand.u32 2147483647, %v8849_v3  ;;  %v471_v28 = vand.u32 2147483647, %v8852_v4 }
  0x51   :  { %v486_v6 = vsub.f32 0.0, %v458_v13  ;;  %v487_v2 = vsub.f32 0.0, %v459_v14  ;;  %v488_v3 = vsub.f32 0.0, %v460_v17  ;;  %v489_v4 = vsub.f32 0.0, %v461_v18  ;;  %v9155_v55 = vld [vmem:[%s8636_s6 + $0x98] sm:$0xff]  ;;  %v9205_v49 = vld [vmem:[%s8636_s6 + $0xc0] sm:$0xff] }
  0x52   :  { %v490_v1 = vsub.f32 0.0, %v462_v19  ;;  %v492_v62 = vsub.f32 0.0, %v464_v21  ;;  %v494_v61 = vsub.f32 0.0, %v466_v23  ;;  %v496_v60 = vsub.f32 0.0, %v468_v25  ;;  %12983 = vst [vmem:[#allocation72_spill] sm:$0xff] %v9155_v55  ;;  %v9174_v55 = vld [vmem:[%s8636_s6 + $0xa8] sm:$0xff] }
  0x53   :  { %v497_v57 = vsub.f32 0.0, %v469_v26  ;;  %v509_v12 = vmul.f32 1.442695, %v479_v8  ;;  %v519_v21 = vmul.f32 1.442695, %v484_v46  ;;  %12988 = vst [vmem:[#allocation74_spill] sm:$0xff] %v9174_v55 }
  0x54   :  { %v523_v23 = vmul.f32 1.442695, %v486_v6  ;;  %v529_v25 = vmul.f32 1.442695, %v489_v4  ;;  %v9197_v51 = vld [vmem:[%s8636_s6 + $0xb8] sm:$0xff]  ;;  %12997 = vst [vmem:[#allocation77_spill] sm:$0xff] %v9205_v49 }
  0x55   :  { %v8901_v6 = vmul.f32 1.442695, %v497_v57  ;;  %12996 = vst [vmem:[#allocation76_spill] sm:$0xff] %v9197_v51  ;;  %v9225_v47 = vld [vmem:[%s8641_s12] sm:$0xff]  ;;  %v9253_v44 = vld [vmem:[%s8641_s12 + $0x10] sm:$0xff]  ;;  %v9264_v43 = vld [vmem:[%s8641_s12 + $0x18] sm:$0xff] }
  0x56   :  { %13003 = vst [vmem:[#allocation80_spill] sm:$0xff] %v9225_v47  ;;  %13013 = vst [vmem:[#allocation84_spill] sm:$0xff] %v9253_v44  ;;  %s13370_s13 = sld [smem:[#allocation14_spill]] }
  0x57   :  { %13017 = vst [vmem:[#allocation85_spill] sm:$0xff] %v9264_v43 }
 0x11e   :  { %v234_v30 = vpop.f32.mrb[0].mxu0 }
 0x11f   :  { %v235_v31 = vadd.f32 %v6654_v29, %v234_v30  ;;  %v7018_v32 = vpop.f32.mrb[1].mxu0  ;;  %v472_v29 = vand.u32 2147483647, %v8857_v9  ;;  %v473_v30 = vand.u32 2147483647, %v8860_v10  ;;  %v491_v9 = vsub.f32 0.0, %v463_v20 }
 0x120   :  { %v475_v32 = vand.u32 2147483647, %v8869_v15  ;;  %v493_v10 = vsub.f32 0.0, %v465_v22  ;;  %v505_v15 = vmul.f32 1.442695, %v477_v54 }
 0x121   :  { %v6657_v33 = vmul.f32 -1.442695, %v235_v31  ;;  %v474_v31 = vand.u32 2147483647, %v8863_v11  ;;  %v495_v11 = vsub.f32 0.0, %v467_v24  ;;  %v501_v5 = vsub.f32 0.0, %v473_v30 }
 0x122   :  { %v503_v13 = vsub.f32 0.0, %v475_v32  ;;  %v517_v20 = vmul.f32 1.442695, %v483_v40  ;;  %v521_v22 = vmul.f32 1.442695, %v485_v50  ;;  %v9069_v50 = vld [vmem:[%s8636_s6 + $0x38] sm:$0xff] }
 0x123   :  { %7428 = vpow2.f32 %v6657_v33  ;;  %v476_v33 = vand.u32 2147483647, %v8872_v16  ;;  %v498_v16 = vsub.f32 0.0, %v470_v27  ;;  %v502_v7 = vsub.f32 0.0, %v474_v31  ;;  %v9059_v40 = vld [vmem:[%s8636_s6 + $0x30] sm:$0x7] }
 0x124   :  { %v525_v54 = vmul.f32 1.442695, %v487_v2  ;;  %v527_v24 = vmul.f32 1.442695, %v488_v3  ;;  %v533_v26 = vmul.f32 1.442695, %v491_v9 }
 0x125   :  { %v504_v14 = vsub.f32 0.0, %v476_v33  ;;  %v8891_v27 = vmul.f32 1.442695, %v492_v62  ;;  %v8893_v8 = vmul.f32 1.442695, %v493_v10  ;;  %v9043_v33 = vld [vmem:[%s8636_s6 + $0x18] sm:$0xff] }
 0x126   :  { %v8903_v2 = vmul.f32 1.442695, %v498_v16  ;;  %v8909_v62 = vmul.f32 1.442695, %v501_v5  ;;  %v8911_v4 = vmul.f32 1.442695, %v502_v7 }
 0x127   :  { %v8914_v9 = vmul.f32 1.442695, %v503_v13  ;;  %12963 = vst [vmem:[#allocation55_spill] sm:$0xff] %v9043_v33  ;;  %12967 = vst [vmem:[#allocation59_spill] sm:$0xff] %v9059_v40  ;;  %v9140_v7 = vld [vmem:[%s8636_s6 + $0x90] sm:$0xff] }
 0x128   :  { %12968 = vst [vmem:[#allocation60_spill] sm:$0xff] %v9069_v50  ;;  %12979 = vst [vmem:[#allocation71_spill] sm:$0xff] %v9140_v7 }
 0x12d   :  { %v7429_v34 = vpop.eup %7428 }
 0x12e   :  { %v241_v35 = vadd.f32 1.0, %v7429_v34  ;;  %v480_v34 = vsub.f32 0.0, %v452_v58  ;;  %v499_v58 = vsub.f32 0.0, %v471_v28  ;;  %v8895_v28 = vmul.f32 1.442695, %v494_v61 }
 0x130   :  { %7430 = vrcp.f32 %v241_v35  ;;  %v481_v35 = vsub.f32 0.0, %v453_v59  ;;  %v507_v59 = vmul.f32 1.442695, %v478_v0  ;;  %v511_v17 = vmul.f32 1.442695, %v480_v34 }
 0x131   :  { %7432 = vpow2.f32 %v505_v15  ;;  %v531_v0 = vmul.f32 1.442695, %v490_v1  ;;  %v8897_v15 = vmul.f32 1.442695, %v495_v11  ;;  %v8905_v3 = vmul.f32 1.442695, %v499_v58 }
 0x132   :  { %v513_v18 = vmul.f32 1.442695, %v481_v35  ;;  %7434 = vpow2.f32 %v507_v59 }
 0x133   :  { %7436 = vpow2.f32 %v509_v12 }
 0x134   :  { %7438 = vpow2.f32 %v511_v17  ;;  %v9123_v17 = vld [vmem:[%s8636_s6 + $0x78] sm:$0xff] }
 0x135   :  { %7440 = vpow2.f32 %v513_v18  ;;  %12976 = vst [vmem:[#allocation68_spill] sm:$0xff] %v9123_v17 }
 0x13a   :  { %v7431_v36 = vpop.eup %7430 }
 0x13b   :  { %7038 = vmatmul.mubr.msk.f32.vlgmr.msra.gmra.mrb[0].mxu1 %vm12672_vm2, %v7431_v36  ;;  %v482_v36 = vsub.f32 0.0, %v454_v63  ;;  %v500_v63 = vsub.f32 0.0, %v472_v29  ;;  %v8899_v29 = vmul.f32 1.442695, %v496_v60  ;;  %v8916_v60 = vmul.f32 1.442695, %v504_v14  ;;  %v8926_v34 = vpop.eup %7432 }
 0x13c   :  { %v8931_v46 = vpop.eup %7434  ;;  %v564_v13 = vmul.f32 -0.5, %v8926_v34  ;;  %v8966_v18 = vadd.f32 1.0, %v8926_v34 }
 0x13d   :  { %v515_v19 = vmul.f32 1.442695, %v482_v36  ;;  %v8907_v1 = vmul.f32 1.442695, %v500_v63  ;;  %v8936_v63 = vpop.eup %7436  ;;  %v12984_v53 = vand.u32 2147483647, %v8931_v46 }
 0x13e   :  { %v8941_v14 = vpop.eup %7438  ;;  %v565_v58 = vadd.f32 1.0, %v564_v13  ;;  %v582_v5 = vmul.f32 -0.5, %v8936_v63  ;;  %v8973_v13 = vadd.f32 1.0, %v8931_v46  ;;  %v12990_v52 = vand.u32 2147483647, %v8936_v63 }
 0x13f   :  { %7442 = vpow2.f32 %v515_v19  ;;  %v8946_v59 = vpop.eup %7440  ;;  %v8991_v10 = vadd.f32 1.0, %v8941_v14  ;;  %v9112_v19 = vld [vmem:[%s8636_s6 + $0x70] sm:$0xff]  ;;  %vm9161_vm4 = vcmp.lt.f32.partialorder %v12984_v53, 0.0004427343 }
 0x140   :  { %7444 = vpow2.f32 %v517_v20  ;;  %v600_v11 = vmul.f32 -0.5, %v8946_v59  ;;  %v583_v20 = vadd.f32 1.0, %v582_v5  ;;  %12975 = vst [vmem:[#allocation67_spill] sm:$0xff] %v9112_v19  ;;  %vm9183_vm5 = vcmp.lt.f32.partialorder %v12990_v52, 0.0004427343 }
 0x141   :  { %7446 = vpow2.f32 %v519_v21  ;;  %v9106_v21 = vld [vmem:[%s8636_s6 + $0x60] sm:$0xff]  ;;  %v13000_v51 = vand.u32 2147483647, %v8946_v59 }
 0x142   :  { %7448 = vpow2.f32 %v521_v22  ;;  %12973 = vst [vmem:[#allocation65_spill] sm:$0xff] %v9106_v21 }
 0x143   :  { %7450 = vpow2.f32 %v523_v23  ;;  %vm9217_vm7 = vcmp.lt.f32.partialorder %v13000_v51, 0.0004427343 }
 0x144   :  { %7452 = vpow2.f32 %v525_v54  ;;  %v573_v54 = vmul.f32 -0.5, %v8931_v46 }
 0x145   :  { %7454 = vpow2.f32 %v527_v24 }
 0x146   :  { %7456 = vpow2.f32 %v529_v25  ;;  %v574_v32 = vadd.f32 1.0, %v573_v54  ;;  %v8984_v54 = vadd.f32 1.0, %v8936_v63 }
 0x147   :  { %7458 = vpow2.f32 %v531_v0 }
 0x148   :  { %7460 = vpow2.f32 %v533_v26  ;;  %v591_v26 = vmul.f32 -0.5, %v8941_v14 }
 0x149   :  { %v8951_v12 = vpop.eup %7442  ;;  %7462 = vpow2.f32 %v8891_v27 }
 0x14a   :  { %v8956_v22 = vpop.eup %7444  ;;  %7464 = vpow2.f32 %v8893_v8  ;;  %v8981_v8 = vmul.f32 %v8926_v34, %v565_v58  ;;  %v609_v57 = vmul.f32 -0.5, %v8951_v12  ;;  %v8998_v58 = vmul.f32 %v8931_v46, %v574_v32  ;;  %v9030_v32 = vld [vmem:[%s8636_s6 + $0x10] sm:$0xff] }
 0x14b   :  { %v8960_v25 = vpop.eup %7446  ;;  %7466 = vpow2.f32 %v8895_v28  ;;  %v592_v5 = vadd.f32 1.0, %v591_v26  ;;  %v601_v28 = vadd.f32 1.0, %v600_v11  ;;  %v618_v0 = vmul.f32 -0.5, %v8956_v22  ;;  %12961 = vst [vmem:[#allocation53_spill] sm:$0xff] %v9030_v32  ;;  %v9177_v46 = vld [vmem:[%s8636_s6 + $0xb0] sm:$0xff] }
 0x14c   :  { %v8977_v27 = vpop.eup %7448  ;;  %7468 = vpow2.f32 %v8897_v15  ;;  %v627_v26 = vmul.f32 -0.5, %v8960_v25  ;;  %v9023_v11 = vadd.f32 1.0, %v8951_v12  ;;  %v610_v31 = vadd.f32 1.0, %v609_v57  ;;  %12989 = vst [vmem:[#allocation75_spill] sm:$0xff] %v9177_v46 }
 0x14d   :  { %v8986_v36 = vpop.eup %7450  ;;  %7470 = vpow2.f32 %v8899_v29  ;;  %v9005_v29 = vadd.f32 1.0, %v8946_v59  ;;  %v9040_v57 = vadd.f32 1.0, %v8956_v22  ;;  %v9049_v32 = vmul.f32 %v8946_v59, %v601_v28 }
 0x14e   :  { %v8994_v15 = vpop.eup %7452  ;;  %7472 = vpow2.f32 %v8901_v6  ;;  %v9012_v6 = vmul.f32 %v8936_v63, %v583_v20  ;;  %v9027_v20 = vld [vmem:[%s8636_s6 + $0x8] sm:$0xff]  ;;  %v9066_v28 = vadd.f32 1.0, %v8960_v25  ;;  %v9093_v40 = vadd.f32 1.0, %v8986_v36 }
 0x14f   :  { %v9001_v30 = vpop.eup %7454  ;;  %7474 = vpow2.f32 %v8903_v2  ;;  %v9017_v2 = vld [vmem:[%s8636_s6] sm:$0xff]  ;;  %12960 = vst [vmem:[#allocation52_spill] sm:$0xff] %v9027_v20  ;;  %12964 = vst [vmem:[#allocation56_spill] sm:$0xff] %v9049_v32  ;;  %v619_v20 = vadd.f32 1.0, %v618_v0  ;;  %v628_v0 = vadd.f32 1.0, %v627_v26  ;;  %v9085_v26 = vld [vmem:[%s8636_s6 + $0x50] sm:$0xff] }
 0x150   :  { %v9008_v16 = vpop.eup %7456  ;;  %7476 = vpow2.f32 %v8905_v3  ;;  %12959 = vst [vmem:[#allocation51_spill] sm:$0xff] %v9017_v2  ;;  %v636_v3 = vmul.f32 -0.5, %v8977_v27  ;;  %v9036_v2 = vmul.f32 %v8941_v14, %v592_v5  ;;  %v9053_v5 = vld [vmem:[%s8636_s6 + $0x20] sm:$0xff]  ;;  %12971 = vst [vmem:[#allocation63_spill] sm:$0xff] %v9085_v26  ;;  %v651_v19 = vadd.f32 1.0, %v8994_v15 }
 0x151   :  { %v9019_v61 = vpop.eup %7458  ;;  %7478 = vpow2.f32 %v8907_v1  ;;  %12965 = vst [vmem:[#allocation57_spill] sm:$0xff] %v9053_v5  ;;  %v9056_v1 = vld [vmem:[%s8636_s6 + $0x28] sm:$0xff]  ;;  %v9102_v26 = vmul.f32 %v8956_v22, %v619_v20  ;;  %v669_v46 = vadd.f32 1.0, %v9008_v16  ;;  %v675_v55 = vand.u32 2147483647, %v9008_v16 }
 0x152   :  { %v9032_v24 = vpop.eup %7460  ;;  %7480 = vpow2.f32 %v8909_v62  ;;  %12962 = vst [vmem:[#allocation54_spill] sm:$0xff] %v9036_v2  ;;  %v645_v62 = vmul.f32 -0.5, %v8986_v36  ;;  %12966 = vst [vmem:[#allocation58_spill] sm:$0xff] %v9056_v1  ;;  %v9075_v1 = vmul.f32 %v8951_v12, %v610_v31  ;;  %v9082_v5 = vld [vmem:[%s8636_s6 + $0x48] sm:$0xff]  ;;  %v681_v56 = vmul.f32 -0.5, %v9019_v61 }
 0x153   :  { %v9045_v35 = vpop.eup %7462  ;;  %7482 = vpow2.f32 %v8911_v4  ;;  %v9079_v4 = vld [vmem:[%s8636_s6 + $0x40] sm:$0xff]  ;;  %12970 = vst [vmem:[#allocation62_spill] sm:$0xff] %v9082_v5  ;;  %v9109_v31 = vld [vmem:[%s8636_s6 + $0x68] sm:$0x7]  ;;  %v687_v49 = vadd.f32 1.0, %v9032_v24 }
 0x154   :  { %v9061_v33 = vpop.eup %7464  ;;  %7484 = vpow2.f32 %v8914_v9  ;;  %v637_v9 = vadd.f32 1.0, %v636_v3  ;;  %12969 = vst [vmem:[#allocation61_spill] sm:$0xff] %v9079_v4  ;;  %v9096_v3 = vld [vmem:[%s8636_s6 + $0x58] sm:$0xff]  ;;  %v646_v5 = vadd.f32 1.0, %v645_v62  ;;  %12974 = vst [vmem:[#allocation66_spill] sm:$0xff] %v9109_v31  ;;  %v663_v62 = vmul.f32 -0.5, %v9001_v30 }
 0x155   :  { %v9071_v23 = vpop.eup %7466  ;;  %7486 = vpow2.f32 %v8916_v60  ;;  %v633_v60 = vadd.f32 1.0, %v8977_v27  ;;  %12972 = vst [vmem:[#allocation64_spill] sm:$0xff] %v9096_v3  ;;  %v9137_v20 = vld [vmem:[%s8636_s6 + $0x88] sm:$0xff]  ;;  %v13004_v45 = vand.u32 2147483647, %v8951_v12  ;;  %v699_v47 = vmul.f32 -0.5, %v9045_v35 }
 0x156   :  { %v9087_v50 = vpop.eup %7468  ;;  %7488 = vlog2.f32 %v8966_v18  ;;  %v654_v18 = vmul.f32 -0.5, %v8994_v15  ;;  %v9129_v31 = vmul.f32 %v8977_v27, %v637_v9  ;;  %12978 = vst [vmem:[#allocation70_spill] sm:$0xff] %v9137_v20  ;;  %v9171_v20 = vld [vmem:[%s8636_s6 + $0xa0] sm:$0x7]  ;;  %v13007_v51 = vand.u32 2147483647, %v8956_v22 }
 0x157   :  { %v9098_v4 = vpop.eup %7470  ;;  %7490 = vlog2.f32 %v8973_v13  ;;  %v9118_v13 = vmul.f32 %v8960_v25, %v628_v0  ;;  %v9134_v0 = vld [vmem:[%s8636_s6 + $0x80] sm:$0xff]  ;;  %12987 = vst [vmem:[#allocation73_spill] sm:$0xff] %v9171_v20  ;;  %v664_v20 = vadd.f32 1.0, %v663_v62  ;;  %v9211_v62 = vld [vmem:[%s8636_s6 + $0xd0] sm:$0xff]  ;;  %vm9231_vm8 = vcmp.lt.f32.partialorder %v13004_v45, 0.0004427343 }
 0x158   :  { %v9114_v3 = vpop.eup %7472  ;;  %7492 = vlog2.f32 %v8984_v54  ;;  %v672_v54 = vmul.f32 -0.5, %v9008_v16  ;;  %12977 = vst [vmem:[#allocation69_spill] sm:$0xff] %v9134_v0  ;;  %v660_v0 = vadd.f32 1.0, %v9001_v30  ;;  %12999 = vst [vmem:[#allocation79_spill] sm:$0xff] %v9211_v62  ;;  %vm9237_vm9 = vcmp.lt.f32.partialorder %v13007_v51, 0.0004427343 }
 0x159   :  { %v9125_v21 = vpop.eup %7474  ;;  %7494 = vlog2.f32 %v8991_v10  ;;  %v12980_v10 = vand.u32 2147483647, %v8926_v34  ;;  %v9247_v12 = vld [vmem:[%s8636_s6 + $0xd8] sm:$0x7]  ;;  %v9250_v45 = vld [vmem:[%s8641_s12 + $0x8] sm:$0xff]  ;;  %v705_v43 = vadd.f32 1.0, %v9061_v33 }
 0x15a   :  { %v9142_v17 = vpop.eup %7476  ;;  %7496 = vlog2.f32 %v9005_v29  ;;  %v9167_v29 = vmul.f32 %v8986_v36, %v646_v5  ;;  %v12993_v5 = vand.u32 2147483647, %v8941_v14  ;;  %v673_v63 = vadd.f32 1.0, %v672_v54  ;;  %13011 = vst [vmem:[#allocation82_spill] sm:$0xff] %v9247_v12  ;;  %13012 = vst [vmem:[#allocation83_spill] sm:$0xff] %v9250_v45  ;;  %v9752_v34 = vld [vmem:[%s8611_s8 + $0x50] sm:$0xff] }
 0x15b   :  { %vm9146_vm3 = vcmp.lt.f32.partialorder %v12980_v10, 0.0004427343  ;;  %v9157_v7 = vpop.eup %7478  ;;  %7498 = vlog2.f32 %v9023_v11  ;;  %v655_v10 = vadd.f32 1.0, %v654_v18  ;;  %v12994_v18 = vmov 0  ;;  %v9763_v11 = vld [vmem:[%s8631_s30 + $0x50] sm:$0xff] }
 0x15c   :  { %v9179_v53 = vpop.eup %7480  ;;  %vm9189_vm6 = vcmp.lt.f32.partialorder %v12993_v5, 0.0004427343  ;;  %7500 = vlog2.f32 %v9040_v57  ;;  %v678_v14 = vadd.f32 1.0, %v9019_v61  ;;  %v690_v5 = vmul.f32 -0.5, %v9032_v24  ;;  %v9208_v57 = vld [vmem:[%s8636_s6 + $0xc8] sm:$0xff]  ;;  %13139 = vst [vmem:[#allocation151_spill] sm:$0xff] %v9763_v11 }
 0x15d   :  { %v12995_v18 = vsel %vm9189_vm6, 4294967295, %v12994_v18  ;;  %v9199_v52 = vpop.eup %7482  ;;  %7502 = vlog2.f32 %v9066_v28  ;;  %12998 = vst [vmem:[#allocation78_spill] sm:$0xff] %v9208_v57  ;;  %v9243_v57 = vmul.f32 %v8994_v15, %v655_v10  ;;  %v682_v54 = vadd.f32 1.0, %v681_v56  ;;  %v9810_v28 = vld [vmem:[%s8631_s30 + $0x68] sm:$0x7] }
 0x15e   :  { %v9213_v48 = vpop.eup %7484  ;;  %7504 = vlog2.f32 %v633_v60  ;;  %v13008_v60 = vmov 0  ;;  %v13014_v51 = vand.u32 2147483647, %v8960_v25  ;;  %v691_v56 = vadd.f32 1.0, %v690_v5  ;;  %v9875_v25 = vld [vmem:[%s8631_s30 + $0x88] sm:$0xff] }
 0x15f   :  { %v9227_v62 = vpop.eup %7486  ;;  %v13009_v60 = vsel %vm9237_vm9, 4294967295, %v13008_v60  ;;  %7506 = vlog2.f32 %v9093_v40  ;;  %v13015_v40 = vmov 0  ;;  %v696_v10 = vadd.f32 1.0, %v9045_v35 }
 0x160   :  { %13010 = vst [vmem:[#allocation81_spill] sm:$0xff] %v13009_v60  ;;  %v7489_v22 = vpop.eup %7488  ;;  %vm9257_vm10 = vcmp.lt.f32.partialorder %v13014_v51, 0.0004427343  ;;  %7508 = vlog2.f32 %v651_v19  ;;  %v702_v12 = vand.u32 2147483647, %v9045_v35  ;;  %v13022_v19 = vmov 0 }
 0x161   :  { %v13016_v40 = vsel %vm9257_vm10, 4294967295, %v13015_v40  ;;  %v7491_v45 = vpop.eup %7490  ;;  %v9266_v44 = vmul.f32 0.6931472, %v7489_v22  ;;  %v13018_v42 = vand.u32 2147483647, %v8977_v27  ;;  %7510 = vlog2.f32 %v660_v0  ;;  %v9285_v22 = vld [vmem:[%s8641_s12 + $0x20] sm:$0xff] }
 0x162   :  { %v13021_v51 = vand.u32 2147483647, %v8986_v36  ;;  %v9281_v5 = vmul.f32 %v9001_v30, %v664_v20  ;;  %13025 = vst [vmem:[#allocation87_spill] sm:$0xff] %v9285_v22  ;;  %v9288_v27 = vld [vmem:[%s8641_s12 + $0x28] sm:$0xff]  ;;  %v7493_v36 = vpop.eup %7492  ;;  %7512 = vlog2.f32 %v669_v46  ;;  %v700_v41 = vadd.f32 1.0, %v699_v47  ;;  %v9297_v20 = vld [vmem:[%s8641_s12 + $0x40] sm:$0xff] }
 0x163   :  { %vm9270_vm11 = vcmp.lt.f32.partialorder %v13018_v42, 0.0004427343  ;;  %13026 = vst [vmem:[#allocation88_spill] sm:$0xff] %v9288_v27  ;;  %v9291_v42 = vld [vmem:[%s8641_s12 + $0x38] sm:$0xff]  ;;  %v708_v0 = vmul.f32 -0.5, %v9061_v33  ;;  %13028 = vst [vmem:[#allocation90_spill] sm:$0xff] %v9297_v20  ;;  %v7495_v39 = vpop.eup %7494  ;;  %v9314_v46 = vmul.f32 %v9008_v16, %v673_v63  ;;  %7514 = vlog2.f32 %v678_v14 }
 0x164   :  { %vm9276_vm12 = vcmp.lt.f32.partialorder %v13021_v51, 0.0004427343  ;;  %13027 = vst [vmem:[#allocation89_spill] sm:$0xff] %v9291_v42  ;;  %v9293_v51 = vmul.f32 0.6931472, %v7491_v45  ;;  %v13030_v27 = vmov 0  ;;  %7516 = vlog2.f32 %v687_v49 }
 0x165   :  { %v13023_v19 = vsel %vm9276_vm12, 4294967295, %v13022_v19  ;;  %v9299_v38 = vmul.f32 0.6931472, %v7493_v36  ;;  %v13029_v22 = vand.u32 2147483647, %v8994_v15  ;;  %v13034_v47 = vmov 0 }
 0x166   :  { %13024 = vst [vmem:[#allocation86_spill] sm:$0xff] %v13023_v19  ;;  %v13033_v45 = vand.u32 2147483647, %v9001_v30  ;;  %v9317_v36 = vmul.f32 %v9019_v61, %v682_v54  ;;  %v9320_v15 = vld [vmem:[%s8641_s12 + $0x30] sm:$0x7]  ;;  %v7497_v30 = vpop.eup %7496  ;;  %v9335_v16 = vmul.f32 %v9032_v24, %v691_v56  ;;  %v709_v63 = vadd.f32 1.0, %v708_v0 }
 0x167   :  { %vm9303_vm13 = vcmp.lt.f32.partialorder %v13029_v22, 0.0004427343  ;;  %13037 = vst [vmem:[#allocation93_spill] sm:$0xff] %v9320_v15  ;;  %v9323_v22 = vld [vmem:[%s8641_s12 + $0x48] sm:$0xff]  ;;  %v9326_v20 = vld [vmem:[%s8641_s12 + $0x50] sm:$0xff]  ;;  %v9338_v14 = vld [vmem:[%s8641_s12 + $0x58] sm:$0xff]  ;;  %7518 = vlog2.f32 %v696_v10  ;;  %v9369_v10 = vmul.f32 %v9045_v35, %v700_v41 }
 0x168   :  { %v13031_v27 = vsel %vm9303_vm13, 4294967295, %v13030_v27  ;;  %vm9309_vm14 = vcmp.lt.f32.partialorder %v13033_v45, 0.0004427343  ;;  %13038 = vst [vmem:[#allocation94_spill] sm:$0xff] %v9323_v22  ;;  %13039 = vst [vmem:[#allocation95_spill] sm:$0xff] %v9326_v20  ;;  %v9341_v54 = vld [vmem:[%s8641_s12 + $0x60] sm:$0xff]  ;;  %7520 = vlog2.f32 %v705_v43 }
 0x169   :  { %13032 = vst [vmem:[#allocation91_spill] sm:$0xff] %v13031_v27  ;;  %v13035_v47 = vsel %vm9309_vm14, 4294967295, %v13034_v47  ;;  %v9328_v42 = vmul.f32 0.6931472, %v7495_v39  ;;  %vm9330_vm15 = vcmp.lt.f32.partialorder %v675_v55, 0.0004427343  ;;  %v7499_v39 = vpop.eup %7498 }
 0x16a   :  { %13036 = vst [vmem:[#allocation92_spill] sm:$0xff] %v13035_v47  ;;  %13043 = vst [vmem:[#allocation97_spill] sm:$0xff] %v9338_v14  ;;  %v9344_v15 = vld [vmem:[%s8641_s12 + $0x70] sm:$0xff]  ;;  %v9350_v49 = vmul.f32 0.6931472, %v7497_v30  ;;  %v7501_v14 = vpop.eup %7500  ;;  %v13049_v55 = vmov 0 }
 0x16b   :  { %13040 = vst [vmem:[#allocation96_spill] sm:$0xff] %v9328_v42  ;;  %13044 = vst [vmem:[#allocation98_spill] sm:$0xff] %v9341_v54  ;;  %v711_v56 = vand.u32 2147483647, %v9061_v33  ;;  %v9354_v0 = vld [vmem:[%s8641_s12 + $0x68] sm:$0x7]  ;;  %v7503_v54 = vpop.eup %7502 }
 0x16c   :  { %13045 = vst [vmem:[#allocation99_spill] sm:$0xff] %v9344_v15  ;;  %13046 = vst [vmem:[#allocation100_spill] sm:$0xff] %v9350_v49  ;;  %v9360_v20 = vmul.f32 0.6931472, %v7499_v39  ;;  %v13048_v22 = vand.u32 2147483647, %v9019_v61 }
 0x16d   :  { %13047 = vst [vmem:[#allocation101_spill] sm:$0xff] %v9354_v0  ;;  %13051 = vst [vmem:[#allocation102_spill] sm:$0xff] %v9369_v10  ;;  %v9372_v30 = vld [vmem:[%s8641_s12 + $0x78] sm:$0xff]  ;;  %v9375_v0 = vld [vmem:[%s8641_s12 + $0x80] sm:$0xff]  ;;  %v9388_v35 = vmul.f32 0.6931472, %v7501_v14  ;;  %v9407_v14 = vmul.f32 %v9061_v33, %v709_v63 }
 0x16e   :  { %vm9364_vm0 = vcmp.lt.f32.partialorder %v13048_v22, 0.0004427343  ;;  %13052 = vst [vmem:[#allocation103_spill] sm:$0xff] %v9372_v30  ;;  %13053 = vst [vmem:[#allocation104_spill] sm:$0xff] %v9375_v0  ;;  %v9378_v15 = vld [vmem:[%s8641_s12 + $0x88] sm:$0xff]  ;;  %v13056_v22 = vmov 0  ;;  %v7505_v0 = vpop.eup %7504 }
 0x16f   :  { %v13050_v55 = vsel %vm9364_vm0, 4294967295, %v13049_v55  ;;  %13054 = vst [vmem:[#allocation105_spill] sm:$0xff] %v9378_v15  ;;  %v13055_v43 = vand.u32 2147483647, %v9032_v24  ;;  %vm9396_vm2 = vcmp.lt.f32.partialorder %v702_v12, 0.0004427343  ;;  %v7507_v30 = vpop.eup %7506 }
 0x170   :  { %v13059_v39 = vmov 0  ;;  %v714_v61 = vadd.f32 1.0, %v9071_v23  ;;  %v9402_v15 = vld [vmem:[%s8641_s12 + $0x90] sm:$0xff]  ;;  %v9404_v41 = vmul.f32 0.6931472, %v7503_v54  ;;  %13063 = vst [vmem:[#allocation109_spill] sm:$0xff] %v9407_v14  ;;  %v7509_v2 = vpop.eup %7508 }
 0x171   :  { %vm9392_vm1 = vcmp.lt.f32.partialorder %v13055_v43, 0.0004427343  ;;  %v13060_v39 = vsel %vm9396_vm2, 4294967295, %v13059_v39  ;;  %13061 = vst [vmem:[#allocation107_spill] sm:$0xff] %v9402_v15  ;;  %v717_v24 = vmul.f32 -0.5, %v9071_v23  ;;  %v9412_v12 = vld [vmem:[%s8641_s12 + $0x98] sm:$0xff] }
 0x172   :  { %v13057_v22 = vsel %vm9392_vm1, 4294967295, %v13056_v22  ;;  %13062 = vst [vmem:[#allocation108_spill] sm:$0xff] %v9404_v41  ;;  %v720_v43 = vand.u32 2147483647, %v9071_v23  ;;  %13064 = vst [vmem:[#allocation110_spill] sm:$0xff] %v9412_v12  ;;  %v13066_v54 = vmov 0  ;;  %7522 = vlog2.f32 %v714_v61 }
 0x173   :  { %13058 = vst [vmem:[#allocation106_spill] sm:$0xff] %v13057_v22  ;;  %v9418_v15 = vmul.f32 0.6931472, %v7505_v0  ;;  %vm9420_vm6 = vcmp.lt.f32.partialorder %v711_v56, 0.0004427343  ;;  %v723_v33 = vadd.f32 1.0, %v9087_v50 }
 0x174   :  { %v13067_v54 = vsel %vm9420_vm6, 4294967295, %v13066_v54  ;;  %v9426_v63 = vld [vmem:[%s8641_s12 + $0xa0] sm:$0x7]  ;;  %v9429_v12 = vld [vmem:[%s8641_s12 + $0xa8] sm:$0xff]  ;;  %v9439_v61 = vmul.f32 0.6931472, %v7507_v30 }
 0x175   :  { %13065 = vst [vmem:[#allocation111_spill] sm:$0xff] %v9418_v15  ;;  %13068 = vst [vmem:[#allocation112_spill] sm:$0xff] %v9426_v63  ;;  %v718_v42 = vadd.f32 1.0, %v717_v24  ;;  %v9442_v49 = vld [vmem:[%s8641_s12 + $0xb0] sm:$0xff]  ;;  %v7511_v63 = vpop.eup %7510  ;;  %v9448_v32 = vmul.f32 0.6931472, %v7509_v2  ;;  %7524 = vlog2.f32 %v723_v33 }
 0x176   :  { %13069 = vst [vmem:[#allocation113_spill] sm:$0xff] %v9429_v12  ;;  %13070 = vst [vmem:[#allocation114_spill] sm:$0xff] %v9442_v49  ;;  %v726_v0 = vmul.f32 -0.5, %v9087_v50  ;;  %v9452_v60 = vld [vmem:[%s8641_s12 + $0xb8] sm:$0xff]  ;;  %v9455_v30 = vld [vmem:[%s8641_s12 + $0xc0] sm:$0xff]  ;;  %v7513_v56 = vpop.eup %7512  ;;  %v13075_v12 = vmov 0 }
 0x177   :  { %13071 = vst [vmem:[#allocation115_spill] sm:$0xff] %v9452_v60  ;;  %13072 = vst [vmem:[#allocation116_spill] sm:$0xff] %v9455_v30  ;;  %v9458_v24 = vld [vmem:[%s8641_s12 + $0xc8] sm:$0xff]  ;;  %v9468_v33 = vmul.f32 0.6931472, %v7511_v63  ;;  %v7515_v60 = vpop.eup %7514  ;;  %v9481_v49 = vmul.f32 %v9071_v23, %v718_v42  ;;  %v732_v19 = vadd.f32 1.0, %v9098_v4 }
 0x178   :  { %13073 = vst [vmem:[#allocation117_spill] sm:$0xff] %v9458_v24  ;;  %vm9470_vm10 = vcmp.lt.f32.partialorder %v720_v43, 0.0004427343  ;;  %v729_v30 = vand.u32 2147483647, %v9087_v50  ;;  %v9476_v24 = vld [vmem:[%s8641_s12 + $0xd0] sm:$0xff]  ;;  %v7517_v63 = vpop.eup %7516 }
 0x179   :  { %13074 = vst [vmem:[#allocation118_spill] sm:$0xff] %v9468_v33  ;;  %v13076_v12 = vsel %vm9470_vm10, 4294967295, %v13075_v12  ;;  %13077 = vst [vmem:[#allocation119_spill] sm:$0xff] %v9476_v24  ;;  %v9478_v41 = vmul.f32 0.6931472, %v7513_v56  ;;  %v727_v15 = vadd.f32 1.0, %v726_v0  ;;  %v7519_v42 = vpop.eup %7518  ;;  %7526 = vlog2.f32 %v732_v19 }
 0x17a   :  { %13078 = vst [vmem:[#allocation120_spill] sm:$0xff] %v9481_v49  ;;  %v9485_v2 = vld [vmem:[%s8641_s12 + $0xd8] sm:$0x7]  ;;  %v9495_v24 = vmul.f32 0.6931472, %v7515_v60  ;;  %v735_v23 = vmul.f32 -0.5, %v9098_v4  ;;  %v7521_v43 = vpop.eup %7520 }
 0x17b   :  { %13079 = vst [vmem:[#allocation121_spill] sm:$0xff] %v9485_v2  ;;  %v9502_v2 = vmul.f32 0.6931472, %v7517_v63  ;;  %vm9504_vm12 = vcmp.lt.f32.partialorder %v729_v30, 0.0004427343  ;;  %v13081_v27 = vmov 0  ;;  %v9511_v60 = vmul.f32 %v9087_v50, %v727_v15 }
 0x17c   :  { %13080 = vst [vmem:[#allocation122_spill] sm:$0xff] %v9495_v24  ;;  %v13082_v27 = vsel %vm9504_vm12, 4294967295, %v13081_v27  ;;  %v9508_v47 = vmul.f32 0.6931472, %v7519_v42  ;;  %v736_v56 = vadd.f32 1.0, %v735_v23  ;;  %v741_v30 = vadd.f32 1.0, %v9114_v3  ;;  %v7523_v42 = vpop.eup %7522 }
 0x17d   :  { %13083 = vst [vmem:[#allocation123_spill] sm:$0xff] %v13082_v27  ;;  %13085 = vst [vmem:[#allocation125_spill] sm:$0xff] %v9511_v60  ;;  %v738_v33 = vand.u32 2147483647, %v9098_v4  ;;  %v9518_v0 = vmul.f32 0.6931472, %v7521_v43 }
 0x17e   :  { %13084 = vst [vmem:[#allocation124_spill] sm:$0xff] %v9508_v47  ;;  %v744_v19 = vmul.f32 -0.5, %v9114_v3  ;;  %v9531_v23 = vmul.f32 %v9098_v4, %v736_v56  ;;  %v747_v43 = vand.u32 2147483647, %v9114_v3  ;;  %v13087_v63 = vmov 0  ;;  %v13168_v59 = vld [vmem:[#allocation108_spill] sm:$0xff] }
 0x17f   :  { %13086 = vst [vmem:[#allocation126_spill] sm:$0xff] %v9518_v0  ;;  %vm9534_vm0 = vcmp.lt.f32.partialorder %v738_v33, 0.0004427343  ;;  %7528 = vlog2.f32 %v741_v30  ;;  %v750_v22 = vadd.f32 1.0, %v9125_v21  ;;  %v9543_v15 = vmul.f32 0.6931472, %v7523_v42  ;;  %v7525_v47 = vpop.eup %7524 }
 0x180   :  { %v13088_v63 = vsel %vm9534_vm0, 4294967295, %v13087_v63  ;;  %v745_v24 = vadd.f32 1.0, %v744_v19  ;;  %v753_v4 = vmul.f32 -0.5, %v9125_v21  ;;  %v759_v56 = vadd.f32 1.0, %v9142_v17 }
 0x181   :  { %13089 = vst [vmem:[#allocation127_spill] sm:$0xff] %v13088_v63  ;;  %13090 = vst [vmem:[#allocation128_spill] sm:$0xff] %v9543_v15  ;;  %vm9547_vm2 = vcmp.lt.f32.partialorder %v747_v43, 0.0004427343  ;;  %v13091_v33 = vmov 0  ;;  %7530 = vlog2.f32 %v750_v22  ;;  %v762_v19 = vmul.f32 -0.5, %v9142_v17 }
 0x182   :  { %v13092_v33 = vsel %vm9547_vm2, 4294967295, %v13091_v33  ;;  %v756_v30 = vand.u32 2147483647, %v9125_v21  ;;  %v9553_v10 = vmul.f32 0.6931472, %v7525_v47  ;;  %v9556_v50 = vmul.f32 %v9114_v3, %v745_v24  ;;  %v9605_v63 = vld [vmem:[%s8611_s8] sm:$0xff] }
 0x183   :  { %v754_v42 = vadd.f32 1.0, %v753_v4  ;;  %7532 = vlog2.f32 %v759_v56  ;;  %v763_v0 = vadd.f32 1.0, %v762_v19  ;;  %v765_v14 = vand.u32 2147483647, %v9142_v17  ;;  %v7527_v56 = vpop.eup %7526  ;;  %13102 = vst [vmem:[#allocation132_spill] sm:$0xff] %v9605_v63  ;;  %v9656_v63 = vld [vmem:[%s8631_s30 + $0x10] sm:$0xff] }
 0x184   :  { %13093 = vst [vmem:[#allocation129_spill] sm:$0xff] %v9553_v10  ;;  %v768_v22 = vadd.f32 1.0, %v9157_v7  ;;  %vm9568_vm6 = vcmp.lt.f32.partialorder %v756_v30, 0.0004427343  ;;  %v13094_v3 = vmov 0  ;;  %v771_v24 = vmul.f32 -0.5, %v9157_v7 }
 0x185   :  { %v13095_v3 = vsel %vm9568_vm6, 4294967295, %v13094_v3  ;;  %v774_v4 = vand.u32 2147483647, %v9157_v7  ;;  %v9575_v19 = vmul.f32 %v9125_v21, %v754_v42  ;;  %v9578_v43 = vmul.f32 %v9142_v17, %v763_v0  ;;  %13113 = vst [vmem:[#allocation139_spill] sm:$0xff] %v9656_v63  ;;  %v9912_v42 = vld [vmem:[%s8616_s14 + $0x30] sm:$0xff] }
 0x186   :  { %13096 = vst [vmem:[#allocation130_spill] sm:$0xff] %v13095_v3  ;;  %7534 = vlog2.f32 %v768_v22  ;;  %v777_v15 = vadd.f32 1.0, %v9179_v53  ;;  %v9581_v27 = vmul.f32 0.6931472, %v7527_v56  ;;  %vm9583_vm12 = vcmp.lt.f32.partialorder %v765_v14, 0.0004427343 }
 0x187   :  { %v772_v47 = vadd.f32 1.0, %v771_v24  ;;  %v780_v10 = vmul.f32 -0.5, %v9179_v53  ;;  %v783_v21 = vand.u32 2147483647, %v9179_v53  ;;  %v786_v17 = vadd.f32 1.0, %v9199_v52  ;;  %v9608_v14 = vld [vmem:[%s8611_s8 + $0x8] sm:$0xff] }
 0x188   :  { %13097 = vst [vmem:[#allocation131_spill] sm:$0xff] %v9581_v27  ;;  %7536 = vlog2.f32 %v777_v15  ;;  %v789_v0 = vmul.f32 -0.5, %v9199_v52  ;;  %vm9595_vm10 = vcmp.lt.f32.partialorder %v774_v4, 0.0004427343  ;;  %v792_v24 = vand.u32 2147483647, %v9199_v52 }
 0x189   :  { %v781_v22 = vadd.f32 1.0, %v780_v10  ;;  %v7529_v15 = vpop.eup %7528  ;;  %v9601_v56 = vmul.f32 %v9157_v7, %v772_v47  ;;  %7538 = vlog2.f32 %v786_v17  ;;  %v795_v49 = vadd.f32 1.0, %v9213_v48  ;;  %13103 = vst [vmem:[#allocation133_spill] sm:$0xff] %v9608_v14  ;;  %v9621_v47 = vld [vmem:[%s8611_s8 + $0x18] sm:$0xff]  ;;  %v9636_v14 = vld [vmem:[%s8611_s8 + $0x20] sm:$0xff] }
 0x18a   :  { %v790_v60 = vadd.f32 1.0, %v789_v0  ;;  %v9610_v4 = vmul.f32 0.6931472, %v7529_v15  ;;  %vm9615_vm0 = vcmp.lt.f32.partialorder %v783_v21, 0.0004427343  ;;  %v13104_v27 = vmov 0 }
 0x18b   :  { %v9613_v10 = vmul.f32 %v9179_v53, %v781_v22  ;;  %v13105_v27 = vsel %vm9615_vm0, 4294967295, %v13104_v27  ;;  %v798_v7 = vmul.f32 -0.5, %v9213_v48  ;;  %13106 = vst [vmem:[#allocation134_spill] sm:$0xff] %v9621_v47  ;;  %v7531_v17 = vpop.eup %7530  ;;  %vm9626_vm1 = vcmp.lt.f32.partialorder %v792_v24, 0.0004427343  ;;  %13110 = vst [vmem:[#allocation136_spill] sm:$0xff] %v9636_v14 }
 0x18c   :  { %v9624_v0 = vmul.f32 %v9199_v52, %v790_v60  ;;  %v13107_v15 = vmov 0  ;;  %7540 = vlog2.f32 %v795_v49  ;;  %v801_v53 = vand.u32 2147483647, %v9213_v48  ;;  %v9633_v22 = vld [vmem:[%s8611_s8 + $0x10] sm:$0x1]  ;;  %v9651_v14 = vld [vmem:[%s8631_s30 + $0x8] sm:$0xff] }
 0x18d   :  { %v13108_v15 = vsel %vm9626_vm1, 4294967295, %v13107_v15  ;;  %v804_v21 = vadd.f32 1.0, %v9227_v62  ;;  %13109 = vst [vmem:[#allocation135_spill] sm:$0xff] %v9633_v22  ;;  %v7533_v47 = vpop.eup %7532  ;;  %v9644_v49 = vmul.f32 0.6931472, %v7531_v17  ;;  %v799_v60 = vadd.f32 1.0, %v798_v7 }
 0x18e   :  { %v807_v24 = vmul.f32 -0.5, %v9227_v62  ;;  %v9648_v22 = vld [vmem:[%s8611_s8 + $0x28] sm:$0x1]  ;;  %13112 = vst [vmem:[#allocation138_spill] sm:$0xff] %v9651_v14  ;;  %v9660_v17 = vmul.f32 0.6931472, %v7533_v47 }
 0x18f   :  { %13111 = vst [vmem:[#allocation137_spill] sm:$0xff] %v9648_v22  ;;  %vm9662_vm2 = vcmp.lt.f32.partialorder %v801_v53, 0.0004427343  ;;  %v13114_v7 = vmov 0  ;;  %7542 = vlog2.f32 %v804_v21  ;;  %v810_v52 = vand.u32 2147483647, %v9227_v62 }
 0x190   :  { %v13115_v7 = vsel %vm9662_vm2, 4294967295, %v13114_v7  ;;  %v9668_v22 = vld [vmem:[%s8631_s30 + $0x18] sm:$0xff]  ;;  %v9673_v14 = vld [vmem:[%s8631_s30 + $0x20] sm:$0xff]  ;;  %v9678_v47 = vld [vmem:[%s8631_s30 + $0x28] sm:$0xff]  ;;  %v9687_v21 = vmul.f32 %v9213_v48, %v799_v60  ;;  %v13120_v63 = vmax.f32 %v8780_v37, 0.0  ;;  %v7535_v60 = vpop.eup %7534 }
 0x191   :  { %13116 = vst [vmem:[#allocation140_spill] sm:$0xff] %v13115_v7  ;;  %13117 = vst [vmem:[#allocation141_spill] sm:$0xff] %v9668_v22  ;;  %v808_v22 = vadd.f32 1.0, %v807_v24  ;;  %v9702_v3 = vld [vmem:[%s8611_s8 + $0x38] sm:$0xff]  ;;  %v9705_v48 = vld [vmem:[%s8611_s8 + $0x40] sm:$0x1] }
 0x192   :  { %13118 = vst [vmem:[#allocation142_spill] sm:$0xff] %v9673_v14  ;;  %13119 = vst [vmem:[#allocation143_spill] sm:$0xff] %v9678_v47  ;;  %v13121_v14 = vsel %vm9146_vm3, %v8981_v8, %v9266_v44  ;;  %v9699_v47 = vld [vmem:[%s8611_s8 + $0x30] sm:$0xff]  ;;  %v9713_v44 = vld [vmem:[%s8631_s30 + $0x38] sm:$0xff]  ;;  %vm9726_vm1 = vcmp.lt.f32.partialorder %v810_v52, 0.0004427343  ;;  %v13134_v52 = vsel %vm9183_vm5, %v9012_v6, %v9299_v38  ;;  %vm13167_vm5 = vnez %v13016_v40 }
 0x193   :  { %v9696_v7 = vadd.f32 %v13121_v14, %v13120_v63  ;;  %13122 = vst [vmem:[#allocation144_spill] sm:$0xff] %v9699_v47  ;;  %13123 = vst [vmem:[#allocation145_spill] sm:$0xff] %v9702_v3  ;;  %v9708_v24 = vld [vmem:[%s8631_s30 + $0x30] sm:$0x7]  ;;  %vm400_vm3 = vcmp.ne.f32.partialorder %v9713_v44, %v9713_v44  ;;  %v9718_v8 = vld [vmem:[%s8631_s30 + $0x40] sm:$0xff] }
 0x194   :  { %13124 = vst [vmem:[#allocation146_spill] sm:$0xff] %v9705_v48  ;;  %vm399_vm2 = vcmp.ne.f32.partialorder %v9708_v24, %v9708_v24  ;;  %13125 = vst [vmem:[#allocation147_spill] sm:$0xff] %v9713_v44  ;;  %v13129_v14 = vld [vmem:[#allocation24_spill] sm:$0xff]  ;;  %v13131_v48 = vsel %vm9161_vm4, %v8998_v58, %v9293_v51  ;;  %v13132_v3 = vld [vmem:[#allocation25_spill] sm:$0xff]  ;;  %v9772_v6 = vmul.f32 0.6931472, %v7535_v60  ;;  %vm13143_vm4 = vnez %v12995_v18 }
 0x195   :  { %13126 = vst [vmem:[#allocation148_spill] sm:$0xff] %v9718_v8  ;;  %v13130_v53 = vmax.f32 %v13129_v14, 0.0  ;;  %v13133_v8 = vmax.f32 %v13132_v3, 0.0  ;;  %v9749_v14 = vld [vmem:[%s8611_s8 + $0x48] sm:$0xff]  ;;  %13136 = vst [vmem:[#allocation25_spill] sm:$0xff] %v9752_v34  ;;  %v9768_v38 = vld [vmem:[%s8631_s30 + $0x58] sm:$0xff]  ;;  %v9775_v3 = vmul.f32 %v9227_v62, %v808_v22 }
 0x196   :  { %13135 = vst [vmem:[#allocation24_spill] sm:$0xff] %v9749_v14  ;;  %v9755_v58 = vld [vmem:[%s8611_s8 + $0x58] sm:$0x1]  ;;  %v9758_v51 = vld [vmem:[%s8631_s30 + $0x48] sm:$0xff]  ;;  %13140 = vst [vmem:[#allocation152_spill] sm:$0xff] %v9768_v38  ;;  %s10806_s8 = smov 0  }
 0x197   :  { %v9737_v47 = vadd.f32 %v13131_v48, %v13130_v53  ;;  %v9746_v9 = vadd.f32 %v13134_v52, %v13133_v8  ;;  %13137 = vst [vmem:[#allocation149_spill] sm:$0xff] %v9755_v58  ;;  %13138 = vst [vmem:[#allocation150_spill] sm:$0xff] %v9758_v51  ;;  %v13141_v53 = vld [vmem:[#allocation26_spill] sm:$0xff]  ;;  %v13145_v52 = vld [vmem:[#allocation96_spill] sm:$0xff] }
 0x198   :  { %v13142_v48 = vmax.f32 %v13141_v53, 0.0  ;;  %v13144_v8 = vld [vmem:[#allocation54_spill] sm:$0xff]  ;;  %v13147_v14 = vld [vmem:[#allocation27_spill] sm:$0xff]  ;;  %v13149_v51 = vld [vmem:[#allocation56_spill] sm:$0xff] }
 0x199   :  { %v13146_v58 = vsel %vm13143_vm4, %v13144_v8, %v13145_v52  ;;  %v13148_v11 = vmax.f32 %v13147_v14, 0.0  ;;  %v13150_v38 = vld [vmem:[#allocation100_spill] sm:$0xff]  ;;  %v9796_v62 = vld [vmem:[%s8616_s14] sm:$0xff]  ;;  %v9802_v18 = vld [vmem:[%s8616_s14 + $0x10] sm:$0x1]  ;;  %13155 = vst [vmem:[#allocation27_spill] sm:$0xff] %v9810_v28 }
 0x19a   :  { %v9784_v34 = vadd.f32 %v13146_v58, %v13142_v48  ;;  %v13151_v60 = vsel %vm9217_vm7, %v13149_v51, %v13150_v38  ;;  %13152 = vst [vmem:[#allocation26_spill] sm:$0xff] %v9796_v62  ;;  %v9799_v22 = vld [vmem:[%s8616_s14 + $0x8] sm:$0xff]  ;;  %13154 = vst [vmem:[#allocation96_spill] sm:$0xff] %v9802_v18  ;;  %v7537_v58 = vpop.eup %7536  ;;  %v9805_v53 = vld [vmem:[%s8631_s30 + $0x60] sm:$0xff]  ;;  %vm406_vm7 = vcmp.ne.f32.partialorder %v9810_v28, %v9810_v28 }
 0x19b   :  { %v9793_v44 = vadd.f32 %v13151_v60, %v13148_v11  ;;  %13153 = vst [vmem:[#allocation54_spill] sm:$0xff] %v9799_v22  ;;  %vm405_vm4 = vcmp.ne.f32.partialorder %v9805_v53, %v9805_v53  ;;  %v9815_v14 = vld [vmem:[%s8631_s30 + $0x70] sm:$0xff]  ;;  %v9820_v51 = vld [vmem:[%s8631_s30 + $0x78] sm:$0xff]  ;;  %v13158_v11 = vld [vmem:[#allocation28_spill] sm:$0xff]  ;;  %v13160_v48 = vsel %vm9231_vm8, %v9075_v1, %v9360_v20  ;;  %v13164_v22 = vsel %vm9237_vm9, %v9102_v26, %v9388_v35 }
 0x19c   :  { %13156 = vst [vmem:[#allocation56_spill] sm:$0xff] %v9815_v14  ;;  %vm407_vm0 = vcmp.ne.f32.partialorder %v9815_v14, %v9815_v14  ;;  %13157 = vst [vmem:[#allocation100_spill] sm:$0xff] %v9820_v51  ;;  %v13159_v38 = vmax.f32 %v13158_v11, 0.0  ;;  %v13161_v52 = vld [vmem:[#allocation29_spill] sm:$0xff]  ;;  %v13165_v14 = vld [vmem:[#allocation30_spill] sm:$0xff]  ;;  %v13169_v11 = vsel %vm13167_vm5, %v9118_v13, %v13168_v59  ;;  %vm13202_vm5 = vnez %v13050_v55 }
 0x19d   :  { %v13162_v60 = vmax.f32 %v13161_v52, 0.0  ;;  %v13166_v51 = vmax.f32 %v13165_v14, 0.0  ;;  %v13170_v1 = vld [vmem:[#allocation31_spill] sm:$0xff]  ;;  %v9861_v26 = vld [vmem:[%s8616_s14 + $0x18] sm:$0xff]  ;;  %v9867_v40 = vld [vmem:[%s8616_s14 + $0x28] sm:$0x1]  ;;  %v776_v14 = vsel %vm9595_vm10, %v9601_v56, %v9772_v6 }
 0x19e   :  { %v9831_v8 = vadd.f32 %v13160_v48, %v13159_v38  ;;  %v13171_v20 = vmax.f32 %v13170_v1, 0.0  ;;  %v13172_v18 = vld [vmem:[#allocation111_spill] sm:$0xff]  ;;  %13174 = vst [vmem:[#allocation28_spill] sm:$0xff] %v9861_v26  ;;  %13176 = vst [vmem:[#allocation81_spill] sm:$0xff] %v9867_v40  ;;  %v13177_v52 = vld [vmem:[#allocation32_spill] sm:$0xff]  ;;  %v13185_v40 = vsel %vm9303_vm13, %v9243_v57, %v9448_v32 }
 0x19f   :  { %v9840_v62 = vadd.f32 %v13164_v22, %v13162_v60  ;;  %v9849_v28 = vadd.f32 %v13169_v11, %v13166_v51  ;;  %v13173_v38 = vsel %vm9270_vm11, %v9129_v31, %v13172_v18  ;;  %v9864_v35 = vld [vmem:[%s8616_s14 + $0x20] sm:$0xff]  ;;  %v9880_v31 = vld [vmem:[%s8631_s30 + $0x90] sm:$0xff]  ;;  %v9885_v22 = vld [vmem:[%s8631_s30 + $0x98] sm:$0xff]  ;;  %v779_v51 = vmul.f32 0.6931472, %v7537_v58  ;;  %13186 = vst [vmem:[#allocation30_spill] sm:$0xff] %v9912_v42 }
 0x1a0   :  { %v9858_v48 = vadd.f32 %v13173_v38, %v13171_v20  ;;  %13175 = vst [vmem:[#allocation29_spill] sm:$0xff] %v9864_v35  ;;  %v9870_v13 = vld [vmem:[%s8631_s30 + $0x80] sm:$0xff]  ;;  %vm411_vm11 = vcmp.ne.f32.partialorder %v9880_v31, %v9880_v31  ;;  %v13178_v60 = vmax.f32 %v13177_v52, 0.0  ;;  %v13179_v59 = vld [vmem:[#allocation86_spill] sm:$0xff]  ;;  %v13182_v20 = vld [vmem:[#allocation33_spill] sm:$0xff] }
 0x1a1   :  { %vm409_vm8 = vcmp.ne.f32.partialorder %v9870_v13, %v9870_v13  ;;  %vm13180_vm9 = vnez %v13179_v59  ;;  %v13183_v18 = vmax.f32 %v13182_v20, 0.0  ;;  %v9915_v56 = vld [vmem:[%s8616_s14 + $0x38] sm:$0xff]  ;;  %v9918_v6 = vld [vmem:[%s8616_s14 + $0x40] sm:$0x1]  ;;  %v9926_v32 = vld [vmem:[%s8631_s30 + $0xa8] sm:$0xff] }
 0x1a2   :  { %v13181_v11 = vsel %vm13180_vm9, %v9167_v29, %v9439_v61  ;;  %13187 = vst [vmem:[#allocation108_spill] sm:$0xff] %v9915_v56  ;;  %13188 = vst [vmem:[#allocation31_spill] sm:$0xff] %v9918_v6  ;;  %v7539_v29 = vpop.eup %7538  ;;  %v9921_v61 = vld [vmem:[%s8631_s30 + $0xa0] sm:$0x7]  ;;  %vm414_vm13 = vcmp.ne.f32.partialorder %v9926_v32, %v9926_v32  ;;  %v9931_v57 = vld [vmem:[%s8631_s30 + $0xb0] sm:$0xff]  ;;  %v13199_v6 = vsel %vm9330_vm15, %v9314_v46, %v9478_v41  ;;  %vm13215_vm15 = vnez %v13105_v27 }
 0x1a3   :  { %v9900_v1 = vadd.f32 %v13181_v11, %v13178_v60  ;;  %v9909_v35 = vadd.f32 %v13185_v40, %v13183_v18  ;;  %vm413_vm10 = vcmp.ne.f32.partialorder %v9921_v61, %v9921_v61  ;;  %13189 = vst [vmem:[#allocation111_spill] sm:$0xff] %v9926_v32  ;;  %13190 = vst [vmem:[#allocation32_spill] sm:$0xff] %v9931_v57  ;;  %v9936_v58 = vld [vmem:[%s8631_s30 + $0xb8] sm:$0xff]  ;;  %v13197_v18 = vld [vmem:[#allocation35_spill] sm:$0xff] }
 0x1a4   :  { %13191 = vst [vmem:[#allocation86_spill] sm:$0xff] %v9936_v58  ;;  %v13192_v40 = vld [vmem:[#allocation34_spill] sm:$0xff]  ;;  %v13198_v38 = vmax.f32 %v13197_v18, 0.0  ;;  %v13200_v56 = vld [vmem:[#allocation36_spill] sm:$0xff]  ;;  %v13205_v57 = vld [vmem:[#allocation37_spill] sm:$0xff] }
 0x1a5   :  { %v13193_v52 = vmax.f32 %v13192_v40, 0.0  ;;  %v13195_v59 = vld [vmem:[#allocation118_spill] sm:$0xff]  ;;  %v13201_v26 = vmax.f32 %v13200_v56, 0.0  ;;  %v13206_v32 = vmax.f32 %v13205_v57, 0.0  ;;  %v9972_v46 = vld [vmem:[%s8616_s14 + $0x50] sm:$0xff]  ;;  %v9978_v56 = vld [vmem:[%s8631_s30 + $0xc0] sm:$0xff] }
 0x1a6   :  { %v13196_v11 = vsel %vm9309_vm14, %v9281_v5, %v13195_v59  ;;  %v825_v42 = vadd.f32 %v13199_v6, %v13198_v38  ;;  %v13203_v40 = vld [vmem:[#allocation122_spill] sm:$0xff]  ;;  %v9969_v59 = vld [vmem:[%s8616_s14 + $0x48] sm:$0xff]  ;;  %13211 = vst [vmem:[#allocation91_spill] sm:$0xff] %v9972_v46  ;;  %v13222_v38 = vld [vmem:[#allocation39_spill] sm:$0xff]  ;;  %v7541_v46 = vpop.eup %7540 }
 0x1a7   :  { %v824_v20 = vadd.f32 %v13196_v11, %v13193_v52  ;;  %v13204_v58 = vsel %vm13202_vm5, %v9317_v36, %v13203_v40  ;;  %v13207_v5 = vld [vmem:[#allocation106_spill] sm:$0xff]  ;;  %13210 = vst [vmem:[#allocation33_spill] sm:$0xff] %v9969_v59  ;;  %v9983_v36 = vld [vmem:[%s8631_s30 + $0xc8] sm:$0xff]  ;;  %vm13218_vm5 = vnez %v13060_v39  ;;  %v13223_v40 = vmax.f32 %v13222_v38, 0.0 }
 0x1a8   :  { %v826_v60 = vadd.f32 %v13204_v58, %v13201_v26  ;;  %vm13208_vm14 = vnez %v13207_v5  ;;  %v9975_v41 = vld [vmem:[%s8616_s14 + $0x58] sm:$0x1]  ;;  %v788_v26 = vmul.f32 0.6931472, %v7539_v29  ;;  %v13220_v58 = vld [vmem:[#allocation124_spill] sm:$0xff]  ;;  %v13225_v5 = vld [vmem:[#allocation109_spill] sm:$0xff] }
 0x1a9   :  { %v13209_v52 = vsel %vm13208_vm14, %v9335_v16, %v9502_v2  ;;  %13212 = vst [vmem:[#allocation34_spill] sm:$0xff] %v9975_v41  ;;  %v9988_v16 = vld [vmem:[%s8631_s30 + $0xd0] sm:$0xff]  ;;  %v9993_v55 = vld [vmem:[%s8631_s30 + $0xd8] sm:$0x7]  ;;  %v785_v2 = vsel %vm13215_vm15, %v9613_v10, %v779_v51  ;;  %vm13224_vm14 = vnez %v13067_v54  ;;  %v13228_v10 = vld [vmem:[#allocation40_spill] sm:$0xff]  ;;  %vm13230_vm15 = vnez %v13076_v12 }
 0x1aa   :  { %v827_v45 = vadd.f32 %v13209_v52, %v13206_v32  ;;  %13213 = vst [vmem:[#allocation92_spill] sm:$0xff] %v9988_v16  ;;  %13214 = vst [vmem:[#allocation118_spill] sm:$0xff] %v9993_v55  ;;  %vm420_vm9 = vcmp.ne.f32.partialorder %v9993_v55, %v9993_v55  ;;  %v13216_v6 = vld [vmem:[#allocation38_spill] sm:$0xff]  ;;  %v13229_v51 = vmax.f32 %v13228_v10, 0.0  ;;  %v13231_v29 = vld [vmem:[#allocation120_spill] sm:$0xff] }
 0x1ab   :  { %v13217_v32 = vmax.f32 %v13216_v6, 0.0  ;;  %v13219_v57 = vld [vmem:[#allocation102_spill] sm:$0xff]  ;;  %v13232_v6 = vld [vmem:[#allocation128_spill] sm:$0xff]  ;;  %v13234_v55 = vld [vmem:[#allocation41_spill] sm:$0xff] }
 0x1ac   :  { %v13221_v11 = vsel %vm13218_vm5, %v13219_v57, %v13220_v58  ;;  %v13226_v52 = vld [vmem:[#allocation126_spill] sm:$0xff]  ;;  %v13233_v39 = vsel %vm13230_vm15, %v13231_v29, %v13232_v6  ;;  %v13235_v57 = vmax.f32 %v13234_v55, 0.0  ;;  %v13238_v58 = vld [vmem:[#allocation125_spill] sm:$0xff]  ;;  %v13247_v16 = vld [vmem:[#allocation43_spill] sm:$0xff]  ;;  %vm13249_vm15 = vnez %v13092_v33 }
 0x1ad   :  { %v828_v18 = vadd.f32 %v13221_v11, %v13217_v32  ;;  %v13227_v41 = vsel %vm13224_vm14, %v13225_v5, %v13226_v52  ;;  %v830_v59 = vadd.f32 %v13233_v39, %v13229_v51  ;;  %v13236_v32 = vld [vmem:[#allocation123_spill] sm:$0xff]  ;;  %v13239_v11 = vld [vmem:[#allocation129_spill] sm:$0xff]  ;;  %v13241_v5 = vld [vmem:[#allocation42_spill] sm:$0xff]  ;;  %v13248_v29 = vmax.f32 %v13247_v16, 0.0 }
 0x1ae   :  { %v829_v27 = vadd.f32 %v13227_v41, %v13223_v40  ;;  %vm13237_vm5 = vnez %v13236_v32  ;;  %v13242_v41 = vmax.f32 %v13241_v5, 0.0  ;;  %v13243_v40 = vld [vmem:[#allocation127_spill] sm:$0xff]  ;;  %v13250_v55 = vsel %vm13249_vm15, %v9556_v50, %v9610_v4  ;;  %v13270_v30 = vld [vmem:[#allocation140_spill] sm:$0xff] }
 0x1af   :  { %v13240_v54 = vsel %vm13237_vm5, %v13238_v58, %v13239_v11  ;;  %vm13244_vm14 = vnez %v13243_v40  ;;  %v13245_v52 = vld [vmem:[#allocation131_spill] sm:$0xff]  ;;  %v833_v51 = vadd.f32 %v13250_v55, %v13248_v29  ;;  %vm13253_vm5 = vnez %v13108_v15  ;;  %v13254_v58 = vld [vmem:[#allocation44_spill] sm:$0xff]  ;;  %v7543_v15 = vpop.eup %7542 }
 0x1b0   :  { %v831_v38 = vadd.f32 %v13240_v54, %v13235_v57  ;;  %v13246_v12 = vsel %vm13244_vm14, %v9531_v23, %v13245_v52  ;;  %v10043_v6 = vld [vmem:[%s8596_s25] sm:$0xf]  ;;  %v794_v57 = vsel %vm13253_vm5, %v9624_v0, %v788_v26  ;;  %v797_v32 = vmul.f32 0.6931472, %v7541_v46  ;;  %v13258_v54 = vld [vmem:[#allocation45_spill] sm:$0xff]  ;;  %v13263_v46 = vld [vmem:[#allocation46_spill] sm:$0xff] }
 0x1b1   :  { %v832_v10 = vadd.f32 %v13246_v12, %v13242_v41  ;;  %13251 = vst [vmem:[#allocation35_spill] sm:$0xff] %v10043_v6  ;;  %v10046_v39 = vld [vmem:[%s8601_s29] sm:$0xf]  ;;  %v13255_v23 = vmax.f32 %v13254_v58, 0.0  ;;  %v13257_v33 = vsel %vm9568_vm6, %v9575_v19, %v9644_v49  ;;  %v13259_v50 = vmax.f32 %v13258_v54, 0.0  ;;  %v13267_v49 = vld [vmem:[#allocation48_spill] sm:$0xff] }
 0x1b2   :  { %13252 = vst [vmem:[#allocation36_spill] sm:$0xff] %v10046_v39  ;;  %v13260_v4 = vsel %vm9583_vm12, %v9578_v43, %v9660_v17  ;;  %v10066_v41 = vld [vmem:[%s8671_s21] sm:$0xf]  ;;  %v13264_v26 = vmax.f32 %v13263_v46, 0.0  ;;  %v13268_v29 = vmax.f32 %v13267_v49, 0.0  ;;  %vm13269_vm6 = vcmp.ne.f32.partialorder %v8780_v37, %v8780_v37  ;;  %v13280_v54 = vld [vmem:[#allocation142_spill] sm:$0xff] }
 0x1b3   :  { %v834_v16 = vadd.f32 %v13257_v33, %v13255_v23  ;;  %v835_v5 = vadd.f32 %v13260_v4, %v13259_v50  ;;  %13261 = vst [vmem:[#allocation122_spill] sm:$0xff] %v10066_v41  ;;  %v10069_v0 = vld [vmem:[%s8676_s4] sm:$0xf]  ;;  %vm13271_vm12 = vnez %v13270_v30  ;;  %v806_v23 = vmul.f32 0.6931472, %v7543_v15  ;;  %v872_v30 = vld [vmem:[%s8651_s27 + $0x18] sm:$0xff] }
 0x1b4   :  { %13262 = vst [vmem:[#allocation37_spill] sm:$0xff] %v10069_v0  ;;  %v836_v40 = vadd.f32 %v776_v14, %v13264_v26  ;;  %v13265_v52 = vld [vmem:[#allocation47_spill] sm:$0xff]  ;;  %v838_v55 = vadd.f32 %v794_v57, %v13268_v29  ;;  %v803_v17 = vsel %vm13271_vm12, %v9687_v21, %v797_v32  ;;  %v13272_v14 = vld [vmem:[#allocation138_spill] sm:$0xff]  ;;  %v13278_v32 = vld [vmem:[#allocation141_spill] sm:$0xff]  ;;  %s13396_s21 = sld [smem:[#allocation10_spill]]  ;;  %s13407_s25 = sld [smem:[#allocation9_spill]] }
 0x1b5   :  { %v13266_v12 = vmax.f32 %v13265_v52, 0.0  ;;  %v7627_v58 = vld [vmem:[%s8631_s30] sm:$0xff]  ;;  %vm13273_vm14 = vcmp.ne.f32.partialorder %v13272_v14, %v13272_v14  ;;  %vm13279_vm5 = vcmp.ne.f32.partialorder %v13278_v32, %v13278_v32  ;;  %v812_v4 = vsel %vm9726_vm1, %v9775_v3, %v806_v23  ;;  %v13287_v3 = vld [vmem:[#allocation50_spill] sm:$0xff]  ;;  %v870_v29 = vld [vmem:[%s8651_s27 + $0x8] sm:$0xff]  ;;  %s13435_s29 = sld [smem:[#allocation13_spill]] }
 0x1b6   :  { %v841_v43 = vsel %vm13269_vm6, %v7627_v58, %v9696_v7  ;;  %v13274_v57 = vld [vmem:[#allocation139_spill] sm:$0xff]  ;;  %v13276_v7 = vld [vmem:[#allocation49_spill] sm:$0xff]  ;;  %v844_v33 = vsel %vm13279_vm5, %v13278_v32, %v9784_v34  ;;  %vm13281_vm6 = vcmp.ne.f32.partialorder %v13280_v54, %v13280_v54  ;;  %v847_v34 = vsel %vm399_vm2, %v9708_v24, %v9840_v62  ;;  %v13289_v24 = vld [vmem:[#allocation150_spill] sm:$0xff] }
 0x1b7   :  { %v837_v19 = vadd.f32 %v785_v2, %v13266_v12  ;;  %v842_v2 = vsel %vm13273_vm14, %v13272_v14, %v9737_v47  ;;  %vm13275_vm15 = vcmp.ne.f32.partialorder %v13274_v57, %v13274_v57  ;;  %v13277_v11 = vmax.f32 %v13276_v7, 0.0  ;;  %v13282_v50 = vld [vmem:[#allocation143_spill] sm:$0xff]  ;;  %v13293_v12 = vld [vmem:[#allocation152_spill] sm:$0xff]  ;;  %v871_v58 = vld [vmem:[%s8651_s27 + $0x10] sm:$0xff] }
 0x1b8   :  { %v843_v37 = vsel %vm13275_vm15, %v13274_v57, %v9746_v9  ;;  %v845_v47 = vsel %vm13281_vm6, %v13280_v54, %v9793_v44  ;;  %vm13283_vm12 = vcmp.ne.f32.partialorder %v13282_v50, %v13282_v50  ;;  %v13284_v15 = vld [vmem:[#allocation147_spill] sm:$0xff]  ;;  %v13288_v46 = vmax.f32 %v13287_v3, 0.0  ;;  %v13296_v23 = vld [vmem:[#allocation56_spill] sm:$0xff] }
 0x1b9   :  { %v839_v21 = vadd.f32 %v803_v17, %v13277_v11  ;;  %v846_v9 = vsel %vm13283_vm12, %v13282_v50, %v9831_v8  ;;  %v848_v44 = vsel %vm400_vm3, %v13284_v15, %v9849_v28  ;;  %v13285_v8 = vld [vmem:[#allocation148_spill] sm:$0xff]  ;;  %vm13290_vm1 = vcmp.ne.f32.partialorder %v13289_v24, %v13289_v24  ;;  %v13291_v52 = vld [vmem:[#allocation151_spill] sm:$0xff]  ;;  %v883_v15 = vld [vmem:[%s8651_s27 + $0x70] sm:$0xff] }
 0x1ba   :  { %vm13286_vm14 = vcmp.ne.f32.partialorder %v13285_v8, %v13285_v8  ;;  %v840_v26 = vadd.f32 %v812_v4, %v13288_v46  ;;  %v850_v62 = vsel %vm13290_vm1, %v13289_v24, %v9900_v1  ;;  %vm13292_vm2 = vcmp.ne.f32.partialorder %v13291_v52, %v13291_v52  ;;  %v869_v49 = vld [vmem:[%s8651_s27] sm:$0xff]  ;;  %v13297_v14 = vld [vmem:[#allocation100_spill] sm:$0xff]  ;;  %v13310_v46 = vld [vmem:[#allocation118_spill] sm:$0xff] }
 0x1bb   :  { %v849_v63 = vsel %vm13286_vm14, %v13285_v8, %v9858_v48  ;;  %v851_v28 = vsel %vm13292_vm2, %v13291_v52, %v9909_v35  ;;  %vm13294_vm3 = vcmp.ne.f32.partialorder %v13293_v12, %v13293_v12  ;;  %v853_v1 = vsel %vm405_vm4, %v9805_v53, %v825_v42  ;;  %v13295_v17 = vld [vmem:[#allocation27_spill] sm:$0xff]  ;;  %v874_v11 = vld [vmem:[%s8651_s27 + $0x28] sm:$0xff]  ;;  %v875_v53 = vld [vmem:[%s8651_s27 + $0x30] sm:$0x7] }
 0x1bc   :  { %v852_v48 = vsel %vm13294_vm3, %v13293_v12, %v824_v20  ;;  %v854_v35 = vsel %vm406_vm7, %v13295_v17, %v826_v60  ;;  %v855_v20 = vsel %vm407_vm0, %v13296_v23, %v827_v45  ;;  %vm13298_vm15 = vcmp.ne.f32.partialorder %v13297_v14, %v13297_v14  ;;  %v873_v7 = vld [vmem:[%s8651_s27 + $0x20] sm:$0xff]  ;;  %v876_v42 = vld [vmem:[%s8651_s27 + $0x38] sm:$0xff]  ;;  %v878_v50 = vld [vmem:[%s8651_s27 + $0x48] sm:$0xff] }
 0x1bd   :  { %v856_v57 = vsel %vm13298_vm15, %v13297_v14, %v828_v18  ;;  %v857_v60 = vsel %vm409_vm8, %v9870_v13, %v829_v27  ;;  %vm13299_vm0 = vcmp.ne.f32.partialorder %v9875_v25, %v9875_v25  ;;  %v859_v18 = vsel %vm411_vm11, %v9880_v31, %v831_v38  ;;  %v877_v54 = vld [vmem:[%s8651_s27 + $0x40] sm:$0xff]  ;;  %v879_v13 = vld [vmem:[%s8651_s27 + $0x50] sm:$0xff]  ;;  %v880_v27 = vld [vmem:[%s8651_s27 + $0x58] sm:$0xff] }
 0x1be   :  { %v858_v45 = vsel %vm13299_vm0, %v9875_v25, %v830_v59  ;;  %vm13300_vm4 = vcmp.ne.f32.partialorder %v9885_v22, %v9885_v22  ;;  %v861_v25 = vsel %vm413_vm10, %v9921_v61, %v833_v51  ;;  %v13301_v59 = vld [vmem:[#allocation111_spill] sm:$0xff]  ;;  %v882_v51 = vld [vmem:[%s8651_s27 + $0x68] sm:$0x7]  ;;  %v884_v8 = vld [vmem:[%s8651_s27 + $0x78] sm:$0xff]  ;;  %vm13306_vm11 = vcmp.ne.f32.partialorder %v9978_v56, %v9978_v56 }
 0x1bf   :  { %v860_v32 = vsel %vm13300_vm4, %v9885_v22, %v832_v10  ;;  %v862_v31 = vsel %vm414_vm13, %v13301_v59, %v834_v16  ;;  %v13302_v22 = vld [vmem:[#allocation32_spill] sm:$0xff]  ;;  %v13304_v10 = vld [vmem:[#allocation86_spill] sm:$0xff]  ;;  %v881_v61 = vld [vmem:[%s8651_s27 + $0x60] sm:$0xff]  ;;  %v865_v16 = vsel %vm13306_vm11, %v9978_v56, %v837_v19  ;;  %vm13307_vm10 = vcmp.ne.f32.partialorder %v9983_v36, %v9983_v36 }
 0x1c0   :  { %vm13303_vm7 = vcmp.ne.f32.partialorder %v13302_v22, %v13302_v22  ;;  %vm13305_vm8 = vcmp.ne.f32.partialorder %v13304_v10, %v13304_v10  ;;  %v13308_v3 = vld [vmem:[#allocation92_spill] sm:$0xff]  ;;  %v868_v24 = vsel %vm420_vm9, %v13310_v46, %v840_v26  ;;  %v885_v56 = vld [vmem:[%s8651_s27 + $0x80] sm:$0xff]  ;;  %v887_v52 = vld [vmem:[%s8651_s27 + $0x90] sm:$0xff]  ;;  %v10234_v14 = vmul.f32 %v869_v49, %v841_v43 }
 0x1c1   :  { %v863_v38 = vsel %vm13303_vm7, %v13302_v22, %v835_v5  ;;  %v864_v4 = vsel %vm13305_vm8, %v13304_v10, %v836_v40  ;;  %v866_v5 = vsel %vm13307_vm10, %v9983_v36, %v838_v55  ;;  %vm13309_vm13 = vcmp.ne.f32.partialorder %v13308_v3, %v13308_v3  ;;  %v886_v19 = vld [vmem:[%s8651_s27 + $0x88] sm:$0xff]  ;;  %v888_v12 = vld [vmem:[%s8651_s27 + $0x98] sm:$0xff]  ;;  %v889_v17 = vld [vmem:[%s8651_s27 + $0xa0] sm:$0x7] }
 0x1c2   :  { %v867_v40 = vsel %vm13309_vm13, %v13308_v3, %v839_v21  ;;  %v890_v23 = vld [vmem:[%s8651_s27 + $0xa8] sm:$0xff]  ;;  %v891_v36 = vld [vmem:[%s8651_s27 + $0xb0] sm:$0xff]  ;;  %v892_v55 = vld [vmem:[%s8651_s27 + $0xb8] sm:$0xff]  ;;  %13311 = vst [vmem:[#allocation106_spill] sm:$0xff] %v10234_v14  ;;  %v10236_v59 = vmul.f32 %v870_v29, %v842_v2  ;;  %v10238_v21 = vmul.f32 %v871_v58, %v843_v37  ;;  %v10240_v22 = vmul.f32 %v872_v30, %v844_v33 }
 0x1c3   :  { %v893_v26 = vld [vmem:[%s8651_s27 + $0xc0] sm:$0xff]  ;;  %v894_v10 = vld [vmem:[%s8651_s27 + $0xc8] sm:$0xff]  ;;  %v895_v3 = vld [vmem:[%s8651_s27 + $0xd0] sm:$0xff]  ;;  %v10246_v0 = vmul.f32 %v873_v7, %v845_v47  ;;  %v10248_v41 = vmul.f32 %v874_v11, %v846_v9  ;;  %v10250_v43 = vmul.f32 %v875_v53, %v847_v34  ;;  %v10252_v2 = vmul.f32 %v876_v42, %v848_v44 }
 0x1c4   :  { %13313 = vst [vmem:[#allocation38_spill] sm:$0xff] %v10236_v59  ;;  %13314 = vst [vmem:[#allocation102_spill] sm:$0xff] %v10238_v21  ;;  %v896_v46 = vld [vmem:[%s8651_s27 + $0xd8] sm:$0x7]  ;;  %v10254_v37 = vmul.f32 %v877_v54, %v849_v63  ;;  %v10256_v33 = vmul.f32 %v878_v50, %v850_v62  ;;  %v10258_v49 = vmul.f32 %v879_v13, %v851_v28  ;;  %v925_v47 = vld [vmem:[%s13312_s0] sm:$0xff]  ;;  %vm13372_vm9 = vcmask 556032  }
 0x1c5   :  { %13315 = vst [vmem:[#allocation124_spill] sm:$0xff] %v10240_v22  ;;  %13316 = vst [vmem:[#allocation39_spill] sm:$0xff] %v10246_v0  ;;  %v10260_v29 = vmul.f32 %v880_v27, %v852_v48  ;;  %v926_v58 = vld [vmem:[%s13312_s0 + $0x8] sm:$0xff]  ;;  %v927_v9 = vld [vmem:[%s13312_s0 + $0x10] sm:$0xff]  ;;  %v10266_v34 = vmul.f32 %v881_v61, %v853_v1  ;;  %v10268_v7 = vmul.f32 %v882_v51, %v854_v35 }
 0x1c6   :  { %13317 = vst [vmem:[#allocation109_spill] sm:$0xff] %v10248_v41  ;;  %13318 = vst [vmem:[#allocation126_spill] sm:$0xff] %v10250_v43  ;;  %v928_v30 = vld [vmem:[%s13312_s0 + $0x18] sm:$0xff]  ;;  %v10270_v44 = vmul.f32 %v883_v15, %v855_v20  ;;  %v10272_v63 = vmul.f32 %v884_v8, %v856_v57  ;;  %v929_v62 = vld [vmem:[%s13312_s0 + $0x20] sm:$0xff]  ;;  %v10277_v11 = vmul.f32 %v885_v56, %v857_v60 }
 0x1c7   :  { %13319 = vst [vmem:[#allocation40_spill] sm:$0xff] %v10252_v2  ;;  %13320 = vst [vmem:[#allocation120_spill] sm:$0xff] %v10254_v37  ;;  %v930_v28 = vld [vmem:[%s13312_s0 + $0x28] sm:$0xff]  ;;  %v931_v48 = vld [vmem:[%s13312_s0 + $0x30] sm:$0x7]  ;;  %v10279_v53 = vmul.f32 %v886_v19, %v858_v45  ;;  %v10281_v42 = vmul.f32 %v887_v52, %v859_v18  ;;  %v10283_v1 = vmul.f32 %v888_v12, %v860_v32 }
 0x1c8   :  { %13321 = vst [vmem:[#allocation128_spill] sm:$0xff] %v10256_v33  ;;  %13322 = vst [vmem:[#allocation41_spill] sm:$0xff] %v10258_v49  ;;  %v932_v35 = vld [vmem:[%s13312_s0 + $0x38] sm:$0xff]  ;;  %v933_v20 = vld [vmem:[%s13312_s0 + $0x40] sm:$0xff]  ;;  %v10288_v54 = vmul.f32 %v889_v17, %v861_v25  ;;  %v10290_v50 = vmul.f32 %v890_v23, %v862_v31  ;;  %v10292_v60 = vmul.f32 %v891_v36, %v863_v38 }
 0x1c9   :  { %13323 = vst [vmem:[#allocation123_spill] sm:$0xff] %v10260_v29  ;;  %13324 = vst [vmem:[#allocation125_spill] sm:$0xff] %v10266_v34  ;;  %v934_v57 = vld [vmem:[%s13312_s0 + $0x48] sm:$0xff]  ;;  %v10294_v45 = vmul.f32 %v892_v55, %v864_v4  ;;  %v935_v18 = vld [vmem:[%s13312_s0 + $0x50] sm:$0xff]  ;;  %v10299_v27 = vmul.f32 %v893_v26, %v865_v16  ;;  %v10301_v61 = vmul.f32 %v894_v10, %v866_v5 }
 0x1ca   :  { %13325 = vst [vmem:[#allocation129_spill] sm:$0xff] %v10268_v7  ;;  %13326 = vst [vmem:[#allocation42_spill] sm:$0xff] %v10270_v44  ;;  %v936_v13 = vld [vmem:[%s13312_s0 + $0x58] sm:$0xff]  ;;  %v937_v32 = vld [vmem:[%s13312_s0 + $0x60] sm:$0xff]  ;;  %v10303_v51 = vmul.f32 %v895_v3, %v867_v40  ;;  %v10305_v25 = vmul.f32 %v896_v46, %v868_v24  ;;  %v10314_v19 = vmul.f32 %v925_v47, %v10234_v14 }
 0x1cb   :  { %13327 = vst [vmem:[#allocation127_spill] sm:$0xff] %v10272_v63  ;;  %13328 = vst [vmem:[#allocation131_spill] sm:$0xff] %v10277_v11  ;;  %v938_v31 = vld [vmem:[%s13312_s0 + $0x68] sm:$0x7]  ;;  %v939_v15 = vld [vmem:[%s13312_s0 + $0x70] sm:$0xff]  ;;  %v10317_v16 = vmul.f32 %v926_v58, %v10236_v59  ;;  %v10320_v5 = vmul.f32 %v927_v9, %v10238_v21  ;;  %v10323_v40 = vmul.f32 %v928_v30, %v10240_v22 }
 0x1cc   :  { %13329 = vst [vmem:[#allocation43_spill] sm:$0xff] %v10279_v53  ;;  %13330 = vst [vmem:[#allocation44_spill] sm:$0xff] %v10281_v42  ;;  %v940_v38 = vld [vmem:[%s13312_s0 + $0x78] sm:$0xff]  ;;  %v941_v4 = vld [vmem:[%s13312_s0 + $0x80] sm:$0xff]  ;;  %v10329_v17 = vmul.f32 %v929_v62, %v10246_v0  ;;  %v10332_v23 = vmul.f32 %v930_v28, %v10248_v41  ;;  %v10335_v36 = vmul.f32 %v931_v48, %v10250_v43 }
 0x1cd   :  { %13331 = vst [vmem:[#allocation130_spill] sm:$0xff] %v10283_v1  ;;  %13332 = vst [vmem:[#allocation45_spill] sm:$0xff] %v10288_v54  ;;  %v942_v8 = vld [vmem:[%s13312_s0 + $0x88] sm:$0xff]  ;;  %v943_v56 = vld [vmem:[%s13312_s0 + $0x90] sm:$0xff]  ;;  %v10338_v55 = vmul.f32 %v932_v35, %v10252_v2  ;;  %v10344_v46 = vmul.f32 %v933_v20, %v10254_v37  ;;  %v10347_v47 = vmul.f32 %v934_v57, %v10256_v33 }
 0x1ce   :  { %13333 = vst [vmem:[#allocation46_spill] sm:$0xff] %v10290_v50  ;;  %13334 = vst [vmem:[#allocation47_spill] sm:$0xff] %v10292_v60  ;;  %v944_v24 = vld [vmem:[%s13312_s0 + $0x98] sm:$0xff]  ;;  %v945_v52 = vld [vmem:[%s13312_s0 + $0xa0] sm:$0x7]  ;;  %v10350_v58 = vmul.f32 %v935_v18, %v10258_v49  ;;  %v10353_v9 = vmul.f32 %v936_v13, %v10260_v29  ;;  %v10359_v48 = vmul.f32 %v937_v32, %v10266_v34 }
 0x1cf   :  { %13335 = vst [vmem:[#allocation48_spill] sm:$0xff] %v10294_v45  ;;  %13336 = vst [vmem:[#allocation140_spill] sm:$0xff] %v10299_v27  ;;  %v946_v12 = vld [vmem:[%s13312_s0 + $0xa8] sm:$0xff]  ;;  %v947_v26 = vld [vmem:[%s13312_s0 + $0xb0] sm:$0xff]  ;;  %v10362_v35 = vmul.f32 %v938_v31, %v10268_v7  ;;  %v10365_v20 = vmul.f32 %v939_v15, %v10270_v44  ;;  %v10368_v57 = vmul.f32 %v940_v38, %v10272_v63 }
 0x1d0   :  { %13337 = vst [vmem:[#allocation138_spill] sm:$0xff] %v10301_v61  ;;  %13338 = vst [vmem:[#allocation139_spill] sm:$0xff] %v10303_v51  ;;  %v948_v10 = vld [vmem:[%s13312_s0 + $0xb8] sm:$0xff]  ;;  %v949_v3 = vld [vmem:[%s13312_s0 + $0xc0] sm:$0xff]  ;;  %v10371_v18 = vmul.f32 %v941_v4, %v10277_v11  ;;  %v10374_v13 = vmul.f32 %v942_v8, %v10279_v53  ;;  %v10377_v32 = vmul.f32 %v943_v56, %v10281_v42 }
 0x1d1   :  { %13339 = vst [vmem:[#allocation49_spill] sm:$0xff] %v10305_v25  ;;  %13340 = vst [vmem:[#allocation141_spill] sm:$0xff] %v10314_v19  ;;  %v950_v30 = vld [vmem:[%s13312_s0 + $0xc8] sm:$0xff]  ;;  %v951_v62 = vld [vmem:[%s13312_s0 + $0xd0] sm:$0xff]  ;;  %v10380_v31 = vmul.f32 %v944_v24, %v10283_v1  ;;  %v10383_v15 = vmul.f32 %v945_v52, %v10288_v54  ;;  %v10386_v38 = vmul.f32 %v946_v12, %v10290_v50 }
 0x1d2   :  { %13341 = vst [vmem:[#allocation142_spill] sm:$0xff] %v10317_v16  ;;  %13342 = vst [vmem:[#allocation143_spill] sm:$0xff] %v10320_v5  ;;  %v952_v28 = vld [vmem:[%s13312_s0 + $0xd8] sm:$0x7]  ;;  %v10389_v4 = vmul.f32 %v947_v26, %v10292_v60  ;;  %v10392_v8 = vmul.f32 %v948_v10, %v10294_v45  ;;  %v10395_v56 = vmul.f32 %v949_v3, %v10299_v27  ;;  %v10407_v12 = vld [vmem:[%s13353_s5] sm:$0xff] }
 0x1d3   :  { %13343 = vst [vmem:[#allocation147_spill] sm:$0xff] %v10323_v40  ;;  %13344 = vst [vmem:[#allocation148_spill] sm:$0xff] %v10329_v17  ;;  %v10401_v24 = vmul.f32 %v951_v62, %v10303_v51  ;;  %v10404_v52 = vmul.f32 %v952_v28, %v10305_v25  ;;  %v10410_v26 = vld [vmem:[%s13353_s5 + $0x8] sm:$0xff]  ;;  %v10413_v10 = vld [vmem:[%s13353_s5 + $0x10] sm:$0x1]  ;;  %vm1061_vm0 = vcmp.ne.f32.partialorder %v10407_v12, %v10407_v12 }
 0x1d4   :  { %13345 = vst [vmem:[#allocation50_spill] sm:$0xff] %v10332_v23  ;;  %13346 = vst [vmem:[#allocation150_spill] sm:$0xff] %v10335_v36  ;;  %v10416_v3 = vld [vmem:[%s13353_s5 + $0x18] sm:$0xff]  ;;  %v10425_v54 = vld [vmem:[%s13353_s5 + $0x30] sm:$0xff]  ;;  %v1085_v28 = vand.u32 2147483647, %v10407_v12  ;;  %vm1062_vm4 = vcmp.ne.f32.partialorder %v10410_v26, %v10410_v26  ;;  %vm1063_vm7 = vcmp.ne.f32.partialorder %v10413_v10, %v10413_v10 }
 0x1d5   :  { %13347 = vst [vmem:[#allocation151_spill] sm:$0xff] %v10338_v55  ;;  %13348 = vst [vmem:[#allocation152_spill] sm:$0xff] %v10344_v46  ;;  %v10428_v62 = vld [vmem:[%s13353_s5 + $0x38] sm:$0xff]  ;;  %v1087_v25 = vand.u32 2147483647, %v10413_v10  ;;  %v10441_v36 = vld [vmem:[%s13353_s5 + $0x48] sm:$0xff]  ;;  %vm1064_vm8 = vcmp.ne.f32.partialorder %v10416_v3, %v10416_v3 }
 0x1d6   :  { %13349 = vst [vmem:[#allocation27_spill] sm:$0xff] %v10347_v47  ;;  %13350 = vst [vmem:[#allocation56_spill] sm:$0xff] %v10350_v58  ;;  %v10436_v7 = vld [vmem:[%s13353_s5 + $0x40] sm:$0x1]  ;;  %v1091_v43 = vand.u32 2147483647, %v10425_v54 }
 0x1d7   :  { %13351 = vst [vmem:[#allocation100_spill] sm:$0xff] %v10353_v9  ;;  %13352 = vst [vmem:[#allocation111_spill] sm:$0xff] %v10359_v48  ;;  %v1097_v1 = vsub.f32 0.0, %v1085_v28  ;;  %v1099_v48 = vsub.f32 0.0, %v1087_v25  ;;  %v10448_v23 = vld [vmem:[%s13353_s5 + $0x58] sm:$0x1] }
 0x1d8   :  { %13354 = vst [vmem:[#allocation32_spill] sm:$0xff] %v10362_v35  ;;  %13355 = vst [vmem:[#allocation86_spill] sm:$0xff] %v10365_v20  ;;  %v10398_v35 = vmul.f32 %v950_v30, %v10301_v61  ;;  %v10422_v30 = vld [vmem:[%s13353_s5 + $0x28] sm:$0x1]  ;;  %v1092_v61 = vand.u32 2147483647, %v10428_v62 }
 0x1d9   :  { %13356 = vst [vmem:[#allocation92_spill] sm:$0xff] %v10368_v57  ;;  %13357 = vst [vmem:[#allocation118_spill] sm:$0xff] %v10371_v18  ;;  %v1093_v42 = vand.u32 2147483647, %v10436_v7  ;;  %v1094_v27 = vand.u32 2147483647, %v10441_v36  ;;  %vm1066_vm10 = vcmp.ne.f32.partialorder %v10422_v30, %v10422_v30 }
 0x1da   :  { %13358 = vst [vmem:[#allocation153_spill] sm:$0xff] %v10374_v13  ;;  %13359 = vst [vmem:[#allocation154_spill] sm:$0xff] %v10377_v32  ;;  %v1103_v9 = vsub.f32 0.0, %v1091_v43  ;;  %v10454_v0 = vld [vmem:[%s13369_s9] sm:$0xf]  ;;  %v1104_v25 = vsub.f32 0.0, %v1092_v61 }
 0x1db   :  { %13360 = vst [vmem:[#allocation155_spill] sm:$0xff] %v10380_v31  ;;  %13361 = vst [vmem:[#allocation156_spill] sm:$0xff] %v10383_v15  ;;  %v10419_v15 = vld [vmem:[%s13353_s5 + $0x20] sm:$0xff]  ;;  %v10444_v31 = vld [vmem:[%s13353_s5 + $0x50] sm:$0xff]  ;;  %v1109_v17 = vmul.f32 1.442695, %v1097_v1 }
 0x1dc   :  { %13362 = vst [vmem:[#allocation157_spill] sm:$0xff] %v10386_v38  ;;  %13363 = vst [vmem:[#allocation158_spill] sm:$0xff] %v10389_v4  ;;  %v1089_v51 = vand.u32 2147483647, %v10419_v15  ;;  %v1113_v13 = vmul.f32 1.442695, %v1099_v48  ;;  %vm1065_vm11 = vcmp.ne.f32.partialorder %v10419_v15, %v10419_v15 }
 0x1dd   :  { %13364 = vst [vmem:[#allocation159_spill] sm:$0xff] %v10392_v8  ;;  %13365 = vst [vmem:[#allocation160_spill] sm:$0xff] %v10395_v56  ;;  %v1095_v56 = vand.u32 2147483647, %v10444_v31  ;;  %v1105_v28 = vsub.f32 0.0, %v1093_v42  ;;  %7544 = vpow2.f32 %v1109_v17  ;;  %v1106_v45 = vsub.f32 0.0, %v1094_v27 }
 0x1de   :  { %13366 = vst [vmem:[#allocation161_spill] sm:$0xff] %v10398_v35  ;;  %13367 = vst [vmem:[#allocation162_spill] sm:$0xff] %v10401_v24  ;;  %v1088_v24 = vand.u32 2147483647, %v10416_v3  ;;  %v1090_v35 = vand.u32 2147483647, %v10422_v30 }
 0x1df   :  { %13368 = vst [vmem:[#allocation163_spill] sm:$0xff] %v10404_v52  ;;  %v1086_v52 = vand.u32 2147483647, %v10410_v26  ;;  %v1101_v32 = vsub.f32 0.0, %v1089_v51  ;;  %v1107_v49 = vsub.f32 0.0, %v1095_v56 }
 0x1e0   :  { %v1100_v41 = vsub.f32 0.0, %v1088_v24  ;;  %v1102_v29 = vsub.f32 0.0, %v1090_v35  ;;  %v1121_v43 = vmul.f32 1.442695, %v1103_v9  ;;  %v1341_v35 = vand.u32 2147483647, %v10454_v0 }
 0x1e1   :  { %v1098_v34 = vsub.f32 0.0, %v1086_v52  ;;  %v1096_v52 = vand.u32 2147483647, %v10448_v23  ;;  %v1117_v51 = vmul.f32 1.442695, %v1101_v32 }
 0x1e2   :  { %v1115_v24 = vmul.f32 1.442695, %v1100_v41  ;;  %v1119_v8 = vmul.f32 1.442695, %v1102_v29  ;;  %v10459_v48 = vld [vmem:[%s13370_s13] sm:$0xf] }
 0x1e3   :  { %v1111_v53 = vmul.f32 1.442695, %v1098_v34  ;;  %v1108_v1 = vsub.f32 0.0, %v1096_v52  ;;  %v1123_v34 = vmul.f32 1.442695, %v1104_v25  ;;  %v1342_v41 = vsub.f32 0.0, %v1341_v35 }
 0x1e4   :  { %v1125_v61 = vmul.f32 1.442695, %v1105_v28  ;;  %v6658_v42 = vld [vmem:[%s13371_s17] ss:$0 sm:$0xff]  ;;  %v1127_v29 = vmul.f32 1.442695, %v1106_v45 }
 0x1e5   :  { %7546 = vpow2.f32 %v1111_v53  ;;  %v1129_v9 = vmul.f32 1.442695, %v1107_v49  ;;  %v1131_v25 = vmul.f32 1.442695, %v1108_v1 }
 0x1e6   :  { %7548 = vpow2.f32 %v1113_v13  ;;  %v1362_v13 = vand.u32 2147483647, %v10459_v48 }
 0x1e7   :  { %7550 = vpow2.f32 %v1115_v24  ;;  %v7545_v35 = vpop.eup %7544 }
 0x1e8   :  { %7552 = vpow2.f32 %v1117_v51 }
 0x1e9   :  { %7554 = vpow2.f32 %v1119_v8  ;;  %v1343_v8 = vmul.f32 1.442695, %v1342_v41  ;;  %v1136_v41 = vmul.f32 -0.5, %v7545_v35 }
 0x1ea   :  { %7556 = vpow2.f32 %v1121_v43 }
 0x1eb   :  { %7558 = vpow2.f32 %v1123_v34  ;;  %v1363_v34 = vsub.f32 0.0, %v1362_v13 }
 0x1ec   :  { %7560 = vpow2.f32 %v1125_v61  ;;  %v1133_v61 = vadd.f32 1.0, %v7545_v35 }
 0x1ed   :  { %7562 = vpow2.f32 %v1127_v29  ;;  %v10476_v1 = vmul.f32 1.442695, %v1363_v34 }
 0x1ee   :  { %7564 = vpow2.f32 %v1129_v9 }
 0x1ef   :  { %7566 = vpow2.f32 %v1131_v25 }
 0x1f0   :  { %7568 = vpow2.f32 %v1343_v8 }
 0x1f1   :  { %7570 = vlog2.f32 %v1133_v61 }
 0x20e   :  { %v332_v32 = vpop.f32.mrb[0].mxu1 }
 0x20f   :  { %v333_v24 = vadd.f32 %v6658_v42, %v332_v32  ;;  %v7039_v28 = vpop.f32.mrb[1].mxu1  ;;  %v7547_v42 = vpop.eup %7546  ;;  %v1139_v32 = vand.u32 2147483647, %v7545_v35 }
 0x210   :  { %v7549_v28 = vpop.eup %7548  ;;  %v1142_v45 = vadd.f32 1.0, %v7547_v42  ;;  %v1145_v43 = vmul.f32 -0.5, %v7547_v42  ;;  %v1148_v51 = vand.u32 2147483647, %v7547_v42 }
 0x211   :  { %336 = vst.msk [vmem:[#allocation2] sm:$0xff] %vm13372_vm9, %v333_v24  ;;  %v7551_v29 = vpop.eup %7550  ;;  %v1137_v24 = vadd.f32 1.0, %v1136_v41  ;;  %v1151_v52 = vadd.f32 1.0, %v7549_v28  ;;  %v1154_v13 = vmul.f32 -0.5, %v7549_v28  ;;  %vm10478_vm5 = vcmp.lt.f32.partialorder %v1139_v32, 0.0004427343 }
 0x212   :  { %v7553_v56 = vpop.eup %7552  ;;  %7572 = vlog2.f32 %v1142_v45  ;;  %v1146_v9 = vadd.f32 1.0, %v1145_v43  ;;  %v1157_v27 = vand.u32 2147483647, %v7549_v28  ;;  %v1160_v8 = vadd.f32 1.0, %v7551_v29 }
 0x213   :  { %v7555_v25 = vpop.eup %7554  ;;  %7574 = vlog2.f32 %v1151_v52  ;;  %v10482_v58 = vmul.f32 %v7545_v35, %v1137_v24  ;;  %vm10484_vm6 = vcmp.lt.f32.partialorder %v1148_v51, 0.0004427343  ;;  %v1155_v45 = vadd.f32 1.0, %v1154_v13 }
 0x214   :  { %v7557_v17 = vpop.eup %7556  ;;  %v1163_v43 = vmul.f32 -0.5, %v7551_v29  ;;  %v1166_v41 = vand.u32 2147483647, %v7551_v29  ;;  %v10488_v49 = vmul.f32 %v7547_v42, %v1146_v9  ;;  %7576 = vlog2.f32 %v1160_v8 }
 0x215   :  { %v7559_v34 = vpop.eup %7558  ;;  %v1169_v32 = vadd.f32 1.0, %v7553_v56  ;;  %v1172_v22 = vmul.f32 -0.5, %v7553_v56  ;;  %v10492_v52 = vmul.f32 %v7549_v28, %v1155_v45  ;;  %vm10494_vm12 = vcmp.lt.f32.partialorder %v1157_v27, 0.0004427343 }
 0x216   :  { %v10490_v40 = vpop.eup %7560  ;;  %v1164_v51 = vadd.f32 1.0, %v1163_v43  ;;  %v1175_v24 = vand.u32 2147483647, %v7553_v56  ;;  %v1178_v18 = vadd.f32 1.0, %v7555_v25  ;;  %v1181_v42 = vmul.f32 -0.5, %v7555_v25 }
 0x217   :  { %v10498_v11 = vpop.eup %7562  ;;  %7578 = vlog2.f32 %v1169_v32  ;;  %v1173_v13 = vadd.f32 1.0, %v1172_v22  ;;  %vm10504_vm14 = vcmp.lt.f32.partialorder %v1166_v41, 0.0004427343  ;;  %v1184_v27 = vand.u32 2147483647, %v7555_v25 }
 0x218   :  { %v10500_v9 = vpop.eup %7564  ;;  %v10502_v8 = vmul.f32 %v7551_v29, %v1164_v51  ;;  %v1187_v28 = vadd.f32 1.0, %v7557_v17  ;;  %vm10510_vm1 = vcmp.lt.f32.partialorder %v1175_v24, 0.0004427343  ;;  %7580 = vlog2.f32 %v1178_v18 }
 0x219   :  { %v10508_v45 = vpop.eup %7566  ;;  %v1182_v22 = vadd.f32 1.0, %v1181_v42  ;;  %v1190_v32 = vmul.f32 -0.5, %v7557_v17  ;;  %v10516_v50 = vmul.f32 %v7553_v56, %v1173_v13  ;;  %v1193_v29 = vand.u32 2147483647, %v7557_v17 }
 0x21a   :  { %v10514_v4 = vpop.eup %7568  ;;  %7582 = vlog2.f32 %v1187_v28  ;;  %v1196_v41 = vadd.f32 1.0, %v7559_v34  ;;  %vm10518_vm2 = vcmp.lt.f32.partialorder %v1184_v27, 0.0004427343  ;;  %v1199_v24 = vmul.f32 -0.5, %v7559_v34 }
 0x21b   :  { %v7571_v51 = vpop.eup %7570  ;;  %v1191_v33 = vadd.f32 1.0, %v1190_v32  ;;  %v1202_v47 = vand.u32 2147483647, %v7559_v34  ;;  %v10522_v18 = vmul.f32 %v7555_v25, %v1182_v22  ;;  %v1205_v42 = vadd.f32 1.0, %v10490_v40  ;;  %v1265_v25 = vld [vmem:[%s13396_s21] sm:$0xff] }
 0x21c   :  { %v7573_v21 = vpop.eup %7572  ;;  %v1135_v5 = vmul.f32 0.6931472, %v7571_v51  ;;  %7584 = vlog2.f32 %v1196_v41  ;;  %vm10529_vm3 = vcmp.lt.f32.partialorder %v1193_v29, 0.0004427343  ;;  %v1200_v63 = vadd.f32 1.0, %v1199_v24 }
 0x21d   :  { %v7575_v56 = vpop.eup %7574  ;;  %v10525_v13 = vmul.f32 0.6931472, %v7573_v21  ;;  %v10527_v28 = vmul.f32 %v7557_v17, %v1191_v33  ;;  %vm10536_vm15 = vcmp.lt.f32.partialorder %v1202_v47, 0.0004427343  ;;  %7586 = vlog2.f32 %v1205_v42 }
 0x21e   :  { %v1141_v32 = vsel %vm10478_vm5, %v10482_v58, %v1135_v5  ;;  %v1153_v51 = vmul.f32 0.6931472, %v7575_v56  ;;  %v1208_v21 = vmul.f32 -0.5, %v10490_v40  ;;  %v7577_v22 = vpop.eup %7576  ;;  %v1201_v17 = vmul.f32 %v7559_v34, %v1200_v63  ;;  %v1267_v34 = vld [vmem:[%s13396_s21 + $0x10] sm:$0x1] }
 0x21f   :  { %v1150_v33 = vsel %vm10484_vm6, %v10488_v49, %v10525_v13  ;;  %v1211_v5 = vand.u32 2147483647, %v10490_v40  ;;  %v1214_v47 = vadd.f32 1.0, %v10498_v11  ;;  %v1162_v53 = vmul.f32 0.6931472, %v7577_v22 }
 0x220   :  { %v1159_v58 = vsel %vm10494_vm12, %v10492_v52, %v1153_v51  ;;  %v1209_v49 = vadd.f32 1.0, %v1208_v21  ;;  %v1217_v63 = vmul.f32 -0.5, %v10498_v11  ;;  %v1220_v29 = vand.u32 2147483647, %v10498_v11 }
 0x221   :  { %v7579_v61 = vpop.eup %7578  ;;  %vm10563_vm13 = vcmp.lt.f32.partialorder %v1211_v5, 0.0004427343  ;;  %7588 = vlog2.f32 %v1214_v47  ;;  %v1223_v52 = vadd.f32 1.0, %v10500_v9  ;;  %vm1067_vm9 = vcmp.ne.f32.partialorder %v10425_v54, %v10425_v54 }
 0x222   :  { %vm1068_vm5 = vcmp.ne.f32.partialorder %v10428_v62, %v10428_v62  ;;  %v1168_v35 = vsel %vm10504_vm14, %v10502_v8, %v1162_v53  ;;  %v1171_v41 = vmul.f32 0.6931472, %v7579_v61  ;;  %v1210_v24 = vmul.f32 %v10490_v40, %v1209_v49  ;;  %v7581_v56 = vpop.eup %7580 }
 0x223   :  { %v1218_v42 = vadd.f32 1.0, %v1217_v63  ;;  %vm10579_vm12 = vcmp.lt.f32.partialorder %v1220_v29, 0.0004427343  ;;  %7590 = vlog2.f32 %v1223_v52  ;;  %v1226_v51 = vmul.f32 -0.5, %v10500_v9 }
 0x224   :  { %v1229_v21 = vand.u32 2147483647, %v10500_v9  ;;  %v7583_v22 = vpop.eup %7582  ;;  %v1177_v60 = vsel %vm10510_vm1, %v10516_v50, %v1171_v41  ;;  %v1180_v40 = vmul.f32 0.6931472, %v7581_v56  ;;  %v1232_v5 = vadd.f32 1.0, %v10508_v45 }
 0x225   :  { %v1219_v8 = vmul.f32 %v10498_v11, %v1218_v42  ;;  %v1189_v47 = vmul.f32 0.6931472, %v7583_v22  ;;  %v1227_v53 = vadd.f32 1.0, %v1226_v51  ;;  %v1235_v63 = vmul.f32 -0.5, %v10508_v45 }
 0x226   :  { %vm10590_vm14 = vcmp.lt.f32.partialorder %v1229_v21, 0.0004427343  ;;  %v7585_v61 = vpop.eup %7584  ;;  %vm1070_vm6 = vcmp.ne.f32.partialorder %v10441_v36, %v10441_v36  ;;  %v1186_v50 = vsel %vm10518_vm2, %v10522_v18, %v1180_v40  ;;  %7592 = vlog2.f32 %v1232_v5 }
 0x227   :  { %v1238_v11 = vand.u32 2147483647, %v10508_v45  ;;  %v13395_v43 = vmax.f32 %v10407_v12, 0.0  ;;  %v1195_v52 = vsel %vm10529_vm3, %v10527_v28, %v1189_v47  ;;  %v1198_v41 = vmul.f32 0.6931472, %v7585_v61  ;;  %v7587_v51 = vpop.eup %7586 }
 0x228   :  { %v1228_v42 = vmul.f32 %v10500_v9, %v1227_v53  ;;  %v1236_v56 = vadd.f32 1.0, %v1235_v63  ;;  %vm1071_vm1 = vcmp.ne.f32.partialorder %v10444_v31, %v10444_v31  ;;  %v13399_v18 = vmax.f32 %v10410_v26, 0.0 }
 0x229   :  { %v1241_v29 = vadd.f32 %v1141_v32, %v13395_v43  ;;  %vm10609_vm2 = vcmp.lt.f32.partialorder %v1238_v11, 0.0004427343  ;;  %v13400_v27 = vmax.f32 %v10413_v10, 0.0  ;;  %v13401_v21 = vmax.f32 %v10416_v3, 0.0 }
 0x22a   :  { %v1242_v32 = vadd.f32 %v1150_v33, %v13399_v18  ;;  %v1204_v22 = vsel %vm10536_vm15, %v1201_v17, %v1198_v41  ;;  %v1207_v40 = vmul.f32 0.6931472, %v7587_v51  ;;  %v10622_v5 = vmul.f32 %v10508_v45, %v1236_v56  ;;  %v1266_v17 = vld [vmem:[%s13396_s21 + $0x8] sm:$0xff]  ;;  %v1268_v56 = vld [vmem:[%s13396_s21 + $0x18] sm:$0xff]  ;;  %v1269_v51 = vld [vmem:[%s13396_s21 + $0x20] sm:$0xff] }
 0x22b   :  { %v1243_v28 = vadd.f32 %v1159_v58, %v13400_v27  ;;  %v1244_v9 = vadd.f32 %v1168_v35, %v13401_v21  ;;  %v13402_v47 = vmax.f32 %v10419_v15, 0.0  ;;  %v13403_v63 = vmax.f32 %v10422_v30, 0.0  ;;  %v1271_v27 = vld [vmem:[%s13396_s21 + $0x30] sm:$0xff] }
 0x22c   :  { %v13404_v61 = vmax.f32 %v10425_v54, 0.0  ;;  %v13405_v11 = vmax.f32 %v10428_v62, 0.0  ;;  %v1253_v45 = vsel %vm1061_vm0, %v10407_v12, %v1241_v29  ;;  %vm1072_vm3 = vcmp.ne.f32.partialorder %v10448_v23, %v10448_v23 }
 0x22d   :  { %v1245_v53 = vadd.f32 %v1177_v60, %v13402_v47  ;;  %v1246_v33 = vadd.f32 %v1186_v50, %v13403_v63  ;;  %v7589_v60 = vpop.eup %7588  ;;  %v1213_v50 = vsel %vm10563_vm13, %v1210_v24, %v1207_v40  ;;  %v1254_v43 = vsel %vm1062_vm4, %v10410_v26, %v1242_v32 }
 0x22e   :  { %v1247_v58 = vadd.f32 %v1195_v52, %v13404_v61  ;;  %v1248_v35 = vadd.f32 %v1204_v22, %v13405_v11  ;;  %v1255_v12 = vsel %vm1063_vm7, %v10413_v10, %v1243_v28  ;;  %v1256_v29 = vsel %vm1064_vm8, %v10416_v3, %v1244_v9  ;;  %v1270_v3 = vld [vmem:[%s13396_s21 + $0x28] sm:$0x1]  ;;  %v7591_v18 = vpop.eup %7590  ;;  %v1272_v28 = vld [vmem:[%s13396_s21 + $0x38] sm:$0xff] }
 0x22f   :  { %v1216_v52 = vmul.f32 0.6931472, %v7589_v60  ;;  %v13406_v24 = vmax.f32 %v10436_v7, 0.0  ;;  %v1257_v26 = vsel %vm1065_vm11, %v10419_v15, %v1245_v53  ;;  %v1258_v10 = vsel %vm1066_vm10, %v10422_v30, %v1246_v33  ;;  %v1273_v30 = vld [vmem:[%s13396_s21 + $0x40] sm:$0x1]  ;;  %v1292_v11 = vld [vmem:[%s13407_s25 + $0x18] sm:$0xff] }
 0x230   :  { %v1259_v32 = vsel %vm1067_vm9, %v10425_v54, %v1247_v58  ;;  %v1260_v15 = vsel %vm1068_vm5, %v10428_v62, %v1248_v35  ;;  %v10679_v21 = vmul.f32 %v1265_v25, %v1253_v45  ;;  %v10681_v9 = vmul.f32 %v1266_v17, %v1254_v43  ;;  %v1274_v62 = vld [vmem:[%s13396_s21 + $0x48] sm:$0xff]  ;;  %v1289_v53 = vld [vmem:[%s13407_s25] sm:$0xff]  ;;  %v7593_v35 = vpop.eup %7592 }
 0x231   :  { %v1249_v41 = vadd.f32 %v1213_v50, %v13406_v24  ;;  %v1222_v22 = vsel %vm10579_vm12, %v1219_v8, %v1216_v52  ;;  %v1225_v40 = vmul.f32 0.6931472, %v7591_v18  ;;  %vm13410_vm15 = vcmp.ne.f32.partialorder %v10436_v7, %v10436_v7  ;;  %v1290_v58 = vld [vmem:[%s13407_s25 + $0x8] sm:$0xff]  ;;  %v1293_v50 = vld [vmem:[%s13407_s25 + $0x20] sm:$0xff]  ;;  %v1275_v52 = vld [vmem:[%s13396_s21 + $0x50] sm:$0xff] }
 0x232   :  { %13408 = vst [vmem:[#allocation164_spill] sm:$0xff] %v10679_v21  ;;  %13409 = vst [vmem:[#allocation165_spill] sm:$0xff] %v10681_v9  ;;  %v10690_v47 = vmul.f32 %v1267_v34, %v1255_v12  ;;  %v13412_v63 = vmax.f32 %v10441_v36, 0.0  ;;  %v10695_v61 = vmul.f32 %v1268_v56, %v1256_v29  ;;  %v10697_v13 = vmul.f32 %v1269_v51, %v1257_v26  ;;  %v1294_v43 = vld [vmem:[%s13407_s25 + $0x28] sm:$0x1]  ;;  %v1296_v24 = vld [vmem:[%s13407_s25 + $0x38] sm:$0xff] }
 0x233   :  { %v1261_v54 = vsel %vm13410_vm15, %v10436_v7, %v1249_v41  ;;  %v10699_v8 = vmul.f32 %v1270_v3, %v1258_v10  ;;  %v1291_v7 = vld [vmem:[%s13407_s25 + $0x10] sm:$0x1]  ;;  %v1231_v45 = vsel %vm10590_vm14, %v1228_v42, %v1225_v40  ;;  %v10706_v25 = vmul.f32 %v1271_v27, %v1259_v32  ;;  %v1297_v10 = vld [vmem:[%s13407_s25 + $0x40] sm:$0x1]  ;;  %v1298_v56 = vld [vmem:[%s13407_s25 + $0x48] sm:$0xff] }
 0x234   :  { %13411 = vst [vmem:[#allocation166_spill] sm:$0xff] %v10690_v47  ;;  %v1250_v33 = vadd.f32 %v1222_v22, %v13412_v63  ;;  %13413 = vst [vmem:[#allocation167_spill] sm:$0xff] %v10695_v61  ;;  %v10708_v17 = vmul.f32 %v1272_v28, %v1260_v15  ;;  %v10710_v60 = vmul.f32 %v1273_v30, %v1261_v54  ;;  %v1234_v12 = vmul.f32 0.6931472, %v7593_v35  ;;  %v1295_v42 = vld [vmem:[%s13407_s25 + $0x30] sm:$0xff] }
 0x235   :  { %13414 = vst [vmem:[#allocation168_spill] sm:$0xff] %v10697_v13  ;;  %13415 = vst [vmem:[#allocation169_spill] sm:$0xff] %v10699_v8  ;;  %v13419_v29 = vmax.f32 %v10444_v31, 0.0  ;;  %v10724_v41 = vmul.f32 %v1289_v53, %v10679_v21  ;;  %v10731_v51 = vmul.f32 %v1290_v58, %v10681_v9  ;;  %v10734_v3 = vmul.f32 %v1291_v7, %v10690_v47  ;;  %v1299_v15 = vld [vmem:[%s13407_s25 + $0x50] sm:$0xff]  ;;  %v1276_v40 = vld [vmem:[%s13396_s21 + $0x58] sm:$0x1] }
 0x236   :  { %13416 = vst [vmem:[#allocation170_spill] sm:$0xff] %v10706_v25  ;;  %13417 = vst [vmem:[#allocation171_spill] sm:$0xff] %v10708_v17  ;;  %v1262_v49 = vsel %vm1070_vm6, %v10441_v36, %v1250_v33  ;;  %v10737_v36 = vmul.f32 %v1292_v11, %v10695_v61  ;;  %v1240_v18 = vsel %vm10609_vm2, %v10622_v5, %v1234_v12  ;;  %v13427_v30 = vmax.f32 %v10448_v23, 0.0  ;;  %v1300_v33 = vld [vmem:[%s13407_s25 + $0x58] sm:$0x1] }
 0x237   :  { %13418 = vst [vmem:[#allocation172_spill] sm:$0xff] %v10710_v60  ;;  %v1251_v34 = vadd.f32 %v1231_v45, %v13419_v29  ;;  %13420 = vst [vmem:[#allocation173_spill] sm:$0xff] %v10724_v41  ;;  %v10726_v26 = vmul.f32 %v1274_v62, %v1262_v49  ;;  %v10748_v27 = vmul.f32 %v1293_v50, %v10697_v13  ;;  %v1345_v53 = vadd.f32 1.0, %v10514_v4 }
 0x238   :  { %13422 = vst [vmem:[#allocation175_spill] sm:$0xff] %v10731_v51  ;;  %13423 = vst [vmem:[#allocation176_spill] sm:$0xff] %v10734_v3  ;;  %v10751_v28 = vmul.f32 %v1294_v43, %v10699_v8  ;;  %v1252_v22 = vadd.f32 %v1240_v18, %v13427_v30  ;;  %v10759_v38 = vmul.f32 %v1295_v42, %v10706_v25  ;;  %7594 = vpow2.f32 %v10476_v1 }
 0x239   :  { %13421 = vst [vmem:[#allocation174_spill] sm:$0xff] %v10726_v26  ;;  %13424 = vst [vmem:[#allocation177_spill] sm:$0xff] %v10737_v36  ;;  %v1263_v32 = vsel %vm1071_vm1, %v10444_v31, %v1251_v34  ;;  %v10762_v5 = vmul.f32 %v1296_v24, %v10708_v17  ;;  %v10765_v31 = vmul.f32 %v1297_v10, %v10710_v60  ;;  %7596 = vlog2.f32 %v1345_v53  ;;  %v1356_v24 = vld [vmem:[%s13435_s29] sm:$0xf] }
 0x23a   :  { %13425 = vst [vmem:[#allocation178_spill] sm:$0xff] %v10748_v27  ;;  %13426 = vst [vmem:[#allocation179_spill] sm:$0xff] %v10751_v28  ;;  %v10756_v54 = vmul.f32 %v1275_v52, %v1263_v32  ;;  %v10768_v62 = vmul.f32 %v1298_v56, %v10726_v26  ;;  %v1264_v63 = vsel %vm1072_vm3, %v10448_v23, %v1252_v22  ;;  %v1348_v11 = vmul.f32 -0.5, %v10514_v4 }
 0x23b   :  { %13429 = vst [vmem:[#allocation181_spill] sm:$0xff] %v10759_v38  ;;  %13430 = vst [vmem:[#allocation182_spill] sm:$0xff] %v10762_v5  ;;  %v10780_v7 = vmul.f32 %v1276_v40, %v1264_v63  ;;  %v1351_v50 = vand.u32 2147483647, %v10514_v4  ;;  %v1338_v29 = vmax.f32 %v10454_v0, 0.0  ;;  %vm1339_vm4 = vcmp.ne.f32.partialorder %v10454_v0, %v10454_v0 }
 0x23c   :  { %13428 = vst [vmem:[#allocation180_spill] sm:$0xff] %v10756_v54  ;;  %13431 = vst [vmem:[#allocation183_spill] sm:$0xff] %v10765_v31  ;;  %v10777_v58 = vmul.f32 %v1299_v15, %v10756_v54  ;;  %v1349_v45 = vadd.f32 1.0, %v1348_v11  ;;  %v1359_v30 = vmax.f32 %v10459_v48, 0.0  ;;  %vm1360_vm8 = vcmp.ne.f32.partialorder %v10459_v48, %v10459_v48 }
 0x23d   :  { %13432 = vst [vmem:[#allocation184_spill] sm:$0xff] %v10768_v62  ;;  %13434 = vst [vmem:[#allocation186_spill] sm:$0xff] %v10780_v7  ;;  %v10784_v35 = vmul.f32 %v1300_v33, %v10780_v7  ;;  %vm1352_vm0 = vcmp.lt.f32.partialorder %v1351_v50, 0.0004427343  ;;  %v10804_v11 = vmov 0.0  }
 0x23e   :  { %13433 = vst [vmem:[#allocation185_spill] sm:$0xff] %v10777_v58  ;;  %v1350_v23 = vmul.f32 %v10514_v4, %v1349_v45 }
 0x23f   :  { %13436 = vst [vmem:[#allocation187_spill] sm:$0xff] %v10784_v35 }
 0x242   :  { %v7595_v43 = vpop.eup %7594 }
 0x243   :  { %v7597_v12 = vpop.eup %7596  ;;  %v1366_v1 = vadd.f32 1.0, %v7595_v43  ;;  %v1369_v52 = vmul.f32 -0.5, %v7595_v43  ;;  %v1372_v4 = vand.u32 2147483647, %v7595_v43 }
 0x244   :  { %v1347_v34 = vmul.f32 0.6931472, %v7597_v12 }
 0x245   :  { %7598 = vlog2.f32 %v1366_v1  ;;  %v1370_v18 = vadd.f32 1.0, %v1369_v52  ;;  %vm1373_vm7 = vcmp.lt.f32.partialorder %v1372_v4, 0.0004427343 }
 0x246   :  { %v1353_v49 = vsel %vm1352_vm0, %v1350_v23, %v1347_v34 }
 0x247   :  { %v1354_v42 = vadd.f32 %v1353_v49, %v1338_v29  ;;  %v1371_v32 = vmul.f32 %v7595_v43, %v1370_v18 }
 0x249   :  { %v1355_v10 = vsel %vm1339_vm4, %v10454_v0, %v1354_v42 }
 0x24a   :  { %v10793_v56 = vmul.f32 %v1356_v24, %v1355_v10 }
 0x24c   :  { %13437 = vst [vmem:[#allocation188_spill] sm:$0xff] %v10793_v56 }
 0x24f   :  { %v7599_v15 = vpop.eup %7598 }
 0x250   :  { %v1368_v22 = vmul.f32 0.6931472, %v7599_v15 }
 0x252   :  { %v1374_v40 = vsel %vm1373_vm7, %v1371_v32, %v1368_v22 }
 0x253   :  { %v1375_v53 = vadd.f32 %v1374_v40, %v1359_v30 }
 0x255   :  { %v1376_v63 = vsel %vm1360_vm8, %v10459_v48, %v1375_v53 }
 0x256   :  { %v10799_v33 = vmul.f32 6.0, %v1376_v63 }
 0x258   :  { %13438 = vst [vmem:[#allocation189_spill] sm:$0xff] %v10799_v33  ;;  %v10802_v0 = vadd.f32 %v10799_v33, %v1355_v10 }
 0x25a   :  { %13439 = vst [vmem:[#allocation190_spill] sm:$0xff] %v10802_v0 }
 0x25b LB: > { %13440 = vst [vmem:[#allocation191_spill] sm:$0xff] %v8511_v11  ;;  %v1415_v48 = vlaneseq  ;;  %p1390_p0 = scmp.lt.s32.totalorder %s8515_s8, 7  ;;  %s8554_s6 = smov 111   ;;  %vm1407_vm11 = vcmask 1040384   ;;  %vm1409_vm10 = vcmask 1041408   ;;  %vm1411_vm13 = vcmask 1042432   ;;  %s8515_s8 = sphi %s10806_s8, %s1388_s8   ;;  %v8511_v11 = vphi %v10804_v11, %v5190_v11  }
 0x25c   : > { %s8555_s12 = smov 94   ;;  %s8556_s27 = smov 77   ;;  %v13445_v6 = vld [vmem:[#allocation35_spill] sm:$0xff]  ;;  %v13446_v39 = vld [vmem:[#allocation36_spill] sm:$0xff]  ;;  %vm1583_vm9 = vcmask 416768   ;;  %v13476_v16 = vld [vmem:[#allocation142_spill] sm:$0xff] }
 0x25d   : > { %v1416_v45 = vshrl.u32 %v1415_v48, 7  ;;  %s1391_s14 = scalar_select %p1390_p0, %s8515_s8, 7  ;;  %v13479_v59 = vld [vmem:[#allocation38_spill] sm:$0xff]  ;;  %v13481_v19 = vld [vmem:[#allocation141_spill] sm:$0xff]  ;;  %v13489_v55 = vld [vmem:[#allocation151_spill] sm:$0xff]  ;;  %vm2074_vm5 = vcmask 411648  }
 0x25e   : > { %v13484_v14 = vld [vmem:[#allocation106_spill] sm:$0xff]  ;;  %v13491_v2 = vld [vmem:[#allocation40_spill] sm:$0xff]  ;;  %v13584_v9 = vld [vmem:[#allocation165_spill] sm:$0xff]  ;;  %vm1587_vm6 = vcmask 409600   ;;  %vm2144_vm12 = vcmask 1041409   ;;  %vm2146_vm14 = vcmask 1042434  }
 0x25f   : > { %v10815_v50 = vsub.s32 0, %v1416_v45  ;;  %v10818_v43 = vsub.s32 1, %v1416_v45  ;;  %s1392_s30 = scalar_lea.vmem [#allocation2], %s1391_s14  ;;  %v10824_v52 = vsub.s32 2, %v1416_v45  ;;  %v10828_v24 = vsub.s32 3, %v1416_v45  ;;  %v13492_v46 = vld [vmem:[#allocation152_spill] sm:$0xff] }
 0x260   : > { %v1393_v12 = vld [vmem:[%s1392_s30] sm:$0x1]  ;;  %v13495_v37 = vld [vmem:[#allocation120_spill] sm:$0xff]  ;;  %v13496_v20 = vld [vmem:[#allocation86_spill] sm:$0xff]  ;;  %vm2148_vm1 = vcmask 1043459   ;;  %vm5194_vm2 = vcmask 131072  }
 0x261   : > { %13441 = vst [vmem:[#allocation192_spill] sm:$0xff] %v10815_v50  ;;  %13442 = vst [vmem:[#allocation193_spill] sm:$0xff] %v10818_v43  ;;  %v1688_v23 = vrot.slane %v8511_v11, %v10815_v50  ;;  %v1395_v29 = vrot.slane %v1393_v12, 7  ;;  %v1719_v1 = vrot.slane %v8511_v11, %v10818_v43  ;;  %v1399_v34 = vrot.slane %v1393_v12, 6  ;;  %v13497_v57 = vld [vmem:[#allocation92_spill] sm:$0xff]  ;;  %v13498_v44 = vld [vmem:[#allocation42_spill] sm:$0xff] }
 0x262   : > { %v1403_v49 = vrot.slane %v1393_v12, 5  ;;  %13443 = vst [vmem:[#allocation194_spill] sm:$0xff] %v10824_v52  ;;  %v1750_v42 = vrot.slane %v8511_v11, %v10824_v52  ;;  %13444 = vst [vmem:[#allocation195_spill] sm:$0xff] %v10828_v24  ;;  %v1781_v10 = vrot.slane %v8511_v11, %v10828_v24  ;;  %v13460_v11 = vld [vmem:[#allocation84_spill] sm:$0xff]  ;;  %v13585_v61 = vld [vmem:[#allocation167_spill] sm:$0xff]  ;;  %vm5198_vm3 = vcmask 132097  }
 0x263   : > { %1694 = vbcast.lane.b32.xlu0 %v1688_v23, 264  ;;  %1690 = vbcast.lane.b32.xlu1 %v1688_v23, 256  ;;  %v13583_v21 = vld [vmem:[#allocation164_spill] sm:$0xff]  ;;  %v13587_v41 = vld [vmem:[#allocation173_spill] sm:$0xff]  ;;  %v13588_v51 = vld [vmem:[#allocation175_spill] sm:$0xff]  ;;  %vm5202_vm15 = vcmask 133122  }
 0x264   : > { %v13586_v13 = vld [vmem:[#allocation168_spill] sm:$0xff]  ;;  %v13589_v36 = vld [vmem:[#allocation177_spill] sm:$0xff]  ;;  %v13590_v27 = vld [vmem:[#allocation178_spill] sm:$0xff]  ;;  %vm5206_vm0 = vcmask 134147   ;;  %s5193_s4 = scalar_lea.vmem [#allocation3], %s8515_s8  ;;  %s1388_s8 = sadd.s32 1, %s8515_s8  }
 0x265   : > { %v13591_v47 = vld [vmem:[#allocation166_spill] sm:$0xff]  ;;  %v13592_v3 = vld [vmem:[#allocation176_spill] sm:$0xff]  ;;  %v13594_v28 = vld [vmem:[#allocation179_spill] sm:$0xff]  ;;  %p1385_p1 = scmp.ge.s32.totalorder %s1388_s8, 12  }
 0x266   : > { %v13593_v5 = vld [vmem:[#allocation182_spill] sm:$0xff]  ;;  %v13595_v8 = vld [vmem:[#allocation169_spill] sm:$0xff]  ;;  %v13596_v62 = vld [vmem:[#allocation184_spill] sm:$0xff]  ;;  %s14113_s15 = sld [smem:[#allocation15_spill]] (%p1385_p1)  ;;  %vm5224_vm4 = vcmask (%p1385_p1), 138240   ;;  %s14114_s16 = sld [smem:[#allocation17_spill]] (%p1385_p1) }
 0x267   : > { %1396 = vrot.lane.b32.xlu0 %v1395_v29, %s8554_s6  ;;  %1721 = vbcast.lane.b32.xlu1 %v1719_v1, 256  ;;  %v13597_v26 = vld [vmem:[#allocation174_spill] sm:$0xff]  ;;  %v13598_v17 = vld [vmem:[#allocation171_spill] sm:$0xff]  ;;  %v13599_v38 = vld [vmem:[#allocation181_spill] sm:$0xff]  ;;  %s14115_s18 = sld [smem:[#allocation16_spill]] (%p1385_p1)  ;;  %s14116_s22 = sld [smem:[#allocation19_spill]] (%p1385_p1) }
 0x268   : > { %v13600_v25 = vld [vmem:[#allocation170_spill] sm:$0xff]  ;;  %v13601_v58 = vld [vmem:[#allocation185_spill] sm:$0xff]  ;;  %v13602_v54 = vld [vmem:[#allocation180_spill] sm:$0xff]  ;;  %s14117_s23 = sld [smem:[#allocation18_spill]] (%p1385_p1)  ;;  %vm8557_vm7 = vmmov (%p1385_p1), 1   ;;  %s14120_s26 = sld [smem:[#allocation21_spill]] (%p1385_p1) }
 0x269   : > { %v13603_v35 = vld [vmem:[#allocation187_spill] sm:$0xff]  ;;  %v13604_v7 = vld [vmem:[#allocation186_spill] sm:$0xff]  ;;  %vm12313_vm8 = vmpackc.low (%p1385_p1), %vm1409_vm10, %vm8557_vm7  ;;  %s14121_s28 = sld [smem:[#allocation20_spill]] (%p1385_p1)  ;;  %s8558_s1 = smov (%p1385_p1), 68  }
 0x26a   : > { %v13605_v31 = vld [vmem:[#allocation183_spill] sm:$0xff]  ;;  %s8559_s2 = smov (%p1385_p1), 76   ;;  %s8560_s7 = smov (%p1385_p1), 8  }
 0x26b   : > { %1400 = vrot.lane.b32.xlu0 %v1399_v34, %s8555_s12  ;;  %1404 = vrot.lane.b32.xlu1 %v1403_v49, %s8556_s27  ;;  %v13447_v49 = vld [vmem:[#allocation52_spill] sm:$0xff]  ;;  %s14124_s10 = sld [smem:[#allocation23_spill]] (%p1385_p1)  ;;  %s14129_s11 = sld [smem:[#allocation22_spill]] (%p1385_p1) }
 0x26f   : > { %1725 = vbcast.lane.b32.xlu0 %v1719_v1, 264  ;;  %1752 = vbcast.lane.b32.xlu1 %v1750_v42, 256 }
 0x273   : > { %1756 = vbcast.lane.b32.xlu0 %v1750_v42, 264  ;;  %1698 = vbcast.lane.b32.xlu1 %v1688_v23, 272 }
 0x277   : > { %1729 = vbcast.lane.b32.xlu0 %v1719_v1, 272  ;;  %1783 = vbcast.lane.b32.xlu1 %v1781_v10, 256 }
 0x27b   : > { %1787 = vbcast.lane.b32.xlu0 %v1781_v10, 264  ;;  %1760 = vbcast.lane.b32.xlu1 %v1750_v42, 272 }
 0x27f   : > { %1702 = vbcast.lane.b32.xlu0 %v1688_v23, 280  ;;  %1733 = vbcast.lane.b32.xlu1 %v1719_v1, 280 }
 0x283   : > { %1791 = vbcast.lane.b32.xlu0 %v1781_v10, 272  ;;  %1764 = vbcast.lane.b32.xlu1 %v1750_v42, 280 }
 0x287   : > { %1706 = vbcast.lane.b32.xlu0 %v1688_v23, 288  ;;  %1737 = vbcast.lane.b32.xlu1 %v1719_v1, 288 }
 0x28b   : > { %1795 = vbcast.lane.b32.xlu0 %v1781_v10, 280  ;;  %1768 = vbcast.lane.b32.xlu1 %v1750_v42, 288 }
 0x28f   : > { %1710 = vbcast.lane.b32.xlu0 %v1688_v23, 296  ;;  %1741 = vbcast.lane.b32.xlu1 %v1719_v1, 296 }
 0x293   : > { %1799 = vbcast.lane.b32.xlu0 %v1781_v10, 288  ;;  %1772 = vbcast.lane.b32.xlu1 %v1750_v42, 296 }
 0x297   : > { %1714 = vbcast.lane.b32.xlu0 %v1688_v23, 304  ;;  %1745 = vbcast.lane.b32.xlu1 %v1719_v1, 304 }
 0x29b   : > { %1803 = vbcast.lane.b32.xlu0 %v1781_v10, 296  ;;  %1776 = vbcast.lane.b32.xlu1 %v1750_v42, 304 }
 0x29f   : > { %1807 = vbcast.lane.b32.xlu0 %v1781_v10, 304 }
 0x2d5   : > { %v1695_v18 = vpop.permute.xlu0 %1694  ;;  %v1691_v4 = vpop.permute.xlu1 %1690 }
 0x2d6   : > { %v1810_v42 = vsub.f32 %v1695_v18, %v13447_v49  ;;  %v13454_v49 = vld [vmem:[#allocation67_spill] sm:$0xff] }
 0x2d9   : > { %v1397_v32 = vpop.permute.xlu0 %1396  ;;  %v1722_v15 = vpop.permute.xlu1 %1721 }
 0x2da   : > { %v1408_v30 = vsel %vm1407_vm11, %v1393_v12, %v1397_v32  ;;  %v13448_v32 = vld [vmem:[#allocation51_spill] sm:$0xff] }
 0x2dd   : > { %v1401_v22 = vpop.permute.xlu0 %1400  ;;  %v1405_v40 = vpop.permute.xlu1 %1404 }
 0x2de   : > { %v1410_v53 = vsel %vm1409_vm10, %v1408_v30, %v1401_v22  ;;  %v1809_v30 = vsub.f32 %v1691_v4, %v13448_v32  ;;  %v13449_v22 = vld [vmem:[#allocation83_spill] sm:$0xff]  ;;  %v13455_v4 = vld [vmem:[#allocation90_spill] sm:$0xff]  ;;  %vm14122_vm10 = vcmask (%p1385_p1), 1043456  }
 0x2df   : > { %v1412_v63 = vsel %vm1411_vm13, %v1410_v53, %v1405_v40  ;;  %v1838_v40 = vmul.f32 %v1810_v42, %v13449_v22  ;;  %v13456_v22 = vld [vmem:[#allocation68_spill] sm:$0xff]  ;;  %vm14123_vm13 = vmmov (%p1385_p1), %vm14122_vm10 }
 0x2e0   : > { %v1413_v48 = vmul.f32 %v1412_v63, %v13445_v6  ;;  %v13450_v63 = vld [vmem:[#allocation80_spill] sm:$0xff] }
 0x2e1   : > { %v1726_v34 = vpop.permute.xlu0 %1725  ;;  %v1753_v10 = vpop.permute.xlu1 %1752 }
 0x2e2   : > { %v1414_v45 = vadd.f32 %v1413_v48, %v13446_v39  ;;  %v1837_v48 = vmul.f32 %v1809_v30, %v13450_v63  ;;  %v13457_v30 = vld [vmem:[#allocation53_spill] sm:$0xff] }
 0x2e4   : > { %v1418_v23 = vrot.slane %v1414_v45, %v10815_v50  ;;  %v1433_v29 = vrot.slane %v1414_v45, %v10818_v43  ;;  %v1448_v1 = vrot.slane %v1414_v45, %v10824_v52  ;;  %v1463_v12 = vrot.slane %v1414_v45, %v10828_v24  ;;  %v13452_v24 = vld [vmem:[#allocation61_spill] sm:$0xff] }
 0x2e5   : > { %v1757_v53 = vpop.permute.xlu0 %1756  ;;  %v1699_v6 = vpop.permute.xlu1 %1698  ;;  %v6673_v45 = vmul.f32 -1.442695, %v1837_v48  ;;  %v1817_v52 = vsub.f32 %v1726_v34, %v13452_v24  ;;  %v1823_v50 = vsub.f32 %v1753_v10, %v13454_v49  ;;  %v13459_v34 = vld [vmem:[#allocation103_spill] sm:$0xff] }
 0x2e6   : > { %1424 = vbcast.lane.b32.xlu1 %v1418_v23, 264  ;;  %1420 = vbcast.lane.b32.xlu0 %v1418_v23, 256  ;;  %v1824_v32 = vsub.f32 %v1757_v53, %v13456_v22  ;;  %v1811_v63 = vsub.f32 %v1699_v6, %v13457_v30  ;;  %v13462_v30 = vld [vmem:[#allocation94_spill] sm:$0xff] }
 0x2e7   : > { %v1845_v42 = vmul.f32 %v1817_v52, %v13455_v4 }
 0x2e8   : > { %v1852_v24 = vmul.f32 %v1824_v32, %v13459_v34  ;;  %v13464_v32 = vld [vmem:[#allocation75_spill] sm:$0xff] }
 0x2e9   : > { %v1730_v43 = vpop.permute.xlu0 %1729  ;;  %v1784_v18 = vpop.permute.xlu1 %1783 }
 0x2ea   : > { %1439 = vbcast.lane.b32.xlu1 %v1433_v29, 264  ;;  %1435 = vbcast.lane.b32.xlu0 %v1433_v29, 256  ;;  %v6688_v52 = vmul.f32 -1.442695, %v1852_v24 }
 0x2ed   : > { %v1788_v56 = vpop.permute.xlu0 %1787 }
 0x2ee   : > { %1450 = vbcast.lane.b32.xlu1 %v1448_v1, 256  ;;  %1454 = vbcast.lane.b32.xlu0 %v1448_v1, 264 }
 0x2f1   : > { %v1703_v53 = vpop.permute.xlu0 %1702 }
 0x2f2   : > { %1443 = vbcast.lane.b32.xlu1 %v1433_v29, 272  ;;  %1428 = vbcast.lane.b32.xlu0 %v1418_v23, 272  ;;  %v6674_v29 = vmul.f32 -1.442695, %v1838_v40  ;;  %v13451_v23 = vld [vmem:[#allocation60_spill] sm:$0xff] }
 0x2f3   : > { %v1816_v39 = vsub.f32 %v1722_v15, %v13451_v23  ;;  %v13458_v15 = vld [vmem:[#allocation99_spill] sm:$0xff]  ;;  %v6681_v23 = vmul.f32 -1.442695, %v1845_v42 }
 0x2f4   : > { %7628 = vpow2.f32 %v6674_v29  ;;  %v1851_v48 = vmul.f32 %v1823_v50, %v13458_v15  ;;  %v1761_v29 = vpop.permute.xlu1 %1760  ;;  %v13463_v50 = vld [vmem:[#allocation74_spill] sm:$0xff] }
 0x2f5   : > { %7630 = vpow2.f32 %v6673_v45  ;;  %v1830_v42 = vsub.f32 %v1784_v18, %v13463_v50  ;;  %v1792_v24 = vpop.permute.xlu0 %1791  ;;  %v13468_v50 = vld [vmem:[#allocation104_spill] sm:$0xff] }
 0x2f6   : > { %1469 = vbcast.lane.b32.xlu1 %v1463_v12, 264  ;;  %1465 = vbcast.lane.b32.xlu0 %v1463_v12, 256  ;;  %v6687_v49 = vmul.f32 -1.442695, %v1851_v48  ;;  %v13466_v48 = vld [vmem:[#allocation69_spill] sm:$0xff] }
 0x2f8   : > { %v1734_v15 = vpop.permute.xlu1 %1733 }
 0x2fa   : > { %1458 = vbcast.lane.b32.xlu1 %v1448_v1, 272  ;;  %1473 = vbcast.lane.b32.xlu0 %v1463_v12, 272  ;;  %v13453_v1 = vld [vmem:[#allocation89_spill] sm:$0xff] }
 0x2fb   : > { %v1844_v12 = vmul.f32 %v1816_v39, %v13453_v1  ;;  %v1839_v39 = vmul.f32 %v1811_v63, %v13460_v11  ;;  %v13461_v1 = vld [vmem:[#allocation62_spill] sm:$0xff]  ;;  %v1831_v11 = vsub.f32 %v1788_v56, %v13464_v32 }
 0x2fc   : > { %v1818_v10 = vsub.f32 %v1730_v43, %v13461_v1 }
 0x2fd   : > { %v6680_v40 = vmul.f32 -1.442695, %v1844_v12  ;;  %v6675_v22 = vmul.f32 -1.442695, %v1839_v39  ;;  %v1825_v39 = vsub.f32 %v1761_v29, %v13466_v48 }
 0x2fe   : > { %v7629_v45 = vpop.eup %7628  ;;  %v1846_v4 = vmul.f32 %v1818_v10, %v13462_v30  ;;  %v1765_v10 = vpop.permute.xlu1 %1764 }
 0x2ff   : > { %7632 = vpow2.f32 %v6680_v40  ;;  %v7631_v6 = vpop.eup %7630  ;;  %v1950_v12 = vadd.f32 1.0, %v7629_v45  ;;  %v13465_v40 = vld [vmem:[#allocation113_spill] sm:$0xff]  ;;  %v13467_v45 = vld [vmem:[#allocation114_spill] sm:$0xff]  ;;  %v1853_v56 = vmul.f32 %v1825_v39, %v13468_v50  ;;  %v13472_v39 = vld [vmem:[#allocation76_spill] sm:$0xff] }
 0x300   : > { %7634 = vpow2.f32 %v6681_v23  ;;  %v1949_v63 = vadd.f32 1.0, %v7631_v6  ;;  %v6682_v43 = vmul.f32 -1.442695, %v1846_v4  ;;  %v1858_v23 = vmul.f32 %v1830_v42, %v13465_v40  ;;  %v1707_v4 = vpop.permute.xlu0 %1706  ;;  %v13470_v40 = vld [vmem:[#allocation63_spill] sm:$0xff] }
 0x301   : > { %7636 = vpow2.f32 %v6687_v49  ;;  %v1859_v1 = vmul.f32 %v1831_v11, %v13467_v45  ;;  %v1819_v30 = vsub.f32 %v1734_v15, %v13470_v40  ;;  %v13473_v50 = vld [vmem:[#allocation95_spill] sm:$0xff]  ;;  %v13475_v40 = vld [vmem:[#allocation57_spill] sm:$0xff] }
 0x302   : > { %7638 = vpow2.f32 %v6688_v52  ;;  %v6694_v49 = vmul.f32 -1.442695, %v1858_v23  ;;  %v1738_v48 = vpop.permute.xlu1 %1737 }
 0x303   : > { %7640 = vpow2.f32 %v6675_v22  ;;  %v6695_v6 = vmul.f32 -1.442695, %v1859_v1  ;;  %v13469_v22 = vld [vmem:[#allocation55_spill] sm:$0xff]  ;;  %v1832_v1 = vsub.f32 %v1792_v24, %v13472_v39 }
 0x304   : > { %7642 = vrcp.f32 %v1950_v12  ;;  %v1812_v12 = vsub.f32 %v1703_v53, %v13469_v22  ;;  %v1847_v22 = vmul.f32 %v1819_v30, %v13473_v50  ;;  %v1796_v0 = vpop.permute.xlu0 %1795 }
 0x305   : > { %7644 = vrcp.f32 %v1949_v63  ;;  %v6689_v63 = vmul.f32 -1.442695, %v1853_v56 }
 0x306   : > { %7646 = vpow2.f32 %v6682_v43 }
 0x307   : > { %7648 = vpow2.f32 %v6694_v49  ;;  %v1813_v49 = vsub.f32 %v1707_v4, %v13475_v40  ;;  %v13482_v40 = vld [vmem:[#allocation87_spill] sm:$0xff] }
 0x309   : > { %v7633_v33 = vpop.eup %7632 }
 0x30a   : > { %v7635_v18 = vpop.eup %7634  ;;  %v1956_v52 = vadd.f32 1.0, %v7633_v33  ;;  %v13471_v33 = vld [vmem:[#allocation85_spill] sm:$0xff] }
 0x30b   : > { %v7637_v32 = vpop.eup %7636  ;;  %v1957_v42 = vadd.f32 1.0, %v7635_v18  ;;  %v1840_v23 = vmul.f32 %v1812_v12, %v13471_v33  ;;  %v13474_v18 = vld [vmem:[#allocation70_spill] sm:$0xff]  ;;  %v13478_v12 = vld [vmem:[#allocation64_spill] sm:$0xff] }
 0x30c   : > { %v7639_v29 = vpop.eup %7638  ;;  %7650 = vrcp.f32 %v1956_v52  ;;  %v1963_v43 = vadd.f32 1.0, %v7637_v32  ;;  %v1826_v34 = vsub.f32 %v1765_v10, %v13474_v18  ;;  %v6683_v10 = vmul.f32 -1.442695, %v1847_v22  ;;  %v1711_v22 = vpop.permute.xlu0 %1710 }
 0x30d   : > { %v7641_v11 = vpop.eup %7640  ;;  %7652 = vpow2.f32 %v6695_v6  ;;  %v1964_v53 = vadd.f32 1.0, %v7639_v29  ;;  %v6676_v56 = vmul.f32 -1.442695, %v1840_v23  ;;  %v13477_v6 = vld [vmem:[#allocation115_spill] sm:$0xff]  ;;  %v1769_v29 = vpop.permute.xlu1 %1768 }
 0x30e   : > { %v7643_v45 = vpop.eup %7642  ;;  %7654 = vrcp.f32 %v1957_v42  ;;  %v1951_v15 = vadd.f32 1.0, %v7641_v11  ;;  %v1860_v24 = vmul.f32 %v1832_v1, %v13477_v6  ;;  %v1820_v42 = vsub.f32 %v1738_v48, %v13478_v12  ;;  %v13480_v11 = vld [vmem:[#allocation105_spill] sm:$0xff] }
 0x30f   : > { %v7645_v60 = vpop.eup %7644  ;;  %v2036_v52 = vmul.f32 %v7643_v45, %v13476_v16  ;;  %7656 = vpow2.f32 %v6689_v63  ;;  %v2162_v30 = vmul.f32 %v7643_v45, %v13479_v59  ;;  %v1854_v4 = vmul.f32 %v1826_v34, %v13480_v11  ;;  %v13483_v63 = vld [vmem:[#allocation77_spill] sm:$0xff]  ;;  %v13486_v45 = vld [vmem:[#allocation71_spill] sm:$0xff] }
 0x310   : > { %v7647_v32 = vpop.eup %7646  ;;  %7658 = vrcp.f32 %v1963_v43  ;;  %v2035_v18 = vmul.f32 %v7645_v60, %v13481_v19  ;;  %v1841_v16 = vmul.f32 %v1813_v49, %v13482_v40  ;;  %v1833_v39 = vsub.f32 %v1796_v0, %v13483_v63  ;;  %v13485_v12 = vld [vmem:[#allocation97_spill] sm:$0xff] }
 0x311   : > { %7660 = vrcp.f32 %v1964_v53  ;;  %v2161_v43 = vmul.f32 %v7645_v60, %v13484_v14  ;;  %v1958_v23 = vadd.f32 1.0, %v7647_v32  ;;  %v7649_v1 = vpop.eup %7648  ;;  %v6696_v48 = vmul.f32 -1.442695, %v1860_v24  ;;  %v13487_v32 = vld [vmem:[#allocation116_spill] sm:$0xff] }
 0x312   : > { %7662 = vrcp.f32 %v1951_v15  ;;  %v1848_v6 = vmul.f32 %v1820_v42, %v13485_v12  ;;  %v1827_v53 = vsub.f32 %v1769_v29, %v13486_v45  ;;  %v2064_v34 = vsel %vm1583_vm9, %v2036_v52, 0.0  ;;  %v13488_v45 = vld [vmem:[#allocation58_spill] sm:$0xff] }
 0x313   : > { %7664 = vpow2.f32 %v6676_v56  ;;  %v6690_v15 = vmul.f32 -1.442695, %v1854_v4  ;;  %v2190_v49 = vsel %vm1583_vm9, %v2162_v30, 0.0  ;;  %v2063_v0 = vsel %vm1583_vm9, %v2035_v18, 0.0  ;;  %v1742_v56 = vpop.permute.xlu1 %1741  ;;  %v13490_v4 = vld [vmem:[#allocation107_spill] sm:$0xff] }
 0x314   : > { %7666 = vpow2.f32 %v6683_v10  ;;  %v6677_v60 = vmul.f32 -1.442695, %v1841_v16  ;;  %v1861_v14 = vmul.f32 %v1833_v39, %v13487_v32  ;;  %v2189_v42 = vsel %vm1583_vm9, %v2161_v43, 0.0 }
 0x315   : > { %7668 = vrcp.f32 %v1958_v23  ;;  %v1970_v29 = vadd.f32 1.0, %v7649_v1  ;;  %v1814_v12 = vsub.f32 %v1711_v22, %v13488_v45  ;;  %v6684_v10 = vmul.f32 -1.442695, %v1848_v6  ;;  %v1800_v23 = vpop.permute.xlu0 %1799  ;;  %v13493_v6 = vld [vmem:[#allocation88_spill] sm:$0xff] }
 0x316   : > { %v7651_v59 = vpop.eup %7650  ;;  %7670 = vpow2.f32 %v6696_v48  ;;  %v1855_v19 = vmul.f32 %v1827_v53, %v13490_v4  ;;  %v6697_v43 = vmul.f32 -1.442695, %v1861_v14  ;;  %v10890_v63 = vadd.f32 %v2064_v34, %v2063_v0 }
 0x317   : > { %v7653_v11 = vpop.eup %7652  ;;  %v2042_v52 = vmul.f32 %v7651_v59, %v13489_v55  ;;  %v2168_v18 = vmul.f32 %v7651_v59, %v13491_v2  ;;  %7672 = vpow2.f32 %v6690_v15  ;;  %v10892_v22 = vadd.f32 %v2190_v49, %v2189_v42  ;;  %v13494_v15 = vld [vmem:[#allocation65_spill] sm:$0xff]  ;;  %v1773_v2 = vpop.permute.xlu1 %1772  ;;  %v13501_v55 = vld [vmem:[#allocation102_spill] sm:$0xff] }
 0x318   : > { %v7655_v24 = vpop.eup %7654  ;;  %v1971_v16 = vadd.f32 1.0, %v7653_v11  ;;  %7674 = vpow2.f32 %v6677_v60  ;;  %v1842_v48 = vmul.f32 %v1814_v12, %v13493_v6  ;;  %v6691_v59 = vmul.f32 -1.442695, %v1855_v19  ;;  %v13503_v6 = vld [vmem:[#allocation72_spill] sm:$0xff] }
 0x319   : > { %v7657_v30 = vpop.eup %7656  ;;  %v2043_v32 = vmul.f32 %v7655_v24, %v13492_v46  ;;  %7676 = vrcp.f32 %v1970_v29  ;;  %v2083_v4 = vsel %vm1583_vm9, %v2042_v52, 0.0  ;;  %v1821_v11 = vsub.f32 %v1742_v56, %v13494_v15  ;;  %v13499_v52 = vld [vmem:[#allocation127_spill] sm:$0xff] }
 0x31a   : > { %v7659_v39 = vpop.eup %7658  ;;  %7678 = vpow2.f32 %v6684_v10  ;;  %v2208_v60 = vsel %vm1583_vm9, %v2168_v18, 0.0  ;;  %v2169_v14 = vmul.f32 %v7655_v24, %v13495_v37  ;;  %v1965_v34 = vadd.f32 1.0, %v7657_v30  ;;  %v13500_v10 = vld [vmem:[#allocation143_spill] sm:$0xff]  ;;  %v13502_v30 = vld [vmem:[#allocation98_spill] sm:$0xff]  ;;  %v1715_v37 = vpop.permute.xlu0 %1714 }
 0x31b   : > { %v7661_v1 = vpop.eup %7660  ;;  %7680 = vrcp.f32 %v1971_v16  ;;  %v2084_v49 = vsel %vm1583_vm9, %v2043_v32, 0.0  ;;  %v2049_v42 = vmul.f32 %v7659_v39, %v13496_v20  ;;  %v2175_v19 = vmul.f32 %v7659_v39, %v13498_v44 }
 0x31c   : > { %v7663_v53 = vpop.eup %7662  ;;  %v2050_v12 = vmul.f32 %v7661_v1, %v13497_v57  ;;  %7682 = vpow2.f32 %v6697_v43  ;;  %v2176_v56 = vmul.f32 %v7661_v1, %v13499_v52  ;;  %v6678_v18 = vmul.f32 -1.442695, %v1842_v48  ;;  %v13508_v57 = vld [vmem:[#allocation66_spill] sm:$0xff] }
 0x31d   : > { %v7665_v0 = vpop.eup %7664  ;;  %v2037_v15 = vmul.f32 %v7663_v53, %v13500_v10  ;;  %v2163_v24 = vmul.f32 %v7663_v53, %v13501_v55  ;;  %7684 = vpow2.f32 %v6691_v59  ;;  %v1849_v16 = vmul.f32 %v1821_v11, %v13502_v30  ;;  %v13504_v53 = vld [vmem:[#allocation78_spill] sm:$0xff]  ;;  %v1746_v55 = vpop.permute.xlu1 %1745 }
 0x31e   : > { %v7667_v29 = vpop.eup %7666  ;;  %v1828_v32 = vsub.f32 %v1773_v2, %v13503_v6  ;;  %v10908_v46 = vadd.f32 %v2084_v49, %v2083_v4  ;;  %v2209_v43 = vsel %vm1583_vm9, %v2169_v14, 0.0  ;;  %7686 = vrcp.f32 %v1965_v34  ;;  %v13505_v49 = vld [vmem:[#allocation110_spill] sm:$0xff]  ;;  %v13506_v6 = vld [vmem:[#allocation59_spill] sm:$0xff] }
 0x31f   : > { %v7669_v20 = vpop.eup %7668  ;;  %v1952_v39 = vadd.f32 1.0, %v7665_v0  ;;  %v2102_v1 = vsel %vm1583_vm9, %v2049_v42, 0.0  ;;  %v2103_v48 = vsel %vm1583_vm9, %v2050_v12, 0.0  ;;  %v1959_v10 = vadd.f32 1.0, %v7667_v29 }
 0x320   : > { %v7671_v44 = vpop.eup %7670  ;;  %v1834_v59 = vsub.f32 %v1800_v23, %v13504_v53  ;;  %v2227_v2 = vsel %vm1583_vm9, %v2175_v19, 0.0  ;;  %v2228_v30 = vsel %vm1583_vm9, %v2176_v56, 0.0  ;;  %v2066_v4 = vsel %vm1583_vm9, %v2037_v15, 0.0  ;;  %v13507_v15 = vld [vmem:[#allocation117_spill] sm:$0xff] }
 0x321   : > { %v7673_v11 = vpop.eup %7672  ;;  %7688 = vpow2.f32 %v6678_v18  ;;  %v2192_v34 = vsel %vm1583_vm9, %v2163_v24, 0.0  ;;  %v6685_v0 = vmul.f32 -1.442695, %v1849_v16  ;;  %v1856_v42 = vmul.f32 %v1828_v32, %v13505_v49  ;;  %v1804_v24 = vpop.permute.xlu0 %1803 }
 0x322   : > { %v7675_v14 = vpop.eup %7674  ;;  %v1815_v12 = vsub.f32 %v1715_v37, %v13506_v6  ;;  %v10920_v52 = vadd.f32 %v2209_v43, %v2208_v60  ;;  %v10922_v23 = vadd.f32 %v2103_v48, %v2102_v1  ;;  %7690 = vrcp.f32 %v1952_v39  ;;  %v13510_v1 = vld [vmem:[#allocation93_spill] sm:$0xff]  ;;  %v13515_v6 = vld [vmem:[#allocation46_spill] sm:$0xff] }
 0x323   : > { %v7677_v29 = vpop.eup %7676  ;;  %v1972_v19 = vadd.f32 1.0, %v7671_v44  ;;  %7692 = vrcp.f32 %v1959_v10  ;;  %v1966_v56 = vadd.f32 1.0, %v7673_v11  ;;  %v1862_v18 = vmul.f32 %v1834_v59, %v13507_v15  ;;  %v13509_v44 = vld [vmem:[#allocation27_spill] sm:$0xff]  ;;  %v1777_v59 = vpop.permute.xlu1 %1776 }
 0x324   : > { %v7679_v53 = vpop.eup %7678  ;;  %v1822_v45 = vsub.f32 %v1746_v55, %v13508_v57  ;;  %v10926_v50 = vadd.f32 %v2228_v30, %v2227_v2  ;;  %v10929_v37 = vadd.f32 %v2066_v4, %v10890_v63  ;;  %v10932_v60 = vadd.f32 %v2192_v34, %v10892_v22  ;;  %v13511_v55 = vld [vmem:[#allocation128_spill] sm:$0xff]  ;;  %v13512_v2 = vld [vmem:[#allocation79_spill] sm:$0xff]  ;;  %v13513_v4 = vld [vmem:[#allocation157_spill] sm:$0xff] }
 0x325   : > { %v7681_v16 = vpop.eup %7680  ;;  %v1953_v32 = vadd.f32 1.0, %v7675_v14  ;;  %v2044_v39 = vmul.f32 %v7669_v20, %v13509_v44  ;;  %7694 = vpow2.f32 %v6685_v0  ;;  %v6692_v10 = vmul.f32 -1.442695, %v1856_v42  ;;  %v13514_v14 = vld [vmem:[#allocation101_spill] sm:$0xff] }
 0x326   : > { %v7683_v43 = vpop.eup %7682  ;;  %v1843_v48 = vmul.f32 %v1815_v12, %v13510_v1  ;;  %v2170_v11 = vmul.f32 %v7669_v20, %v13511_v55  ;;  %7696 = vrcp.f32 %v1972_v19  ;;  %v1960_v30 = vadd.f32 1.0, %v7679_v53  ;;  %v13516_v12 = vld [vmem:[#allocation73_spill] sm:$0xff]  ;;  %v13517_v19 = vld [vmem:[#allocation158_spill] sm:$0xff] }
 0x327   : > { %v1835_v57 = vsub.f32 %v1804_v24, %v13512_v2  ;;  %v7685_v63 = vpop.eup %7684  ;;  %v2056_v49 = vmul.f32 %v7677_v29, %v13513_v4  ;;  %7698 = vrcp.f32 %v1966_v56  ;;  %v6698_v22 = vmul.f32 -1.442695, %v1862_v18  ;;  %v1808_v2 = vpop.permute.xlu0 %1807  ;;  %v13518_v4 = vld [vmem:[#allocation47_spill] sm:$0xff] }
 0x328   : > { %v1850_v34 = vmul.f32 %v1822_v45, %v13514_v14  ;;  %v7687_v15 = vpop.eup %7686  ;;  %v2182_v0 = vmul.f32 %v7677_v29, %v13515_v6  ;;  %7700 = vrcp.f32 %v1953_v32  ;;  %v1973_v42 = vadd.f32 1.0, %v7683_v43  ;;  %v13519_v45 = vld [vmem:[#allocation119_spill] sm:$0xff]  ;;  %v13520_v32 = vld [vmem:[#allocation118_spill] sm:$0xff] }
 0x329   : > { %v1829_v1 = vsub.f32 %v1777_v59, %v13516_v12  ;;  %v2086_v20 = vsel %vm1583_vm9, %v2044_v39, 0.0  ;;  %v2057_v53 = vmul.f32 %v7681_v16, %v13517_v19  ;;  %7702 = vpow2.f32 %v6692_v10  ;;  %v13521_v10 = vld [vmem:[#allocation112_spill] sm:$0xff]  ;;  %v13522_v6 = vld [vmem:[#allocation82_spill] sm:$0xff] }
 0x32a   : > { %v6679_v24 = vmul.f32 -1.442695, %v1843_v48  ;;  %v2183_v56 = vmul.f32 %v7681_v16, %v13518_v4  ;;  %7704 = vrcp.f32 %v1960_v30  ;;  %v1967_v18 = vadd.f32 1.0, %v7685_v63  ;;  %v13523_v30 = vld [vmem:[#allocation131_spill] sm:$0xff] }
 0x32b   : > { %v7689_v55 = vpop.eup %7688  ;;  %v1863_v14 = vmul.f32 %v1835_v57, %v13519_v45  ;;  %v2211_v29 = vsel %vm1583_vm9, %v2170_v11, 0.0  ;;  %v2051_v43 = vmul.f32 %v7687_v15, %v13520_v32  ;;  %7706 = vpow2.f32 %v6698_v22 }
 0x32c   : > { %v6686_v59 = vmul.f32 -1.442695, %v1850_v34  ;;  %v7691_v12 = vpop.eup %7690  ;;  %v2121_v39 = vsel %vm1583_vm9, %v2056_v49, 0.0  ;;  %7708 = vrcp.f32 %v1973_v42  ;;  %v1857_v48 = vmul.f32 %v1829_v1, %v13521_v10  ;;  %v13524_v42 = vld [vmem:[#allocation147_spill] sm:$0xff]  ;;  %v13525_v10 = vld [vmem:[#allocation124_spill] sm:$0xff] }
 0x32d   : > { %v1836_v19 = vsub.f32 %v1808_v2, %v13522_v6  ;;  %v7693_v44 = vpop.eup %7692  ;;  %v2246_v16 = vsel %vm1583_vm9, %v2182_v0, 0.0  ;;  %v2177_v63 = vmul.f32 %v7687_v15, %v13523_v30  ;;  %v1954_v57 = vadd.f32 1.0, %v7689_v55  ;;  %v13526_v15 = vld [vmem:[#allocation56_spill] sm:$0xff]  ;;  %v13527_v30 = vld [vmem:[#allocation121_spill] sm:$0xff] }
 0x32e   : > { %7710 = vpow2.f32 %v6679_v24  ;;  %v2122_v11 = vsel %vm1583_vm9, %v2057_v53, 0.0  ;;  %v2247_v22 = vsel %vm1583_vm9, %v2183_v56, 0.0  ;;  %v6699_v34 = vmul.f32 -1.442695, %v1863_v14 }
 0x32f   : > { %7712 = vrcp.f32 %v1967_v18  ;;  %v7695_v32 = vpop.eup %7694  ;;  %v2105_v49 = vsel %vm1583_vm9, %v2051_v43, 0.0  ;;  %v2038_v1 = vmul.f32 %v7691_v12, %v13524_v42  ;;  %v2164_v2 = vmul.f32 %v7691_v12, %v13525_v10 }
 0x330   : > { %7714 = vpow2.f32 %v6686_v59  ;;  %v7697_v6 = vpop.eup %7696  ;;  %v2087_v0 = vadd.f32 %v2086_v20, %v10908_v46  ;;  %v2045_v55 = vmul.f32 %v7693_v44, %v13526_v15  ;;  %v6693_v24 = vmul.f32 -1.442695, %v1857_v48  ;;  %v13528_v48 = vld [vmem:[#allocation41_spill] sm:$0xff]  ;;  %v13529_v15 = vld [vmem:[#allocation159_spill] sm:$0xff] }
 0x331   : > { %v1864_v53 = vmul.f32 %v1836_v19, %v13527_v30  ;;  %v7699_v45 = vpop.eup %7698  ;;  %v2212_v56 = vadd.f32 %v2211_v29, %v10920_v52  ;;  %v2123_v14 = vadd.f32 %v2122_v11, %v2121_v39  ;;  %v2248_v18 = vadd.f32 %v2247_v22, %v2246_v16  ;;  %v13530_v39 = vld [vmem:[#allocation48_spill] sm:$0xff]  ;;  %v13532_v22 = vld [vmem:[#allocation43_spill] sm:$0xff] }
 0x332   : > { %7716 = vrcp.f32 %v1954_v57  ;;  %v7701_v43 = vpop.eup %7700  ;;  %v2106_v42 = vadd.f32 %v2105_v49, %v10922_v23  ;;  %v2230_v12 = vsel %vm1583_vm9, %v2177_v63, 0.0  ;;  %v1961_v59 = vadd.f32 1.0, %v7695_v32  ;;  %v13531_v63 = vld [vmem:[#allocation153_spill] sm:$0xff]  ;;  %v13533_v49 = vld [vmem:[#allocation148_spill] sm:$0xff] }
 0x333   : > { %7718 = vpow2.f32 %v6699_v34  ;;  %v7703_v10 = vpop.eup %7702  ;;  %v2068_v46 = vsel %vm1583_vm9, %v2038_v1, 0.0  ;;  %v2194_v20 = vsel %vm1583_vm9, %v2164_v2, 0.0  ;;  %v2171_v19 = vmul.f32 %v7693_v44, %v13528_v48 }
 0x334   : > { %v2058_v30 = vmul.f32 %v7697_v6, %v13529_v15  ;;  %v7705_v52 = vpop.eup %7704  ;;  %v2088_v29 = vsel %vm1583_vm9, %v2045_v55, 0.0  ;;  %v2184_v16 = vmul.f32 %v7697_v6, %v13530_v39  ;;  %7720 = vpow2.f32 %v6693_v24 }
 0x335   : > { %v6700_v23 = vmul.f32 -1.442695, %v1864_v53  ;;  %v7707_v57 = vpop.eup %7706  ;;  %v2231_v32 = vadd.f32 %v2230_v12, %v10926_v50  ;;  %v2052_v11 = vmul.f32 %v7699_v45, %v13531_v63  ;;  %v2178_v34 = vmul.f32 %v7699_v45, %v13532_v22  ;;  %v13534_v50 = vld [vmem:[#allocation39_spill] sm:$0xff]  ;;  %v13535_v22 = vld [vmem:[#allocation100_spill] sm:$0xff] }
 0x336   : > { %v2039_v1 = vmul.f32 %v7701_v43, %v13533_v49  ;;  %v7709_v2 = vpop.eup %7708  ;;  %v2069_v44 = vadd.f32 %v2068_v46, %v10929_v37  ;;  %v2195_v48 = vadd.f32 %v2194_v20, %v10932_v60  ;;  %7722 = vrcp.f32 %v1961_v59  ;;  %v13536_v59 = vld [vmem:[#allocation123_spill] sm:$0xff]  ;;  %v13537_v20 = vld [vmem:[#allocation160_spill] sm:$0xff] }
 0x337   : > { %v1968_v55 = vadd.f32 1.0, %v7703_v10  ;;  %v2089_v6 = vadd.f32 %v2088_v29, %v2087_v0  ;;  %v2213_v24 = vsel %vm1583_vm9, %v2171_v19, 0.0  ;;  %v2124_v53 = vsel %vm1583_vm9, %v2058_v30, 0.0  ;;  %v13538_v19 = vld [vmem:[#allocation140_spill] sm:$0xff] }
 0x338   : > { %v7711_v15 = vpop.eup %7710  ;;  %v2165_v12 = vmul.f32 %v7701_v43, %v13534_v50  ;;  %v2249_v45 = vsel %vm1583_vm9, %v2184_v16, 0.0  ;;  %v2046_v49 = vmul.f32 %v7705_v52, %v13535_v22  ;;  %v1974_v39 = vadd.f32 1.0, %v7707_v57 }
 0x339   : > { %v7713_v63 = vpop.eup %7712  ;;  %7724 = vpow2.f32 %v6700_v23  ;;  %v2107_v60 = vsel %vm1583_vm9, %v2052_v11, 0.0  ;;  %v2232_v10 = vsel %vm1583_vm9, %v2178_v34, 0.0  ;;  %v2070_v0 = vsel %vm1583_vm9, %v2039_v1, 0.0  ;;  %v13539_v34 = vld [vmem:[#allocation154_spill] sm:$0xff] }
 0x33a   : > { %v7715_v37 = vpop.eup %7714  ;;  %v2172_v46 = vmul.f32 %v7705_v52, %v13536_v59  ;;  %v2059_v30 = vmul.f32 %v7709_v2, %v13537_v20  ;;  %v2185_v43 = vmul.f32 %v7709_v2, %v13538_v19  ;;  %7726 = vrcp.f32 %v1968_v55 }
 0x33b   : > { %v1955_v29 = vadd.f32 1.0, %v7711_v15  ;;  %v2214_v50 = vadd.f32 %v2213_v24, %v2212_v56  ;;  %v2125_v22 = vadd.f32 %v2124_v53, %v2123_v14  ;;  %v2250_v57 = vadd.f32 %v2249_v45, %v2248_v18  ;;  %v13540_v14 = vld [vmem:[#allocation44_spill] sm:$0xff] }
 0x33c   : > { %v7717_v16 = vpop.eup %7716  ;;  %v2196_v23 = vsel %vm1583_vm9, %v2165_v12, 0.0  ;;  %v2090_v11 = vsel %vm1583_vm9, %v2046_v49, 0.0  ;;  %v2053_v40 = vmul.f32 %v7713_v63, %v13539_v34  ;;  %7728 = vrcp.f32 %v1974_v39  ;;  %v13541_v49 = vld [vmem:[#allocation50_spill] sm:$0xff] }
 0x33d   : > { %v7719_v4 = vpop.eup %7718  ;;  %v1962_v1 = vadd.f32 1.0, %v7715_v37  ;;  %v2108_v52 = vadd.f32 %v2107_v60, %v2106_v42  ;;  %v2233_v59 = vadd.f32 %v2232_v10, %v2231_v32  ;;  %v2071_v20 = vadd.f32 %v2070_v0, %v2069_v44  ;;  %v13542_v44 = vld [vmem:[#allocation132_spill] sm:$0xff]  ;;  %v13543_v10 = vld [vmem:[#allocation133_spill] sm:$0xff] }
 0x33e   : > { %v2215_v2 = vsel %vm1583_vm9, %v2172_v46, 0.0  ;;  %v7721_v55 = vpop.eup %7720  ;;  %v2126_v15 = vsel %vm1583_vm9, %v2059_v30, 0.0  ;;  %v2251_v56 = vsel %vm1583_vm9, %v2185_v43, 0.0  ;;  %v2179_v18 = vmul.f32 %v7713_v63, %v13540_v14  ;;  %v13546_v14 = vld [vmem:[#allocation54_spill] sm:$0xff] }
 0x33f   : > { %7730 = vrcp.f32 %v1955_v29  ;;  %v2197_v24 = vadd.f32 %v2196_v23, %v2195_v48  ;;  %v2091_v53 = vadd.f32 %v2090_v11, %v2089_v6  ;;  %v2040_v12 = vmul.f32 %v7717_v16, %v13541_v49  ;;  %v13545_v23 = vld [vmem:[#allocation26_spill] sm:$0xff] }
 0x340   : > { %v1975_v45 = vadd.f32 1.0, %v7719_v4  ;;  %v7723_v42 = vpop.eup %7722  ;;  %v2109_v32 = vsel %vm1583_vm9, %v2053_v40, 0.0  ;;  %7732 = vrcp.f32 %v1962_v1  ;;  %v2216_v46 = vadd.f32 %v2215_v2, %v2214_v50  ;;  %v13544_v4 = vld [vmem:[#allocation109_spill] sm:$0xff] }
 0x341   : > { %v10998_v30 = vadd.f32 %v2126_v15, %v2125_v22  ;;  %v11000_v63 = vadd.f32 %v2251_v56, %v2250_v57  ;;  %v1969_v48 = vadd.f32 1.0, %v7721_v55  ;;  %v2234_v43 = vsel %vm1583_vm9, %v2179_v18, 0.0  ;;  %v13548_v56 = vld [vmem:[#allocation134_spill] sm:$0xff] }
 0x342   : > { %v2166_v29 = vmul.f32 %v7717_v16, %v13544_v4  ;;  %v11006_v1 = vadd.f32 %v2109_v32, %v2108_v52  ;;  %7734 = vrcp.f32 %v1975_v45  ;;  %v13549_v16 = vld [vmem:[#allocation136_spill] sm:$0xff] }
 0x343   : > { %v7725_v6 = vpop.eup %7724  ;;  %7736 = vrcp.f32 %v1969_v48  ;;  %v13551_v45 = vld [vmem:[#allocation28_spill] sm:$0xff] }
 0x344   : > { %v7727_v2 = vpop.eup %7726  ;;  %v1976_v52 = vadd.f32 1.0, %v7725_v6 }
 0x346   : > { %v7729_v32 = vpop.eup %7728 }
 0x358   : > { %v1421_v39 = vpop.permute.xlu0 %1420  ;;  %v1425_v37 = vpop.permute.xlu1 %1424 }
 0x359   : > { %v1475_v60 = vsub.f32 %v1421_v39, %v13542_v44  ;;  %v1476_v0 = vsub.f32 %v1425_v37, %v13543_v10  ;;  %v2072_v39 = vsel %vm1583_vm9, %v2040_v12, 0.0  ;;  %v13547_v37 = vld [vmem:[#allocation111_spill] sm:$0xff]  ;;  %v13550_v10 = vld [vmem:[#allocation125_spill] sm:$0xff]  ;;  %v2198_v12 = vsel %vm1583_vm9, %v2166_v29, 0.0  ;;  %v13555_v29 = vld [vmem:[#allocation144_spill] sm:$0xff] }
 0x35a   : > { %v2047_v50 = vmul.f32 %v7723_v42, %v13547_v37  ;;  %v11016_v34 = vadd.f32 %v2072_v39, %v2071_v20 }
 0x35b   : > { %v1487_v11 = vmul.f32 %v1475_v60, %v13545_v23  ;;  %v1488_v40 = vmul.f32 %v1476_v0, %v13546_v14  ;;  %v2235_v60 = vadd.f32 %v2234_v43, %v2233_v59  ;;  %v2173_v14 = vmul.f32 %v7723_v42, %v13550_v10  ;;  %v13552_v23 = vld [vmem:[#allocation29_spill] sm:$0xff]  ;;  %v7731_v42 = vpop.eup %7730 }
 0x35c   : > { %v1436_v22 = vpop.permute.xlu0 %1435  ;;  %v1440_v57 = vpop.permute.xlu1 %1439 }
 0x35d   : > { %v6661_v55 = vmul.f32 -1.442695, %v1487_v11  ;;  %v6662_v15 = vmul.f32 -1.442695, %v1488_v40  ;;  %v1478_v18 = vsub.f32 %v1436_v22, %v13548_v56  ;;  %v1479_v44 = vsub.f32 %v1440_v57, %v13549_v16  ;;  %v13553_v40 = vld [vmem:[#allocation130_spill] sm:$0xff]  ;;  %v13554_v57 = vld [vmem:[#allocation145_spill] sm:$0xff]  ;;  %v7733_v39 = vpop.eup %7732 }
 0x35e   : > { %v2092_v11 = vsel %vm1583_vm9, %v2047_v50, 0.0  ;;  %v2180_v22 = vmul.f32 %v7727_v2, %v13553_v40  ;;  %v2199_v16 = vadd.f32 %v2198_v12, %v2197_v24  ;;  %v13557_v50 = vld [vmem:[#allocation155_spill] sm:$0xff]  ;;  %v13559_v40 = vld [vmem:[#allocation30_spill] sm:$0xff] }
 0x35f   : > { %7738 = vpow2.f32 %v6661_v55  ;;  %v1490_v0 = vmul.f32 %v1478_v18, %v13551_v45  ;;  %v1491_v37 = vmul.f32 %v1479_v44, %v13552_v23  ;;  %v2217_v18 = vsel %vm1583_vm9, %v2173_v14, 0.0  ;;  %v13556_v44 = vld [vmem:[#allocation138_spill] sm:$0xff] }
 0x360   : > { %7740 = vpow2.f32 %v6662_v15  ;;  %v1455_v59 = vpop.permute.xlu0 %1454  ;;  %v1451_v43 = vpop.permute.xlu1 %1450  ;;  %v2186_v20 = vmul.f32 %v7729_v32, %v13556_v44  ;;  %v2054_v45 = vmul.f32 %v7727_v2, %v13557_v50  ;;  %v13558_v15 = vld [vmem:[#allocation108_spill] sm:$0xff]  ;;  %v2236_v12 = vsel %vm1583_vm9, %v2180_v22, 0.0  ;;  %v13563_v2 = vld [vmem:[#allocation137_spill] sm:$0xff] }
 0x361   : > { %v6664_v48 = vmul.f32 -1.442695, %v1490_v0  ;;  %v6665_v6 = vmul.f32 -1.442695, %v1491_v37  ;;  %v1482_v56 = vsub.f32 %v1455_v59, %v13554_v57  ;;  %v1481_v55 = vsub.f32 %v1451_v43, %v13555_v29  ;;  %v13560_v37 = vld [vmem:[#allocation150_spill] sm:$0xff]  ;;  %v13562_v29 = vld [vmem:[#allocation135_spill] sm:$0xff]  ;;  %v11034_v50 = vpop.eup %7734 }
 0x362   : > { %7742 = vrcp.f32 %v1976_v52  ;;  %v11027_v0 = vadd.f32 %v2092_v11, %v2091_v53  ;;  %v2041_v59 = vmul.f32 %v7731_v42, %v13560_v37  ;;  %v13561_v57 = vld [vmem:[#allocation126_spill] sm:$0xff]  ;;  %v13565_v11 = vld [vmem:[#allocation129_spill] sm:$0xff] }
 0x363   : > { %7744 = vpow2.f32 %v6664_v48  ;;  %v1494_v23 = vmul.f32 %v1482_v56, %v13558_v15  ;;  %v1493_v10 = vmul.f32 %v1481_v55, %v13559_v40  ;;  %v2167_v43 = vmul.f32 %v7731_v42, %v13561_v57  ;;  %v13564_v40 = vld [vmem:[#allocation161_spill] sm:$0xff]  ;;  %v13566_v57 = vld [vmem:[#allocation96_spill] sm:$0xff] }
 0x364   : > { %7746 = vpow2.f32 %v6665_v6  ;;  %v1429_v24 = vpop.permute.xlu0 %1428  ;;  %v1444_v14 = vpop.permute.xlu1 %1443  ;;  %v2218_v56 = vadd.f32 %v2217_v18, %v2216_v46  ;;  %v2060_v53 = vmul.f32 %v7729_v32, %v13564_v40  ;;  %v2174_v15 = vmul.f32 %v7733_v39, %v13565_v11  ;;  %v13569_v55 = vld [vmem:[#allocation24_spill] sm:$0xff]  ;;  %v13570_v40 = vld [vmem:[#allocation25_spill] sm:$0xff] }
 0x365   : > { %v6668_v52 = vmul.f32 -1.442695, %v1494_v23  ;;  %v1477_v44 = vsub.f32 %v1429_v24, %v13562_v29  ;;  %v1480_v48 = vsub.f32 %v1444_v14, %v13563_v2  ;;  %v6667_v37 = vmul.f32 -1.442695, %v1493_v10  ;;  %v13567_v23 = vld [vmem:[#allocation81_spill] sm:$0xff]  ;;  %v7737_v24 = vpop.eup %7736  ;;  %v13568_v2 = vld [vmem:[#allocation32_spill] sm:$0xff] }
 0x366   : > { %v2253_v42 = vsel %vm1583_vm9, %v2186_v20, 0.0  ;;  %v11040_v6 = vsel %vm1583_vm9, %v2054_v45, 0.0  ;;  %v2237_v29 = vadd.f32 %v2236_v12, %v2235_v60  ;;  %v2075_v14 = vsel %vm2074_vm5, %v2041_v59, 0.0 }
 0x367   : > { %v1489_v22 = vmul.f32 %v1477_v44, %v13566_v57  ;;  %v1492_v4 = vmul.f32 %v1480_v48, %v13567_v23  ;;  %v2048_v46 = vmul.f32 %v7733_v39, %v13568_v2  ;;  %7748 = vpow2.f32 %v6668_v52  ;;  %v13571_v39 = vld [vmem:[#allocation33_spill] sm:$0xff]  ;;  %v13572_v52 = vld [vmem:[#allocation91_spill] sm:$0xff] }
 0x368   : > { %v1466_v32 = vpop.permute.xlu0 %1465  ;;  %v1470_v18 = vpop.permute.xlu1 %1469  ;;  %v2200_v10 = vsel %vm2074_vm5, %v2167_v43, 0.0  ;;  %v2219_v57 = vsel %vm2074_vm5, %v2174_v15, 0.0  ;;  %7750 = vpow2.f32 %v6667_v37  ;;  %v13574_v37 = vld [vmem:[#allocation149_spill] sm:$0xff] }
 0x369   : > { %v7739_v11 = vpop.eup %7738  ;;  %v6663_v20 = vmul.f32 -1.442695, %v1489_v22  ;;  %v1484_v45 = vsub.f32 %v1466_v32, %v13569_v55  ;;  %v1485_v49 = vsub.f32 %v1470_v18, %v13570_v40  ;;  %v6666_v60 = vmul.f32 -1.442695, %v1492_v4  ;;  %v13573_v55 = vld [vmem:[#allocation45_spill] sm:$0xff] }
 0x36a   : > { %v7741_v44 = vpop.eup %7740  ;;  %v1535_v48 = vadd.f32 1.0, %v7739_v11  ;;  %v2201_v43 = vadd.f32 %v2200_v10, %v2199_v16  ;;  %v2094_v22 = vsel %vm2074_vm5, %v2048_v46, 0.0  ;;  %v2181_v32 = vmul.f32 %v7737_v24, %v13573_v55  ;;  %v13576_v10 = vld [vmem:[#allocation34_spill] sm:$0xff]  ;;  %v13577_v55 = vld [vmem:[#allocation139_spill] sm:$0xff] }
 0x36b   : > { %v1536_v59 = vadd.f32 1.0, %v7741_v44  ;;  %7752 = vpow2.f32 %v6663_v20  ;;  %v1496_v12 = vmul.f32 %v1484_v45, %v13571_v39  ;;  %v1497_v23 = vmul.f32 %v1485_v49, %v13572_v52  ;;  %v13575_v39 = vld [vmem:[#allocation146_spill] sm:$0xff] }
 0x36c   : > { %v11052_v2 = vpop.eup %7742  ;;  %7754 = vrcp.f32 %v1535_v48  ;;  %v1474_v40 = vpop.permute.xlu0 %1473  ;;  %v2220_v11 = vadd.f32 %v2219_v57, %v2218_v56  ;;  %v2076_v16 = vadd.f32 %v2075_v14, %v11016_v34  ;;  %v2187_v19 = vmul.f32 %v11034_v50, %v13577_v55  ;;  %v13578_v57 = vld [vmem:[#allocation31_spill] sm:$0xff]  ;;  %v13579_v34 = vld [vmem:[#allocation156_spill] sm:$0xff] }
 0x36d   : > { %v1459_v18 = vpop.permute.xlu1 %1458  ;;  %v7745_v15 = vpop.eup %7744  ;;  %7756 = vrcp.f32 %v1536_v59  ;;  %v6670_v4 = vmul.f32 -1.442695, %v1496_v12  ;;  %v1486_v20 = vsub.f32 %v1474_v40, %v13574_v37  ;;  %v6671_v49 = vmul.f32 -1.442695, %v1497_v23 }
 0x36e   : > { %v7747_v44 = vpop.eup %7746  ;;  %v1538_v45 = vadd.f32 1.0, %v7745_v15  ;;  %7758 = vpow2.f32 %v6666_v60  ;;  %v1483_v52 = vsub.f32 %v1459_v18, %v13575_v39  ;;  %v2238_v56 = vsel %vm2074_vm5, %v2181_v32, 0.0 }
 0x36f   : > { %v1539_v46 = vadd.f32 1.0, %v7747_v44  ;;  %7760 = vpow2.f32 %v6670_v4  ;;  %v1498_v48 = vmul.f32 %v1486_v20, %v13576_v10  ;;  %v2202_v12 = vrot.slane %v2201_v43, 4 }
 0x370   : > { %7762 = vrcp.f32 %v1538_v45  ;;  %v1495_v59 = vmul.f32 %v1483_v52, %v13578_v57  ;;  %v2095_v60 = vadd.f32 %v2094_v22, %v11027_v0  ;;  %v2221_v18 = vrot.slane %v2220_v11, 4  ;;  %v13580_v45 = vld [vmem:[#allocation162_spill] sm:$0xff]  ;;  %v13581_v22 = vld [vmem:[#allocation49_spill] sm:$0xff] }
 0x371   : > { %7764 = vrcp.f32 %v1539_v46  ;;  %v6672_v23 = vmul.f32 -1.442695, %v1498_v48  ;;  %v7749_v40 = vpop.eup %7748  ;;  %v2055_v14 = vmul.f32 %v7737_v24, %v13579_v34  ;;  %v2128_v4 = vsel %vm1583_vm9, %v2060_v53, 0.0 }
 0x372   : > { %7766 = vpow2.f32 %v6671_v49  ;;  %v6669_v15 = vmul.f32 -1.442695, %v1495_v59  ;;  %v2254_v37 = vadd.f32 %v2253_v42, %v11000_v63  ;;  %v2239_v20 = vadd.f32 %v2238_v56, %v2237_v29  ;;  %v7751_v32 = vpop.eup %7750 }
 0x373   : > { %7768 = vpow2.f32 %v6672_v23  ;;  %v2077_v44 = vrot.slane %v2076_v16, 4  ;;  %v2061_v39 = vmul.f32 %v11034_v50, %v13580_v45  ;;  %v2255_v0 = vsel %vm1583_vm9, %v2187_v19, 0.0 }
 0x374   : > { %v2188_v52 = vmul.f32 %v11052_v2, %v13581_v22  ;;  %v2112_v24 = vadd.f32 %v11040_v6, %v11006_v1  ;;  %v2203_v49 = vadd.f32 %v2202_v12, %v2201_v43  ;;  %v2096_v53 = vrot.slane %v2095_v60, 4 }
 0x375   : > { %v7753_v46 = vpop.eup %7752  ;;  %v1542_v10 = vadd.f32 1.0, %v7749_v40  ;;  %v2222_v42 = vadd.f32 %v2221_v18, %v2220_v11  ;;  %v2113_v29 = vsel %vm2074_vm5, %v2055_v14, 0.0  ;;  %7770 = vpow2.f32 %v6669_v15  ;;  %v13582_v15 = vld [vmem:[#allocation163_spill] sm:$0xff] }
 0x376   : > { %v7755_v63 = vpop.eup %7754  ;;  %v1537_v48 = vadd.f32 1.0, %v7753_v46  ;;  %v2129_v50 = vadd.f32 %v2128_v4, %v10998_v30  ;;  %v2256_v19 = vadd.f32 %v2255_v0, %v2254_v37  ;;  %v2240_v57 = vrot.slane %v2239_v20, 4 }
 0x377   : > { %v7757_v56 = vpop.eup %7756  ;;  %v1541_v59 = vadd.f32 1.0, %v7751_v32  ;;  %v11077_v34 = vadd.f32 %v2077_v44, %v2076_v16  ;;  %v2130_v1 = vsel %vm1583_vm9, %v2061_v39, 0.0  ;;  %v2257_v6 = vsel %vm2074_vm5, %v2188_v52, 0.0 }
 0x378   : > { %v7759_v23 = vpop.eup %7758  ;;  %7772 = vrcp.f32 %v1537_v48  ;;  %v2204_v11 = vrot.slane %v2203_v49, 2  ;;  %v11081_v12 = vadd.f32 %v2113_v29, %v2112_v24  ;;  %v11083_v14 = vadd.f32 %v2096_v53, %v2095_v60 }
 0x379   : > { %v7761_v43 = vpop.eup %7760  ;;  %7774 = vrcp.f32 %v1542_v10  ;;  %v1540_v40 = vadd.f32 1.0, %v7759_v23  ;;  %v2223_v30 = vrot.slane %v2222_v42, 2  ;;  %v2062_v4 = vmul.f32 %v11052_v2, %v13582_v15 }
 0x37a   : > { %v7763_v18 = vpop.eup %7762  ;;  %v1544_v16 = vadd.f32 1.0, %v7761_v43  ;;  %v2241_v32 = vadd.f32 %v2240_v57, %v2239_v20  ;;  %v2258_v44 = vadd.f32 %v2257_v6, %v2256_v19  ;;  %v1629_v39 = vmul.f32 %v7755_v63, %v13583_v21 }
 0x37b   : > { %v7765_v37 = vpop.eup %7764  ;;  %7776 = vrcp.f32 %v1541_v59  ;;  %v2131_v52 = vadd.f32 %v2130_v1, %v2129_v50  ;;  %v1630_v46 = vmul.f32 %v7757_v56, %v13584_v9  ;;  %v11090_v53 = vadd.f32 %v2204_v11, %v2203_v49 }
 0x37c   : > { %v7767_v0 = vpop.eup %7766  ;;  %7778 = vrcp.f32 %v1540_v40  ;;  %v2132_v29 = vsel %vm2074_vm5, %v2062_v4, 0.0  ;;  %v11095_v19 = vadd.f32 %v2223_v30, %v2222_v42  ;;  %v2242_v50 = vrot.slane %v2241_v32, 2 }
 0x37d   : > { %v7769_v24 = vpop.eup %7768  ;;  %7780 = vrcp.f32 %v1544_v16  ;;  %v1545_v2 = vadd.f32 1.0, %v7767_v0  ;;  %v2259_v57 = vrot.slane %v2258_v44, 4  ;;  %v1641_v59 = vsel %vm1583_vm9, %v1629_v39, 0.0 }
 0x37e   : > { %v1546_v48 = vadd.f32 1.0, %v7769_v24  ;;  %v1642_v1 = vsel %vm1583_vm9, %v1630_v46, 0.0  ;;  %v1632_v49 = vmul.f32 %v7763_v18, %v13585_v61  ;;  %v1633_v6 = vmul.f32 %v7765_v37, %v13586_v13  ;;  %v13646_v61 = vld [vmem:[#allocation63_spill] sm:$0xff] }
 0x37f   : > { %v7771_v23 = vpop.eup %7770  ;;  %7782 = vrcp.f32 %v1545_v2  ;;  %v1571_v43 = vmul.f32 %v7755_v63, %v13587_v41  ;;  %v1572_v11 = vmul.f32 %v7757_v56, %v13588_v51  ;;  %v11104_v4 = vadd.f32 %v2132_v29, %v2131_v52 }
 0x380   : > { %7784 = vrcp.f32 %v1546_v48  ;;  %v1543_v40 = vadd.f32 1.0, %v7771_v23  ;;  %v1574_v16 = vmul.f32 %v7763_v18, %v13589_v36  ;;  %v1575_v39 = vmul.f32 %v7765_v37, %v13590_v27 }
 0x381   : > { %v2260_v24 = vadd.f32 %v2259_v57, %v2258_v44  ;;  %v1643_v2 = vadd.f32 %v1642_v1, %v1641_v59  ;;  %v1652_v56 = vsel %vm1583_vm9, %v1632_v49, 0.0  ;;  %v1653_v48 = vsel %vm1583_vm9, %v1633_v6, 0.0 }
 0x382   : > { %v7773_v42 = vpop.eup %7772  ;;  %7786 = vrcp.f32 %v1543_v40  ;;  %v11113_v29 = vadd.f32 %v2242_v50, %v2241_v32  ;;  %v1584_v18 = vsel %vm1583_vm9, %v1571_v43, 0.0  ;;  %v1585_v37 = vsel %vm1583_vm9, %v1572_v11, 0.0 }
 0x383   : > { %v7775_v0 = vpop.eup %7774  ;;  %v1631_v63 = vmul.f32 %v7773_v42, %v13591_v47  ;;  %v1573_v23 = vmul.f32 %v7773_v42, %v13592_v3  ;;  %v1596_v57 = vsel %vm1583_vm9, %v1574_v16, 0.0  ;;  %v1597_v59 = vsel %vm1583_vm9, %v1575_v39, 0.0 }
 0x384   : > { %v1578_v1 = vmul.f32 %v7775_v0, %v13593_v5  ;;  %v2261_v42 = vrot.slane %v2260_v24, 2  ;;  %v1654_v40 = vadd.f32 %v1653_v48, %v1652_v56  ;;  %v1586_v16 = vadd.f32 %v1585_v37, %v1584_v18 }
 0x385   : > { %v7777_v52 = vpop.eup %7776  ;;  %v1644_v10 = vsel %vm1587_vm6, %v1631_v63, 0.0  ;;  %v1588_v43 = vsel %vm1587_vm6, %v1573_v23, 0.0  ;;  %v1598_v20 = vadd.f32 %v1597_v59, %v1596_v57  ;;  %v1636_v39 = vmul.f32 %v7775_v0, %v13598_v17 }
 0x386   : > { %v7779_v44 = vpop.eup %7778  ;;  %v1645_v49 = vadd.f32 %v1644_v10, %v1643_v2  ;;  %v1608_v56 = vsel %vm1583_vm9, %v1578_v1, 0.0  ;;  %v1577_v48 = vmul.f32 %v7777_v52, %v13599_v38  ;;  %v1589_v30 = vadd.f32 %v1588_v43, %v1586_v16 }
 0x387   : > { %v7781_v6 = vpop.eup %7780  ;;  %v1576_v32 = vmul.f32 %v7779_v44, %v13594_v28  ;;  %v1634_v50 = vmul.f32 %v7779_v44, %v13595_v8  ;;  %v1635_v44 = vmul.f32 %v7777_v52, %v13600_v25 }
 0x388   : > { %v1646_v11 = vrot.slane %v1645_v49, 4  ;;  %v1580_v63 = vmul.f32 %v7781_v6, %v13596_v62  ;;  %v1638_v60 = vmul.f32 %v7781_v6, %v13597_v26  ;;  %v1607_v16 = vsel %vm1583_vm9, %v1577_v48, 0.0  ;;  %v13606_v48 = vld [vmem:[#allocation172_spill] sm:$0xff]  ;;  %v13648_v62 = vld [vmem:[#allocation115_spill] sm:$0xff] }
 0x389   : > { %v1655_v10 = vsel %vm1587_vm6, %v1634_v50, 0.0  ;;  %v7783_v2 = vpop.eup %7782  ;;  %v1599_v3 = vsel %vm1587_vm6, %v1576_v32, 0.0  ;;  %v1664_v32 = vsel %vm1583_vm9, %v1636_v39, 0.0 }
 0x38a   : > { %v1656_v46 = vadd.f32 %v1655_v10, %v1654_v40  ;;  %v7785_v23 = vpop.eup %7784  ;;  %v1581_v6 = vmul.f32 %v7783_v2, %v13601_v58  ;;  %v1639_v18 = vmul.f32 %v7783_v2, %v13602_v54  ;;  %v1647_v37 = vadd.f32 %v1646_v11, %v1645_v49 }
 0x38b   : > { %v1618_v57 = vsel %vm1583_vm9, %v1580_v63, 0.0  ;;  %v1674_v59 = vsel %vm1583_vm9, %v1638_v60, 0.0  ;;  %v1582_v52 = vmul.f32 %v7785_v23, %v13603_v35  ;;  %v1640_v40 = vmul.f32 %v7785_v23, %v13604_v7  ;;  %v13643_v35 = vld [vmem:[#allocation113_spill] sm:$0xff] }
 0x38c   : > { %v1657_v0 = vrot.slane %v1656_v46, 4  ;;  %v1619_v1 = vsel %vm1583_vm9, %v1581_v6, 0.0  ;;  %v1675_v50 = vsel %vm1583_vm9, %v1639_v18, 0.0  ;;  %v7787_v43 = vpop.eup %7786  ;;  %v1600_v10 = vadd.f32 %v1599_v3, %v1598_v20 }
 0x38d   : > { %v1663_v11 = vsel %vm1583_vm9, %v1635_v44, 0.0  ;;  %v1676_v63 = vadd.f32 %v1675_v50, %v1674_v59  ;;  %v1621_v60 = vsel %vm1587_vm6, %v1582_v52, 0.0  ;;  %v1677_v2 = vsel %vm1587_vm6, %v1640_v40, 0.0 }
 0x38e   : > { %v1658_v49 = vadd.f32 %v1657_v0, %v1656_v46  ;;  %v2262_v6 = vadd.f32 %v2261_v42, %v2260_v24  ;;  %v1590_v18 = vrot.slane %v1589_v30, 4  ;;  %v1648_v5 = vrot.slane %v1647_v37, 2 }
 0x38f   : > { %v1620_v8 = vadd.f32 %v1619_v1, %v1618_v57  ;;  %v1678_v7 = vadd.f32 %v1677_v2, %v1676_v63  ;;  %v1579_v39 = vmul.f32 %v7787_v43, %v13605_v31  ;;  %v1637_v3 = vmul.f32 %v7787_v43, %v13606_v48 }
 0x390   : > { %v1659_v23 = vrot.slane %v1658_v49, 2  ;;  %v1609_v20 = vadd.f32 %v1608_v56, %v1607_v16  ;;  %v1665_v46 = vadd.f32 %v1664_v32, %v1663_v11  ;;  %v1601_v44 = vrot.slane %v1600_v10, 4 }
 0x391   : > { %v1622_v0 = vadd.f32 %v1621_v60, %v1620_v8  ;;  %v2134_v59 = vrot.slane %v11104_v4, 4  ;;  %v1679_v50 = vrot.slane %v1678_v7, 4  ;;  %v1610_v24 = vsel %vm1587_vm6, %v1579_v39, 0.0 }
 0x392   : > { %v1666_v42 = vsel %vm1587_vm6, %v1637_v3, 0.0  ;;  %v2244_v57 = vrot.slane %v11113_v29, 1  ;;  %v2263_v1 = vrot.slane %v2262_v6, 1  ;;  %v1611_v52 = vadd.f32 %v1610_v24, %v1609_v20 }
 0x393   : > { %v1667_v40 = vadd.f32 %v1666_v42, %v1665_v46  ;;  %v1591_v63 = vadd.f32 %v1590_v18, %v1589_v30  ;;  %v1649_v2 = vadd.f32 %v1648_v5, %v1647_v37  ;;  %v1660_v43 = vadd.f32 %v1659_v23, %v1658_v49 }
 0x394   : > { %v1680_v48 = vadd.f32 %v1679_v50, %v1678_v7  ;;  %v1602_v56 = vadd.f32 %v1601_v44, %v1600_v10  ;;  %v1623_v32 = vrot.slane %v1622_v0, 4  ;;  %v1612_v16 = vrot.slane %v1611_v52, 4 }
 0x395   : > { %v1668_v8 = vrot.slane %v1667_v40, 4  ;;  %v13607_v11 = vrot.slane %v11090_v53, 1  ;;  %v13608_v39 = vrot.slane %v11095_v19, 1  ;;  %v13609_v20 = vrot.slane %v11081_v12, 4 }
 0x396   : > { %v1681_v30 = vrot.slane %v1680_v48, 2  ;;  %v2245_v5 = vadd.f32 %v2244_v57, %v11113_v29  ;;  %v2135_v7 = vadd.f32 %v2134_v59, %v11104_v4  ;;  %v1613_v37 = vadd.f32 %v1612_v16, %v1611_v52 }
 0x397   : > { %v2207_v60 = vadd.f32 %v13607_v11, %v11090_v53  ;;  %v2226_v3 = vadd.f32 %v13608_v39, %v11095_v19  ;;  %v2116_v46 = vadd.f32 %v13609_v20, %v11081_v12  ;;  %v1669_v10 = vadd.f32 %v1668_v8, %v1667_v40 }
 0x398   : > { %v2264_v49 = vadd.f32 %v2263_v1, %v2262_v6  ;;  %v1650_v18 = vrot.slane %v1649_v2, 1  ;;  %v1661_v23 = vrot.slane %v1660_v43, 1  ;;  %v1682_v44 = vadd.f32 %v1681_v30, %v1680_v48 }
 0x399   : > { %v1592_v53 = vrot.slane %v1591_v63, 2  ;;  %v1603_v50 = vrot.slane %v1602_v56, 2  ;;  %v1624_v24 = vadd.f32 %v1623_v32, %v1622_v0  ;;  %v1670_v42 = vrot.slane %v1669_v10, 2 }
 0x39a   : > { %v2269_v19 = vsel %vm2144_vm12, %v2226_v3, %v2207_v60  ;;  %v2117_v11 = vrot.slane %v2116_v46, 2  ;;  %v1683_v39 = vrot.slane %v1682_v44, 1  ;;  %v1614_v12 = vrot.slane %v1613_v37, 2 }
 0x39b   : > { %v13610_v29 = vrot.slane %v11077_v34, 2  ;;  %v2270_v4 = vsel %vm2146_vm14, %v2245_v5, %v2269_v19  ;;  %v2136_v59 = vrot.slane %v2135_v7, 2  ;;  %v1671_v6 = vadd.f32 %v1670_v42, %v1669_v10  ;;  %v13612_v10 = vld [vmem:[#allocation190_spill] sm:$0xff] }
 0x39c   : > { %v13611_v1 = vrot.slane %v11083_v14, 2  ;;  %v2271_v0 = vsel %vm2148_vm1, %v2264_v49, %v2270_v4  ;;  %v1651_v40 = vadd.f32 %v1650_v18, %v1649_v2  ;;  %v1662_v48 = vadd.f32 %v1661_v23, %v1660_v43 }
 0x39d   : > { %v2080_v57 = vadd.f32 %v13610_v29, %v11077_v34  ;;  %v1593_v32 = vadd.f32 %v1592_v53, %v1591_v63  ;;  %v1604_v16 = vadd.f32 %v1603_v50, %v1602_v56  ;;  %v1625_v8 = vrot.slane %v1624_v24, 2 }
 0x39e   : > { %v2099_v52 = vadd.f32 %v13611_v1, %v11083_v14  ;;  %v1672_v60 = vrot.slane %v1671_v6, 1  ;;  %v2118_v3 = vadd.f32 %v2117_v11, %v2116_v46  ;;  %v1684_v20 = vadd.f32 %v1683_v39, %v1682_v44  ;;  %v13614_v39 = vld [vmem:[#allocation189_spill] sm:$0xff] }
 0x39f   : > { %v1615_v30 = vadd.f32 %v1614_v12, %v1613_v37  ;;  %v2137_v34 = vadd.f32 %v2136_v59, %v2135_v7  ;;  %v2081_v5 = vrot.slane %v2080_v57, 1  ;;  %v2273_v42 = vadd.f32 %v2271_v0, %v13612_v10  ;;  %v13615_v12 = vld [vmem:[#allocation191_spill] sm:$0xff] }
 0x3a0   : > { %v1673_v29 = vadd.f32 %v1672_v60, %v1671_v6  ;;  %v2100_v19 = vrot.slane %v2099_v52, 1  ;;  %v2278_v9 = vsel %vm2144_vm12, %v1662_v48, %v1651_v40  ;;  %v1594_v14 = vrot.slane %v1593_v32, 1 }
 0x3a1   : > { %v1605_v1 = vrot.slane %v1604_v16, 1  ;;  %v1626_v49 = vadd.f32 %v1625_v8, %v1624_v24  ;;  %v2119_v63 = vrot.slane %v2118_v3, 1  ;;  %v1616_v43 = vrot.slane %v1615_v30, 1 }
 0x3a2   : > { %v2279_v2 = vsel %vm2146_vm14, %v1673_v29, %v2278_v9  ;;  %v2138_v46 = vrot.slane %v2137_v34, 1  ;;  %v2082_v37 = vadd.f32 %v2081_v5, %v2080_v57  ;;  %v2101_v18 = vadd.f32 %v2100_v19, %v2099_v52  ;;  %v13616_v57 = vld [vmem:[#allocation188_spill] sm:$0xff]  ;;  %v13620_v19 = vld [vmem:[#allocation194_spill] sm:$0xff] }
 0x3a3   : > { %v11175_v56 = vsel %vm2148_vm1, %v1684_v20, %v2279_v2  ;;  %v1595_v23 = vadd.f32 %v1594_v14, %v1593_v32  ;;  %v1606_v44 = vadd.f32 %v1605_v1, %v1604_v16  ;;  %v1627_v53 = vrot.slane %v1626_v49, 1  ;;  %v13619_v29 = vld [vmem:[#allocation193_spill] sm:$0xff]  ;;  %v13621_v14 = vld [vmem:[#allocation195_spill] sm:$0xff] }
 0x3a4   : > { %13613 = vst [vmem:[#allocation196_spill] sm:$0xff] %v11175_v56  ;;  %v2282_v7 = vadd.f32 %v11175_v56, %v2273_v42  ;;  %v2120_v11 = vadd.f32 %v2119_v63, %v2118_v3  ;;  %v2033_v24 = vmul.f32 %v13615_v12, %v13614_v39  ;;  %v1617_v4 = vadd.f32 %v1616_v43, %v1615_v30  ;;  %v13618_v30 = vld [vmem:[#allocation192_spill] sm:$0xff]  ;;  %v13622_v63 = vld [vmem:[#allocation52_spill] sm:$0xff] }
 0x3a5   : > { %v2139_v9 = vadd.f32 %v2138_v46, %v2137_v34  ;;  %v2145_v59 = vsel %vm2144_vm12, %v2101_v18, %v2082_v37  ;;  %v2156_v6 = vsel %vm2144_vm12, %v1606_v44, %v1595_v23  ;;  %v1628_v0 = vadd.f32 %v1627_v53, %v1626_v49  ;;  %v13623_v46 = vld [vmem:[#allocation51_spill] sm:$0xff]  ;;  %v13625_v53 = vld [vmem:[#allocation80_spill] sm:$0xff] }
 0x3a6   : > { %v2283_v50 = vadd.f32 1e-08, %v2282_v7  ;;  %v2147_v40 = vsel %vm2146_vm14, %v2120_v11, %v2145_v59  ;;  %v2034_v52 = vadd.f32 %v2033_v24, %v13616_v57  ;;  %v2157_v48 = vsel %vm2146_vm14, %v1617_v4, %v2156_v6  ;;  %v13624_v37 = vld [vmem:[#allocation83_spill] sm:$0xff]  ;;  %v13626_v11 = vld [vmem:[#allocation61_spill] sm:$0xff]  ;;  %v13628_v4 = vld [vmem:[#allocation60_spill] sm:$0xff] }
 0x3a7   : > { %v2149_v32 = vsel %vm2148_vm1, %v2139_v9, %v2147_v40  ;;  %v11187_v16 = vsel %vm2148_vm1, %v1628_v0, %v2157_v48  ;;  %v13627_v12 = vmov %v13626_v11  ;;  %v13629_v6 = vld [vmem:[#allocation90_spill] sm:$0xff]  ;;  %vm14125_vm6 = vcmask (%p1385_p1), 556032  }
 0x3a8   : > { %7788 = vrcp.f32 %v2283_v50  ;;  %13617 = vst [vmem:[#allocation191_spill] sm:$0xff] %v11187_v16  ;;  %v2151_v8 = vadd.f32 %v2149_v32, %v2034_v52  ;;  %v13630_v32 = vld [vmem:[#allocation89_spill] sm:$0xff] }
 0x3aa   : > { %v2160_v60 = vadd.f32 %v11187_v16, %v2151_v8 }
 0x3b2   : > { %v7789_v3 = vpop.eup %7788 }
 0x3b3   : > { %v11190_v20 = vmul.f32 %v7789_v3, %v2160_v60  ;;  %v13631_v60 = vld [vmem:[#allocation68_spill] sm:$0xff] }
 0x3b5   : > { %v2289_v34 = vrot.slane %v11190_v20, %v13618_v30  ;;  %v2320_v5 = vrot.slane %v11190_v20, %v13619_v29  ;;  %v2351_v42 = vrot.slane %v11190_v20, %v13620_v19  ;;  %v2382_v1 = vrot.slane %v11190_v20, %v13621_v14 }
 0x3b7   : > { %2295 = vbcast.lane.b32.xlu0 %v2289_v34, 264  ;;  %2291 = vbcast.lane.b32.xlu1 %v2289_v34, 256 }
 0x3bb   : > { %2326 = vbcast.lane.b32.xlu0 %v2320_v5, 264  ;;  %2322 = vbcast.lane.b32.xlu1 %v2320_v5, 256 }
 0x3bf   : > { %2357 = vbcast.lane.b32.xlu0 %v2351_v42, 264  ;;  %2353 = vbcast.lane.b32.xlu1 %v2351_v42, 256 }
 0x3c3   : > { %2330 = vbcast.lane.b32.xlu0 %v2320_v5, 272  ;;  %2299 = vbcast.lane.b32.xlu1 %v2289_v34, 272 }
 0x3c7   : > { %2388 = vbcast.lane.b32.xlu0 %v2382_v1, 264  ;;  %2384 = vbcast.lane.b32.xlu1 %v2382_v1, 256 }
 0x3cb   : > { %2303 = vbcast.lane.b32.xlu0 %v2289_v34, 280  ;;  %2361 = vbcast.lane.b32.xlu1 %v2351_v42, 272 }
 0x3cf   : > { %2392 = vbcast.lane.b32.xlu0 %v2382_v1, 272  ;;  %2334 = vbcast.lane.b32.xlu1 %v2320_v5, 280 }
 0x3d3   : > { %2307 = vbcast.lane.b32.xlu0 %v2289_v34, 288  ;;  %2365 = vbcast.lane.b32.xlu1 %v2351_v42, 280 }
 0x3d7   : > { %2396 = vbcast.lane.b32.xlu0 %v2382_v1, 280  ;;  %2338 = vbcast.lane.b32.xlu1 %v2320_v5, 288 }
 0x3db   : > { %2311 = vbcast.lane.b32.xlu0 %v2289_v34, 296  ;;  %2369 = vbcast.lane.b32.xlu1 %v2351_v42, 288 }
 0x3df   : > { %2400 = vbcast.lane.b32.xlu0 %v2382_v1, 288  ;;  %2342 = vbcast.lane.b32.xlu1 %v2320_v5, 296 }
 0x3e3   : > { %2315 = vbcast.lane.b32.xlu0 %v2289_v34, 304  ;;  %2373 = vbcast.lane.b32.xlu1 %v2351_v42, 296  ;;  %v13632_v34 = vld [vmem:[#allocation67_spill] sm:$0xff] }
 0x3e7   : > { %2404 = vbcast.lane.b32.xlu0 %v2382_v1, 296  ;;  %2346 = vbcast.lane.b32.xlu1 %v2320_v5, 304 }
 0x3eb   : > { %2408 = vbcast.lane.b32.xlu0 %v2382_v1, 304  ;;  %2377 = vbcast.lane.b32.xlu1 %v2351_v42, 304  ;;  %v13633_v42 = vld [vmem:[#allocation103_spill] sm:$0xff] }
 0x429   : > { %v2296_v49 = vpop.permute.xlu0 %2295  ;;  %v2292_v2 = vpop.permute.xlu1 %2291 }
 0x42a   : > { %v2411_v43 = vsub.f32 %v2296_v49, %v13622_v63  ;;  %v2410_v7 = vsub.f32 %v2292_v2, %v13623_v46  ;;  %v13634_v2 = vld [vmem:[#allocation99_spill] sm:$0xff] }
 0x42c   : > { %v2439_v18 = vmul.f32 %v2411_v43, %v13624_v37  ;;  %v2438_v50 = vmul.f32 %v2410_v7, %v13625_v53 }
 0x42d   : > { %v2327_v23 = vpop.permute.xlu0 %2326  ;;  %v2323_v44 = vpop.permute.xlu1 %2322 }
 0x42e   : > { %v2418_v24 = vsub.f32 %v2327_v23, %v13626_v11  ;;  %v2417_v9 = vsub.f32 %v2323_v44, %v13628_v4  ;;  %v6702_v59 = vmul.f32 -1.442695, %v2439_v18  ;;  %v6701_v48 = vmul.f32 -1.442695, %v2438_v50  ;;  %v13635_v44 = vld [vmem:[#allocation62_spill] sm:$0xff] }
 0x430   : > { %v2446_v0 = vmul.f32 %v2418_v24, %v13629_v6  ;;  %v2445_v8 = vmul.f32 %v2417_v9, %v13630_v32  ;;  %7790 = vpow2.f32 %v6702_v59  ;;  %v13636_v24 = vld [vmem:[#allocation53_spill] sm:$0xff]  ;;  %v13637_v9 = vld [vmem:[#allocation94_spill] sm:$0xff]  ;;  %v13638_v59 = vld [vmem:[#allocation75_spill] sm:$0xff] }
 0x431   : > { %v2358_v40 = vpop.permute.xlu0 %2357  ;;  %v2354_v52 = vpop.permute.xlu1 %2353  ;;  %7792 = vpow2.f32 %v6701_v48  ;;  %v13640_v48 = vld [vmem:[#allocation114_spill] sm:$0xff] }
 0x432   : > { %v2425_v3 = vsub.f32 %v2358_v40, %v13631_v60  ;;  %v2424_v5 = vsub.f32 %v2354_v52, %v13632_v34  ;;  %v6709_v49 = vmul.f32 -1.442695, %v2446_v0  ;;  %v6708_v18 = vmul.f32 -1.442695, %v2445_v8 }
 0x434   : > { %v2453_v1 = vmul.f32 %v2425_v3, %v13633_v42  ;;  %v2452_v43 = vmul.f32 %v2424_v5, %v13634_v2  ;;  %7794 = vpow2.f32 %v6709_v49  ;;  %v13639_v5 = vld [vmem:[#allocation84_spill] sm:$0xff]  ;;  %v13641_v49 = vld [vmem:[#allocation74_spill] sm:$0xff] }
 0x435   : > { %v2331_v7 = vpop.permute.xlu0 %2330  ;;  %v2300_v23 = vpop.permute.xlu1 %2299  ;;  %7796 = vpow2.f32 %v6708_v18 }
 0x436   : > { %v2419_v11 = vsub.f32 %v2331_v7, %v13635_v44  ;;  %v2412_v50 = vsub.f32 %v2300_v23, %v13636_v24  ;;  %v6716_v13 = vmul.f32 -1.442695, %v2453_v1  ;;  %v6715_v40 = vmul.f32 -1.442695, %v2452_v43 }
 0x438   : > { %v2447_v17 = vmul.f32 %v2419_v11, %v13637_v9  ;;  %v2440_v25 = vmul.f32 %v2412_v50, %v13639_v5  ;;  %7798 = vpow2.f32 %v6716_v13  ;;  %v13642_v50 = vld [vmem:[#allocation55_spill] sm:$0xff]  ;;  %v13670_v5 = vld [vmem:[#allocation86_spill] sm:$0xff] }
 0x439   : > { %v2389_v52 = vpop.permute.xlu0 %2388  ;;  %v2385_v21 = vpop.permute.xlu1 %2384  ;;  %7800 = vpow2.f32 %v6715_v40 }
 0x43a   : > { %v2432_v0 = vsub.f32 %v2389_v52, %v13638_v59  ;;  %v6710_v3 = vmul.f32 -1.442695, %v2447_v17  ;;  %v7791_v23 = vpop.eup %7790  ;;  %v6703_v1 = vmul.f32 -1.442695, %v2440_v25  ;;  %v2431_v43 = vsub.f32 %v2385_v21, %v13641_v49  ;;  %v13644_v25 = vld [vmem:[#allocation69_spill] sm:$0xff]  ;;  %v13668_v49 = vld [vmem:[#allocation40_spill] sm:$0xff] }
 0x43b   : > { %v7793_v11 = vpop.eup %7792  ;;  %v2551_v31 = vadd.f32 1.0, %v7791_v23 }
 0x43c   : > { %v2460_v8 = vmul.f32 %v2432_v0, %v13640_v48  ;;  %7802 = vpow2.f32 %v6710_v3  ;;  %v2550_v17 = vadd.f32 1.0, %v7793_v11  ;;  %v2459_v0 = vmul.f32 %v2431_v43, %v13643_v35  ;;  %v13645_v11 = vld [vmem:[#allocation76_spill] sm:$0xff]  ;;  %v13649_v35 = vld [vmem:[#allocation57_spill] sm:$0xff] }
 0x43d   : > { %v2304_v7 = vpop.permute.xlu0 %2303  ;;  %v2362_v26 = vpop.permute.xlu1 %2361  ;;  %7804 = vpow2.f32 %v6703_v1 }
 0x43e   : > { %v6723_v27 = vmul.f32 -1.442695, %v2460_v8  ;;  %v7795_v52 = vpop.eup %7794  ;;  %v2413_v13 = vsub.f32 %v2304_v7, %v13642_v50  ;;  %v2426_v38 = vsub.f32 %v2362_v26, %v13644_v25  ;;  %v6722_v54 = vmul.f32 -1.442695, %v2459_v0  ;;  %v13667_v50 = vld [vmem:[#allocation151_spill] sm:$0xff] }
 0x43f   : > { %v7797_v40 = vpop.eup %7796  ;;  %v2558_v3 = vadd.f32 1.0, %v7795_v52 }
 0x440   : > { %7806 = vpow2.f32 %v6723_v27  ;;  %v2557_v47 = vadd.f32 1.0, %v7797_v40  ;;  %v2441_v23 = vmul.f32 %v2413_v13, %v13471_v33  ;;  %v13650_v13 = vld [vmem:[#allocation70_spill] sm:$0xff] }
 0x441   : > { %v2393_v28 = vpop.permute.xlu0 %2392  ;;  %v2335_v18 = vpop.permute.xlu1 %2334  ;;  %7808 = vrcp.f32 %v2551_v31  ;;  %v13647_v31 = vld [vmem:[#allocation104_spill] sm:$0xff] }
 0x442   : > { %v7799_v36 = vpop.eup %7798  ;;  %7810 = vrcp.f32 %v2550_v17  ;;  %v2433_v1 = vsub.f32 %v2393_v28, %v13645_v11  ;;  %v2420_v43 = vsub.f32 %v2335_v18, %v13646_v61  ;;  %v2454_v52 = vmul.f32 %v2426_v38, %v13647_v31  ;;  %v13652_v38 = vld [vmem:[#allocation87_spill] sm:$0xff] }
 0x443   : > { %v7801_v8 = vpop.eup %7800  ;;  %v2565_v58 = vadd.f32 1.0, %v7799_v36  ;;  %7812 = vrcp.f32 %v2558_v3  ;;  %v6704_v26 = vmul.f32 -1.442695, %v2441_v23  ;;  %v13651_v36 = vld [vmem:[#allocation95_spill] sm:$0xff] }
 0x444   : > { %v2564_v27 = vadd.f32 1.0, %v7801_v8  ;;  %7814 = vrcp.f32 %v2557_v47  ;;  %v2461_v25 = vmul.f32 %v2433_v1, %v13648_v62  ;;  %v2448_v18 = vmul.f32 %v2420_v43, %v13651_v36  ;;  %v13656_v36 = vld [vmem:[#allocation38_spill] sm:$0xff] }
 0x445   : > { %v2308_v41 = vpop.permute.xlu0 %2307  ;;  %v2366_v21 = vpop.permute.xlu1 %2365  ;;  %7816 = vpow2.f32 %v6722_v54  ;;  %v6717_v3 = vmul.f32 -1.442695, %v2454_v52 }
 0x446   : > { %v7803_v7 = vpop.eup %7802  ;;  %v2414_v17 = vsub.f32 %v2308_v41, %v13649_v35  ;;  %v2427_v51 = vsub.f32 %v2366_v21, %v13650_v13  ;;  %7818 = vrcp.f32 %v2565_v58  ;;  %v6724_v47 = vmul.f32 -1.442695, %v2461_v25  ;;  %v13654_v13 = vld [vmem:[#allocation77_spill] sm:$0xff] }
 0x447   : > { %v2559_v40 = vadd.f32 1.0, %v7803_v7  ;;  %v7805_v11 = vpop.eup %7804  ;;  %7820 = vrcp.f32 %v2564_v27  ;;  %v13653_v7 = vld [vmem:[#allocation105_spill] sm:$0xff]  ;;  %v6711_v21 = vmul.f32 -1.442695, %v2448_v18  ;;  %v13655_v27 = vld [vmem:[#allocation142_spill] sm:$0xff]  ;;  %v13658_v18 = vld [vmem:[#allocation116_spill] sm:$0xff] }
 0x448   : > { %7822 = vpow2.f32 %v6704_v26  ;;  %v2442_v23 = vmul.f32 %v2414_v17, %v13652_v38  ;;  %v2552_v41 = vadd.f32 1.0, %v7805_v11  ;;  %v2455_v54 = vmul.f32 %v2427_v51, %v13653_v7  ;;  %v13657_v38 = vld [vmem:[#allocation141_spill] sm:$0xff] }
 0x449   : > { %v2397_v28 = vpop.permute.xlu0 %2396  ;;  %v2339_v0 = vpop.permute.xlu1 %2338  ;;  %7824 = vrcp.f32 %v2559_v40 }
 0x44a   : > { %v7807_v8 = vpop.eup %7806  ;;  %v2434_v62 = vsub.f32 %v2397_v28, %v13654_v13  ;;  %7826 = vpow2.f32 %v6717_v3  ;;  %v6705_v25 = vmul.f32 -1.442695, %v2442_v23  ;;  %v6718_v11 = vmul.f32 -1.442695, %v2455_v54  ;;  %v13659_v28 = vld [vmem:[#allocation64_spill] sm:$0xff]  ;;  %v13660_v13 = vld [vmem:[#allocation106_spill] sm:$0xff] }
 0x44b   : > { %v7809_v1 = vpop.eup %7808  ;;  %v2572_v31 = vadd.f32 1.0, %v7807_v8  ;;  %7828 = vpow2.f32 %v6724_v47  ;;  %v2421_v8 = vsub.f32 %v2339_v0, %v13659_v28  ;;  %v13663_v0 = vld [vmem:[#allocation97_spill] sm:$0xff] }
 0x44c   : > { %v7811_v35 = vpop.eup %7810  ;;  %v2637_v52 = vmul.f32 %v7809_v1, %v13655_v27  ;;  %v2751_v26 = vmul.f32 %v7809_v1, %v13656_v36  ;;  %7830 = vrcp.f32 %v2552_v41  ;;  %v2462_v7 = vmul.f32 %v2434_v62, %v13658_v18  ;;  %v13661_v27 = vld [vmem:[#allocation58_spill] sm:$0xff] }
 0x44d   : > { %v2312_v58 = vpop.permute.xlu0 %2311  ;;  %v2370_v43 = vpop.permute.xlu1 %2369  ;;  %v2636_v40 = vmul.f32 %v7811_v35, %v13657_v38  ;;  %7832 = vpow2.f32 %v6711_v21  ;;  %v2750_v61 = vmul.f32 %v7811_v35, %v13660_v13  ;;  %v13662_v38 = vld [vmem:[#allocation152_spill] sm:$0xff]  ;;  %v2449_v28 = vmul.f32 %v2421_v8, %v13663_v0 }
 0x44e   : > { %v7813_v17 = vpop.eup %7812  ;;  %7834 = vrcp.f32 %v2572_v31  ;;  %v2415_v33 = vsub.f32 %v2312_v58, %v13661_v27  ;;  %v2665_v47 = vsel %vm1583_vm9, %v2637_v52, 0.0  ;;  %v2779_v23 = vsel %vm1583_vm9, %v2751_v26, 0.0  ;;  %v13664_v58 = vld [vmem:[#allocation120_spill] sm:$0xff] }
 0x44f   : > { %v7815_v51 = vpop.eup %7814  ;;  %7836 = vpow2.f32 %v6705_v25  ;;  %v6725_v41 = vmul.f32 -1.442695, %v2462_v7  ;;  %v2664_v21 = vsel %vm1583_vm9, %v2636_v40, 0.0  ;;  %v2644_v62 = vmul.f32 %v7813_v17, %v13662_v38  ;;  %v13665_v13 = vld [vmem:[#allocation88_spill] sm:$0xff]  ;;  %v13666_v25 = vld [vmem:[#allocation71_spill] sm:$0xff] }
 0x450   : > { %v7817_v3 = vpop.eup %7816  ;;  %7838 = vpow2.f32 %v6718_v11  ;;  %v2758_v27 = vmul.f32 %v7813_v17, %v13664_v58  ;;  %v2443_v26 = vmul.f32 %v2415_v33, %v13665_v13  ;;  %v2428_v7 = vsub.f32 %v2370_v43, %v13666_v25  ;;  %v13669_v11 = vld [vmem:[#allocation92_spill] sm:$0xff]  ;;  %v13671_v13 = vld [vmem:[#allocation127_spill] sm:$0xff]  ;;  %v13672_v25 = vld [vmem:[#allocation42_spill] sm:$0xff] }
 0x451   : > { %v7819_v1 = vpop.eup %7818  ;;  %v11245_v18 = vpop.permute.xlu0 %2400  ;;  %v2571_v52 = vadd.f32 1.0, %v7817_v3  ;;  %v2643_v40 = vmul.f32 %v7815_v51, %v13667_v50  ;;  %v2757_v38 = vmul.f32 %v7815_v51, %v13668_v49  ;;  %7840 = vpow2.f32 %v6725_v41  ;;  %v13673_v51 = vld [vmem:[#allocation27_spill] sm:$0xff] }
 0x452   : > { %v7821_v54 = vpop.eup %7820  ;;  %v11247_v35 = vpop.permute.xlu1 %2342  ;;  %v2651_v48 = vmul.f32 %v7819_v1, %v13669_v11  ;;  %v11255_v8 = vadd.f32 %v2665_v47, %v2664_v21  ;;  %v2778_v0 = vsel %vm1583_vm9, %v2750_v61, 0.0  ;;  %v6712_v17 = vmul.f32 -1.442695, %v2449_v28  ;;  %v13674_v47 = vld [vmem:[#allocation107_spill] sm:$0xff] }
 0x453   : > { %v7823_v31 = vpop.eup %7822  ;;  %v2650_v59 = vmul.f32 %v7821_v54, %v13670_v5  ;;  %v2684_v33 = vsel %vm1583_vm9, %v2644_v62, 0.0  ;;  %v2765_v43 = vmul.f32 %v7819_v1, %v13671_v13  ;;  %v2764_v58 = vmul.f32 %v7821_v54, %v13672_v25  ;;  %v13675_v25 = vld [vmem:[#allocation128_spill] sm:$0xff] }
 0x454   : > { %v7825_v36 = vpop.eup %7824  ;;  %v2553_v50 = vadd.f32 1.0, %v7823_v31  ;;  %7842 = vrcp.f32 %v2571_v52  ;;  %v6706_v41 = vmul.f32 -1.442695, %v2443_v26  ;;  %v2456_v21 = vmul.f32 %v2428_v7, %v13674_v47 }
 0x455   : > { %v7827_v3 = vpop.eup %7826  ;;  %v2645_v49 = vmul.f32 %v7825_v36, %v13673_v51  ;;  %v2798_v61 = vsel %vm1583_vm9, %v2758_v27, 0.0  ;;  %v2683_v28 = vsel %vm1583_vm9, %v2643_v40, 0.0  ;;  %v2797_v5 = vsel %vm1583_vm9, %v2757_v38, 0.0  ;;  %v2316_v1 = vpop.permute.xlu0 %2315 }
 0x456   : > { %v7829_v9 = vpop.eup %7828  ;;  %v2703_v62 = vsel %vm1583_vm9, %v2651_v48, 0.0  ;;  %v2374_v13 = vpop.permute.xlu1 %2373  ;;  %v2702_v31 = vsel %vm1583_vm9, %v2650_v59, 0.0  ;;  %v2759_v51 = vmul.f32 %v7825_v36, %v13675_v25  ;;  %v2566_v52 = vadd.f32 1.0, %v7827_v3  ;;  %v13676_v48 = vld [vmem:[#allocation143_spill] sm:$0xff] }
 0x457   : > { %v7831_v11 = vpop.eup %7830  ;;  %7844 = vpow2.f32 %v6712_v17  ;;  %v2817_v7 = vsel %vm1583_vm9, %v2765_v43, 0.0  ;;  %v2816_v27 = vsel %vm1583_vm9, %v2764_v58, 0.0  ;;  %v2573_v40 = vadd.f32 1.0, %v7829_v9 }
 0x458   : > { %v7833_v54 = vpop.eup %7832  ;;  %7846 = vrcp.f32 %v2553_v50  ;;  %v2686_v38 = vsel %vm1583_vm9, %v2645_v49, 0.0  ;;  %v2638_v24 = vmul.f32 %v7831_v11, %v13676_v48  ;;  %v6719_v44 = vmul.f32 -1.442695, %v2456_v21  ;;  %v13677_v49 = vld [vmem:[#allocation102_spill] sm:$0xff] }
 0x459   : > { %v7835_v26 = vpop.eup %7834  ;;  %7848 = vpow2.f32 %v6706_v41  ;;  %v11274_v59 = vadd.f32 %v2779_v23, %v2778_v0  ;;  %v2685_v36 = vadd.f32 %v2684_v33, %v2683_v28  ;;  %v2799_v3 = vadd.f32 %v2798_v61, %v2797_v5  ;;  %v13678_v41 = vld [vmem:[#allocation158_spill] sm:$0xff]  ;;  %v2405_v23 = vpop.permute.xlu0 %2404 }
 0x45a   : > { %v7837_v47 = vpop.eup %7836  ;;  %v11276_v17 = vadd.f32 %v2703_v62, %v2702_v31  ;;  %v11278_v25 = vadd.f32 %v2817_v7, %v2816_v27  ;;  %v2800_v58 = vsel %vm1583_vm9, %v2759_v51, 0.0  ;;  %7850 = vrcp.f32 %v2566_v52  ;;  %v2347_v0 = vpop.permute.xlu1 %2346  ;;  %v13679_v28 = vld [vmem:[#allocation78_spill] sm:$0xff]  ;;  %v13680_v62 = vld [vmem:[#allocation65_spill] sm:$0xff]  ;;  %v13681_v31 = vld [vmem:[#allocation59_spill] sm:$0xff] }
 0x45b   : > { %v7839_v2 = vpop.eup %7838  ;;  %v2560_v9 = vadd.f32 1.0, %v7833_v54  ;;  %v11281_v43 = vadd.f32 %v2686_v38, %v2685_v36  ;;  %v2752_v48 = vmul.f32 %v7831_v11, %v13677_v49  ;;  %v2658_v21 = vmul.f32 %v7835_v26, %v13678_v41  ;;  %v13682_v7 = vld [vmem:[#allocation72_spill] sm:$0xff]  ;;  %v13686_v49 = vld [vmem:[#allocation93_spill] sm:$0xff] }
 0x45c   : > { %v7841_v50 = vpop.eup %7840  ;;  %7852 = vrcp.f32 %v2573_v40  ;;  %v2667_v5 = vsel %vm1583_vm9, %v2638_v24, 0.0  ;;  %v2554_v33 = vadd.f32 1.0, %v7837_v47  ;;  %v2567_v61 = vadd.f32 1.0, %v7839_v2  ;;  %v13683_v40 = vld [vmem:[#allocation47_spill] sm:$0xff]  ;;  %v13684_v47 = vld [vmem:[#allocation117_spill] sm:$0xff] }
 0x45d   : > { %7854 = vpow2.f32 %v6719_v44  ;;  %v2435_v51 = vsub.f32 %v11245_v18, %v13679_v28  ;;  %v2422_v54 = vsub.f32 %v11247_v35, %v13680_v62  ;;  %v2416_v52 = vsub.f32 %v2316_v1, %v13681_v31  ;;  %v13685_v44 = vld [vmem:[#allocation98_spill] sm:$0xff]  ;;  %v13687_v28 = vld [vmem:[#allocation79_spill] sm:$0xff] }
 0x45e   : > { %v2429_v11 = vsub.f32 %v2374_v13, %v13682_v7  ;;  %v7843_v27 = vpop.eup %7842  ;;  %v11292_v38 = vadd.f32 %v2800_v58, %v2799_v3  ;;  %v2772_v36 = vmul.f32 %v7835_v26, %v13683_v40  ;;  %7856 = vrcp.f32 %v2560_v9  ;;  %v13688_v3 = vld [vmem:[#allocation110_spill] sm:$0xff]  ;;  %v13695_v62 = vld [vmem:[#allocation147_spill] sm:$0xff] }
 0x45f   : > { %v2574_v24 = vadd.f32 1.0, %v7841_v50  ;;  %v2463_v2 = vmul.f32 %v2435_v51, %v13684_v47  ;;  %v2450_v41 = vmul.f32 %v2422_v54, %v13685_v44  ;;  %v2444_v18 = vmul.f32 %v2416_v52, %v13686_v49  ;;  %v13689_v50 = vld [vmem:[#allocation157_spill] sm:$0xff]  ;;  %v2409_v44 = vpop.permute.xlu0 %2408  ;;  %v2378_v52 = vpop.permute.xlu1 %2377 }
 0x460   : > { %v2436_v42 = vsub.f32 %v2405_v23, %v13687_v28  ;;  %v11300_v1 = vadd.f32 %v2667_v5, %v11255_v8  ;;  %v2781_v13 = vsel %vm1583_vm9, %v2752_v48, 0.0  ;;  %7858 = vrcp.f32 %v2554_v33  ;;  %v13690_v5 = vld [vmem:[#allocation46_spill] sm:$0xff]  ;;  %v13691_v33 = vld [vmem:[#allocation119_spill] sm:$0xff] }
 0x461   : > { %v7845_v35 = vpop.eup %7844  ;;  %v2457_v58 = vmul.f32 %v2429_v11, %v13688_v3  ;;  %v2722_v9 = vsel %vm1583_vm9, %v2658_v21, 0.0  ;;  %v2657_v51 = vmul.f32 %v7843_v27, %v13689_v50  ;;  %7860 = vrcp.f32 %v2567_v61  ;;  %v13692_v21 = vld [vmem:[#allocation66_spill] sm:$0xff] }
 0x462   : > { %v7847_v26 = vpop.eup %7846  ;;  %v6726_v54 = vmul.f32 -1.442695, %v2463_v2  ;;  %7862 = vrcp.f32 %v2574_v24  ;;  %v6713_v23 = vmul.f32 -1.442695, %v2450_v41  ;;  %v6707_v28 = vmul.f32 -1.442695, %v2444_v18 }
 0x463   : > { %v7849_v49 = vpop.eup %7848  ;;  %v6720_v8 = vmul.f32 -1.442695, %v2457_v58  ;;  %v2771_v47 = vmul.f32 %v7843_v27, %v13690_v5  ;;  %v2561_v48 = vadd.f32 1.0, %v7845_v35  ;;  %v2464_v11 = vmul.f32 %v2436_v42, %v13691_v33  ;;  %v13693_v50 = vld [vmem:[#allocation82_spill] sm:$0xff]  ;;  %v13694_v2 = vld [vmem:[#allocation73_spill] sm:$0xff]  ;;  %v13696_v35 = vld [vmem:[#allocation124_spill] sm:$0xff] }
 0x464   : > { %7864 = vpow2.f32 %v6726_v54  ;;  %v7851_v3 = vpop.eup %7850  ;;  %v2423_v40 = vsub.f32 %v2347_v0, %v13692_v21  ;;  %v2437_v61 = vsub.f32 %v2409_v44, %v13693_v50  ;;  %v2430_v7 = vsub.f32 %v2378_v52, %v13694_v2  ;;  %v13697_v42 = vld [vmem:[#allocation101_spill] sm:$0xff]  ;;  %v13698_v33 = vld [vmem:[#allocation118_spill] sm:$0xff]  ;;  %v13700_v52 = vld [vmem:[#allocation112_spill] sm:$0xff] }
 0x465   : > { %7866 = vpow2.f32 %v6713_v23  ;;  %v2639_v24 = vmul.f32 %v7847_v26, %v13695_v62  ;;  %v2555_v41 = vadd.f32 1.0, %v7849_v49  ;;  %v6727_v18 = vmul.f32 -1.442695, %v2464_v11  ;;  %v13699_v44 = vld [vmem:[#allocation121_spill] sm:$0xff]  ;;  %v13701_v62 = vld [vmem:[#allocation131_spill] sm:$0xff] }
 0x466   : > { %v7853_v31 = vpop.eup %7852  ;;  %7868 = vpow2.f32 %v6707_v28  ;;  %v2721_v27 = vsel %vm1583_vm9, %v2657_v51, 0.0  ;;  %v2753_v54 = vmul.f32 %v7847_v26, %v13696_v35  ;;  %v2451_v23 = vmul.f32 %v2423_v40, %v13697_v42  ;;  %v13702_v5 = vld [vmem:[#allocation159_spill] sm:$0xff] }
 0x467   : > { %v7855_v58 = vpop.eup %7854  ;;  %7870 = vpow2.f32 %v6720_v8  ;;  %v2652_v0 = vmul.f32 %v7851_v3, %v13698_v33  ;;  %v2465_v50 = vmul.f32 %v2437_v61, %v13699_v44  ;;  %v2458_v2 = vmul.f32 %v2430_v7, %v13700_v52 }
 0x468   : > { %7872 = vpow2.f32 %v6727_v18  ;;  %v7857_v21 = vpop.eup %7856  ;;  %v2766_v49 = vmul.f32 %v7851_v3, %v13701_v62  ;;  %v2568_v28 = vadd.f32 1.0, %v7855_v58  ;;  %v6714_v11 = vmul.f32 -1.442695, %v2451_v23  ;;  %v13703_v18 = vld [vmem:[#allocation48_spill] sm:$0xff] }
 0x469   : > { %7874 = vrcp.f32 %v2561_v48  ;;  %v2836_v51 = vsel %vm1583_vm9, %v2772_v36, 0.0  ;;  %v2659_v26 = vmul.f32 %v7853_v31, %v13702_v5  ;;  %v6728_v8 = vmul.f32 -1.442695, %v2465_v50 }
 0x46a   : > { %7876 = vrcp.f32 %v2555_v41  ;;  %v7859_v40 = vpop.eup %7858  ;;  %v2835_v33 = vsel %vm1583_vm9, %v2771_v47, 0.0  ;;  %v2773_v42 = vmul.f32 %v7853_v31, %v13703_v18  ;;  %v6721_v61 = vmul.f32 -1.442695, %v2458_v2  ;;  %v13704_v2 = vld [vmem:[#allocation56_spill] sm:$0xff] }
 0x46b   : > { %7878 = vpow2.f32 %v6714_v11  ;;  %v7861_v7 = vpop.eup %7860  ;;  %v2782_v52 = vadd.f32 %v2781_v13, %v11274_v59  ;;  %v2723_v3 = vadd.f32 %v2722_v9, %v2721_v27  ;;  %v2669_v48 = vsel %vm1583_vm9, %v2639_v24, 0.0  ;;  %v13705_v9 = vld [vmem:[#allocation41_spill] sm:$0xff]  ;;  %v13706_v27 = vld [vmem:[#allocation148_spill] sm:$0xff] }
 0x46c   : > { %7880 = vpow2.f32 %v6728_v8  ;;  %v7863_v58 = vpop.eup %7862  ;;  %v2783_v36 = vsel %vm1583_vm9, %v2753_v54, 0.0  ;;  %v2705_v41 = vsel %vm1583_vm9, %v2652_v0, 0.0  ;;  %v2819_v50 = vsel %vm1583_vm9, %v2766_v49, 0.0 }
 0x46d   : > { %7882 = vrcp.f32 %v2568_v28  ;;  %v2837_v23 = vadd.f32 %v2836_v51, %v2835_v33  ;;  %v2724_v31 = vsel %vm1583_vm9, %v2659_v26, 0.0  ;;  %v2646_v11 = vmul.f32 %v7857_v21, %v13704_v2  ;;  %v13707_v2 = vld [vmem:[#allocation39_spill] sm:$0xff] }
 0x46e   : > { %v7865_v47 = vpop.eup %7864  ;;  %7884 = vpow2.f32 %v6721_v61  ;;  %v2838_v13 = vsel %vm1583_vm9, %v2773_v42, 0.0  ;;  %v2760_v24 = vmul.f32 %v7857_v21, %v13705_v9  ;;  %v2640_v8 = vmul.f32 %v7859_v40, %v13706_v27 }
 0x46f   : > { %v7867_v59 = vpop.eup %7866  ;;  %v2575_v54 = vadd.f32 1.0, %v7865_v47  ;;  %v2670_v0 = vadd.f32 %v2669_v48, %v11300_v1  ;;  %v2784_v49 = vadd.f32 %v2783_v36, %v2782_v52  ;;  %v2706_v28 = vadd.f32 %v2705_v41, %v11276_v17  ;;  %v13708_v48 = vld [vmem:[#allocation153_spill] sm:$0xff]  ;;  %v13709_v36 = vld [vmem:[#allocation43_spill] sm:$0xff]  ;;  %v13710_v41 = vld [vmem:[#allocation160_spill] sm:$0xff] }
 0x470   : > { %v7869_v18 = vpop.eup %7868  ;;  %v2820_v33 = vadd.f32 %v2819_v50, %v11278_v25  ;;  %v2725_v26 = vadd.f32 %v2724_v31, %v2723_v3  ;;  %v2754_v61 = vmul.f32 %v7859_v40, %v13707_v2  ;;  %v2562_v5 = vadd.f32 1.0, %v7867_v59 }
 0x471   : > { %v7871_v51 = vpop.eup %7870  ;;  %7886 = vrcp.f32 %v2575_v54  ;;  %v2839_v62 = vadd.f32 %v2838_v13, %v2837_v23  ;;  %v2688_v21 = vsel %vm1583_vm9, %v2646_v11, 0.0  ;;  %v2556_v27 = vadd.f32 1.0, %v7869_v18  ;;  %v13711_v11 = vld [vmem:[#allocation140_spill] sm:$0xff]  ;;  %v13714_v54 = vld [vmem:[#allocation123_spill] sm:$0xff] }
 0x472   : > { %v7873_v42 = vpop.eup %7872  ;;  %v2569_v47 = vadd.f32 1.0, %v7871_v51  ;;  %v2802_v1 = vsel %vm1583_vm9, %v2760_v24, 0.0  ;;  %v2671_v52 = vsel %vm1583_vm9, %v2640_v8, 0.0  ;;  %7888 = vrcp.f32 %v2562_v5  ;;  %v13713_v8 = vld [vmem:[#allocation100_spill] sm:$0xff] }
 0x473   : > { %v7875_v9 = vpop.eup %7874  ;;  %v2576_v17 = vadd.f32 1.0, %v7873_v42  ;;  %v2653_v3 = vmul.f32 %v7861_v7, %v13708_v48  ;;  %v2767_v40 = vmul.f32 %v7861_v7, %v13709_v36  ;;  %v2660_v50 = vmul.f32 %v7863_v58, %v13710_v41 }
 0x474   : > { %v7877_v25 = vpop.eup %7876  ;;  %7890 = vrcp.f32 %v2556_v27  ;;  %v2689_v31 = vadd.f32 %v2688_v21, %v11281_v43  ;;  %v2785_v18 = vsel %vm1583_vm9, %v2754_v61, 0.0  ;;  %v13712_v59 = vmov %v13711_v11  ;;  %v13715_v27 = vld [vmem:[#allocation50_spill] sm:$0xff] }
 0x475   : > { %v7879_v23 = vpop.eup %7878  ;;  %v2774_v13 = vmul.f32 %v7863_v58, %v13711_v11  ;;  %7892 = vrcp.f32 %v2569_v47  ;;  %v2647_v5 = vmul.f32 %v7875_v9, %v13713_v8  ;;  %v2761_v51 = vmul.f32 %v7875_v9, %v13714_v54  ;;  %v13716_v11 = vld [vmem:[#allocation109_spill] sm:$0xff] }
 0x476   : > { %v7881_v24 = vpop.eup %7880  ;;  %7894 = vrcp.f32 %v2576_v17  ;;  %v2563_v42 = vadd.f32 1.0, %v7879_v23  ;;  %v2803_v7 = vadd.f32 %v2802_v1, %v11292_v38  ;;  %v2672_v41 = vadd.f32 %v2671_v52, %v2670_v0  ;;  %v13717_v1 = vld [vmem:[#allocation154_spill] sm:$0xff] }
 0x477   : > { %v7883_v48 = vpop.eup %7882  ;;  %v2641_v36 = vmul.f32 %v7877_v25, %v13715_v27  ;;  %v2577_v2 = vadd.f32 1.0, %v7881_v24  ;;  %v2707_v61 = vsel %vm1583_vm9, %v2653_v3, 0.0  ;;  %v2821_v58 = vsel %vm1583_vm9, %v2767_v40, 0.0 }
 0x478   : > { %v7885_v43 = vpop.eup %7884  ;;  %v2726_v21 = vsel %vm1583_vm9, %v2660_v50, 0.0  ;;  %7896 = vrcp.f32 %v2563_v42  ;;  %v2786_v47 = vadd.f32 %v2785_v18, %v2784_v49  ;;  %v2755_v9 = vmul.f32 %v7877_v25, %v13716_v11  ;;  %v13718_v42 = vld [vmem:[#allocation44_spill] sm:$0xff]  ;;  %v13719_v18 = vld [vmem:[#allocation161_spill] sm:$0xff] }
 0x479   : > { %7898 = vrcp.f32 %v2577_v2  ;;  %v2570_v17 = vadd.f32 1.0, %v7885_v43  ;;  %v2840_v23 = vsel %vm1583_vm9, %v2774_v13, 0.0  ;;  %v2690_v38 = vsel %vm1583_vm9, %v2647_v5, 0.0  ;;  %v13720_v2 = vld [vmem:[#allocation138_spill] sm:$0xff] }
 0x47a   : > { %v2804_v0 = vsel %vm1583_vm9, %v2761_v51, 0.0  ;;  %v2654_v52 = vmul.f32 %v7883_v48, %v13717_v1  ;;  %v2708_v3 = vadd.f32 %v2707_v61, %v2706_v28  ;;  %v2822_v27 = vadd.f32 %v2821_v58, %v2820_v33  ;;  %v13722_v61 = vld [vmem:[#allocation125_spill] sm:$0xff] }
 0x47b   : > { %v7887_v24 = vpop.eup %7886  ;;  %v2727_v40 = vadd.f32 %v2726_v21, %v2725_v26  ;;  %v2673_v50 = vsel %vm1583_vm9, %v2641_v36, 0.0  ;;  %v2768_v49 = vmul.f32 %v7883_v48, %v13718_v42  ;;  %7900 = vrcp.f32 %v2570_v17  ;;  %v13721_v26 = vld [vmem:[#allocation111_spill] sm:$0xff]  ;;  %v13723_v17 = vld [vmem:[#allocation150_spill] sm:$0xff] }
 0x47c   : > { %v2661_v25 = vmul.f32 %v7887_v24, %v13719_v18  ;;  %v2775_v43 = vmul.f32 %v7887_v24, %v13720_v2  ;;  %v7889_v13 = vpop.eup %7888  ;;  %v2841_v11 = vadd.f32 %v2840_v23, %v2839_v62  ;;  %v2691_v5 = vadd.f32 %v2690_v38, %v2689_v31  ;;  %v13724_v62 = vld [vmem:[#allocation126_spill] sm:$0xff] }
 0x47d   : > { %v2805_v8 = vadd.f32 %v2804_v0, %v2803_v7  ;;  %v2787_v51 = vsel %vm1583_vm9, %v2755_v9, 0.0  ;;  %v2709_v28 = vsel %vm1583_vm9, %v2654_v52, 0.0  ;;  %v2648_v36 = vmul.f32 %v7889_v13, %v13721_v26 }
 0x47e   : > { %v7891_v1 = vpop.eup %7890  ;;  %v2728_v33 = vsel %vm1583_vm9, %v2661_v25, 0.0  ;;  %v2762_v48 = vmul.f32 %v7889_v13, %v13722_v61  ;;  %v2674_v21 = vadd.f32 %v2673_v50, %v2672_v41  ;;  %v2842_v24 = vsel %vm1583_vm9, %v2775_v43, 0.0 }
 0x47f   : > { %v7893_v58 = vpop.eup %7892  ;;  %v2642_v2 = vmul.f32 %v7891_v1, %v13723_v17  ;;  %v2756_v31 = vmul.f32 %v7891_v1, %v13724_v62  ;;  %v2788_v23 = vadd.f32 %v2787_v51, %v2786_v47  ;;  %v2823_v9 = vsel %vm1583_vm9, %v2768_v49, 0.0  ;;  %v13725_v17 = vld [vmem:[#allocation155_spill] sm:$0xff]  ;;  %v13726_v1 = vld [vmem:[#allocation130_spill] sm:$0xff] }
 0x480   : > { %v7895_v7 = vpop.eup %7894  ;;  %v2692_v38 = vsel %vm1583_vm9, %v2648_v36, 0.0  ;;  %v2806_v0 = vsel %vm1583_vm9, %v2762_v48, 0.0  ;;  %v2710_v52 = vadd.f32 %v2709_v28, %v2708_v3  ;;  %v2729_v25 = vadd.f32 %v2728_v33, %v2727_v40  ;;  %v13727_v28 = vld [vmem:[#allocation32_spill] sm:$0xff]  ;;  %v13728_v33 = vld [vmem:[#allocation129_spill] sm:$0xff] }
 0x481   : > { %v2675_v13 = vsel %vm2074_vm5, %v2642_v2, 0.0  ;;  %v2789_v41 = vsel %vm2074_vm5, %v2756_v31, 0.0  ;;  %v2843_v43 = vadd.f32 %v2842_v24, %v2841_v11  ;;  %v2655_v26 = vmul.f32 %v7893_v58, %v13725_v17 }
 0x482   : > { %v7897_v50 = vpop.eup %7896  ;;  %v2790_v61 = vadd.f32 %v2789_v41, %v2788_v23  ;;  %v2769_v62 = vmul.f32 %v7893_v58, %v13726_v1  ;;  %v2693_v51 = vadd.f32 %v2692_v38, %v2691_v5  ;;  %v2807_v49 = vadd.f32 %v2806_v0, %v2805_v8 }
 0x483   : > { %v7899_v47 = vpop.eup %7898  ;;  %v2662_v36 = vmul.f32 %v7895_v7, %v13580_v45  ;;  %v2776_v48 = vmul.f32 %v7895_v7, %v13577_v55  ;;  %v2676_v3 = vadd.f32 %v2675_v13, %v2674_v21  ;;  %v2649_v2 = vmul.f32 %v7897_v50, %v13727_v28  ;;  %v13729_v28 = vld [vmem:[#allocation156_spill] sm:$0xff]  ;;  %v13730_v55 = vld [vmem:[#allocation45_spill] sm:$0xff] }
 0x484   : > { %v2791_v40 = vrot.slane %v2790_v61, 4  ;;  %v2763_v31 = vmul.f32 %v7897_v50, %v13728_v33  ;;  %v2663_v23 = vmul.f32 %v7899_v47, %v13582_v15  ;;  %v2777_v58 = vmul.f32 %v7899_v47, %v13581_v22 }
 0x485   : > { %v2730_v11 = vsel %vm1583_vm9, %v2662_v36, 0.0  ;;  %v2844_v24 = vsel %vm1583_vm9, %v2776_v48, 0.0  ;;  %v7901_v5 = vpop.eup %7900  ;;  %v2711_v8 = vsel %vm1583_vm9, %v2655_v26, 0.0  ;;  %v2825_v38 = vsel %vm1583_vm9, %v2769_v62, 0.0 }
 0x486   : > { %v2731_v7 = vadd.f32 %v2730_v11, %v2729_v25  ;;  %v2845_v21 = vadd.f32 %v2844_v24, %v2843_v43  ;;  %v2694_v0 = vsel %vm2074_vm5, %v2649_v2, 0.0  ;;  %v2808_v13 = vsel %vm2074_vm5, %v2763_v31, 0.0 }
 0x487   : > { %v2732_v41 = vsel %vm2074_vm5, %v2663_v23, 0.0  ;;  %v2846_v50 = vsel %vm2074_vm5, %v2777_v58, 0.0  ;;  %v2824_v36 = vadd.f32 %v2823_v9, %v2822_v27  ;;  %v2792_v48 = vadd.f32 %v2791_v40, %v2790_v61 }
 0x488   : > { %v2695_v15 = vadd.f32 %v2694_v0, %v2693_v51  ;;  %v2809_v33 = vadd.f32 %v2808_v13, %v2807_v49  ;;  %v2733_v47 = vadd.f32 %v2732_v41, %v2731_v7  ;;  %v2847_v22 = vadd.f32 %v2846_v50, %v2845_v21 }
 0x489   : > { %v2656_v26 = vmul.f32 %v7901_v5, %v13729_v28  ;;  %v2770_v62 = vmul.f32 %v7901_v5, %v13730_v55  ;;  %v2712_v25 = vadd.f32 %v2711_v8, %v2710_v52  ;;  %v2826_v43 = vadd.f32 %v2825_v38, %v2824_v36 }
 0x48a   : > { %v2696_v11 = vrot.slane %v2695_v15, 4  ;;  %v2810_v2 = vrot.slane %v2809_v33, 4  ;;  %v2677_v24 = vrot.slane %v2676_v3, 4  ;;  %v2848_v31 = vrot.slane %v2847_v22, 4 }
 0x48b   : > { %v2713_v23 = vsel %vm2074_vm5, %v2656_v26, 0.0  ;;  %v2827_v58 = vsel %vm2074_vm5, %v2770_v62, 0.0  ;;  %v2793_v27 = vrot.slane %v2792_v48, 2  ;;  %v2734_v9 = vrot.slane %v2733_v47, 4 }
 0x48c   : > { %v2811_v61 = vadd.f32 %v2810_v2, %v2809_v33  ;;  %v2697_v51 = vadd.f32 %v2696_v11, %v2695_v15  ;;  %v2849_v49 = vadd.f32 %v2848_v31, %v2847_v22  ;;  %v2714_v40 = vadd.f32 %v2713_v23, %v2712_v25 }
 0x48d   : > { %v2828_v7 = vadd.f32 %v2827_v58, %v2826_v43  ;;  %v2678_v0 = vadd.f32 %v2677_v24, %v2676_v3  ;;  %v2794_v38 = vadd.f32 %v2793_v27, %v2792_v48  ;;  %v2735_v41 = vadd.f32 %v2734_v9, %v2733_v47 }
 0x48e   : > { %v2812_v21 = vrot.slane %v2811_v61, 2  ;;  %v2850_v5 = vrot.slane %v2849_v49, 2  ;;  %v2715_v52 = vrot.slane %v2714_v40, 4  ;;  %v2698_v50 = vrot.slane %v2697_v51, 2 }
 0x48f   : > { %v2829_v8 = vrot.slane %v2828_v7, 4  ;;  %v2679_v28 = vrot.slane %v2678_v0, 2  ;;  %v2795_v15 = vrot.slane %v2794_v38, 1  ;;  %v2736_v43 = vrot.slane %v2735_v41, 2 }
 0x490   : > { %v2813_v13 = vadd.f32 %v2812_v21, %v2811_v61  ;;  %v2851_v36 = vadd.f32 %v2850_v5, %v2849_v49  ;;  %v2716_v26 = vadd.f32 %v2715_v52, %v2714_v40  ;;  %v2699_v25 = vadd.f32 %v2698_v50, %v2697_v51 }
 0x491   : > { %v2830_v55 = vadd.f32 %v2829_v8, %v2828_v7  ;;  %v2680_v31 = vadd.f32 %v2679_v28, %v2678_v0  ;;  %v2796_v48 = vadd.f32 %v2795_v15, %v2794_v38  ;;  %v2737_v27 = vadd.f32 %v2736_v43, %v2735_v41 }
 0x492   : > { %v2814_v62 = vrot.slane %v2813_v13, 1  ;;  %v2717_v33 = vrot.slane %v2716_v26, 2  ;;  %v2852_v22 = vrot.slane %v2851_v36, 1  ;;  %v2700_v47 = vrot.slane %v2699_v25, 1 }
 0x493   : > { %v2831_v2 = vrot.slane %v2830_v55, 2  ;;  %v2681_v40 = vrot.slane %v2680_v31, 1  ;;  %v2738_v5 = vrot.slane %v2737_v27, 1  ;;  %v2634_v41 = vmul.f32 %v11190_v20, %v13614_v39 }
 0x494   : > { %v2815_v3 = vadd.f32 %v2814_v62, %v2813_v13  ;;  %v2718_v24 = vadd.f32 %v2717_v33, %v2716_v26  ;;  %v2853_v58 = vadd.f32 %v2852_v22, %v2851_v36  ;;  %v2701_v51 = vadd.f32 %v2700_v47, %v2699_v25 }
 0x495   : > { %v2832_v11 = vadd.f32 %v2831_v2, %v2830_v55  ;;  %v2682_v28 = vadd.f32 %v2681_v40, %v2680_v31  ;;  %v2739_v38 = vadd.f32 %v2738_v5, %v2737_v27  ;;  %v2635_v26 = vadd.f32 %v2634_v41, %v13616_v57 }
 0x496   : > { %v2858_v9 = vsel %vm2144_vm12, %v2815_v3, %v2796_v48  ;;  %v2719_v49 = vrot.slane %v2718_v24, 1 }
 0x497   : > { %v2833_v23 = vrot.slane %v2832_v11, 1  ;;  %v2744_v8 = vsel %vm2144_vm12, %v2701_v51, %v2682_v28 }
 0x498   : > { %v2720_v52 = vadd.f32 %v2719_v49, %v2718_v24 }
 0x499   : > { %v2834_v61 = vadd.f32 %v2833_v23, %v2832_v11 }
 0x49a   : > { %v2745_v50 = vsel %vm2146_vm14, %v2720_v52, %v2744_v8  ;;  %v13731_v52 = vld [vmem:[#allocation103_spill] sm:$0xff] }
 0x49b   : > { %v2859_v7 = vsel %vm2146_vm14, %v2834_v61, %v2858_v9  ;;  %v2746_v36 = vsel %vm2148_vm1, %v2739_v38, %v2745_v50  ;;  %v13732_v8 = vld [vmem:[#allocation99_spill] sm:$0xff] }
 0x49c   : > { %v2860_v21 = vsel %vm2148_vm1, %v2853_v58, %v2859_v7  ;;  %v2748_v62 = vadd.f32 %v2746_v36, %v2635_v26  ;;  %v13733_v36 = vld [vmem:[#allocation62_spill] sm:$0xff] }
 0x49d   : > { %v2862_v55 = vadd.f32 %v2860_v21, %v13612_v10 }
 0x49e   : > { %v2749_v33 = vadd.f32 %v2748_v62, %v11187_v16  ;;  %v13734_v62 = vld [vmem:[#allocation53_spill] sm:$0xff] }
 0x49f   : > { %v2863_v0 = vadd.f32 %v2862_v55, %v11175_v56 }
 0x4a1   : > { %v2864_v13 = vadd.f32 1e-08, %v2863_v0 }
 0x4a3   : > { %7902 = vrcp.f32 %v2864_v13 }
 0x4ad   : > { %v7903_v2 = vpop.eup %7902 }
 0x4ae   : > { %v11407_v15 = vmul.f32 %v7903_v2, %v2749_v33 }
 0x4b0   : > { %v2870_v22 = vrot.slane %v11407_v15, %v13618_v30  ;;  %v2901_v20 = vrot.slane %v11407_v15, %v13619_v29  ;;  %v2932_v25 = vrot.slane %v11407_v15, %v13620_v19  ;;  %v2963_v43 = vrot.slane %v11407_v15, %v13621_v14 }
 0x4b2   : > { %2876 = vbcast.lane.b32.xlu0 %v2870_v22, 264  ;;  %2872 = vbcast.lane.b32.xlu1 %v2870_v22, 256 }
 0x4b6   : > { %2907 = vbcast.lane.b32.xlu0 %v2901_v20, 264  ;;  %2903 = vbcast.lane.b32.xlu1 %v2901_v20, 256 }
 0x4ba   : > { %2938 = vbcast.lane.b32.xlu0 %v2932_v25, 264  ;;  %2934 = vbcast.lane.b32.xlu1 %v2932_v25, 256 }
 0x4be   : > { %2911 = vbcast.lane.b32.xlu0 %v2901_v20, 272  ;;  %2880 = vbcast.lane.b32.xlu1 %v2870_v22, 272 }
 0x4c2   : > { %2969 = vbcast.lane.b32.xlu0 %v2963_v43, 264  ;;  %2965 = vbcast.lane.b32.xlu1 %v2963_v43, 256 }
 0x4c6   : > { %2884 = vbcast.lane.b32.xlu0 %v2870_v22, 280  ;;  %2942 = vbcast.lane.b32.xlu1 %v2932_v25, 272 }
 0x4ca   : > { %2973 = vbcast.lane.b32.xlu0 %v2963_v43, 272  ;;  %2915 = vbcast.lane.b32.xlu1 %v2901_v20, 280 }
 0x4ce   : > { %2888 = vbcast.lane.b32.xlu0 %v2870_v22, 288  ;;  %2946 = vbcast.lane.b32.xlu1 %v2932_v25, 280 }
 0x4d2   : > { %2977 = vbcast.lane.b32.xlu0 %v2963_v43, 280  ;;  %2919 = vbcast.lane.b32.xlu1 %v2901_v20, 288 }
 0x4d6   : > { %2892 = vbcast.lane.b32.xlu0 %v2870_v22, 296  ;;  %2950 = vbcast.lane.b32.xlu1 %v2932_v25, 288 }
 0x4da   : > { %2981 = vbcast.lane.b32.xlu0 %v2963_v43, 288  ;;  %2923 = vbcast.lane.b32.xlu1 %v2901_v20, 296 }
 0x4de   : > { %2896 = vbcast.lane.b32.xlu0 %v2870_v22, 304  ;;  %2954 = vbcast.lane.b32.xlu1 %v2932_v25, 296  ;;  %v13735_v22 = vld [vmem:[#allocation94_spill] sm:$0xff] }
 0x4e2   : > { %2985 = vbcast.lane.b32.xlu0 %v2963_v43, 296  ;;  %2927 = vbcast.lane.b32.xlu1 %v2901_v20, 304 }
 0x4e6   : > { %2989 = vbcast.lane.b32.xlu0 %v2963_v43, 304  ;;  %2958 = vbcast.lane.b32.xlu1 %v2932_v25, 304 }
 0x524   : > { %v2877_v11 = vpop.permute.xlu0 %2876  ;;  %v2873_v3 = vpop.permute.xlu1 %2872 }
 0x525   : > { %v2992_v24 = vsub.f32 %v2877_v11, %v13622_v63  ;;  %v2991_v31 = vsub.f32 %v2873_v3, %v13623_v46  ;;  %v13736_v3 = vld [vmem:[#allocation75_spill] sm:$0xff] }
 0x527   : > { %v3020_v23 = vmul.f32 %v2992_v24, %v13624_v37  ;;  %v3019_v47 = vmul.f32 %v2991_v31, %v13625_v53 }
 0x528   : > { %v2908_v48 = vpop.permute.xlu0 %2907  ;;  %v2904_v58 = vpop.permute.xlu1 %2903 }
 0x529   : > { %v2999_v27 = vsub.f32 %v2908_v48, %v13627_v12  ;;  %v2998_v61 = vsub.f32 %v2904_v58, %v13628_v4  ;;  %v6730_v9 = vmul.f32 -1.442695, %v3020_v23  ;;  %v6729_v21 = vmul.f32 -1.442695, %v3019_v47  ;;  %v13737_v23 = vld [vmem:[#allocation84_spill] sm:$0xff]  ;;  %v13738_v58 = vld [vmem:[#allocation114_spill] sm:$0xff] }
 0x52a   : > { %v13795_v12 = vld [vmem:[#allocation147_spill] sm:$0xff] }
 0x52b   : > { %v3027_v49 = vmul.f32 %v2999_v27, %v13629_v6  ;;  %v3026_v51 = vmul.f32 %v2998_v61, %v13630_v32  ;;  %7904 = vpow2.f32 %v6730_v9 }
 0x52c   : > { %v2939_v40 = vpop.permute.xlu0 %2938  ;;  %v2935_v7 = vpop.permute.xlu1 %2934  ;;  %7906 = vpow2.f32 %v6729_v21 }
 0x52d   : > { %v3006_v5 = vsub.f32 %v2939_v40, %v13631_v60  ;;  %v3005_v55 = vsub.f32 %v2935_v7, %v13632_v34  ;;  %v6737_v0 = vmul.f32 -1.442695, %v3027_v49  ;;  %v6736_v50 = vmul.f32 -1.442695, %v3026_v51  ;;  %v13739_v7 = vld [vmem:[#allocation74_spill] sm:$0xff] }
 0x52f   : > { %v3034_v28 = vmul.f32 %v3006_v5, %v13731_v52  ;;  %v3033_v38 = vmul.f32 %v3005_v55, %v13732_v8  ;;  %7908 = vpow2.f32 %v6737_v0  ;;  %v13769_v8 = vld [vmem:[#allocation86_spill] sm:$0xff] }
 0x530   : > { %v2912_v13 = vpop.permute.xlu0 %2911  ;;  %v2881_v41 = vpop.permute.xlu1 %2880  ;;  %7910 = vpow2.f32 %v6736_v50 }
 0x531   : > { %v3000_v26 = vsub.f32 %v2912_v13, %v13733_v36  ;;  %v2993_v33 = vsub.f32 %v2881_v41, %v13734_v62  ;;  %v6744_v2 = vmul.f32 -1.442695, %v3034_v28  ;;  %v6743_v25 = vmul.f32 -1.442695, %v3033_v38  ;;  %v13740_v13 = vld [vmem:[#allocation55_spill] sm:$0xff]  ;;  %v13767_v62 = vld [vmem:[#allocation40_spill] sm:$0xff] }
 0x533   : > { %v3028_v20 = vmul.f32 %v3000_v26, %v13735_v22  ;;  %v3021_v48 = vmul.f32 %v2993_v33, %v13737_v23  ;;  %7912 = vpow2.f32 %v6744_v2  ;;  %v13741_v26 = vld [vmem:[#allocation113_spill] sm:$0xff]  ;;  %v13766_v22 = vld [vmem:[#allocation151_spill] sm:$0xff] }
 0x534   : > { %v2970_v43 = vpop.permute.xlu0 %2969  ;;  %v2966_v11 = vpop.permute.xlu1 %2965  ;;  %7914 = vpow2.f32 %v6743_v25  ;;  %v13742_v25 = vld [vmem:[#allocation69_spill] sm:$0xff] }
 0x535   : > { %v3013_v24 = vsub.f32 %v2970_v43, %v13736_v3  ;;  %v6738_v31 = vmul.f32 -1.442695, %v3028_v20  ;;  %v7905_v9 = vpop.eup %7904  ;;  %v6731_v49 = vmul.f32 -1.442695, %v3021_v48  ;;  %v3012_v21 = vsub.f32 %v2966_v11, %v13739_v7  ;;  %v13748_v23 = vld [vmem:[#allocation57_spill] sm:$0xff] }
 0x536   : > { %v7907_v40 = vpop.eup %7906  ;;  %v3132_v28 = vadd.f32 1.0, %v7905_v9 }
 0x537   : > { %v3041_v47 = vmul.f32 %v3013_v24, %v13738_v58  ;;  %7916 = vpow2.f32 %v6738_v31  ;;  %v3131_v38 = vadd.f32 1.0, %v7907_v40  ;;  %v3040_v33 = vmul.f32 %v3012_v21, %v13741_v26  ;;  %v13744_v40 = vld [vmem:[#allocation76_spill] sm:$0xff]  ;;  %v13745_v58 = vld [vmem:[#allocation63_spill] sm:$0xff] }
 0x538   : > { %v2885_v27 = vpop.permute.xlu0 %2884  ;;  %v2943_v61 = vpop.permute.xlu1 %2942  ;;  %7918 = vpow2.f32 %v6731_v49 }
 0x539   : > { %v6751_v51 = vmul.f32 -1.442695, %v3041_v47  ;;  %v7909_v0 = vpop.eup %7908  ;;  %v2994_v41 = vsub.f32 %v2885_v27, %v13740_v13  ;;  %v3007_v43 = vsub.f32 %v2943_v61, %v13742_v25  ;;  %v13743_v47 = vld [vmem:[#allocation85_spill] sm:$0xff]  ;;  %v6750_v7 = vmul.f32 -1.442695, %v3040_v33  ;;  %v13747_v25 = vld [vmem:[#allocation115_spill] sm:$0xff] }
 0x53a   : > { %v7911_v50 = vpop.eup %7910  ;;  %v3139_v20 = vadd.f32 1.0, %v7909_v0 }
 0x53b   : > { %7920 = vpow2.f32 %v6751_v51  ;;  %v3138_v48 = vadd.f32 1.0, %v7911_v50  ;;  %v3022_v9 = vmul.f32 %v2994_v41, %v13743_v47  ;;  %v13749_v41 = vld [vmem:[#allocation70_spill] sm:$0xff] }
 0x53c   : > { %v2974_v5 = vpop.permute.xlu0 %2973  ;;  %v2916_v55 = vpop.permute.xlu1 %2915  ;;  %7922 = vrcp.f32 %v3132_v28  ;;  %v13746_v28 = vld [vmem:[#allocation104_spill] sm:$0xff] }
 0x53d   : > { %v7913_v2 = vpop.eup %7912  ;;  %7924 = vrcp.f32 %v3131_v38  ;;  %v3014_v49 = vsub.f32 %v2974_v5, %v13744_v40  ;;  %v3001_v21 = vsub.f32 %v2916_v55, %v13745_v58  ;;  %v3035_v0 = vmul.f32 %v3007_v43, %v13746_v28 }
 0x53e   : > { %v7915_v31 = vpop.eup %7914  ;;  %v3146_v13 = vadd.f32 1.0, %v7913_v2  ;;  %7926 = vrcp.f32 %v3139_v20  ;;  %v6732_v61 = vmul.f32 -1.442695, %v3022_v9  ;;  %v13750_v2 = vld [vmem:[#allocation95_spill] sm:$0xff] }
 0x53f   : > { %v3145_v51 = vadd.f32 1.0, %v7915_v31  ;;  %7928 = vrcp.f32 %v3138_v48  ;;  %v3042_v26 = vmul.f32 %v3014_v49, %v13747_v25  ;;  %v3029_v55 = vmul.f32 %v3001_v21, %v13750_v2  ;;  %v13751_v48 = vld [vmem:[#allocation87_spill] sm:$0xff]  ;;  %v13755_v2 = vld [vmem:[#allocation38_spill] sm:$0xff] }
 0x540   : > { %v2889_v24 = vpop.permute.xlu0 %2888  ;;  %v2947_v11 = vpop.permute.xlu1 %2946  ;;  %7930 = vpow2.f32 %v6750_v7  ;;  %v6745_v20 = vmul.f32 -1.442695, %v3035_v0 }
 0x541   : > { %v7917_v27 = vpop.eup %7916  ;;  %v2995_v38 = vsub.f32 %v2889_v24, %v13748_v23  ;;  %v3008_v47 = vsub.f32 %v2947_v11, %v13749_v41  ;;  %7932 = vrcp.f32 %v3146_v13  ;;  %v6752_v43 = vmul.f32 -1.442695, %v3042_v26  ;;  %v13753_v41 = vld [vmem:[#allocation77_spill] sm:$0xff] }
 0x542   : > { %v3140_v50 = vadd.f32 1.0, %v7917_v27  ;;  %v7919_v40 = vpop.eup %7918  ;;  %7934 = vrcp.f32 %v3145_v51  ;;  %v13752_v27 = vld [vmem:[#allocation105_spill] sm:$0xff]  ;;  %v6739_v11 = vmul.f32 -1.442695, %v3029_v55  ;;  %v13754_v51 = vld [vmem:[#allocation142_spill] sm:$0xff]  ;;  %v13757_v55 = vld [vmem:[#allocation116_spill] sm:$0xff] }
 0x543   : > { %7936 = vpow2.f32 %v6732_v61  ;;  %v3023_v9 = vmul.f32 %v2995_v38, %v13751_v48  ;;  %v3133_v24 = vadd.f32 1.0, %v7919_v40  ;;  %v3036_v7 = vmul.f32 %v3008_v47, %v13752_v27  ;;  %v13756_v48 = vld [vmem:[#allocation141_spill] sm:$0xff] }
 0x544   : > { %v2978_v5 = vpop.permute.xlu0 %2977  ;;  %v2920_v33 = vpop.permute.xlu1 %2919  ;;  %7938 = vrcp.f32 %v3140_v50 }
 0x545   : > { %v7921_v31 = vpop.eup %7920  ;;  %v3015_v25 = vsub.f32 %v2978_v5, %v13753_v41  ;;  %7940 = vpow2.f32 %v6745_v20  ;;  %v6733_v26 = vmul.f32 -1.442695, %v3023_v9  ;;  %v6746_v40 = vmul.f32 -1.442695, %v3036_v7  ;;  %v13758_v5 = vld [vmem:[#allocation64_spill] sm:$0xff]  ;;  %v13759_v41 = vld [vmem:[#allocation106_spill] sm:$0xff] }
 0x546   : > { %v7923_v49 = vpop.eup %7922  ;;  %v3153_v28 = vadd.f32 1.0, %v7921_v31  ;;  %7942 = vpow2.f32 %v6752_v43  ;;  %v3002_v31 = vsub.f32 %v2920_v33, %v13758_v5  ;;  %v13762_v33 = vld [vmem:[#allocation97_spill] sm:$0xff] }
 0x547   : > { %v7925_v23 = vpop.eup %7924  ;;  %v3218_v0 = vmul.f32 %v7923_v49, %v13754_v51  ;;  %v3332_v61 = vmul.f32 %v7923_v49, %v13755_v2  ;;  %7944 = vrcp.f32 %v3133_v24  ;;  %v3043_v27 = vmul.f32 %v3015_v25, %v13757_v55  ;;  %v13760_v51 = vld [vmem:[#allocation58_spill] sm:$0xff] }
 0x548   : > { %v2893_v13 = vpop.permute.xlu0 %2892  ;;  %v2951_v21 = vpop.permute.xlu1 %2950  ;;  %v3217_v50 = vmul.f32 %v7925_v23, %v13756_v48  ;;  %7946 = vpow2.f32 %v6739_v11  ;;  %v3331_v58 = vmul.f32 %v7925_v23, %v13759_v41  ;;  %v13761_v48 = vld [vmem:[#allocation152_spill] sm:$0xff]  ;;  %v3030_v5 = vmul.f32 %v3002_v31, %v13762_v33 }
 0x549   : > { %v7927_v38 = vpop.eup %7926  ;;  %7948 = vrcp.f32 %v3153_v28  ;;  %v2996_v3 = vsub.f32 %v2893_v13, %v13760_v51  ;;  %v3246_v43 = vsel %vm1583_vm9, %v3218_v0, 0.0  ;;  %v3360_v9 = vsel %vm1583_vm9, %v3332_v61, 0.0  ;;  %v13763_v13 = vld [vmem:[#allocation120_spill] sm:$0xff] }
 0x54a   : > { %v7929_v47 = vpop.eup %7928  ;;  %7950 = vpow2.f32 %v6733_v26  ;;  %v6753_v24 = vmul.f32 -1.442695, %v3043_v27  ;;  %v3245_v11 = vsel %vm1583_vm9, %v3217_v50, 0.0  ;;  %v3225_v25 = vmul.f32 %v7927_v38, %v13761_v48  ;;  %v13764_v41 = vld [vmem:[#allocation88_spill] sm:$0xff]  ;;  %v13765_v26 = vld [vmem:[#allocation71_spill] sm:$0xff] }
 0x54b   : > { %v7931_v20 = vpop.eup %7930  ;;  %7952 = vpow2.f32 %v6746_v40  ;;  %v3339_v51 = vmul.f32 %v7927_v38, %v13763_v13  ;;  %v3024_v61 = vmul.f32 %v2996_v3, %v13764_v41  ;;  %v3009_v27 = vsub.f32 %v2951_v21, %v13765_v26  ;;  %v13768_v40 = vld [vmem:[#allocation92_spill] sm:$0xff]  ;;  %v13770_v41 = vld [vmem:[#allocation127_spill] sm:$0xff]  ;;  %v13771_v26 = vld [vmem:[#allocation42_spill] sm:$0xff] }
 0x54c   : > { %v7933_v49 = vpop.eup %7932  ;;  %v11462_v55 = vpop.permute.xlu0 %2981  ;;  %v3152_v0 = vadd.f32 1.0, %v7931_v20  ;;  %v3224_v50 = vmul.f32 %v7929_v47, %v13766_v22  ;;  %v3338_v48 = vmul.f32 %v7929_v47, %v13767_v62  ;;  %7954 = vpow2.f32 %v6753_v24  ;;  %v13772_v47 = vld [vmem:[#allocation27_spill] sm:$0xff] }
 0x54d   : > { %v7935_v7 = vpop.eup %7934  ;;  %v11464_v23 = vpop.permute.xlu1 %2923  ;;  %v3232_v36 = vmul.f32 %v7933_v49, %v13768_v40  ;;  %v11472_v31 = vadd.f32 %v3246_v43, %v3245_v11  ;;  %v3359_v33 = vsel %vm1583_vm9, %v3331_v58, 0.0  ;;  %v6740_v38 = vmul.f32 -1.442695, %v3030_v5  ;;  %v13773_v43 = vld [vmem:[#allocation107_spill] sm:$0xff] }
 0x54e   : > { %v7937_v28 = vpop.eup %7936  ;;  %v3231_v52 = vmul.f32 %v7935_v7, %v13769_v8  ;;  %v3265_v3 = vsel %vm1583_vm9, %v3225_v25, 0.0  ;;  %v3346_v21 = vmul.f32 %v7933_v49, %v13770_v41  ;;  %v3345_v13 = vmul.f32 %v7935_v7, %v13771_v26  ;;  %v13774_v26 = vld [vmem:[#allocation128_spill] sm:$0xff] }
 0x54f   : > { %v7939_v2 = vpop.eup %7938  ;;  %v3134_v22 = vadd.f32 1.0, %v7937_v28  ;;  %7956 = vrcp.f32 %v3152_v0  ;;  %v6734_v24 = vmul.f32 -1.442695, %v3024_v61  ;;  %v3037_v11 = vmul.f32 %v3009_v27, %v13773_v43 }
 0x550   : > { %v7941_v20 = vpop.eup %7940  ;;  %v3226_v62 = vmul.f32 %v7939_v2, %v13772_v47  ;;  %v3379_v58 = vsel %vm1583_vm9, %v3339_v51, 0.0  ;;  %v3264_v5 = vsel %vm1583_vm9, %v3224_v50, 0.0  ;;  %v3378_v8 = vsel %vm1583_vm9, %v3338_v48, 0.0  ;;  %v2897_v49 = vpop.permute.xlu0 %2896 }
 0x551   : > { %v7943_v34 = vpop.eup %7942  ;;  %v3284_v25 = vsel %vm1583_vm9, %v3232_v36, 0.0  ;;  %v2955_v41 = vpop.permute.xlu1 %2954  ;;  %v3283_v28 = vsel %vm1583_vm9, %v3231_v52, 0.0  ;;  %v3340_v47 = vmul.f32 %v7939_v2, %v13774_v26  ;;  %v3147_v0 = vadd.f32 1.0, %v7941_v20  ;;  %v13775_v36 = vld [vmem:[#allocation143_spill] sm:$0xff] }
 0x552   : > { %v7945_v40 = vpop.eup %7944  ;;  %7958 = vpow2.f32 %v6740_v38  ;;  %v3398_v27 = vsel %vm1583_vm9, %v3346_v21, 0.0  ;;  %v3397_v51 = vsel %vm1583_vm9, %v3345_v13, 0.0  ;;  %v3154_v50 = vadd.f32 1.0, %v7943_v34 }
 0x553   : > { %v7947_v7 = vpop.eup %7946  ;;  %7960 = vrcp.f32 %v3134_v22  ;;  %v3267_v48 = vsel %vm1583_vm9, %v3226_v62, 0.0  ;;  %v3219_v60 = vmul.f32 %v7945_v40, %v13775_v36  ;;  %v6747_v32 = vmul.f32 -1.442695, %v3037_v11  ;;  %v13776_v62 = vld [vmem:[#allocation102_spill] sm:$0xff] }
 0x554   : > { %v7949_v61 = vpop.eup %7948  ;;  %7962 = vpow2.f32 %v6734_v24  ;;  %v11491_v52 = vadd.f32 %v3360_v9, %v3359_v33  ;;  %v3266_v2 = vadd.f32 %v3265_v3, %v3264_v5  ;;  %v3380_v20 = vadd.f32 %v3379_v58, %v3378_v8  ;;  %v13777_v24 = vld [vmem:[#allocation158_spill] sm:$0xff]  ;;  %v2986_v9 = vpop.permute.xlu0 %2985 }
 0x555   : > { %v7951_v43 = vpop.eup %7950  ;;  %v11493_v38 = vadd.f32 %v3284_v25, %v3283_v28  ;;  %v11495_v26 = vadd.f32 %v3398_v27, %v3397_v51  ;;  %v3381_v13 = vsel %vm1583_vm9, %v3340_v47, 0.0  ;;  %7964 = vrcp.f32 %v3147_v0  ;;  %v2928_v33 = vpop.permute.xlu1 %2927  ;;  %v13778_v5 = vld [vmem:[#allocation78_spill] sm:$0xff]  ;;  %v13779_v25 = vld [vmem:[#allocation65_spill] sm:$0xff]  ;;  %v13780_v28 = vld [vmem:[#allocation59_spill] sm:$0xff] }
 0x556   : > { %v7953_v6 = vpop.eup %7952  ;;  %v3141_v34 = vadd.f32 1.0, %v7947_v7  ;;  %v11498_v21 = vadd.f32 %v3267_v48, %v3266_v2  ;;  %v3333_v36 = vmul.f32 %v7945_v40, %v13776_v62  ;;  %v3239_v11 = vmul.f32 %v7949_v61, %v13777_v24  ;;  %v13781_v27 = vld [vmem:[#allocation72_spill] sm:$0xff]  ;;  %v13785_v62 = vld [vmem:[#allocation93_spill] sm:$0xff] }
 0x557   : > { %v7955_v22 = vpop.eup %7954  ;;  %7966 = vrcp.f32 %v3154_v50  ;;  %v3248_v8 = vsel %vm1583_vm9, %v3219_v60, 0.0  ;;  %v3135_v3 = vadd.f32 1.0, %v7951_v43  ;;  %v3148_v58 = vadd.f32 1.0, %v7953_v6  ;;  %v13782_v50 = vld [vmem:[#allocation47_spill] sm:$0xff]  ;;  %v13783_v43 = vld [vmem:[#allocation117_spill] sm:$0xff] }
 0x558   : > { %7968 = vpow2.f32 %v6747_v32  ;;  %v3016_v47 = vsub.f32 %v11462_v55, %v13778_v5  ;;  %v3003_v7 = vsub.f32 %v11464_v23, %v13779_v25  ;;  %v2997_v0 = vsub.f32 %v2897_v49, %v13780_v28  ;;  %v13784_v32 = vld [vmem:[#allocation98_spill] sm:$0xff]  ;;  %v13786_v5 = vld [vmem:[#allocation79_spill] sm:$0xff] }
 0x559   : > { %v3010_v40 = vsub.f32 %v2955_v41, %v13781_v27  ;;  %v7957_v51 = vpop.eup %7956  ;;  %v11509_v48 = vadd.f32 %v3381_v13, %v3380_v20  ;;  %v3353_v2 = vmul.f32 %v7949_v61, %v13782_v50  ;;  %7970 = vrcp.f32 %v3141_v34  ;;  %v13787_v20 = vld [vmem:[#allocation110_spill] sm:$0xff] }
 0x55a   : > { %v3155_v60 = vadd.f32 1.0, %v7955_v22  ;;  %v3044_v6 = vmul.f32 %v3016_v47, %v13783_v43  ;;  %v3031_v24 = vmul.f32 %v3003_v7, %v13784_v32  ;;  %v3025_v55 = vmul.f32 %v2997_v0, %v13785_v62  ;;  %v13788_v22 = vld [vmem:[#allocation157_spill] sm:$0xff]  ;;  %v2990_v32 = vpop.permute.xlu0 %2989  ;;  %v2959_v0 = vpop.permute.xlu1 %2958 }
 0x55b   : > { %v3017_v4 = vsub.f32 %v2986_v9, %v13786_v5  ;;  %v11517_v49 = vadd.f32 %v3248_v8, %v11472_v31  ;;  %v3362_v41 = vsel %vm1583_vm9, %v3333_v36, 0.0  ;;  %7972 = vrcp.f32 %v3135_v3  ;;  %v13789_v8 = vld [vmem:[#allocation46_spill] sm:$0xff]  ;;  %v13790_v3 = vld [vmem:[#allocation119_spill] sm:$0xff] }
 0x55c   : > { %v7959_v23 = vpop.eup %7958  ;;  %v3038_v13 = vmul.f32 %v3010_v40, %v13787_v20  ;;  %v3303_v34 = vsel %vm1583_vm9, %v3239_v11, 0.0  ;;  %v3238_v47 = vmul.f32 %v7957_v51, %v13788_v22  ;;  %7974 = vrcp.f32 %v3148_v58  ;;  %v13791_v11 = vld [vmem:[#allocation66_spill] sm:$0xff] }
 0x55d   : > { %v7961_v61 = vpop.eup %7960  ;;  %v6754_v7 = vmul.f32 -1.442695, %v3044_v6  ;;  %7976 = vrcp.f32 %v3155_v60  ;;  %v6741_v9 = vmul.f32 -1.442695, %v3031_v24  ;;  %v6735_v5 = vmul.f32 -1.442695, %v3025_v55 }
 0x55e   : > { %v7963_v62 = vpop.eup %7962  ;;  %v6748_v31 = vmul.f32 -1.442695, %v3038_v13  ;;  %v3352_v43 = vmul.f32 %v7957_v51, %v13789_v8  ;;  %v3142_v36 = vadd.f32 1.0, %v7959_v23  ;;  %v3045_v40 = vmul.f32 %v3017_v4, %v13790_v3  ;;  %v13793_v22 = vld [vmem:[#allocation82_spill] sm:$0xff]  ;;  %v13794_v6 = vld [vmem:[#allocation73_spill] sm:$0xff] }
 0x55f   : > { %7978 = vpow2.f32 %v6754_v7  ;;  %v7965_v20 = vpop.eup %7964  ;;  %v13792_v50 = vmov %v13791_v11  ;;  %v3004_v27 = vsub.f32 %v2928_v33, %v13791_v11  ;;  %v3018_v58 = vsub.f32 %v2990_v32, %v13793_v22  ;;  %v13796_v4 = vld [vmem:[#allocation101_spill] sm:$0xff]  ;;  %v13800_v22 = vld [vmem:[#allocation159_spill] sm:$0xff] }
 0x560   : > { %7980 = vpow2.f32 %v6741_v9  ;;  %v3011_v28 = vsub.f32 %v2959_v0, %v13794_v6  ;;  %v3220_v60 = vmul.f32 %v7961_v61, %v13795_v12  ;;  %v3136_v24 = vadd.f32 1.0, %v7963_v62  ;;  %v13797_v9 = vld [vmem:[#allocation118_spill] sm:$0xff]  ;;  %v13798_v0 = vld [vmem:[#allocation112_spill] sm:$0xff]  ;;  %v13799_v12 = vld [vmem:[#allocation131_spill] sm:$0xff] }
 0x561   : > { %v7967_v25 = vpop.eup %7966  ;;  %7982 = vpow2.f32 %v6735_v5  ;;  %v6755_v55 = vmul.f32 -1.442695, %v3045_v40  ;;  %v3302_v51 = vsel %vm1583_vm9, %v3238_v47, 0.0  ;;  %v3334_v23 = vmul.f32 %v7961_v61, %v13696_v35 }
 0x562   : > { %v7969_v13 = vpop.eup %7968  ;;  %7984 = vpow2.f32 %v6748_v31  ;;  %v3032_v7 = vmul.f32 %v3004_v27, %v13796_v4  ;;  %v3233_v33 = vmul.f32 %v7965_v20, %v13797_v9  ;;  %v3046_v32 = vmul.f32 %v3018_v58, %v13699_v44 }
 0x563   : > { %7986 = vpow2.f32 %v6755_v55  ;;  %v3039_v11 = vmul.f32 %v3011_v28, %v13798_v0  ;;  %v7971_v6 = vpop.eup %7970  ;;  %v3347_v62 = vmul.f32 %v7965_v20, %v13799_v12  ;;  %v3149_v5 = vadd.f32 1.0, %v7969_v13  ;;  %v13801_v55 = vld [vmem:[#allocation48_spill] sm:$0xff] }
 0x564   : > { %7988 = vrcp.f32 %v3142_v36  ;;  %v6742_v40 = vmul.f32 -1.442695, %v3032_v7  ;;  %v3417_v47 = vsel %vm1583_vm9, %v3353_v2, 0.0  ;;  %v3240_v61 = vmul.f32 %v7967_v25, %v13800_v22 }
 0x565   : > { %7990 = vrcp.f32 %v3136_v24  ;;  %v6756_v31 = vmul.f32 -1.442695, %v3046_v32  ;;  %v7973_v27 = vpop.eup %7972  ;;  %v3416_v9 = vsel %vm1583_vm9, %v3352_v43, 0.0  ;;  %v3354_v4 = vmul.f32 %v7967_v25, %v13801_v55 }
 0x566   : > { %7992 = vpow2.f32 %v6742_v40  ;;  %v6749_v58 = vmul.f32 -1.442695, %v3039_v11  ;;  %v7975_v28 = vpop.eup %7974  ;;  %v3363_v0 = vadd.f32 %v3362_v41, %v11491_v52  ;;  %v3304_v20 = vadd.f32 %v3303_v34, %v3302_v51  ;;  %v13802_v11 = vld [vmem:[#allocation56_spill] sm:$0xff]  ;;  %v13803_v34 = vld [vmem:[#allocation41_spill] sm:$0xff] }
 0x567   : > { %v3250_v36 = vsel %vm1583_vm9, %v3220_v60, 0.0  ;;  %7994 = vpow2.f32 %v6756_v31  ;;  %v7977_v13 = vpop.eup %7976  ;;  %v3364_v2 = vsel %vm1583_vm9, %v3334_v23, 0.0  ;;  %v3286_v24 = vsel %vm1583_vm9, %v3233_v33, 0.0  ;;  %v13804_v51 = vld [vmem:[#allocation148_spill] sm:$0xff] }
 0x568   : > { %v3400_v7 = vsel %vm1583_vm9, %v3347_v62, 0.0  ;;  %7996 = vrcp.f32 %v3149_v5  ;;  %v3418_v32 = vadd.f32 %v3417_v47, %v3416_v9  ;;  %v3305_v25 = vsel %vm1583_vm9, %v3240_v61, 0.0 }
 0x569   : > { %v7979_v43 = vpop.eup %7978  ;;  %v3227_v55 = vmul.f32 %v7971_v6, %v13802_v11  ;;  %7998 = vpow2.f32 %v6749_v58  ;;  %v3419_v41 = vsel %vm1583_vm9, %v3354_v4, 0.0  ;;  %v3341_v60 = vmul.f32 %v7971_v6, %v13803_v34  ;;  %v13805_v11 = vld [vmem:[#allocation39_spill] sm:$0xff] }
 0x56a   : > { %v7981_v52 = vpop.eup %7980  ;;  %v3221_v31 = vmul.f32 %v7973_v27, %v13804_v51  ;;  %v3156_v23 = vadd.f32 1.0, %v7979_v43  ;;  %v3251_v33 = vadd.f32 %v3250_v36, %v11517_v49  ;;  %v3365_v62 = vadd.f32 %v3364_v2, %v3363_v0  ;;  %v13807_v36 = vld [vmem:[#allocation153_spill] sm:$0xff]  ;;  %v13808_v2 = vld [vmem:[#allocation43_spill] sm:$0xff] }
 0x56b   : > { %v7983_v22 = vpop.eup %7982  ;;  %v3287_v5 = vadd.f32 %v3286_v24, %v11493_v38  ;;  %v3401_v9 = vadd.f32 %v3400_v7, %v11495_v26  ;;  %v3306_v61 = vadd.f32 %v3305_v25, %v3304_v20  ;;  %v13806_v40 = vmov %v13805_v11  ;;  %v13809_v24 = vld [vmem:[#allocation160_spill] sm:$0xff] }
 0x56c   : > { %v7985_v47 = vpop.eup %7984  ;;  %v3335_v58 = vmul.f32 %v7973_v27, %v13805_v11  ;;  %8000 = vrcp.f32 %v3156_v23  ;;  %v3143_v12 = vadd.f32 1.0, %v7981_v52  ;;  %v3420_v44 = vadd.f32 %v3419_v41, %v3418_v32  ;;  %v13810_v41 = vld [vmem:[#allocation100_spill] sm:$0xff] }
 0x56d   : > { %v7987_v4 = vpop.eup %7986  ;;  %v3269_v6 = vsel %vm1583_vm9, %v3227_v55, 0.0  ;;  %v3137_v51 = vadd.f32 1.0, %v7983_v22  ;;  %v3150_v43 = vadd.f32 1.0, %v7985_v47  ;;  %v3383_v49 = vsel %vm1583_vm9, %v3341_v60, 0.0 }
 0x56e   : > { %v7989_v34 = vpop.eup %7988  ;;  %v3252_v0 = vsel %vm1583_vm9, %v3221_v31, 0.0  ;;  %8002 = vrcp.f32 %v3143_v12  ;;  %v3157_v38 = vadd.f32 1.0, %v7987_v4  ;;  %v3234_v20 = vmul.f32 %v7975_v28, %v13807_v36 }
 0x56f   : > { %v7991_v26 = vpop.eup %7990  ;;  %v3348_v27 = vmul.f32 %v7975_v28, %v13808_v2  ;;  %v3241_v7 = vmul.f32 %v7977_v13, %v13809_v24  ;;  %8004 = vrcp.f32 %v3137_v51  ;;  %v3270_v55 = vadd.f32 %v3269_v6, %v11498_v21  ;;  %v13811_v51 = vld [vmem:[#allocation50_spill] sm:$0xff] }
 0x570   : > { %v7993_v32 = vpop.eup %7992  ;;  %v3366_v22 = vsel %vm1583_vm9, %v3335_v58, 0.0  ;;  %v3355_v25 = vmul.f32 %v7977_v13, %v13712_v59  ;;  %8006 = vrcp.f32 %v3150_v43  ;;  %v3228_v12 = vmul.f32 %v7989_v34, %v13810_v41  ;;  %v13812_v41 = vld [vmem:[#allocation109_spill] sm:$0xff] }
 0x571   : > { %v7995_v52 = vpop.eup %7994  ;;  %v3342_v60 = vmul.f32 %v7989_v34, %v13714_v54  ;;  %8008 = vrcp.f32 %v3157_v38  ;;  %v3144_v31 = vadd.f32 1.0, %v7993_v32  ;;  %v3384_v28 = vadd.f32 %v3383_v49, %v11509_v48  ;;  %v13813_v49 = vld [vmem:[#allocation154_spill] sm:$0xff] }
 0x572   : > { %v7997_v23 = vpop.eup %7996  ;;  %v3253_v47 = vadd.f32 %v3252_v0, %v3251_v33  ;;  %v3222_v11 = vmul.f32 %v7991_v26, %v13811_v51  ;;  %v3158_v4 = vadd.f32 1.0, %v7995_v52  ;;  %v3288_v58 = vsel %vm1583_vm9, %v3234_v20, 0.0 }
 0x573   : > { %v7999_v21 = vpop.eup %7998  ;;  %v3402_v13 = vsel %vm1583_vm9, %v3348_v27, 0.0  ;;  %v3307_v6 = vsel %vm1583_vm9, %v3241_v7, 0.0  ;;  %8010 = vrcp.f32 %v3144_v31  ;;  %v3367_v43 = vadd.f32 %v3366_v22, %v3365_v62  ;;  %v13814_v22 = vld [vmem:[#allocation138_spill] sm:$0xff] }
 0x574   : > { %v3336_v34 = vmul.f32 %v7991_v26, %v13812_v41  ;;  %8012 = vrcp.f32 %v3158_v4  ;;  %v3151_v38 = vadd.f32 1.0, %v7999_v21  ;;  %v3421_v32 = vsel %vm1583_vm9, %v3355_v25, 0.0 }
 0x575   : > { %v3271_v48 = vsel %vm1583_vm9, %v3228_v12, 0.0  ;;  %v3385_v33 = vsel %vm1583_vm9, %v3342_v60, 0.0  ;;  %v3235_v0 = vmul.f32 %v7997_v23, %v13813_v49  ;;  %v3289_v20 = vadd.f32 %v3288_v58, %v3287_v5  ;;  %v13816_v58 = vld [vmem:[#allocation125_spill] sm:$0xff] }
 0x576   : > { %v8001_v52 = vpop.eup %8000  ;;  %v3403_v51 = vadd.f32 %v3402_v13, %v3401_v9  ;;  %v3308_v27 = vadd.f32 %v3307_v6, %v3306_v61  ;;  %v3254_v7 = vsel %vm1583_vm9, %v3222_v11, 0.0  ;;  %v3349_v62 = vmul.f32 %v7997_v23, %v13718_v42  ;;  %v13815_v61 = vld [vmem:[#allocation111_spill] sm:$0xff] }
 0x577   : > { %v3242_v26 = vmul.f32 %v8001_v52, %v13719_v18  ;;  %v3356_v31 = vmul.f32 %v8001_v52, %v13814_v22  ;;  %8014 = vrcp.f32 %v3151_v38  ;;  %v3422_v4 = vadd.f32 %v3421_v32, %v3420_v44  ;;  %v13817_v38 = vld [vmem:[#allocation150_spill] sm:$0xff] }
 0x578   : > { %v8003_v25 = vpop.eup %8002  ;;  %v3272_v12 = vadd.f32 %v3271_v48, %v3270_v55  ;;  %v3386_v21 = vadd.f32 %v3385_v33, %v3384_v28  ;;  %v3368_v60 = vsel %vm1583_vm9, %v3336_v34, 0.0  ;;  %v3290_v5 = vsel %vm1583_vm9, %v3235_v0, 0.0  ;;  %v13818_v44 = vld [vmem:[#allocation126_spill] sm:$0xff] }
 0x579   : > { %v8005_v49 = vpop.eup %8004  ;;  %v3309_v9 = vsel %vm1583_vm9, %v3242_v26, 0.0  ;;  %v3229_v11 = vmul.f32 %v8003_v25, %v13815_v61  ;;  %v3343_v23 = vmul.f32 %v8003_v25, %v13816_v58  ;;  %v3255_v6 = vadd.f32 %v3254_v7, %v3253_v47 }
 0x57a   : > { %v8007_v13 = vpop.eup %8006  ;;  %v3423_v52 = vsel %vm1583_vm9, %v3356_v31, 0.0  ;;  %v3223_v22 = vmul.f32 %v8005_v49, %v13817_v38  ;;  %v3337_v55 = vmul.f32 %v8005_v49, %v13818_v44  ;;  %v3369_v32 = vadd.f32 %v3368_v60, %v3367_v43  ;;  %v13819_v44 = vld [vmem:[#allocation139_spill] sm:$0xff] }
 0x57b   : > { %v8009_v28 = vpop.eup %8008  ;;  %v3404_v34 = vsel %vm1583_vm9, %v3349_v62, 0.0  ;;  %v3273_v48 = vsel %vm1583_vm9, %v3229_v11, 0.0  ;;  %v3387_v33 = vsel %vm1583_vm9, %v3343_v23, 0.0  ;;  %v3291_v0 = vadd.f32 %v3290_v5, %v3289_v20  ;;  %v13820_v5 = vld [vmem:[#allocation32_spill] sm:$0xff] }
 0x57c   : > { %v3310_v26 = vadd.f32 %v3309_v9, %v3308_v27  ;;  %v3256_v25 = vsel %vm2074_vm5, %v3223_v22, 0.0  ;;  %v3370_v47 = vsel %vm2074_vm5, %v3337_v55, 0.0  ;;  %v3424_v31 = vadd.f32 %v3423_v52, %v3422_v4  ;;  %v13821_v9 = vld [vmem:[#allocation129_spill] sm:$0xff] }
 0x57d   : > { %v8011_v7 = vpop.eup %8010  ;;  %v3371_v58 = vadd.f32 %v3370_v47, %v3369_v32  ;;  %v3236_v38 = vmul.f32 %v8007_v13, %v13725_v17  ;;  %v3350_v49 = vmul.f32 %v8007_v13, %v13726_v1  ;;  %v3274_v60 = vadd.f32 %v3273_v48, %v3272_v12  ;;  %v13822_v32 = vld [vmem:[#allocation163_spill] sm:$0xff]  ;;  %v13823_v13 = vld [vmem:[#allocation49_spill] sm:$0xff] }
 0x57e   : > { %v8013_v43 = vpop.eup %8012  ;;  %v3388_v62 = vadd.f32 %v3387_v33, %v3386_v21  ;;  %v3243_v11 = vmul.f32 %v8009_v28, %v13580_v45  ;;  %v3357_v23 = vmul.f32 %v8009_v28, %v13819_v44  ;;  %v3257_v20 = vadd.f32 %v3256_v25, %v3255_v6  ;;  %v13824_v44 = vld [vmem:[#allocation156_spill] sm:$0xff]  ;;  %v13825_v45 = vld [vmem:[#allocation45_spill] sm:$0xff] }
 0x57f   : > { %v3372_v27 = vrot.slane %v3371_v58, 4  ;;  %v3230_v22 = vmul.f32 %v8011_v7, %v13820_v5  ;;  %v3344_v55 = vmul.f32 %v8011_v7, %v13821_v9  ;;  %v3244_v47 = vmul.f32 %v8013_v43, %v13822_v32 }
 0x580   : > { %v3311_v4 = vsel %vm1583_vm9, %v3243_v11, 0.0  ;;  %v3425_v52 = vsel %vm1583_vm9, %v3357_v23, 0.0  ;;  %v3358_v1 = vmul.f32 %v8013_v43, %v13823_v13  ;;  %v3292_v21 = vsel %vm1583_vm9, %v3236_v38, 0.0 }
 0x581   : > { %v8015_v12 = vpop.eup %8014  ;;  %v3406_v48 = vsel %vm1583_vm9, %v3350_v49, 0.0  ;;  %v3312_v28 = vadd.f32 %v3311_v4, %v3310_v26  ;;  %v3426_v6 = vadd.f32 %v3425_v52, %v3424_v31  ;;  %v3275_v33 = vsel %vm2074_vm5, %v3230_v22, 0.0 }
 0x582   : > { %v3389_v25 = vsel %vm2074_vm5, %v3344_v55, 0.0  ;;  %v3313_v7 = vsel %vm2074_vm5, %v3244_v47, 0.0  ;;  %v3427_v11 = vsel %vm2074_vm5, %v3358_v1, 0.0  ;;  %v3405_v23 = vadd.f32 %v3404_v34, %v3403_v51 }
 0x583   : > { %v3373_v9 = vadd.f32 %v3372_v27, %v3371_v58  ;;  %v3276_v32 = vadd.f32 %v3275_v33, %v3274_v60  ;;  %v3390_v5 = vadd.f32 %v3389_v25, %v3388_v62  ;;  %v3314_v43 = vadd.f32 %v3313_v7, %v3312_v28 }
 0x584   : > { %v3428_v13 = vadd.f32 %v3427_v11, %v3426_v6  ;;  %v3237_v38 = vmul.f32 %v8015_v12, %v13824_v44  ;;  %v3351_v49 = vmul.f32 %v8015_v12, %v13825_v45  ;;  %v3293_v26 = vadd.f32 %v3292_v21, %v3291_v0 }
 0x585   : > { %v3407_v31 = vadd.f32 %v3406_v48, %v3405_v23  ;;  %v3277_v4 = vrot.slane %v3276_v32, 4  ;;  %v3391_v22 = vrot.slane %v3390_v5, 4  ;;  %v3258_v52 = vrot.slane %v3257_v20, 4 }
 0x586   : > { %v3429_v55 = vrot.slane %v3428_v13, 4  ;;  %v3294_v47 = vsel %vm2074_vm5, %v3237_v38, 0.0  ;;  %v3408_v1 = vsel %vm2074_vm5, %v3351_v49, 0.0  ;;  %v3374_v51 = vrot.slane %v3373_v9, 2 }
 0x587   : > { %v3392_v58 = vadd.f32 %v3391_v22, %v3390_v5  ;;  %v3315_v34 = vrot.slane %v3314_v43, 4  ;;  %v3278_v60 = vadd.f32 %v3277_v4, %v3276_v32  ;;  %v3295_v27 = vadd.f32 %v3294_v47, %v3293_v26 }
 0x588   : > { %v3430_v62 = vadd.f32 %v3429_v55, %v3428_v13  ;;  %v3409_v28 = vadd.f32 %v3408_v1, %v3407_v31  ;;  %v3259_v33 = vadd.f32 %v3258_v52, %v3257_v20  ;;  %v3375_v48 = vadd.f32 %v3374_v51, %v3373_v9 }
 0x589   : > { %v3393_v6 = vrot.slane %v3392_v58, 2  ;;  %v3296_v0 = vrot.slane %v3295_v27, 4  ;;  %v3316_v7 = vadd.f32 %v3315_v34, %v3314_v43  ;;  %v3279_v11 = vrot.slane %v3278_v60, 2 }
 0x58a   : > { %v3431_v12 = vrot.slane %v3430_v62, 2  ;;  %v3410_v21 = vrot.slane %v3409_v28, 4  ;;  %v3260_v44 = vrot.slane %v3259_v33, 2  ;;  %v3376_v32 = vrot.slane %v3375_v48, 1 }
 0x58b   : > { %v3394_v25 = vadd.f32 %v3393_v6, %v3392_v58  ;;  %v3297_v38 = vadd.f32 %v3296_v0, %v3295_v27  ;;  %v3280_v26 = vadd.f32 %v3279_v11, %v3278_v60  ;;  %v3317_v31 = vrot.slane %v3316_v7, 2 }
 0x58c   : > { %v3432_v23 = vadd.f32 %v3431_v12, %v3430_v62  ;;  %v3411_v45 = vadd.f32 %v3410_v21, %v3409_v28  ;;  %v3261_v55 = vadd.f32 %v3260_v44, %v3259_v33  ;;  %v3377_v9 = vadd.f32 %v3376_v32, %v3375_v48 }
 0x58d   : > { %v3395_v49 = vrot.slane %v3394_v25, 1  ;;  %v3298_v5 = vrot.slane %v3297_v38, 2  ;;  %v3281_v43 = vrot.slane %v3280_v26, 1  ;;  %v3318_v51 = vadd.f32 %v3317_v31, %v3316_v7 }
 0x58e   : > { %v3412_v22 = vrot.slane %v3411_v45, 2  ;;  %v3433_v13 = vrot.slane %v3432_v23, 1  ;;  %v3262_v27 = vrot.slane %v3261_v55, 1  ;;  %v3215_v7 = vmul.f32 %v11407_v15, %v13614_v39 }
 0x58f   : > { %v3396_v20 = vadd.f32 %v3395_v49, %v3394_v25  ;;  %v3299_v52 = vadd.f32 %v3298_v5, %v3297_v38  ;;  %v3282_v60 = vadd.f32 %v3281_v43, %v3280_v26  ;;  %v3319_v12 = vrot.slane %v3318_v51, 1 }
 0x590   : > { %v3413_v4 = vadd.f32 %v3412_v22, %v3411_v45  ;;  %v3434_v1 = vadd.f32 %v3433_v13, %v3432_v23  ;;  %v3263_v44 = vadd.f32 %v3262_v27, %v3261_v55  ;;  %v3216_v38 = vadd.f32 %v3215_v7, %v13616_v57  ;;  %v13832_v7 = vld [vmem:[#allocation103_spill] sm:$0xff] }
 0x591   : > { %v3439_v34 = vsel %vm2144_vm12, %v3396_v20, %v3377_v9  ;;  %v3300_v62 = vrot.slane %v3299_v52, 1  ;;  %v3320_v48 = vadd.f32 %v3319_v12, %v3318_v51  ;;  %v13826_v51 = vld [vmem:[#allocation61_spill] sm:$0xff] }
 0x592   : > { %v3414_v47 = vrot.slane %v3413_v4, 1  ;;  %v3325_v21 = vsel %vm2144_vm12, %v3282_v60, %v3263_v44 }
 0x593   : > { %v3301_v0 = vadd.f32 %v3300_v62, %v3299_v52 }
 0x594   : > { %v3415_v58 = vadd.f32 %v3414_v47, %v3413_v4 }
 0x595   : > { %v3326_v11 = vsel %vm2146_vm14, %v3301_v0, %v3325_v21  ;;  %v13829_v0 = vld [vmem:[#allocation89_spill] sm:$0xff] }
 0x596   : > { %v3440_v28 = vsel %vm2146_vm14, %v3415_v58, %v3439_v34  ;;  %v3327_v23 = vsel %vm2148_vm1, %v3320_v48, %v3326_v11  ;;  %v13827_v34 = vld [vmem:[#allocation60_spill] sm:$0xff]  ;;  %v13831_v48 = vld [vmem:[#allocation67_spill] sm:$0xff] }
 0x597   : > { %v3441_v6 = vsel %vm2148_vm1, %v3434_v1, %v3440_v28  ;;  %v3329_v49 = vadd.f32 %v3327_v23, %v3216_v38  ;;  %v13828_v28 = vld [vmem:[#allocation90_spill] sm:$0xff]  ;;  %v13833_v38 = vld [vmem:[#allocation99_spill] sm:$0xff] }
 0x598   : > { %v3443_v45 = vadd.f32 %v3441_v6, %v13612_v10 }
 0x599   : > { %v3330_v5 = vadd.f32 %v3329_v49, %v11187_v16 }
 0x59a   : > { %v3444_v33 = vadd.f32 %v3443_v45, %v11175_v56 }
 0x59c   : > { %v3445_v25 = vadd.f32 1e-08, %v3444_v33  ;;  %v13830_v33 = vld [vmem:[#allocation68_spill] sm:$0xff] }
 0x59e   : > { %8016 = vrcp.f32 %v3445_v25 }
 0x5a8   : > { %v8017_v22 = vpop.eup %8016 }
 0x5a9   : > { %v11624_v32 = vmul.f32 %v8017_v22, %v3330_v5 }
 0x5ab   : > { %v3451_v13 = vrot.slane %v11624_v32, %v13618_v30  ;;  %v3482_v15 = vrot.slane %v11624_v32, %v13619_v29  ;;  %v3513_v26 = vrot.slane %v11624_v32, %v13620_v19  ;;  %v3544_v31 = vrot.slane %v11624_v32, %v13621_v14 }
 0x5ad   : > { %3457 = vbcast.lane.b32.xlu0 %v3451_v13, 264  ;;  %3453 = vbcast.lane.b32.xlu1 %v3451_v13, 256 }
 0x5b1   : > { %3488 = vbcast.lane.b32.xlu0 %v3482_v15, 264  ;;  %3484 = vbcast.lane.b32.xlu1 %v3482_v15, 256 }
 0x5b5   : > { %3519 = vbcast.lane.b32.xlu0 %v3513_v26, 264  ;;  %3515 = vbcast.lane.b32.xlu1 %v3513_v26, 256 }
 0x5b9   : > { %3492 = vbcast.lane.b32.xlu0 %v3482_v15, 272  ;;  %3461 = vbcast.lane.b32.xlu1 %v3451_v13, 272 }
 0x5bd   : > { %3550 = vbcast.lane.b32.xlu0 %v3544_v31, 264  ;;  %3546 = vbcast.lane.b32.xlu1 %v3544_v31, 256 }
 0x5c1   : > { %3465 = vbcast.lane.b32.xlu0 %v3451_v13, 280  ;;  %3523 = vbcast.lane.b32.xlu1 %v3513_v26, 272 }
 0x5c5   : > { %3554 = vbcast.lane.b32.xlu0 %v3544_v31, 272  ;;  %3496 = vbcast.lane.b32.xlu1 %v3482_v15, 280 }
 0x5c9   : > { %3469 = vbcast.lane.b32.xlu0 %v3451_v13, 288  ;;  %3527 = vbcast.lane.b32.xlu1 %v3513_v26, 280 }
 0x5cd   : > { %3558 = vbcast.lane.b32.xlu0 %v3544_v31, 280  ;;  %3500 = vbcast.lane.b32.xlu1 %v3482_v15, 288 }
 0x5d1   : > { %3473 = vbcast.lane.b32.xlu0 %v3451_v13, 296  ;;  %3531 = vbcast.lane.b32.xlu1 %v3513_v26, 288 }
 0x5d5   : > { %3562 = vbcast.lane.b32.xlu0 %v3544_v31, 288  ;;  %3504 = vbcast.lane.b32.xlu1 %v3482_v15, 296 }
 0x5d9   : > { %3477 = vbcast.lane.b32.xlu0 %v3451_v13, 304  ;;  %3535 = vbcast.lane.b32.xlu1 %v3513_v26, 296 }
 0x5dd   : > { %3566 = vbcast.lane.b32.xlu0 %v3544_v31, 296  ;;  %3508 = vbcast.lane.b32.xlu1 %v3482_v15, 304  ;;  %v13834_v15 = vld [vmem:[#allocation62_spill] sm:$0xff] }
 0x5e1   : > { %3570 = vbcast.lane.b32.xlu0 %v3544_v31, 304  ;;  %3539 = vbcast.lane.b32.xlu1 %v3513_v26, 304  ;;  %v13835_v31 = vld [vmem:[#allocation53_spill] sm:$0xff] }
 0x61f   : > { %v3458_v4 = vpop.permute.xlu0 %3457  ;;  %v3454_v20 = vpop.permute.xlu1 %3453 }
 0x620   : > { %v3573_v52 = vsub.f32 %v3458_v4, %v13622_v63  ;;  %v3572_v55 = vsub.f32 %v3454_v20, %v13623_v46 }
 0x622   : > { %v3601_v47 = vmul.f32 %v3573_v52, %v13624_v37  ;;  %v3600_v43 = vmul.f32 %v3572_v55, %v13625_v53  ;;  %v13836_v52 = vld [vmem:[#allocation94_spill] sm:$0xff] }
 0x623   : > { %v3489_v9 = vpop.permute.xlu0 %3488  ;;  %v3485_v1 = vpop.permute.xlu1 %3484 }
 0x624   : > { %v3580_v58 = vsub.f32 %v3489_v9, %v13826_v51  ;;  %v3579_v62 = vsub.f32 %v3485_v1, %v13827_v34  ;;  %v6758_v27 = vmul.f32 -1.442695, %v3601_v47  ;;  %v6757_v45 = vmul.f32 -1.442695, %v3600_v43  ;;  %v13837_v43 = vld [vmem:[#allocation75_spill] sm:$0xff]  ;;  %v13870_v34 = vld [vmem:[#allocation86_spill] sm:$0xff] }
 0x626   : > { %v3608_v6 = vmul.f32 %v3580_v58, %v13828_v28  ;;  %v3607_v44 = vmul.f32 %v3579_v62, %v13829_v0  ;;  %8018 = vpow2.f32 %v6758_v27  ;;  %v13838_v27 = vld [vmem:[#allocation84_spill] sm:$0xff] }
 0x627   : > { %v3520_v60 = vpop.permute.xlu0 %3519  ;;  %v3516_v12 = vpop.permute.xlu1 %3515  ;;  %8020 = vpow2.f32 %v6757_v45  ;;  %v13868_v0 = vld [vmem:[#allocation40_spill] sm:$0xff] }
 0x628   : > { %v3587_v21 = vsub.f32 %v3520_v60, %v13830_v33  ;;  %v3586_v25 = vsub.f32 %v3516_v12, %v13831_v48  ;;  %v6765_v23 = vmul.f32 -1.442695, %v3608_v6  ;;  %v6764_v13 = vmul.f32 -1.442695, %v3607_v44  ;;  %v13839_v60 = vld [vmem:[#allocation114_spill] sm:$0xff]  ;;  %v13849_v48 = vld [vmem:[#allocation57_spill] sm:$0xff] }
 0x629   : > { %v13867_v33 = vld [vmem:[#allocation151_spill] sm:$0xff] }
 0x62a   : > { %v3615_v11 = vmul.f32 %v3587_v21, %v13832_v7  ;;  %v3614_v49 = vmul.f32 %v3586_v25, %v13833_v38  ;;  %8022 = vpow2.f32 %v6765_v23  ;;  %v13840_v23 = vld [vmem:[#allocation74_spill] sm:$0xff]  ;;  %v13846_v7 = vld [vmem:[#allocation63_spill] sm:$0xff] }
 0x62b   : > { %v3493_v5 = vpop.permute.xlu0 %3492  ;;  %v3462_v22 = vpop.permute.xlu1 %3461  ;;  %8024 = vpow2.f32 %v6764_v13 }
 0x62c   : > { %v3581_v26 = vsub.f32 %v3493_v5, %v13834_v15  ;;  %v3574_v4 = vsub.f32 %v3462_v22, %v13835_v31  ;;  %v6772_v20 = vmul.f32 -1.442695, %v3615_v11  ;;  %v6771_v47 = vmul.f32 -1.442695, %v3614_v49 }
 0x62e   : > { %v3609_v55 = vmul.f32 %v3581_v26, %v13836_v52  ;;  %v3602_v6 = vmul.f32 %v3574_v4, %v13838_v27  ;;  %8026 = vpow2.f32 %v6772_v20  ;;  %v13841_v4 = vld [vmem:[#allocation55_spill] sm:$0xff]  ;;  %v13842_v27 = vld [vmem:[#allocation113_spill] sm:$0xff] }
 0x62f   : > { %v3551_v9 = vpop.permute.xlu0 %3550  ;;  %v3547_v1 = vpop.permute.xlu1 %3546  ;;  %8028 = vpow2.f32 %v6771_v47 }
 0x630   : > { %v3594_v58 = vsub.f32 %v3551_v9, %v13837_v43  ;;  %v6766_v62 = vmul.f32 -1.442695, %v3609_v55  ;;  %v8019_v21 = vpop.eup %8018  ;;  %v6759_v25 = vmul.f32 -1.442695, %v3602_v6  ;;  %v3593_v49 = vsub.f32 %v3547_v1, %v13840_v23  ;;  %v13843_v6 = vld [vmem:[#allocation69_spill] sm:$0xff] }
 0x631   : > { %v8021_v11 = vpop.eup %8020  ;;  %v3713_v26 = vadd.f32 1.0, %v8019_v21  ;;  %v13844_v21 = vld [vmem:[#allocation85_spill] sm:$0xff] }
 0x632   : > { %v3622_v12 = vmul.f32 %v3594_v58, %v13839_v60  ;;  %8030 = vpow2.f32 %v6766_v62  ;;  %v3712_v55 = vadd.f32 1.0, %v8021_v11  ;;  %v3621_v58 = vmul.f32 %v3593_v49, %v13842_v27  ;;  %v13845_v11 = vld [vmem:[#allocation76_spill] sm:$0xff] }
 0x633   : > { %v3466_v45 = vpop.permute.xlu0 %3465  ;;  %v3524_v44 = vpop.permute.xlu1 %3523  ;;  %8032 = vpow2.f32 %v6759_v25 }
 0x634   : > { %v6779_v5 = vmul.f32 -1.442695, %v3622_v12  ;;  %v8023_v9 = vpop.eup %8022  ;;  %v3575_v20 = vsub.f32 %v3466_v45, %v13841_v4  ;;  %v3588_v43 = vsub.f32 %v3524_v44, %v13843_v6  ;;  %v6778_v38 = vmul.f32 -1.442695, %v3621_v58  ;;  %v13848_v6 = vld [vmem:[#allocation115_spill] sm:$0xff] }
 0x635   : > { %v8025_v47 = vpop.eup %8024  ;;  %v3720_v62 = vadd.f32 1.0, %v8023_v9 }
 0x636   : > { %8034 = vpow2.f32 %v6779_v5  ;;  %v3719_v23 = vadd.f32 1.0, %v8025_v47  ;;  %v3603_v31 = vmul.f32 %v3575_v20, %v13844_v21  ;;  %v13850_v20 = vld [vmem:[#allocation70_spill] sm:$0xff] }
 0x637   : > { %v3555_v22 = vpop.permute.xlu0 %3554  ;;  %v3497_v13 = vpop.permute.xlu1 %3496  ;;  %8036 = vrcp.f32 %v3713_v26  ;;  %v13847_v26 = vld [vmem:[#allocation104_spill] sm:$0xff] }
 0x638   : > { %v8027_v60 = vpop.eup %8026  ;;  %8038 = vrcp.f32 %v3712_v55  ;;  %v3595_v25 = vsub.f32 %v3555_v22, %v13845_v11  ;;  %v3582_v49 = vsub.f32 %v3497_v13, %v13846_v7  ;;  %v3616_v9 = vmul.f32 %v3588_v43, %v13847_v26 }
 0x639   : > { %v8029_v12 = vpop.eup %8028  ;;  %v3727_v4 = vadd.f32 1.0, %v8027_v60  ;;  %8040 = vrcp.f32 %v3720_v62  ;;  %v6760_v44 = vmul.f32 -1.442695, %v3603_v31  ;;  %v13851_v60 = vld [vmem:[#allocation95_spill] sm:$0xff] }
 0x63a   : > { %v3726_v5 = vadd.f32 1.0, %v8029_v12  ;;  %8042 = vrcp.f32 %v3719_v23  ;;  %v3623_v27 = vmul.f32 %v3595_v25, %v13848_v6  ;;  %v3610_v13 = vmul.f32 %v3582_v49, %v13851_v60  ;;  %v13852_v31 = vld [vmem:[#allocation87_spill] sm:$0xff]  ;;  %v13856_v60 = vld [vmem:[#allocation38_spill] sm:$0xff] }
 0x63b   : > { %v3470_v52 = vpop.permute.xlu0 %3469  ;;  %v3528_v1 = vpop.permute.xlu1 %3527  ;;  %8044 = vpow2.f32 %v6778_v38  ;;  %v6773_v62 = vmul.f32 -1.442695, %v3616_v9 }
 0x63c   : > { %v8031_v45 = vpop.eup %8030  ;;  %v3576_v55 = vsub.f32 %v3470_v52, %v13849_v48  ;;  %v3589_v15 = vsub.f32 %v3528_v1, %v13850_v20  ;;  %8046 = vrcp.f32 %v3727_v4  ;;  %v6780_v43 = vmul.f32 -1.442695, %v3623_v27  ;;  %v13854_v20 = vld [vmem:[#allocation77_spill] sm:$0xff] }
 0x63d   : > { %v3721_v47 = vadd.f32 1.0, %v8031_v45  ;;  %v8033_v11 = vpop.eup %8032  ;;  %8048 = vrcp.f32 %v3726_v5  ;;  %v13853_v45 = vld [vmem:[#allocation105_spill] sm:$0xff]  ;;  %v6767_v1 = vmul.f32 -1.442695, %v3610_v13  ;;  %v13855_v5 = vld [vmem:[#allocation142_spill] sm:$0xff]  ;;  %v13858_v13 = vld [vmem:[#allocation116_spill] sm:$0xff] }
 0x63e   : > { %8050 = vpow2.f32 %v6760_v44  ;;  %v3604_v23 = vmul.f32 %v3576_v55, %v13852_v31  ;;  %v3714_v52 = vadd.f32 1.0, %v8033_v11  ;;  %v3617_v38 = vmul.f32 %v3589_v15, %v13853_v45  ;;  %v13857_v31 = vld [vmem:[#allocation141_spill] sm:$0xff] }
 0x63f   : > { %v3559_v22 = vpop.permute.xlu0 %3558  ;;  %v3501_v58 = vpop.permute.xlu1 %3500  ;;  %8052 = vrcp.f32 %v3721_v47 }
 0x640   : > { %v8035_v12 = vpop.eup %8034  ;;  %v3596_v6 = vsub.f32 %v3559_v22, %v13854_v20  ;;  %8054 = vpow2.f32 %v6773_v62  ;;  %v6761_v27 = vmul.f32 -1.442695, %v3604_v23  ;;  %v6774_v11 = vmul.f32 -1.442695, %v3617_v38  ;;  %v13859_v22 = vld [vmem:[#allocation64_spill] sm:$0xff]  ;;  %v13860_v20 = vld [vmem:[#allocation106_spill] sm:$0xff] }
 0x641   : > { %v8037_v25 = vpop.eup %8036  ;;  %v3734_v26 = vadd.f32 1.0, %v8035_v12  ;;  %8056 = vpow2.f32 %v6780_v43  ;;  %v3583_v12 = vsub.f32 %v3501_v58, %v13859_v22  ;;  %v13863_v58 = vld [vmem:[#allocation97_spill] sm:$0xff] }
 0x642   : > { %v8039_v48 = vpop.eup %8038  ;;  %v3799_v9 = vmul.f32 %v8037_v25, %v13855_v5  ;;  %v3913_v44 = vmul.f32 %v8037_v25, %v13856_v60  ;;  %8058 = vrcp.f32 %v3714_v52  ;;  %v3624_v45 = vmul.f32 %v3596_v6, %v13858_v13  ;;  %v13861_v5 = vld [vmem:[#allocation58_spill] sm:$0xff] }
 0x643   : > { %v3474_v4 = vpop.permute.xlu0 %3473  ;;  %v3532_v49 = vpop.permute.xlu1 %3531  ;;  %v3798_v47 = vmul.f32 %v8039_v48, %v13857_v31  ;;  %8060 = vpow2.f32 %v6767_v1  ;;  %v3912_v7 = vmul.f32 %v8039_v48, %v13860_v20  ;;  %v13862_v31 = vld [vmem:[#allocation152_spill] sm:$0xff]  ;;  %v3611_v22 = vmul.f32 %v3583_v12, %v13863_v58 }
 0x644   : > { %v8041_v55 = vpop.eup %8040  ;;  %8062 = vrcp.f32 %v3734_v26  ;;  %v3577_v21 = vsub.f32 %v3474_v4, %v13861_v5  ;;  %v3827_v43 = vsel %vm1583_vm9, %v3799_v9, 0.0  ;;  %v3941_v23 = vsel %vm1583_vm9, %v3913_v44, 0.0  ;;  %v13864_v4 = vld [vmem:[#allocation120_spill] sm:$0xff] }
 0x645   : > { %v8043_v15 = vpop.eup %8042  ;;  %8064 = vpow2.f32 %v6761_v27  ;;  %v6781_v52 = vmul.f32 -1.442695, %v3624_v45  ;;  %v3826_v1 = vsel %vm1583_vm9, %v3798_v47, 0.0  ;;  %v3806_v6 = vmul.f32 %v8041_v55, %v13862_v31  ;;  %v13865_v20 = vld [vmem:[#allocation88_spill] sm:$0xff]  ;;  %v13866_v27 = vld [vmem:[#allocation71_spill] sm:$0xff] }
 0x646   : > { %v8045_v62 = vpop.eup %8044  ;;  %8066 = vpow2.f32 %v6774_v11  ;;  %v3920_v5 = vmul.f32 %v8041_v55, %v13864_v4  ;;  %v3605_v44 = vmul.f32 %v3577_v21, %v13865_v20  ;;  %v3590_v45 = vsub.f32 %v3532_v49, %v13866_v27  ;;  %v13869_v11 = vld [vmem:[#allocation92_spill] sm:$0xff]  ;;  %v13871_v20 = vld [vmem:[#allocation127_spill] sm:$0xff]  ;;  %v13872_v27 = vld [vmem:[#allocation42_spill] sm:$0xff] }
 0x647   : > { %v8047_v25 = vpop.eup %8046  ;;  %v11679_v13 = vpop.permute.xlu0 %3562  ;;  %v3733_v9 = vadd.f32 1.0, %v8045_v62  ;;  %v3805_v47 = vmul.f32 %v8043_v15, %v13867_v33  ;;  %v3919_v31 = vmul.f32 %v8043_v15, %v13868_v0  ;;  %8068 = vpow2.f32 %v6781_v52  ;;  %v13873_v15 = vld [vmem:[#allocation27_spill] sm:$0xff] }
 0x648   : > { %v8049_v38 = vpop.eup %8048  ;;  %v11681_v48 = vpop.permute.xlu1 %3504  ;;  %v3813_v28 = vmul.f32 %v8047_v25, %v13869_v11  ;;  %v11689_v12 = vadd.f32 %v3827_v43, %v3826_v1  ;;  %v3940_v58 = vsel %vm1583_vm9, %v3912_v7, 0.0  ;;  %v6768_v55 = vmul.f32 -1.442695, %v3611_v22  ;;  %v13874_v43 = vld [vmem:[#allocation107_spill] sm:$0xff] }
 0x649   : > { %v8051_v26 = vpop.eup %8050  ;;  %v3812_v51 = vmul.f32 %v8049_v38, %v13870_v34  ;;  %v3846_v21 = vsel %vm1583_vm9, %v3806_v6, 0.0  ;;  %v3927_v49 = vmul.f32 %v8047_v25, %v13871_v20  ;;  %v3926_v4 = vmul.f32 %v8049_v38, %v13872_v27  ;;  %v13875_v27 = vld [vmem:[#allocation128_spill] sm:$0xff] }
 0x64a   : > { %v8053_v60 = vpop.eup %8052  ;;  %v3715_v33 = vadd.f32 1.0, %v8051_v26  ;;  %8070 = vrcp.f32 %v3733_v9  ;;  %v6762_v52 = vmul.f32 -1.442695, %v3605_v44  ;;  %v3618_v1 = vmul.f32 %v3590_v45, %v13874_v43 }
 0x64b   : > { %v8055_v62 = vpop.eup %8054  ;;  %v3807_v0 = vmul.f32 %v8053_v60, %v13873_v15  ;;  %v3960_v7 = vsel %vm1583_vm9, %v3920_v5, 0.0  ;;  %v3845_v22 = vsel %vm1583_vm9, %v3805_v47, 0.0  ;;  %v3959_v34 = vsel %vm1583_vm9, %v3919_v31, 0.0  ;;  %v3478_v25 = vpop.permute.xlu0 %3477 }
 0x64c   : > { %v8057_v53 = vpop.eup %8056  ;;  %v3865_v6 = vsel %vm1583_vm9, %v3813_v28, 0.0  ;;  %v3536_v20 = vpop.permute.xlu1 %3535  ;;  %v3864_v26 = vsel %vm1583_vm9, %v3812_v51, 0.0  ;;  %v3921_v15 = vmul.f32 %v8053_v60, %v13875_v27  ;;  %v3728_v9 = vadd.f32 1.0, %v8055_v62  ;;  %v13876_v28 = vld [vmem:[#allocation143_spill] sm:$0xff] }
 0x64d   : > { %v8059_v11 = vpop.eup %8058  ;;  %8072 = vpow2.f32 %v6768_v55  ;;  %v3979_v45 = vsel %vm1583_vm9, %v3927_v49, 0.0  ;;  %v3978_v5 = vsel %vm1583_vm9, %v3926_v4, 0.0  ;;  %v3735_v47 = vadd.f32 1.0, %v8057_v53 }
 0x64e   : > { %v8061_v38 = vpop.eup %8060  ;;  %8074 = vrcp.f32 %v3715_v33  ;;  %v3848_v31 = vsel %vm1583_vm9, %v3807_v0, 0.0  ;;  %v3800_v37 = vmul.f32 %v8059_v11, %v13876_v28  ;;  %v6775_v46 = vmul.f32 -1.442695, %v3618_v1  ;;  %v13877_v0 = vld [vmem:[#allocation102_spill] sm:$0xff] }
 0x64f   : > { %v8063_v44 = vpop.eup %8062  ;;  %8076 = vpow2.f32 %v6762_v52  ;;  %v11708_v51 = vadd.f32 %v3941_v23, %v3940_v58  ;;  %v3847_v60 = vadd.f32 %v3846_v21, %v3845_v22  ;;  %v3961_v62 = vadd.f32 %v3960_v7, %v3959_v34  ;;  %v13878_v52 = vld [vmem:[#allocation158_spill] sm:$0xff]  ;;  %v3567_v23 = vpop.permute.xlu0 %3566 }
 0x650   : > { %v8065_v43 = vpop.eup %8064  ;;  %v11710_v55 = vadd.f32 %v3865_v6, %v3864_v26  ;;  %v11712_v27 = vadd.f32 %v3979_v45, %v3978_v5  ;;  %v3962_v4 = vsel %vm1583_vm9, %v3921_v15, 0.0  ;;  %8078 = vrcp.f32 %v3728_v9  ;;  %v3509_v58 = vpop.permute.xlu1 %3508  ;;  %v13879_v22 = vld [vmem:[#allocation78_spill] sm:$0xff]  ;;  %v13880_v6 = vld [vmem:[#allocation65_spill] sm:$0xff]  ;;  %v13881_v26 = vld [vmem:[#allocation59_spill] sm:$0xff] }
 0x651   : > { %v8067_v63 = vpop.eup %8066  ;;  %v3722_v53 = vadd.f32 1.0, %v8061_v38  ;;  %v11715_v49 = vadd.f32 %v3848_v31, %v3847_v60  ;;  %v3914_v28 = vmul.f32 %v8059_v11, %v13877_v0  ;;  %v3820_v1 = vmul.f32 %v8063_v44, %v13878_v52  ;;  %v13882_v45 = vld [vmem:[#allocation72_spill] sm:$0xff]  ;;  %v13886_v0 = vld [vmem:[#allocation93_spill] sm:$0xff] }
 0x652   : > { %v8069_v33 = vpop.eup %8068  ;;  %8080 = vrcp.f32 %v3735_v47  ;;  %v3829_v34 = vsel %vm1583_vm9, %v3800_v37, 0.0  ;;  %v3716_v21 = vadd.f32 1.0, %v8065_v43  ;;  %v3729_v7 = vadd.f32 1.0, %v8067_v63  ;;  %v13883_v47 = vld [vmem:[#allocation47_spill] sm:$0xff]  ;;  %v13884_v43 = vld [vmem:[#allocation117_spill] sm:$0xff] }
 0x653   : > { %8082 = vpow2.f32 %v6775_v46  ;;  %v3597_v15 = vsub.f32 %v11679_v13, %v13879_v22  ;;  %v3584_v38 = vsub.f32 %v11681_v48, %v13880_v6  ;;  %v3578_v9 = vsub.f32 %v3478_v25, %v13881_v26  ;;  %v13885_v46 = vld [vmem:[#allocation98_spill] sm:$0xff]  ;;  %v13887_v22 = vld [vmem:[#allocation79_spill] sm:$0xff] }
 0x654   : > { %v3591_v11 = vsub.f32 %v3536_v20, %v13882_v45  ;;  %v8071_v5 = vpop.eup %8070  ;;  %v11726_v31 = vadd.f32 %v3962_v4, %v3961_v62  ;;  %v3934_v60 = vmul.f32 %v8063_v44, %v13883_v47  ;;  %8084 = vrcp.f32 %v3722_v53  ;;  %v13888_v62 = vld [vmem:[#allocation110_spill] sm:$0xff]  ;;  %v13892_v47 = vld [vmem:[#allocation147_spill] sm:$0xff] }
 0x655   : > { %v3736_v37 = vadd.f32 1.0, %v8069_v33  ;;  %v3625_v63 = vmul.f32 %v3597_v15, %v13884_v43  ;;  %v3612_v52 = vmul.f32 %v3584_v38, %v13885_v46  ;;  %v3606_v13 = vmul.f32 %v3578_v9, %v13886_v0  ;;  %v13889_v33 = vld [vmem:[#allocation157_spill] sm:$0xff]  ;;  %v3571_v46 = vpop.permute.xlu0 %3570  ;;  %v3540_v9 = vpop.permute.xlu1 %3539 }
 0x656   : > { %v3598_v14 = vsub.f32 %v3567_v23, %v13887_v22  ;;  %v11734_v25 = vadd.f32 %v3829_v34, %v11689_v12  ;;  %v3943_v20 = vsel %vm1583_vm9, %v3914_v28, 0.0  ;;  %8086 = vrcp.f32 %v3716_v21 }
 0x657   : > { %v8073_v48 = vpop.eup %8072  ;;  %v3619_v4 = vmul.f32 %v3591_v11, %v13888_v62  ;;  %v3884_v53 = vsel %vm1583_vm9, %v3820_v1, 0.0  ;;  %v3819_v15 = vmul.f32 %v8071_v5, %v13889_v33  ;;  %8088 = vrcp.f32 %v3729_v7  ;;  %v13890_v33 = vld [vmem:[#allocation82_spill] sm:$0xff] }
 0x658   : > { %v8075_v44 = vpop.eup %8074  ;;  %v6782_v38 = vmul.f32 -1.442695, %v3625_v63  ;;  %8090 = vrcp.f32 %v3736_v37  ;;  %v6769_v23 = vmul.f32 -1.442695, %v3612_v52  ;;  %v6763_v22 = vmul.f32 -1.442695, %v3606_v13 }
 0x659   : > { %v8077_v0 = vpop.eup %8076  ;;  %v6776_v12 = vmul.f32 -1.442695, %v3619_v4  ;;  %v3933_v34 = vmul.f32 %v8071_v5, %v13789_v8  ;;  %v3723_v28 = vadd.f32 1.0, %v8073_v48  ;;  %v3626_v21 = vmul.f32 %v3598_v14, %v13790_v3  ;;  %v13891_v63 = vld [vmem:[#allocation73_spill] sm:$0xff]  ;;  %v13898_v3 = vld [vmem:[#allocation159_spill] sm:$0xff] }
 0x65a   : > { %8092 = vpow2.f32 %v6782_v38  ;;  %v8079_v11 = vpop.eup %8078  ;;  %v3585_v1 = vsub.f32 %v3509_v58, %v13792_v50  ;;  %v3599_v7 = vsub.f32 %v3571_v46, %v13890_v33  ;;  %v3592_v62 = vsub.f32 %v3540_v9, %v13891_v63  ;;  %v13893_v14 = vld [vmem:[#allocation101_spill] sm:$0xff]  ;;  %v13896_v9 = vld [vmem:[#allocation112_spill] sm:$0xff] }
 0x65b   : > { %8094 = vpow2.f32 %v6769_v23  ;;  %v3801_v37 = vmul.f32 %v8075_v44, %v13892_v47  ;;  %v3717_v52 = vadd.f32 1.0, %v8077_v0  ;;  %v6783_v13 = vmul.f32 -1.442695, %v3626_v21  ;;  %v13894_v23 = vld [vmem:[#allocation118_spill] sm:$0xff]  ;;  %v13895_v46 = vld [vmem:[#allocation121_spill] sm:$0xff]  ;;  %v13897_v47 = vld [vmem:[#allocation131_spill] sm:$0xff] }
 0x65c   : > { %v8081_v43 = vpop.eup %8080  ;;  %8096 = vpow2.f32 %v6763_v22  ;;  %v3883_v5 = vsel %vm1583_vm9, %v3819_v15, 0.0  ;;  %v3915_v48 = vmul.f32 %v8075_v44, %v13696_v35  ;;  %v3613_v38 = vmul.f32 %v3585_v1, %v13893_v14 }
 0x65d   : > { %v8083_v4 = vpop.eup %8082  ;;  %8098 = vpow2.f32 %v6776_v12  ;;  %v3814_v58 = vmul.f32 %v8079_v11, %v13894_v23  ;;  %v3627_v33 = vmul.f32 %v3599_v7, %v13895_v46  ;;  %v3620_v63 = vmul.f32 %v3592_v62, %v13896_v9 }
 0x65e   : > { %8100 = vpow2.f32 %v6783_v13  ;;  %v8085_v50 = vpop.eup %8084  ;;  %v3928_v0 = vmul.f32 %v8079_v11, %v13897_v47  ;;  %v3730_v22 = vadd.f32 1.0, %v8083_v4  ;;  %v6770_v21 = vmul.f32 -1.442695, %v3613_v38  ;;  %v13899_v13 = vld [vmem:[#allocation48_spill] sm:$0xff] }
 0x65f   : > { %8102 = vrcp.f32 %v3723_v28  ;;  %v3998_v15 = vsel %vm1583_vm9, %v3934_v60, 0.0  ;;  %v3821_v44 = vmul.f32 %v8081_v43, %v13898_v3  ;;  %v6784_v12 = vmul.f32 -1.442695, %v3627_v33 }
 0x660   : > { %8104 = vrcp.f32 %v3717_v52  ;;  %v8087_v1 = vpop.eup %8086  ;;  %v3997_v23 = vsel %vm1583_vm9, %v3933_v34, 0.0  ;;  %v3935_v14 = vmul.f32 %v8081_v43, %v13899_v13  ;;  %v6777_v7 = vmul.f32 -1.442695, %v3620_v63  ;;  %v13900_v63 = vld [vmem:[#allocation56_spill] sm:$0xff] }
 0x661   : > { %8106 = vpow2.f32 %v6770_v21  ;;  %v8089_v62 = vpop.eup %8088  ;;  %v3944_v9 = vadd.f32 %v3943_v20, %v11708_v51  ;;  %v3885_v11 = vadd.f32 %v3884_v53, %v3883_v5  ;;  %v3831_v28 = vsel %vm1583_vm9, %v3801_v37, 0.0  ;;  %v13901_v53 = vld [vmem:[#allocation41_spill] sm:$0xff]  ;;  %v13902_v5 = vld [vmem:[#allocation148_spill] sm:$0xff] }
 0x662   : > { %8108 = vpow2.f32 %v6784_v12  ;;  %v8091_v4 = vpop.eup %8090  ;;  %v3945_v60 = vsel %vm1583_vm9, %v3915_v48, 0.0  ;;  %v3867_v52 = vsel %vm1583_vm9, %v3814_v58, 0.0  ;;  %v3981_v33 = vsel %vm1583_vm9, %v3928_v0, 0.0 }
 0x663   : > { %8110 = vrcp.f32 %v3730_v22  ;;  %v3999_v38 = vadd.f32 %v3998_v15, %v3997_v23  ;;  %v3886_v43 = vsel %vm1583_vm9, %v3821_v44, 0.0  ;;  %v3808_v21 = vmul.f32 %v8085_v50, %v13900_v63 }
 0x664   : > { %v8093_v34 = vpop.eup %8092  ;;  %8112 = vpow2.f32 %v6777_v7  ;;  %v4000_v20 = vsel %vm1583_vm9, %v3935_v14, 0.0  ;;  %v3922_v37 = vmul.f32 %v8085_v50, %v13901_v53  ;;  %v3802_v12 = vmul.f32 %v8087_v1, %v13902_v5 }
 0x665   : > { %v8095_v51 = vpop.eup %8094  ;;  %v3737_v48 = vadd.f32 1.0, %v8093_v34  ;;  %v3832_v58 = vadd.f32 %v3831_v28, %v11734_v25  ;;  %v3946_v0 = vadd.f32 %v3945_v60, %v3944_v9  ;;  %v3868_v22 = vadd.f32 %v3867_v52, %v11710_v55 }
 0x666   : > { %v8097_v13 = vpop.eup %8096  ;;  %v3982_v23 = vadd.f32 %v3981_v33, %v11712_v27  ;;  %v3887_v44 = vadd.f32 %v3886_v43, %v3885_v11  ;;  %v3916_v7 = vmul.f32 %v8087_v1, %v13806_v40  ;;  %v3724_v63 = vadd.f32 1.0, %v8095_v51  ;;  %v13903_v43 = vld [vmem:[#allocation100_spill] sm:$0xff] }
 0x667   : > { %v8099_v15 = vpop.eup %8098  ;;  %8114 = vrcp.f32 %v3737_v48  ;;  %v4001_v3 = vadd.f32 %v4000_v20, %v3999_v38  ;;  %v3850_v50 = vsel %vm1583_vm9, %v3808_v21, 0.0  ;;  %v3718_v5 = vadd.f32 1.0, %v8097_v13 }
 0x668   : > { %v8101_v14 = vpop.eup %8100  ;;  %v3731_v34 = vadd.f32 1.0, %v8099_v15  ;;  %v3964_v25 = vsel %vm1583_vm9, %v3922_v37, 0.0  ;;  %v3833_v9 = vsel %vm1583_vm9, %v3802_v12, 0.0  ;;  %8116 = vrcp.f32 %v3724_v63 }
 0x669   : > { %v8103_v53 = vpop.eup %8102  ;;  %v3738_v55 = vadd.f32 1.0, %v8101_v14  ;;  %v3815_v11 = vmul.f32 %v8089_v62, %v13807_v36  ;;  %v3929_v1 = vmul.f32 %v8089_v62, %v13808_v2  ;;  %v3822_v28 = vmul.f32 %v8091_v4, %v13809_v24 }
 0x66a   : > { %v8105_v27 = vpop.eup %8104  ;;  %8118 = vrcp.f32 %v3718_v5  ;;  %v3851_v52 = vadd.f32 %v3850_v50, %v11715_v49  ;;  %v3947_v13 = vsel %vm1583_vm9, %v3916_v7, 0.0  ;;  %v3936_v33 = vmul.f32 %v8091_v4, %v13712_v59  ;;  %v13904_v5 = vld [vmem:[#allocation50_spill] sm:$0xff] }
 0x66b   : > { %v8107_v60 = vpop.eup %8106  ;;  %8120 = vrcp.f32 %v3731_v34  ;;  %v3809_v63 = vmul.f32 %v8103_v53, %v13903_v43  ;;  %v3923_v21 = vmul.f32 %v8103_v53, %v13714_v54  ;;  %v3965_v62 = vadd.f32 %v3964_v25, %v11726_v31  ;;  %v13905_v25 = vld [vmem:[#allocation154_spill] sm:$0xff] }
 0x66c   : > { %v8109_v38 = vpop.eup %8108  ;;  %8122 = vrcp.f32 %v3738_v55  ;;  %v3725_v51 = vadd.f32 1.0, %v8107_v60  ;;  %v3834_v37 = vadd.f32 %v3833_v9, %v3832_v58  ;;  %v3803_v12 = vmul.f32 %v8105_v27, %v13904_v5 }
 0x66d   : > { %v8111_v20 = vpop.eup %8110  ;;  %v3739_v48 = vadd.f32 1.0, %v8109_v38  ;;  %v3869_v15 = vsel %vm1583_vm9, %v3815_v11, 0.0  ;;  %v3983_v4 = vsel %vm1583_vm9, %v3929_v1, 0.0  ;;  %v3888_v7 = vsel %vm1583_vm9, %v3822_v28, 0.0 }
 0x66e   : > { %v8113_v49 = vpop.eup %8112  ;;  %8124 = vrcp.f32 %v3725_v51  ;;  %v3948_v14 = vadd.f32 %v3947_v13, %v3946_v0  ;;  %v3917_v53 = vmul.f32 %v8105_v27, %v13812_v41  ;;  %v4002_v34 = vsel %vm1583_vm9, %v3936_v33, 0.0  ;;  %v13906_v13 = vld [vmem:[#allocation138_spill] sm:$0xff] }
 0x66f   : > { %8126 = vrcp.f32 %v3739_v48  ;;  %v3732_v50 = vadd.f32 1.0, %v8113_v49  ;;  %v3852_v31 = vsel %vm1583_vm9, %v3809_v63, 0.0  ;;  %v3966_v58 = vsel %vm1583_vm9, %v3923_v21, 0.0 }
 0x670   : > { %v3816_v9 = vmul.f32 %v8111_v20, %v13905_v25  ;;  %v3870_v11 = vadd.f32 %v3869_v15, %v3868_v22  ;;  %v3984_v60 = vadd.f32 %v3983_v4, %v3982_v23  ;;  %v3889_v1 = vadd.f32 %v3888_v7, %v3887_v44 }
 0x671   : > { %v8115_v55 = vpop.eup %8114  ;;  %v3835_v28 = vsel %vm1583_vm9, %v3803_v12, 0.0  ;;  %v3930_v0 = vmul.f32 %v8111_v20, %v13718_v42  ;;  %8128 = vrcp.f32 %v3732_v50  ;;  %v4003_v51 = vadd.f32 %v4002_v34, %v4001_v3  ;;  %v13907_v12 = vld [vmem:[#allocation125_spill] sm:$0xff]  ;;  %v13908_v50 = vld [vmem:[#allocation150_spill] sm:$0xff] }
 0x672   : > { %v3823_v27 = vmul.f32 %v8115_v55, %v13719_v18  ;;  %v3937_v38 = vmul.f32 %v8115_v55, %v13906_v13  ;;  %v8117_v33 = vpop.eup %8116  ;;  %v3853_v63 = vadd.f32 %v3852_v31, %v3851_v52  ;;  %v3967_v48 = vadd.f32 %v3966_v58, %v3965_v62  ;;  %v13909_v3 = vld [vmem:[#allocation126_spill] sm:$0xff]  ;;  %v13912_v13 = vld [vmem:[#allocation139_spill] sm:$0xff] }
 0x673   : > { %v3949_v21 = vsel %vm1583_vm9, %v3917_v53, 0.0  ;;  %v3871_v22 = vsel %vm1583_vm9, %v3816_v9, 0.0  ;;  %v3810_v44 = vmul.f32 %v8117_v33, %v13815_v61  ;;  %v3924_v20 = vmul.f32 %v8117_v33, %v13907_v12  ;;  %v13911_v61 = vld [vmem:[#allocation162_spill] sm:$0xff] }
 0x674   : > { %v8119_v49 = vpop.eup %8118  ;;  %v3890_v23 = vsel %vm1583_vm9, %v3823_v27, 0.0  ;;  %v3836_v4 = vadd.f32 %v3835_v28, %v3834_v37  ;;  %v4004_v7 = vsel %vm1583_vm9, %v3937_v38, 0.0  ;;  %v3950_v34 = vadd.f32 %v3949_v21, %v3948_v14 }
 0x675   : > { %v8121_v15 = vpop.eup %8120  ;;  %v3804_v55 = vmul.f32 %v8119_v49, %v13908_v50  ;;  %v3918_v52 = vmul.f32 %v8119_v49, %v13909_v3  ;;  %v3985_v53 = vsel %vm1583_vm9, %v3930_v0, 0.0  ;;  %v3854_v31 = vsel %vm1583_vm9, %v3810_v44, 0.0  ;;  %v13910_v49 = vld [vmem:[#allocation130_spill] sm:$0xff] }
 0x676   : > { %v8123_v62 = vpop.eup %8122  ;;  %v3968_v58 = vsel %vm1583_vm9, %v3924_v20, 0.0  ;;  %v3872_v9 = vadd.f32 %v3871_v22, %v3870_v11  ;;  %v3891_v27 = vadd.f32 %v3890_v23, %v3889_v1  ;;  %v4005_v38 = vadd.f32 %v4004_v7, %v4003_v51  ;;  %v13913_v22 = vld [vmem:[#allocation32_spill] sm:$0xff] }
 0x677   : > { %v3837_v33 = vsel %vm2074_vm5, %v3804_v55, 0.0  ;;  %v3951_v37 = vsel %vm2074_vm5, %v3918_v52, 0.0  ;;  %v3817_v50 = vmul.f32 %v8121_v15, %v13725_v17  ;;  %v3931_v3 = vmul.f32 %v8121_v15, %v13910_v49  ;;  %v13914_v55 = vld [vmem:[#allocation129_spill] sm:$0xff] }
 0x678   : > { %v8125_v28 = vpop.eup %8124  ;;  %v3952_v12 = vadd.f32 %v3951_v37, %v3950_v34  ;;  %v3855_v21 = vadd.f32 %v3854_v31, %v3853_v63  ;;  %v3969_v0 = vadd.f32 %v3968_v58, %v3967_v48  ;;  %v3824_v44 = vmul.f32 %v8123_v62, %v13911_v61  ;;  %v13915_v34 = vld [vmem:[#allocation163_spill] sm:$0xff]  ;;  %v13916_v15 = vld [vmem:[#allocation49_spill] sm:$0xff] }
 0x679   : > { %v8127_v14 = vpop.eup %8126  ;;  %v3938_v20 = vmul.f32 %v8123_v62, %v13912_v13  ;;  %v3838_v11 = vadd.f32 %v3837_v33, %v3836_v4  ;;  %v3811_v23 = vmul.f32 %v8125_v28, %v13913_v22  ;;  %v3925_v52 = vmul.f32 %v8125_v28, %v13914_v55  ;;  %v13917_v13 = vld [vmem:[#allocation156_spill] sm:$0xff]  ;;  %v13918_v61 = vld [vmem:[#allocation45_spill] sm:$0xff] }
 0x67a   : > { %v3953_v1 = vrot.slane %v3952_v12, 4  ;;  %v3892_v51 = vsel %vm1583_vm9, %v3824_v44, 0.0  ;;  %v3825_v37 = vmul.f32 %v8127_v14, %v13915_v34  ;;  %v3939_v49 = vmul.f32 %v8127_v14, %v13916_v15 }
 0x67b   : > { %v4006_v7 = vsel %vm1583_vm9, %v3938_v20, 0.0  ;;  %v8129_v63 = vpop.eup %8128  ;;  %v3873_v48 = vsel %vm1583_vm9, %v3817_v50, 0.0  ;;  %v3987_v31 = vsel %vm1583_vm9, %v3931_v3, 0.0  ;;  %v3893_v62 = vadd.f32 %v3892_v51, %v3891_v27 }
 0x67c   : > { %v4007_v4 = vadd.f32 %v4006_v7, %v4005_v38  ;;  %v3856_v58 = vsel %vm2074_vm5, %v3811_v23, 0.0  ;;  %v3970_v33 = vsel %vm2074_vm5, %v3925_v52, 0.0  ;;  %v3894_v28 = vsel %vm2074_vm5, %v3825_v37, 0.0 }
 0x67d   : > { %v4008_v44 = vsel %vm2074_vm5, %v3939_v49, 0.0  ;;  %v3986_v20 = vadd.f32 %v3985_v53, %v3984_v60  ;;  %v3954_v55 = vadd.f32 %v3953_v1, %v3952_v12  ;;  %v3857_v34 = vadd.f32 %v3856_v58, %v3855_v21 }
 0x67e   : > { %v3971_v22 = vadd.f32 %v3970_v33, %v3969_v0  ;;  %v3895_v14 = vadd.f32 %v3894_v28, %v3893_v62  ;;  %v4009_v15 = vadd.f32 %v4008_v44, %v4007_v4  ;;  %v3818_v50 = vmul.f32 %v8129_v63, %v13917_v13 }
 0x67f   : > { %v3932_v3 = vmul.f32 %v8129_v63, %v13918_v61  ;;  %v3874_v27 = vadd.f32 %v3873_v48, %v3872_v9  ;;  %v3988_v38 = vadd.f32 %v3987_v31, %v3986_v20  ;;  %v3858_v51 = vrot.slane %v3857_v34, 4 }
 0x680   : > { %v3972_v23 = vrot.slane %v3971_v22, 4  ;;  %v3839_v7 = vrot.slane %v3838_v11, 4  ;;  %v4010_v52 = vrot.slane %v4009_v15, 4  ;;  %v3875_v37 = vsel %vm2074_vm5, %v3818_v50, 0.0 }
 0x681   : > { %v3989_v49 = vsel %vm2074_vm5, %v3932_v3, 0.0  ;;  %v3955_v60 = vrot.slane %v3954_v55, 2  ;;  %v3896_v53 = vrot.slane %v3895_v14, 4  ;;  %v3859_v21 = vadd.f32 %v3858_v51, %v3857_v34 }
 0x682   : > { %v3973_v12 = vadd.f32 %v3972_v23, %v3971_v22  ;;  %v4011_v0 = vadd.f32 %v4010_v52, %v4009_v15  ;;  %v3876_v1 = vadd.f32 %v3875_v37, %v3874_v27  ;;  %v3990_v62 = vadd.f32 %v3989_v49, %v3988_v38 }
 0x683   : > { %v3840_v58 = vadd.f32 %v3839_v7, %v3838_v11  ;;  %v3956_v31 = vadd.f32 %v3955_v60, %v3954_v55  ;;  %v3897_v28 = vadd.f32 %v3896_v53, %v3895_v14  ;;  %v3860_v44 = vrot.slane %v3859_v21, 2 }
 0x684   : > { %v3974_v4 = vrot.slane %v3973_v12, 2  ;;  %v4012_v63 = vrot.slane %v4011_v0, 2  ;;  %v3877_v9 = vrot.slane %v3876_v1, 4  ;;  %v3991_v48 = vrot.slane %v3990_v62, 4 }
 0x685   : > { %v3841_v13 = vrot.slane %v3840_v58, 2  ;;  %v3957_v34 = vrot.slane %v3956_v31, 1  ;;  %v3861_v27 = vadd.f32 %v3860_v44, %v3859_v21  ;;  %v3898_v38 = vrot.slane %v3897_v28, 2 }
 0x686   : > { %v3975_v33 = vadd.f32 %v3974_v4, %v3973_v12  ;;  %v4013_v20 = vadd.f32 %v4012_v63, %v4011_v0  ;;  %v3878_v50 = vadd.f32 %v3877_v9, %v3876_v1  ;;  %v3992_v61 = vadd.f32 %v3991_v48, %v3990_v62 }
 0x687   : > { %v3842_v52 = vadd.f32 %v3841_v13, %v3840_v58  ;;  %v3958_v55 = vadd.f32 %v3957_v34, %v3956_v31  ;;  %v3862_v14 = vrot.slane %v3861_v27, 1  ;;  %v3899_v60 = vadd.f32 %v3898_v38, %v3897_v28  ;;  %v13919_v38 = vld [vmem:[#allocation195_spill] sm:$0xff] }
 0x688   : > { %v3976_v3 = vrot.slane %v3975_v33, 1  ;;  %v3879_v22 = vrot.slane %v3878_v50, 2  ;;  %v3993_v23 = vrot.slane %v3992_v61, 2  ;;  %v4014_v15 = vrot.slane %v4013_v20, 1 }
 0x689   : > { %v3843_v1 = vrot.slane %v3842_v52, 1  ;;  %v3863_v21 = vadd.f32 %v3862_v14, %v3861_v27  ;;  %v3900_v63 = vrot.slane %v3899_v60, 1  ;;  %v3796_v28 = vmul.f32 %v11624_v32, %v13614_v39  ;;  %v13922_v14 = vld [vmem:[#allocation83_spill] sm:$0xff] }
 0x68a   : > { %v3994_v51 = vadd.f32 %v3993_v23, %v3992_v61  ;;  %v3977_v11 = vadd.f32 %v3976_v3, %v3975_v33  ;;  %v3880_v7 = vadd.f32 %v3879_v22, %v3878_v50  ;;  %v4015_v49 = vadd.f32 %v4014_v15, %v4013_v20 }
 0x68b   : > { %v3844_v13 = vadd.f32 %v3843_v1, %v3842_v52  ;;  %v3901_v31 = vadd.f32 %v3900_v63, %v3899_v60  ;;  %v3797_v50 = vadd.f32 %v3796_v28, %v13616_v57  ;;  %v13920_v52 = vld [vmem:[#allocation52_spill] sm:$0xff] }
 0x68c   : > { %v3995_v37 = vrot.slane %v3994_v51, 1  ;;  %v4020_v53 = vsel %vm2144_vm12, %v3977_v11, %v3958_v55  ;;  %v3881_v0 = vrot.slane %v3880_v7, 1  ;;  %v13921_v55 = vld [vmem:[#allocation51_spill] sm:$0xff] }
 0x68d   : > { %v3906_v48 = vsel %vm2144_vm12, %v3863_v21, %v3844_v13  ;;  %v13925_v21 = vld [vmem:[#allocation60_spill] sm:$0xff] }
 0x68e   : > { %v3996_v12 = vadd.f32 %v3995_v37, %v3994_v51  ;;  %v3882_v9 = vadd.f32 %v3881_v0, %v3880_v7  ;;  %v13923_v0 = vld [vmem:[#allocation80_spill] sm:$0xff] }
 0x690   : > { %v4021_v62 = vsel %vm2146_vm14, %v3996_v12, %v4020_v53  ;;  %v3907_v44 = vsel %vm2146_vm14, %v3882_v9, %v3906_v48  ;;  %v13926_v9 = vld [vmem:[#allocation90_spill] sm:$0xff] }
 0x691   : > { %v4022_v4 = vsel %vm2148_vm1, %v4015_v49, %v4021_v62  ;;  %v3908_v20 = vsel %vm2148_vm1, %v3901_v31, %v3907_v44  ;;  %v13924_v62 = vld [vmem:[#allocation61_spill] sm:$0xff]  ;;  %v13928_v44 = vld [vmem:[#allocation68_spill] sm:$0xff] }
 0x692   : > { %v4024_v61 = vadd.f32 %v4022_v4, %v13612_v10  ;;  %v3910_v3 = vadd.f32 %v3908_v20, %v3797_v50  ;;  %v13929_v50 = vld [vmem:[#allocation67_spill] sm:$0xff] }
 0x694   : > { %v4025_v58 = vadd.f32 %v4024_v61, %v11175_v56  ;;  %v3911_v22 = vadd.f32 %v3910_v3, %v11187_v16 }
 0x696   : > { %v4026_v33 = vadd.f32 1e-08, %v4025_v58 }
 0x698   : > { %8130 = vrcp.f32 %v4026_v33  ;;  %v13927_v33 = vld [vmem:[#allocation89_spill] sm:$0xff] }
 0x6a2   : > { %v8131_v23 = vpop.eup %8130 }
 0x6a3   : > { %v11841_v34 = vmul.f32 %v8131_v23, %v3911_v22  ;;  %v13930_v22 = vld [vmem:[#allocation103_spill] sm:$0xff] }
 0x6a5   : > { %v4032_v15 = vrot.slane %v11841_v34, %v13618_v30  ;;  %v4063_v32 = vrot.slane %v11841_v34, %v13619_v29  ;;  %v4094_v27 = vrot.slane %v11841_v34, %v13620_v19  ;;  %v4125_v51 = vrot.slane %v11841_v34, %v13919_v38 }
 0x6a7   : > { %4038 = vbcast.lane.b32.xlu0 %v4032_v15, 264  ;;  %4034 = vbcast.lane.b32.xlu1 %v4032_v15, 256 }
 0x6ab   : > { %4069 = vbcast.lane.b32.xlu0 %v4063_v32, 264  ;;  %4065 = vbcast.lane.b32.xlu1 %v4063_v32, 256 }
 0x6af   : > { %4100 = vbcast.lane.b32.xlu0 %v4094_v27, 264  ;;  %4096 = vbcast.lane.b32.xlu1 %v4094_v27, 256 }
 0x6b3   : > { %4073 = vbcast.lane.b32.xlu0 %v4063_v32, 272  ;;  %4042 = vbcast.lane.b32.xlu1 %v4032_v15, 272 }
 0x6b7   : > { %4131 = vbcast.lane.b32.xlu0 %v4125_v51, 264  ;;  %4127 = vbcast.lane.b32.xlu1 %v4125_v51, 256 }
 0x6bb   : > { %4046 = vbcast.lane.b32.xlu0 %v4032_v15, 280  ;;  %4104 = vbcast.lane.b32.xlu1 %v4094_v27, 272 }
 0x6bf   : > { %4135 = vbcast.lane.b32.xlu0 %v4125_v51, 272  ;;  %4077 = vbcast.lane.b32.xlu1 %v4063_v32, 280 }
 0x6c3   : > { %4050 = vbcast.lane.b32.xlu0 %v4032_v15, 288  ;;  %4108 = vbcast.lane.b32.xlu1 %v4094_v27, 280 }
 0x6c7   : > { %4139 = vbcast.lane.b32.xlu0 %v4125_v51, 280  ;;  %4081 = vbcast.lane.b32.xlu1 %v4063_v32, 288 }
 0x6cb   : > { %4054 = vbcast.lane.b32.xlu0 %v4032_v15, 296  ;;  %4112 = vbcast.lane.b32.xlu1 %v4094_v27, 288 }
 0x6cf   : > { %4143 = vbcast.lane.b32.xlu0 %v4125_v51, 288  ;;  %4085 = vbcast.lane.b32.xlu1 %v4063_v32, 296 }
 0x6d3   : > { %4058 = vbcast.lane.b32.xlu0 %v4032_v15, 304  ;;  %4116 = vbcast.lane.b32.xlu1 %v4094_v27, 296 }
 0x6d7   : > { %4147 = vbcast.lane.b32.xlu0 %v4125_v51, 296  ;;  %4089 = vbcast.lane.b32.xlu1 %v4063_v32, 304  ;;  %v13931_v32 = vld [vmem:[#allocation99_spill] sm:$0xff] }
 0x6db   : > { %4151 = vbcast.lane.b32.xlu0 %v4125_v51, 304  ;;  %4120 = vbcast.lane.b32.xlu1 %v4094_v27, 304 }
 0x719   : > { %v4039_v11 = vpop.permute.xlu0 %4038  ;;  %v4035_v7 = vpop.permute.xlu1 %4034 }
 0x71a   : > { %v4154_v37 = vsub.f32 %v4039_v11, %v13920_v52  ;;  %v4153_v49 = vsub.f32 %v4035_v7, %v13921_v55  ;;  %v13968_v52 = vld [vmem:[#allocation86_spill] sm:$0xff] }
 0x71c   : > { %v4182_v60 = vmul.f32 %v4154_v37, %v13922_v14  ;;  %v4181_v1 = vmul.f32 %v4153_v49, %v13923_v0  ;;  %v13932_v37 = vld [vmem:[#allocation62_spill] sm:$0xff]  ;;  %v13965_v0 = vld [vmem:[#allocation151_spill] sm:$0xff]  ;;  %v13966_v14 = vld [vmem:[#allocation40_spill] sm:$0xff] }
 0x71d   : > { %v4070_v12 = vpop.permute.xlu0 %4069  ;;  %v4066_v53 = vpop.permute.xlu1 %4065 }
 0x71e   : > { %v4161_v4 = vsub.f32 %v4070_v12, %v13924_v62  ;;  %v4160_v63 = vsub.f32 %v4066_v53, %v13925_v21  ;;  %v6786_v61 = vmul.f32 -1.442695, %v4182_v60  ;;  %v6785_v31 = vmul.f32 -1.442695, %v4181_v1  ;;  %v13933_v60 = vld [vmem:[#allocation53_spill] sm:$0xff]  ;;  %v13934_v1 = vld [vmem:[#allocation94_spill] sm:$0xff] }
 0x71f   : > { %v13944_v21 = vld [vmem:[#allocation63_spill] sm:$0xff]  ;;  %v13947_v62 = vld [vmem:[#allocation57_spill] sm:$0xff] }
 0x720   : > { %v4189_v13 = vmul.f32 %v4161_v4, %v13926_v9  ;;  %v4188_v28 = vmul.f32 %v4160_v63, %v13927_v33  ;;  %8132 = vpow2.f32 %v6786_v61  ;;  %v13935_v61 = vld [vmem:[#allocation75_spill] sm:$0xff] }
 0x721   : > { %v4101_v58 = vpop.permute.xlu0 %4100  ;;  %v4097_v48 = vpop.permute.xlu1 %4096  ;;  %8134 = vpow2.f32 %v6785_v31  ;;  %v13937_v31 = vld [vmem:[#allocation114_spill] sm:$0xff] }
 0x722   : > { %v4168_v20 = vsub.f32 %v4101_v58, %v13928_v44  ;;  %v4167_v3 = vsub.f32 %v4097_v48, %v13929_v50  ;;  %v6793_v15 = vmul.f32 -1.442695, %v4189_v13  ;;  %v6792_v7 = vmul.f32 -1.442695, %v4188_v28 }
 0x724   : > { %v4196_v23 = vmul.f32 %v4168_v20, %v13930_v22  ;;  %v4195_v27 = vmul.f32 %v4167_v3, %v13931_v32  ;;  %8136 = vpow2.f32 %v6793_v15  ;;  %v13936_v3 = vld [vmem:[#allocation84_spill] sm:$0xff]  ;;  %v13938_v15 = vld [vmem:[#allocation74_spill] sm:$0xff] }
 0x725   : > { %v4074_v51 = vpop.permute.xlu0 %4073  ;;  %v4043_v11 = vpop.permute.xlu1 %4042  ;;  %8138 = vpow2.f32 %v6792_v7 }
 0x726   : > { %v4162_v49 = vsub.f32 %v4074_v51, %v13932_v37  ;;  %v4155_v12 = vsub.f32 %v4043_v11, %v13933_v60  ;;  %v6800_v53 = vmul.f32 -1.442695, %v4196_v23  ;;  %v6799_v63 = vmul.f32 -1.442695, %v4195_v27 }
 0x728   : > { %v4190_v4 = vmul.f32 %v4162_v49, %v13934_v1  ;;  %v4183_v32 = vmul.f32 %v4155_v12, %v13936_v3  ;;  %8140 = vpow2.f32 %v6800_v53  ;;  %v13939_v12 = vld [vmem:[#allocation55_spill] sm:$0xff]  ;;  %v13940_v3 = vld [vmem:[#allocation113_spill] sm:$0xff] }
 0x729   : > { %v4132_v58 = vpop.permute.xlu0 %4131  ;;  %v4128_v48 = vpop.permute.xlu1 %4127  ;;  %8142 = vpow2.f32 %v6799_v63 }
 0x72a   : > { %v4175_v13 = vsub.f32 %v4132_v58, %v13935_v61  ;;  %v6794_v20 = vmul.f32 -1.442695, %v4190_v4  ;;  %v8133_v11 = vpop.eup %8132  ;;  %v6787_v23 = vmul.f32 -1.442695, %v4183_v32  ;;  %v4174_v27 = vsub.f32 %v4128_v48, %v13938_v15  ;;  %v13941_v32 = vld [vmem:[#allocation69_spill] sm:$0xff] }
 0x72b   : > { %v8135_v49 = vpop.eup %8134  ;;  %v4294_v22 = vadd.f32 1.0, %v8133_v11  ;;  %v13942_v11 = vld [vmem:[#allocation85_spill] sm:$0xff] }
 0x72c   : > { %v4203_v28 = vmul.f32 %v4175_v13, %v13937_v31  ;;  %8144 = vpow2.f32 %v6794_v20  ;;  %v4293_v4 = vadd.f32 1.0, %v8135_v49  ;;  %v4202_v13 = vmul.f32 %v4174_v27, %v13940_v3  ;;  %v13943_v49 = vld [vmem:[#allocation76_spill] sm:$0xff] }
 0x72d   : > { %v4047_v51 = vpop.permute.xlu0 %4046  ;;  %v4105_v37 = vpop.permute.xlu1 %4104  ;;  %8146 = vpow2.f32 %v6787_v23 }
 0x72e   : > { %v6807_v1 = vmul.f32 -1.442695, %v4203_v28  ;;  %v8137_v58 = vpop.eup %8136  ;;  %v4156_v53 = vsub.f32 %v4047_v51, %v13939_v12  ;;  %v4169_v61 = vsub.f32 %v4105_v37, %v13941_v32  ;;  %v6806_v9 = vmul.f32 -1.442695, %v4202_v13  ;;  %v13946_v32 = vld [vmem:[#allocation115_spill] sm:$0xff] }
 0x72f   : > { %v8139_v63 = vpop.eup %8138  ;;  %v4301_v20 = vadd.f32 1.0, %v8137_v58 }
 0x730   : > { %8148 = vpow2.f32 %v6807_v1  ;;  %v4300_v15 = vadd.f32 1.0, %v8139_v63  ;;  %v4184_v33 = vmul.f32 %v4156_v53, %v13942_v11  ;;  %v13948_v53 = vld [vmem:[#allocation70_spill] sm:$0xff] }
 0x731   : > { %v4136_v60 = vpop.permute.xlu0 %4135  ;;  %v4078_v7 = vpop.permute.xlu1 %4077  ;;  %8150 = vrcp.f32 %v4294_v22  ;;  %v13945_v22 = vld [vmem:[#allocation104_spill] sm:$0xff] }
 0x732   : > { %v8141_v31 = vpop.eup %8140  ;;  %8152 = vrcp.f32 %v4293_v4  ;;  %v4176_v23 = vsub.f32 %v4136_v60, %v13943_v49  ;;  %v4163_v27 = vsub.f32 %v4078_v7, %v13944_v21  ;;  %v4197_v58 = vmul.f32 %v4169_v61, %v13945_v22 }
 0x733   : > { %v8143_v28 = vpop.eup %8142  ;;  %v4308_v12 = vadd.f32 1.0, %v8141_v31  ;;  %8154 = vrcp.f32 %v4301_v20  ;;  %v6788_v37 = vmul.f32 -1.442695, %v4184_v33  ;;  %v13949_v31 = vld [vmem:[#allocation95_spill] sm:$0xff] }
 0x734   : > { %v4307_v1 = vadd.f32 1.0, %v8143_v28  ;;  %8156 = vrcp.f32 %v4300_v15  ;;  %v4204_v3 = vmul.f32 %v4176_v23, %v13946_v32  ;;  %v4191_v7 = vmul.f32 %v4163_v27, %v13949_v31  ;;  %v13950_v33 = vld [vmem:[#allocation87_spill] sm:$0xff]  ;;  %v13954_v31 = vld [vmem:[#allocation38_spill] sm:$0xff] }
 0x735   : > { %v4051_v50 = vpop.permute.xlu0 %4050  ;;  %v4109_v48 = vpop.permute.xlu1 %4108  ;;  %8158 = vpow2.f32 %v6806_v9  ;;  %v6801_v20 = vmul.f32 -1.442695, %v4197_v58 }
 0x736   : > { %v8145_v51 = vpop.eup %8144  ;;  %v4157_v4 = vsub.f32 %v4051_v50, %v13947_v62  ;;  %v4170_v11 = vsub.f32 %v4109_v48, %v13948_v53  ;;  %8160 = vrcp.f32 %v4308_v12  ;;  %v6808_v61 = vmul.f32 -1.442695, %v4204_v3  ;;  %v13952_v53 = vld [vmem:[#allocation77_spill] sm:$0xff] }
 0x737   : > { %v4302_v63 = vadd.f32 1.0, %v8145_v51  ;;  %v8147_v49 = vpop.eup %8146  ;;  %8162 = vrcp.f32 %v4307_v1  ;;  %v13951_v51 = vld [vmem:[#allocation105_spill] sm:$0xff]  ;;  %v6795_v48 = vmul.f32 -1.442695, %v4191_v7  ;;  %v13953_v1 = vld [vmem:[#allocation142_spill] sm:$0xff]  ;;  %v13956_v7 = vld [vmem:[#allocation116_spill] sm:$0xff] }
 0x738   : > { %8164 = vpow2.f32 %v6788_v37  ;;  %v4185_v15 = vmul.f32 %v4157_v4, %v13950_v33  ;;  %v4295_v50 = vadd.f32 1.0, %v8147_v49  ;;  %v4198_v9 = vmul.f32 %v4170_v11, %v13951_v51  ;;  %v13955_v33 = vld [vmem:[#allocation141_spill] sm:$0xff] }
 0x739   : > { %v4140_v60 = vpop.permute.xlu0 %4139  ;;  %v4082_v13 = vpop.permute.xlu1 %4081  ;;  %8166 = vrcp.f32 %v4302_v63 }
 0x73a   : > { %v8149_v28 = vpop.eup %8148  ;;  %v4177_v32 = vsub.f32 %v4140_v60, %v13952_v53  ;;  %8168 = vpow2.f32 %v6801_v20  ;;  %v6789_v3 = vmul.f32 -1.442695, %v4185_v15  ;;  %v6802_v49 = vmul.f32 -1.442695, %v4198_v9  ;;  %v13957_v60 = vld [vmem:[#allocation64_spill] sm:$0xff]  ;;  %v13958_v53 = vld [vmem:[#allocation106_spill] sm:$0xff] }
 0x73b   : > { %v8151_v23 = vpop.eup %8150  ;;  %v4315_v22 = vadd.f32 1.0, %v8149_v28  ;;  %8170 = vpow2.f32 %v6808_v61  ;;  %v4164_v28 = vsub.f32 %v4082_v13, %v13957_v60  ;;  %v13961_v13 = vld [vmem:[#allocation97_spill] sm:$0xff] }
 0x73c   : > { %v8153_v62 = vpop.eup %8152  ;;  %v4380_v58 = vmul.f32 %v8151_v23, %v13953_v1  ;;  %v4494_v37 = vmul.f32 %v8151_v23, %v13954_v31  ;;  %8172 = vrcp.f32 %v4295_v50  ;;  %v4205_v51 = vmul.f32 %v4177_v32, %v13956_v7  ;;  %v13959_v1 = vld [vmem:[#allocation58_spill] sm:$0xff] }
 0x73d   : > { %v4055_v12 = vpop.permute.xlu0 %4054  ;;  %v4113_v27 = vpop.permute.xlu1 %4112  ;;  %v4379_v63 = vmul.f32 %v8153_v62, %v13955_v33  ;;  %8174 = vpow2.f32 %v6795_v48  ;;  %v4493_v21 = vmul.f32 %v8153_v62, %v13958_v53  ;;  %v13960_v33 = vld [vmem:[#allocation152_spill] sm:$0xff]  ;;  %v4192_v60 = vmul.f32 %v4164_v28, %v13961_v13 }
 0x73e   : > { %v8155_v4 = vpop.eup %8154  ;;  %8176 = vrcp.f32 %v4315_v22  ;;  %v4158_v44 = vsub.f32 %v4055_v12, %v13959_v1  ;;  %v4408_v61 = vsel %vm1583_vm9, %v4380_v58, 0.0  ;;  %v4522_v15 = vsel %vm1583_vm9, %v4494_v37, 0.0  ;;  %v13962_v12 = vld [vmem:[#allocation120_spill] sm:$0xff] }
 0x73f   : > { %v8157_v11 = vpop.eup %8156  ;;  %8178 = vpow2.f32 %v6789_v3  ;;  %v6809_v50 = vmul.f32 -1.442695, %v4205_v51  ;;  %v4407_v48 = vsel %vm1583_vm9, %v4379_v63, 0.0  ;;  %v4387_v32 = vmul.f32 %v8155_v4, %v13960_v33  ;;  %v13963_v53 = vld [vmem:[#allocation88_spill] sm:$0xff]  ;;  %v13964_v3 = vld [vmem:[#allocation71_spill] sm:$0xff] }
 0x740   : > { %v8159_v20 = vpop.eup %8158  ;;  %8180 = vpow2.f32 %v6802_v49  ;;  %v4501_v1 = vmul.f32 %v8155_v4, %v13962_v12  ;;  %v4186_v37 = vmul.f32 %v4158_v44, %v13963_v53  ;;  %v4171_v51 = vsub.f32 %v4113_v27, %v13964_v3  ;;  %v13967_v49 = vld [vmem:[#allocation92_spill] sm:$0xff]  ;;  %v13969_v53 = vld [vmem:[#allocation127_spill] sm:$0xff]  ;;  %v13970_v3 = vld [vmem:[#allocation42_spill] sm:$0xff] }
 0x741   : > { %v8161_v23 = vpop.eup %8160  ;;  %v11896_v7 = vpop.permute.xlu0 %4143  ;;  %v4314_v58 = vadd.f32 1.0, %v8159_v20  ;;  %v4386_v63 = vmul.f32 %v8157_v11, %v13965_v0  ;;  %v4500_v33 = vmul.f32 %v8157_v11, %v13966_v14  ;;  %8182 = vpow2.f32 %v6809_v50  ;;  %v13971_v11 = vld [vmem:[#allocation27_spill] sm:$0xff]  ;;  %v13973_v14 = vld [vmem:[#allocation128_spill] sm:$0xff] }
 0x742   : > { %v8163_v9 = vpop.eup %8162  ;;  %v11898_v62 = vpop.permute.xlu1 %4085  ;;  %v4394_v55 = vmul.f32 %v8161_v23, %v13967_v49  ;;  %v11906_v28 = vadd.f32 %v4408_v61, %v4407_v48  ;;  %v4521_v13 = vsel %vm1583_vm9, %v4493_v21, 0.0  ;;  %v6796_v4 = vmul.f32 -1.442695, %v4192_v60  ;;  %v13972_v61 = vld [vmem:[#allocation107_spill] sm:$0xff] }
 0x743   : > { %v8165_v22 = vpop.eup %8164  ;;  %v4393_v38 = vmul.f32 %v8163_v9, %v13968_v52  ;;  %v4427_v44 = vsel %vm1583_vm9, %v4387_v32, 0.0  ;;  %v4508_v27 = vmul.f32 %v8161_v23, %v13969_v53  ;;  %v4507_v12 = vmul.f32 %v8163_v9, %v13970_v3 }
 0x744   : > { %v8167_v31 = vpop.eup %8166  ;;  %v4296_v0 = vadd.f32 1.0, %v8165_v22  ;;  %8184 = vrcp.f32 %v4314_v58  ;;  %v6790_v50 = vmul.f32 -1.442695, %v4186_v37  ;;  %v4199_v48 = vmul.f32 %v4171_v51, %v13972_v61 }
 0x745   : > { %v8169_v20 = vpop.eup %8168  ;;  %v4388_v29 = vmul.f32 %v8167_v31, %v13971_v11  ;;  %v4541_v21 = vsel %vm1583_vm9, %v4501_v1, 0.0  ;;  %v4426_v60 = vsel %vm1583_vm9, %v4386_v63, 0.0  ;;  %v4540_v52 = vsel %vm1583_vm9, %v4500_v33, 0.0  ;;  %v4059_v23 = vpop.permute.xlu0 %4058 }
 0x746   : > { %v8171_v19 = vpop.eup %8170  ;;  %v4446_v32 = vsel %vm1583_vm9, %v4394_v55, 0.0  ;;  %v4117_v53 = vpop.permute.xlu1 %4116  ;;  %v4445_v22 = vsel %vm1583_vm9, %v4393_v38, 0.0  ;;  %v4502_v11 = vmul.f32 %v8167_v31, %v13973_v14  ;;  %v4309_v58 = vadd.f32 1.0, %v8169_v20  ;;  %v13974_v55 = vld [vmem:[#allocation143_spill] sm:$0xff] }
 0x747   : > { %v8173_v49 = vpop.eup %8172  ;;  %8186 = vpow2.f32 %v6796_v4  ;;  %v4560_v51 = vsel %vm1583_vm9, %v4508_v27, 0.0  ;;  %v4559_v1 = vsel %vm1583_vm9, %v4507_v12, 0.0  ;;  %v4316_v63 = vadd.f32 1.0, %v8171_v19 }
 0x748   : > { %v8175_v9 = vpop.eup %8174  ;;  %8188 = vrcp.f32 %v4296_v0  ;;  %v4429_v33 = vsel %vm1583_vm9, %v4388_v29, 0.0  ;;  %v4381_v3 = vmul.f32 %v8173_v49, %v13974_v55  ;;  %v6803_v30 = vmul.f32 -1.442695, %v4199_v48  ;;  %v13975_v29 = vld [vmem:[#allocation102_spill] sm:$0xff] }
 0x749   : > { %v8177_v37 = vpop.eup %8176  ;;  %8190 = vpow2.f32 %v6790_v50  ;;  %v11925_v38 = vadd.f32 %v4522_v15, %v4521_v13  ;;  %v4428_v31 = vadd.f32 %v4427_v44, %v4426_v60  ;;  %v4542_v20 = vadd.f32 %v4541_v21, %v4540_v52  ;;  %v13976_v50 = vld [vmem:[#allocation158_spill] sm:$0xff]  ;;  %v4148_v15 = vpop.permute.xlu0 %4147 }
 0x74a   : > { %v8179_v61 = vpop.eup %8178  ;;  %v11927_v4 = vadd.f32 %v4446_v32, %v4445_v22  ;;  %v11929_v14 = vadd.f32 %v4560_v51, %v4559_v1  ;;  %v4543_v12 = vsel %vm1583_vm9, %v4502_v11, 0.0  ;;  %8192 = vrcp.f32 %v4309_v58  ;;  %v4090_v13 = vpop.permute.xlu1 %4089  ;;  %v13977_v60 = vld [vmem:[#allocation78_spill] sm:$0xff]  ;;  %v13978_v51 = vld [vmem:[#allocation47_spill] sm:$0xff] }
 0x74b   : > { %v8181_v16 = vpop.eup %8180  ;;  %v4303_v19 = vadd.f32 1.0, %v8175_v9  ;;  %v11932_v27 = vadd.f32 %v4429_v33, %v4428_v31  ;;  %v4495_v55 = vmul.f32 %v8173_v49, %v13975_v29  ;;  %v4401_v48 = vmul.f32 %v8177_v37, %v13976_v50  ;;  %v13981_v33 = vld [vmem:[#allocation93_spill] sm:$0xff]  ;;  %v13982_v31 = vld [vmem:[#allocation79_spill] sm:$0xff] }
 0x74c   : > { %v8183_v0 = vpop.eup %8182  ;;  %8194 = vrcp.f32 %v4316_v63  ;;  %v4410_v52 = vsel %vm1583_vm9, %v4381_v3, 0.0  ;;  %v4297_v44 = vadd.f32 1.0, %v8179_v61  ;;  %v4310_v21 = vadd.f32 1.0, %v8181_v16  ;;  %v13979_v61 = vld [vmem:[#allocation117_spill] sm:$0xff] }
 0x74d   : > { %8196 = vpow2.f32 %v6803_v30  ;;  %v4178_v32 = vsub.f32 %v11896_v7, %v13977_v60  ;;  %v4165_v9 = vsub.f32 %v11898_v62, %v13880_v6  ;;  %v4159_v22 = vsub.f32 %v4059_v23, %v13881_v26  ;;  %v13980_v30 = vld [vmem:[#allocation98_spill] sm:$0xff]  ;;  %v13989_v26 = vld [vmem:[#allocation147_spill] sm:$0xff] }
 0x74e   : > { %v4172_v49 = vsub.f32 %v4117_v53, %v13882_v45  ;;  %v8185_v11 = vpop.eup %8184  ;;  %v11943_v58 = vadd.f32 %v4543_v12, %v4542_v20  ;;  %v4515_v1 = vmul.f32 %v8177_v37, %v13978_v51  ;;  %8198 = vrcp.f32 %v4303_v19  ;;  %v13983_v20 = vld [vmem:[#allocation110_spill] sm:$0xff] }
 0x74f   : > { %v4317_v3 = vadd.f32 1.0, %v8183_v0  ;;  %v4206_v16 = vmul.f32 %v4178_v32, %v13979_v61  ;;  %v4193_v63 = vmul.f32 %v4165_v9, %v13980_v30  ;;  %v4187_v7 = vmul.f32 %v4159_v22, %v13981_v33  ;;  %v13984_v0 = vld [vmem:[#allocation157_spill] sm:$0xff]  ;;  %v4152_v30 = vpop.permute.xlu0 %4151  ;;  %v4121_v22 = vpop.permute.xlu1 %4120 }
 0x750   : > { %v4179_v60 = vsub.f32 %v4148_v15, %v13982_v31  ;;  %v11951_v23 = vadd.f32 %v4410_v52, %v11906_v28  ;;  %v4524_v53 = vsel %vm1583_vm9, %v4495_v55, 0.0  ;;  %8200 = vrcp.f32 %v4297_v44  ;;  %v13985_v44 = vld [vmem:[#allocation119_spill] sm:$0xff] }
 0x751   : > { %v8187_v62 = vpop.eup %8186  ;;  %v4200_v12 = vmul.f32 %v4172_v49, %v13983_v20  ;;  %v4465_v19 = vsel %vm1583_vm9, %v4401_v48, 0.0  ;;  %v4400_v32 = vmul.f32 %v8185_v11, %v13984_v0  ;;  %8202 = vrcp.f32 %v4310_v21  ;;  %v13986_v48 = vld [vmem:[#allocation66_spill] sm:$0xff] }
 0x752   : > { %v8189_v37 = vpop.eup %8188  ;;  %v6810_v9 = vmul.f32 -1.442695, %v4206_v16  ;;  %8204 = vrcp.f32 %v4317_v3  ;;  %v6797_v15 = vmul.f32 -1.442695, %v4193_v63  ;;  %v6791_v31 = vmul.f32 -1.442695, %v4187_v7 }
 0x753   : > { %v8191_v33 = vpop.eup %8190  ;;  %v6804_v28 = vmul.f32 -1.442695, %v4200_v12  ;;  %v4514_v52 = vmul.f32 %v8185_v11, %v13789_v8  ;;  %v4304_v55 = vadd.f32 1.0, %v8187_v62  ;;  %v4207_v49 = vmul.f32 %v4179_v60, %v13985_v44  ;;  %v13987_v0 = vld [vmem:[#allocation82_spill] sm:$0xff]  ;;  %v13988_v16 = vld [vmem:[#allocation73_spill] sm:$0xff] }
 0x754   : > { %8206 = vpow2.f32 %v6810_v9  ;;  %v8193_v20 = vpop.eup %8192  ;;  %v4166_v61 = vsub.f32 %v4090_v13, %v13986_v48  ;;  %v4180_v21 = vsub.f32 %v4152_v30, %v13987_v0  ;;  %v4173_v51 = vsub.f32 %v4121_v22, %v13988_v16  ;;  %v13990_v60 = vld [vmem:[#allocation101_spill] sm:$0xff]  ;;  %v13992_v22 = vld [vmem:[#allocation112_spill] sm:$0xff] }
 0x755   : > { %8208 = vpow2.f32 %v6797_v15  ;;  %v4382_v3 = vmul.f32 %v8189_v37, %v13989_v26  ;;  %v4298_v63 = vadd.f32 1.0, %v8191_v33  ;;  %v6811_v7 = vmul.f32 -1.442695, %v4207_v49  ;;  %v13991_v15 = vld [vmem:[#allocation118_spill] sm:$0xff]  ;;  %v13993_v26 = vld [vmem:[#allocation159_spill] sm:$0xff] }
 0x756   : > { %v8195_v45 = vpop.eup %8194  ;;  %8210 = vpow2.f32 %v6791_v31  ;;  %v4464_v11 = vsel %vm1583_vm9, %v4400_v32, 0.0  ;;  %v4496_v62 = vmul.f32 %v8189_v37, %v13696_v35  ;;  %v4194_v9 = vmul.f32 %v4166_v61, %v13990_v60 }
 0x757   : > { %v8197_v12 = vpop.eup %8196  ;;  %8212 = vpow2.f32 %v6804_v28  ;;  %v4395_v13 = vmul.f32 %v8193_v20, %v13991_v15  ;;  %v4208_v30 = vmul.f32 %v4180_v21, %v13895_v46  ;;  %v4201_v16 = vmul.f32 %v4173_v51, %v13992_v22 }
 0x758   : > { %8214 = vpow2.f32 %v6811_v7  ;;  %v8199_v0 = vpop.eup %8198  ;;  %v4509_v33 = vmul.f32 %v8193_v20, %v13897_v47  ;;  %v4311_v31 = vadd.f32 1.0, %v8197_v12  ;;  %v6798_v49 = vmul.f32 -1.442695, %v4194_v9  ;;  %v13994_v7 = vld [vmem:[#allocation48_spill] sm:$0xff] }
 0x759   : > { %8216 = vrcp.f32 %v4304_v55  ;;  %v4579_v32 = vsel %vm1583_vm9, %v4515_v1, 0.0  ;;  %v4402_v37 = vmul.f32 %v8195_v45, %v13993_v26  ;;  %v6812_v28 = vmul.f32 -1.442695, %v4208_v30 }
 0x75a   : > { %8218 = vrcp.f32 %v4298_v63  ;;  %v8201_v61 = vpop.eup %8200  ;;  %v4578_v15 = vsel %vm1583_vm9, %v4514_v52, 0.0  ;;  %v4516_v60 = vmul.f32 %v8195_v45, %v13994_v7  ;;  %v6805_v21 = vmul.f32 -1.442695, %v4201_v16  ;;  %v13995_v16 = vld [vmem:[#allocation56_spill] sm:$0xff] }
 0x75b   : > { %8220 = vpow2.f32 %v6798_v49  ;;  %v8203_v51 = vpop.eup %8202  ;;  %v4525_v22 = vadd.f32 %v4524_v53, %v11925_v38  ;;  %v4466_v20 = vadd.f32 %v4465_v19, %v4464_v11  ;;  %v4412_v55 = vsel %vm1583_vm9, %v4382_v3, 0.0  ;;  %v13996_v19 = vld [vmem:[#allocation41_spill] sm:$0xff]  ;;  %v13997_v11 = vld [vmem:[#allocation148_spill] sm:$0xff] }
 0x75c   : > { %8222 = vpow2.f32 %v6812_v28  ;;  %v8205_v12 = vpop.eup %8204  ;;  %v4526_v1 = vsel %vm1583_vm9, %v4496_v62, 0.0  ;;  %v4448_v63 = vsel %vm1583_vm9, %v4395_v13, 0.0  ;;  %v4562_v9 = vsel %vm1583_vm9, %v4509_v33, 0.0 }
 0x75d   : > { %8224 = vrcp.f32 %v4311_v31  ;;  %v4580_v30 = vadd.f32 %v4579_v32, %v4578_v15  ;;  %v4467_v45 = vsel %vm1583_vm9, %v4402_v37, 0.0  ;;  %v4389_v49 = vmul.f32 %v8199_v0, %v13995_v16 }
 0x75e   : > { %v8207_v52 = vpop.eup %8206  ;;  %8226 = vpow2.f32 %v6805_v21  ;;  %v4581_v53 = vsel %vm1583_vm9, %v4516_v60, 0.0  ;;  %v4503_v3 = vmul.f32 %v8199_v0, %v13996_v19  ;;  %v4383_v7 = vmul.f32 %v8201_v61, %v13997_v11 }
 0x75f   : > { %v8209_v38 = vpop.eup %8208  ;;  %v4318_v62 = vadd.f32 1.0, %v8207_v52  ;;  %v4413_v13 = vadd.f32 %v4412_v55, %v11951_v23  ;;  %v4527_v33 = vadd.f32 %v4526_v1, %v4525_v22  ;;  %v4449_v31 = vadd.f32 %v4448_v63, %v11927_v4 }
 0x760   : > { %v8211_v26 = vpop.eup %8210  ;;  %v4563_v15 = vadd.f32 %v4562_v9, %v11929_v14  ;;  %v4468_v37 = vadd.f32 %v4467_v45, %v4466_v20  ;;  %v4497_v21 = vmul.f32 %v8201_v61, %v13806_v40  ;;  %v4305_v16 = vadd.f32 1.0, %v8209_v38 }
 0x761   : > { %v8213_v32 = vpop.eup %8212  ;;  %8228 = vrcp.f32 %v4318_v62  ;;  %v4582_v47 = vadd.f32 %v4581_v53, %v4580_v30  ;;  %v4431_v0 = vsel %vm1583_vm9, %v4389_v49, 0.0  ;;  %v4299_v11 = vadd.f32 1.0, %v8211_v26 }
 0x762   : > { %v8215_v60 = vpop.eup %8214  ;;  %v4312_v52 = vadd.f32 1.0, %v8213_v32  ;;  %v4545_v23 = vsel %vm1583_vm9, %v4503_v3, 0.0  ;;  %v4414_v22 = vsel %vm1583_vm9, %v4383_v7, 0.0  ;;  %8230 = vrcp.f32 %v4305_v16 }
 0x763   : > { %v8217_v28 = vpop.eup %8216  ;;  %v4319_v4 = vadd.f32 1.0, %v8215_v60  ;;  %v4396_v20 = vmul.f32 %v8203_v51, %v13807_v36  ;;  %v4510_v61 = vmul.f32 %v8203_v51, %v13808_v2  ;;  %v4403_v55 = vmul.f32 %v8205_v12, %v13809_v24 }
 0x764   : > { %v8219_v14 = vpop.eup %8218  ;;  %8232 = vrcp.f32 %v4299_v11  ;;  %v4432_v63 = vadd.f32 %v4431_v0, %v11932_v27  ;;  %v4528_v26 = vsel %vm1583_vm9, %v4497_v21, 0.0  ;;  %v4517_v9 = vmul.f32 %v8205_v12, %v13712_v59 }
 0x765   : > { %v8221_v1 = vpop.eup %8220  ;;  %8234 = vrcp.f32 %v4312_v52  ;;  %v4390_v7 = vmul.f32 %v8217_v28, %v13903_v43  ;;  %v4504_v45 = vmul.f32 %v8217_v28, %v13714_v54  ;;  %v4546_v51 = vadd.f32 %v4545_v23, %v11943_v58 }
 0x766   : > { %v8223_v30 = vpop.eup %8222  ;;  %8236 = vrcp.f32 %v4319_v4  ;;  %v4306_v16 = vadd.f32 1.0, %v8221_v1  ;;  %v4415_v38 = vadd.f32 %v4414_v22, %v4413_v13  ;;  %v4384_v53 = vmul.f32 %v8219_v14, %v13904_v5 }
 0x767   : > { %v8225_v49 = vpop.eup %8224  ;;  %v4320_v3 = vadd.f32 1.0, %v8223_v30  ;;  %v4450_v62 = vsel %vm1583_vm9, %v4396_v20, 0.0  ;;  %v4564_v12 = vsel %vm1583_vm9, %v4510_v61, 0.0  ;;  %v4469_v32 = vsel %vm1583_vm9, %v4403_v55, 0.0  ;;  %v13998_v61 = vld [vmem:[#allocation138_spill] sm:$0xff] }
 0x768   : > { %v8227_v27 = vpop.eup %8226  ;;  %8238 = vrcp.f32 %v4306_v16  ;;  %v4529_v21 = vadd.f32 %v4528_v26, %v4527_v33  ;;  %v4498_v28 = vmul.f32 %v8219_v14, %v13812_v41  ;;  %v4583_v0 = vsel %vm1583_vm9, %v4517_v9, 0.0 }
 0x769   : > { %8240 = vrcp.f32 %v4320_v3  ;;  %v4313_v60 = vadd.f32 1.0, %v8227_v27  ;;  %v4433_v58 = vsel %vm1583_vm9, %v4390_v7, 0.0  ;;  %v4547_v13 = vsel %vm1583_vm9, %v4504_v45, 0.0 }
 0x76a   : > { %v4397_v11 = vmul.f32 %v8225_v49, %v13905_v25  ;;  %v4451_v23 = vadd.f32 %v4450_v62, %v4449_v31  ;;  %v4565_v22 = vadd.f32 %v4564_v12, %v4563_v15  ;;  %v4470_v4 = vadd.f32 %v4469_v32, %v4468_v37  ;;  %v13999_v37 = vld [vmem:[#allocation111_spill] sm:$0xff]  ;;  %v14001_v12 = vld [vmem:[#allocation150_spill] sm:$0xff] }
 0x76b   : > { %v8229_v52 = vpop.eup %8228  ;;  %v4416_v20 = vsel %vm1583_vm9, %v4384_v53, 0.0  ;;  %v4511_v33 = vmul.f32 %v8225_v49, %v13718_v42  ;;  %8242 = vrcp.f32 %v4313_v60  ;;  %v4584_v26 = vadd.f32 %v4583_v0, %v4582_v47  ;;  %v14000_v53 = vld [vmem:[#allocation125_spill] sm:$0xff]  ;;  %v14002_v47 = vld [vmem:[#allocation126_spill] sm:$0xff] }
 0x76c   : > { %v4404_v14 = vmul.f32 %v8229_v52, %v13719_v18  ;;  %v4518_v55 = vmul.f32 %v8229_v52, %v13998_v61  ;;  %v8231_v1 = vpop.eup %8230  ;;  %v4434_v9 = vadd.f32 %v4433_v58, %v4432_v63  ;;  %v4548_v30 = vadd.f32 %v4547_v13, %v4546_v51 }
 0x76d   : > { %v4530_v7 = vsel %vm1583_vm9, %v4498_v28, 0.0  ;;  %v4452_v31 = vsel %vm1583_vm9, %v4397_v11, 0.0  ;;  %v4391_v16 = vmul.f32 %v8231_v1, %v13999_v37  ;;  %v4505_v49 = vmul.f32 %v8231_v1, %v14000_v53  ;;  %v14005_v53 = vld [vmem:[#allocation139_spill] sm:$0xff] }
 0x76e   : > { %v8233_v45 = vpop.eup %8232  ;;  %v4471_v15 = vsel %vm1583_vm9, %v4404_v14, 0.0  ;;  %v4417_v27 = vadd.f32 %v4416_v20, %v4415_v38  ;;  %v4585_v62 = vsel %vm1583_vm9, %v4518_v55, 0.0  ;;  %v4531_v60 = vadd.f32 %v4530_v7, %v4529_v21 }
 0x76f   : > { %v8235_v3 = vpop.eup %8234  ;;  %v4385_v32 = vmul.f32 %v8233_v45, %v14001_v12  ;;  %v4499_v63 = vmul.f32 %v8233_v45, %v14002_v47  ;;  %v4566_v28 = vsel %vm1583_vm9, %v4511_v33, 0.0  ;;  %v4435_v0 = vsel %vm1583_vm9, %v4391_v16, 0.0  ;;  %v14003_v45 = vld [vmem:[#allocation130_spill] sm:$0xff] }
 0x770   : > { %v8237_v51 = vpop.eup %8236  ;;  %v4549_v58 = vsel %vm1583_vm9, %v4505_v49, 0.0  ;;  %v4453_v13 = vadd.f32 %v4452_v31, %v4451_v23  ;;  %v4472_v11 = vadd.f32 %v4471_v15, %v4470_v4  ;;  %v4586_v14 = vadd.f32 %v4585_v62, %v4584_v26  ;;  %v14004_v12 = vld [vmem:[#allocation162_spill] sm:$0xff]  ;;  %v14006_v31 = vld [vmem:[#allocation32_spill] sm:$0xff] }
 0x771   : > { %v4418_v52 = vsel %vm2074_vm5, %v4385_v32, 0.0  ;;  %v4532_v38 = vsel %vm2074_vm5, %v4499_v63, 0.0  ;;  %v4398_v1 = vmul.f32 %v8235_v3, %v13725_v17  ;;  %v4512_v47 = vmul.f32 %v8235_v3, %v14003_v45  ;;  %v14007_v32 = vld [vmem:[#allocation129_spill] sm:$0xff] }
 0x772   : > { %v8239_v20 = vpop.eup %8238  ;;  %v4533_v55 = vadd.f32 %v4532_v38, %v4531_v60  ;;  %v4436_v7 = vadd.f32 %v4435_v0, %v4434_v9  ;;  %v4550_v33 = vadd.f32 %v4549_v58, %v4548_v30  ;;  %v4405_v16 = vmul.f32 %v8237_v51, %v14004_v12  ;;  %v14008_v60 = vld [vmem:[#allocation163_spill] sm:$0xff]  ;;  %v14009_v3 = vld [vmem:[#allocation49_spill] sm:$0xff] }
 0x773   : > { %v8241_v21 = vpop.eup %8240  ;;  %v4519_v49 = vmul.f32 %v8237_v51, %v14005_v53  ;;  %v4419_v23 = vadd.f32 %v4418_v52, %v4417_v27  ;;  %v4392_v15 = vmul.f32 %v8239_v20, %v14006_v31  ;;  %v4506_v63 = vmul.f32 %v8239_v20, %v14007_v32  ;;  %v14010_v53 = vld [vmem:[#allocation156_spill] sm:$0xff]  ;;  %v14011_v12 = vld [vmem:[#allocation45_spill] sm:$0xff] }
 0x774   : > { %v4534_v4 = vrot.slane %v4533_v55, 4  ;;  %v4473_v26 = vsel %vm1583_vm9, %v4405_v16, 0.0  ;;  %v4406_v38 = vmul.f32 %v8241_v21, %v14008_v60  ;;  %v4520_v45 = vmul.f32 %v8241_v21, %v14009_v3 }
 0x775   : > { %v4587_v62 = vsel %vm1583_vm9, %v4519_v49, 0.0  ;;  %v8243_v9 = vpop.eup %8242  ;;  %v4454_v30 = vsel %vm1583_vm9, %v4398_v1, 0.0  ;;  %v4568_v0 = vsel %vm1583_vm9, %v4512_v47, 0.0  ;;  %v4474_v51 = vadd.f32 %v4473_v26, %v4472_v11 }
 0x776   : > { %v4588_v27 = vadd.f32 %v4587_v62, %v4586_v14  ;;  %v4437_v58 = vsel %vm2074_vm5, %v4392_v15, 0.0  ;;  %v4551_v52 = vsel %vm2074_vm5, %v4506_v63, 0.0  ;;  %v4475_v20 = vsel %vm2074_vm5, %v4406_v38, 0.0 }
 0x777   : > { %v4589_v16 = vsel %vm2074_vm5, %v4520_v45, 0.0  ;;  %v4567_v49 = vadd.f32 %v4566_v28, %v4565_v22  ;;  %v4535_v32 = vadd.f32 %v4534_v4, %v4533_v55  ;;  %v4438_v60 = vadd.f32 %v4437_v58, %v4436_v7 }
 0x778   : > { %v4552_v31 = vadd.f32 %v4551_v52, %v4550_v33  ;;  %v4476_v21 = vadd.f32 %v4475_v20, %v4474_v51  ;;  %v4590_v3 = vadd.f32 %v4589_v16, %v4588_v27  ;;  %v4399_v1 = vmul.f32 %v8243_v9, %v14010_v53 }
 0x779   : > { %v4513_v47 = vmul.f32 %v8243_v9, %v14011_v12  ;;  %v4455_v11 = vadd.f32 %v4454_v30, %v4453_v13  ;;  %v4569_v14 = vadd.f32 %v4568_v0, %v4567_v49  ;;  %v4439_v26 = vrot.slane %v4438_v60, 4 }
 0x77a   : > { %v4553_v15 = vrot.slane %v4552_v31, 4  ;;  %v4420_v62 = vrot.slane %v4419_v23, 4  ;;  %v4591_v63 = vrot.slane %v4590_v3, 4  ;;  %v4456_v38 = vsel %vm2074_vm5, %v4399_v1, 0.0 }
 0x77b   : > { %v4570_v45 = vsel %vm2074_vm5, %v4513_v47, 0.0  ;;  %v4536_v22 = vrot.slane %v4535_v32, 2  ;;  %v4477_v55 = vrot.slane %v4476_v21, 4  ;;  %v4440_v7 = vadd.f32 %v4439_v26, %v4438_v60 }
 0x77c   : > { %v4554_v28 = vadd.f32 %v4553_v15, %v4552_v31  ;;  %v4592_v33 = vadd.f32 %v4591_v63, %v4590_v3  ;;  %v4457_v4 = vadd.f32 %v4456_v38, %v4455_v11  ;;  %v4571_v51 = vadd.f32 %v4570_v45, %v4569_v14 }
 0x77d   : > { %v4421_v58 = vadd.f32 %v4420_v62, %v4419_v23  ;;  %v4537_v0 = vadd.f32 %v4536_v22, %v4535_v32  ;;  %v4478_v20 = vadd.f32 %v4477_v55, %v4476_v21  ;;  %v4441_v16 = vrot.slane %v4440_v7, 2 }
 0x77e   : > { %v4555_v27 = vrot.slane %v4554_v28, 2  ;;  %v4593_v9 = vrot.slane %v4592_v33, 2  ;;  %v4458_v13 = vrot.slane %v4457_v4, 4  ;;  %v4572_v30 = vrot.slane %v4571_v51, 4 }
 0x77f   : > { %v4422_v53 = vrot.slane %v4421_v58, 2  ;;  %v4538_v60 = vrot.slane %v4537_v0, 1  ;;  %v4442_v11 = vadd.f32 %v4441_v16, %v4440_v7  ;;  %v4479_v14 = vrot.slane %v4478_v20, 2 }
 0x780   : > { %v4556_v52 = vadd.f32 %v4555_v27, %v4554_v28  ;;  %v4594_v49 = vadd.f32 %v4593_v9, %v4592_v33  ;;  %v4459_v1 = vadd.f32 %v4458_v13, %v4457_v4  ;;  %v4573_v12 = vadd.f32 %v4572_v30, %v4571_v51 }
 0x781   : > { %v4423_v63 = vadd.f32 %v4422_v53, %v4421_v58  ;;  %v4539_v32 = vadd.f32 %v4538_v60, %v4537_v0  ;;  %v4443_v21 = vrot.slane %v4442_v11, 1  ;;  %v4480_v22 = vadd.f32 %v4479_v14, %v4478_v20 }
 0x782   : > { %v4557_v47 = vrot.slane %v4556_v52, 1  ;;  %v4460_v31 = vrot.slane %v4459_v1, 2  ;;  %v4574_v15 = vrot.slane %v4573_v12, 2  ;;  %v4595_v3 = vrot.slane %v4594_v49, 1 }
 0x783   : > { %v4424_v4 = vrot.slane %v4423_v63, 1  ;;  %v4444_v7 = vadd.f32 %v4443_v21, %v4442_v11  ;;  %v4481_v9 = vrot.slane %v4480_v22, 1  ;;  %v4377_v20 = vmul.f32 %v11841_v34, %v13614_v39  ;;  %v14014_v11 = vld [vmem:[#allocation192_spill] sm:$0xff]  ;;  %v14018_v21 = vld [vmem:[#allocation52_spill] sm:$0xff] }
 0x784   : > { %v4575_v26 = vadd.f32 %v4574_v15, %v4573_v12  ;;  %v4558_v23 = vadd.f32 %v4557_v47, %v4556_v52  ;;  %v4461_v62 = vadd.f32 %v4460_v31, %v4459_v1  ;;  %v4596_v45 = vadd.f32 %v4595_v3, %v4594_v49  ;;  %v14012_v31 = vld [vmem:[#allocation191_spill] sm:$0xff] }
 0x785   : > { %v4425_v53 = vadd.f32 %v4424_v4, %v4423_v63  ;;  %v4482_v0 = vadd.f32 %v4481_v9, %v4480_v22  ;;  %v4378_v1 = vadd.f32 %v4377_v20, %v13616_v57  ;;  %v14017_v63 = vld [vmem:[#allocation195_spill] sm:$0xff] }
 0x786   : > { %v4576_v38 = vrot.slane %v4575_v26, 1  ;;  %v4601_v55 = vsel %vm2144_vm12, %v4558_v23, %v4539_v32  ;;  %v4462_v33 = vrot.slane %v4461_v62, 1  ;;  %v14016_v23 = vld [vmem:[#allocation194_spill] sm:$0xff] }
 0x787   : > { %v4487_v30 = vsel %vm2144_vm12, %v4444_v7, %v4425_v53  ;;  %v14021_v7 = vld [vmem:[#allocation80_spill] sm:$0xff] }
 0x788   : > { %v4577_v28 = vadd.f32 %v4576_v38, %v4575_v26  ;;  %v4463_v13 = vadd.f32 %v4462_v33, %v4461_v62  ;;  %v14015_v26 = vld [vmem:[#allocation193_spill] sm:$0xff]  ;;  %v14020_v33 = vld [vmem:[#allocation83_spill] sm:$0xff] }
 0x789   : > { %v14023_v53 = vld [vmem:[#allocation60_spill] sm:$0xff] }
 0x78a   : > { %v4602_v51 = vsel %vm2146_vm14, %v4577_v28, %v4601_v55  ;;  %v4488_v16 = vsel %vm2146_vm14, %v4463_v13, %v4487_v30  ;;  %v14019_v28 = vld [vmem:[#allocation51_spill] sm:$0xff] }
 0x78b   : > { %v4603_v27 = vsel %vm2148_vm1, %v4596_v45, %v4602_v51  ;;  %v4489_v49 = vsel %vm2148_vm1, %v4482_v0, %v4488_v16  ;;  %v14024_v0 = vld [vmem:[#allocation90_spill] sm:$0xff] }
 0x78c   : > { %v4605_v12 = vadd.f32 %v4603_v27, %v13612_v10  ;;  %v4491_v47 = vadd.f32 %v4489_v49, %v4378_v1  ;;  %v14025_v1 = vld [vmem:[#allocation89_spill] sm:$0xff] }
 0x78e   : > { %v4606_v58 = vadd.f32 %v4605_v12, %v11175_v56  ;;  %v4492_v15 = vadd.f32 %v4491_v47, %v14012_v31  ;;  %v14022_v12 = vld [vmem:[#allocation61_spill] sm:$0xff] }
 0x790   : > { %v4607_v52 = vadd.f32 1e-08, %v4606_v58 }
 0x792   : > { %8244 = vrcp.f32 %v4607_v52 }
 0x79c   : > { %v8245_v60 = vpop.eup %8244 }
 0x79d   : > { %v12058_v3 = vmul.f32 %v8245_v60, %v4492_v15  ;;  %v14026_v15 = vld [vmem:[#allocation68_spill] sm:$0xff] }
 0x79f   : > { %14013 = vst [vmem:[#allocation197_spill] sm:$0xff] %v12058_v3  ;;  %v4613_v14 = vrot.slane %v12058_v3, %v14014_v11  ;;  %v4644_v34 = vrot.slane %v12058_v3, %v14015_v26  ;;  %v4675_v62 = vrot.slane %v12058_v3, %v14016_v23  ;;  %v4706_v38 = vrot.slane %v12058_v3, %v14017_v63  ;;  %v14027_v11 = vld [vmem:[#allocation67_spill] sm:$0xff] }
 0x7a0   : > { %v14028_v26 = vld [vmem:[#allocation103_spill] sm:$0xff] }
 0x7a1   : > { %4619 = vbcast.lane.b32.xlu0 %v4613_v14, 264  ;;  %4615 = vbcast.lane.b32.xlu1 %v4613_v14, 256 }
 0x7a5   : > { %4650 = vbcast.lane.b32.xlu0 %v4644_v34, 264  ;;  %4646 = vbcast.lane.b32.xlu1 %v4644_v34, 256 }
 0x7a9   : > { %4681 = vbcast.lane.b32.xlu0 %v4675_v62, 264  ;;  %4677 = vbcast.lane.b32.xlu1 %v4675_v62, 256 }
 0x7ad   : > { %4654 = vbcast.lane.b32.xlu0 %v4644_v34, 272  ;;  %4623 = vbcast.lane.b32.xlu1 %v4613_v14, 272 }
 0x7b1   : > { %4712 = vbcast.lane.b32.xlu0 %v4706_v38, 264  ;;  %4708 = vbcast.lane.b32.xlu1 %v4706_v38, 256 }
 0x7b5   : > { %4627 = vbcast.lane.b32.xlu0 %v4613_v14, 280  ;;  %4685 = vbcast.lane.b32.xlu1 %v4675_v62, 272 }
 0x7b9   : > { %4716 = vbcast.lane.b32.xlu0 %v4706_v38, 272  ;;  %4658 = vbcast.lane.b32.xlu1 %v4644_v34, 280 }
 0x7bd   : > { %4631 = vbcast.lane.b32.xlu0 %v4613_v14, 288  ;;  %4689 = vbcast.lane.b32.xlu1 %v4675_v62, 280 }
 0x7c1   : > { %4720 = vbcast.lane.b32.xlu0 %v4706_v38, 280  ;;  %4662 = vbcast.lane.b32.xlu1 %v4644_v34, 288 }
 0x7c5   : > { %4635 = vbcast.lane.b32.xlu0 %v4613_v14, 296  ;;  %4693 = vbcast.lane.b32.xlu1 %v4675_v62, 288 }
 0x7c9   : > { %4724 = vbcast.lane.b32.xlu0 %v4706_v38, 288  ;;  %4666 = vbcast.lane.b32.xlu1 %v4644_v34, 296 }
 0x7cd   : > { %4639 = vbcast.lane.b32.xlu0 %v4613_v14, 304  ;;  %4697 = vbcast.lane.b32.xlu1 %v4675_v62, 296 }
 0x7d1   : > { %4728 = vbcast.lane.b32.xlu0 %v4706_v38, 296  ;;  %4670 = vbcast.lane.b32.xlu1 %v4644_v34, 304 }
 0x7d5   : > { %4732 = vbcast.lane.b32.xlu0 %v4706_v38, 304  ;;  %4701 = vbcast.lane.b32.xlu1 %v4675_v62, 304  ;;  %v14029_v62 = vld [vmem:[#allocation99_spill] sm:$0xff] }
 0x813   : > { %v4620_v32 = vpop.permute.xlu0 %4619  ;;  %v4616_v45 = vpop.permute.xlu1 %4615 }
 0x814   : > { %v4735_v22 = vsub.f32 %v4620_v32, %v14018_v21  ;;  %v4734_v55 = vsub.f32 %v4616_v45, %v14019_v28  ;;  %v14030_v21 = vld [vmem:[#allocation62_spill] sm:$0xff]  ;;  %v14031_v28 = vld [vmem:[#allocation53_spill] sm:$0xff] }
 0x816   : > { %v4763_v4 = vmul.f32 %v4735_v22, %v14020_v33  ;;  %v4762_v9 = vmul.f32 %v4734_v55, %v14021_v7 }
 0x817   : > { %v4651_v51 = vpop.permute.xlu0 %4650  ;;  %v4647_v27 = vpop.permute.xlu1 %4646 }
 0x818   : > { %v4742_v13 = vsub.f32 %v4651_v51, %v14022_v12  ;;  %v4741_v58 = vsub.f32 %v4647_v27, %v14023_v53  ;;  %v6814_v30 = vmul.f32 -1.442695, %v4763_v4  ;;  %v6813_v49 = vmul.f32 -1.442695, %v4762_v9  ;;  %v14032_v4 = vld [vmem:[#allocation94_spill] sm:$0xff]  ;;  %v14033_v12 = vld [vmem:[#allocation75_spill] sm:$0xff] }
 0x81a   : > { %v4770_v52 = vmul.f32 %v4742_v13, %v14024_v0  ;;  %v4769_v47 = vmul.f32 %v4741_v58, %v14025_v1  ;;  %8246 = vpow2.f32 %v6814_v30  ;;  %v14034_v58 = vld [vmem:[#allocation84_spill] sm:$0xff]  ;;  %v14035_v0 = vld [vmem:[#allocation114_spill] sm:$0xff] }
 0x81b   : > { %v4682_v20 = vpop.permute.xlu0 %4681  ;;  %v4678_v16 = vpop.permute.xlu1 %4677  ;;  %8248 = vpow2.f32 %v6813_v49 }
 0x81c   : > { %v4749_v60 = vsub.f32 %v4682_v20, %v14026_v15  ;;  %v4748_v14 = vsub.f32 %v4678_v16, %v14027_v11  ;;  %v6821_v23 = vmul.f32 -1.442695, %v4770_v52  ;;  %v6820_v45 = vmul.f32 -1.442695, %v4769_v47  ;;  %v14036_v15 = vld [vmem:[#allocation74_spill] sm:$0xff] }
 0x81e   : > { %v4777_v34 = vmul.f32 %v4749_v60, %v14028_v26  ;;  %v4776_v63 = vmul.f32 %v4748_v14, %v14029_v62  ;;  %8250 = vpow2.f32 %v6821_v23 }
 0x81f   : > { %v4655_v38 = vpop.permute.xlu0 %4654  ;;  %v4624_v32 = vpop.permute.xlu1 %4623  ;;  %8252 = vpow2.f32 %v6820_v45  ;;  %v14038_v45 = vld [vmem:[#allocation113_spill] sm:$0xff] }
 0x820   : > { %v4743_v22 = vsub.f32 %v4655_v38, %v14030_v21  ;;  %v4736_v55 = vsub.f32 %v4624_v32, %v14031_v28  ;;  %v6828_v33 = vmul.f32 -1.442695, %v4777_v34  ;;  %v6827_v27 = vmul.f32 -1.442695, %v4776_v63  ;;  %v14037_v63 = vld [vmem:[#allocation55_spill] sm:$0xff] }
 0x822   : > { %v4771_v51 = vmul.f32 %v4743_v22, %v14032_v4  ;;  %v4764_v30 = vmul.f32 %v4736_v55, %v14034_v58  ;;  %8254 = vpow2.f32 %v6828_v33  ;;  %v14039_v55 = vld [vmem:[#allocation69_spill] sm:$0xff] }
 0x823   : > { %v4713_v7 = vpop.permute.xlu0 %4712  ;;  %v4709_v9 = vpop.permute.xlu1 %4708  ;;  %8256 = vpow2.f32 %v6827_v27 }
 0x824   : > { %v4756_v13 = vsub.f32 %v4713_v7, %v14033_v12  ;;  %v6822_v53 = vmul.f32 -1.442695, %v4771_v51  ;;  %v8247_v49 = vpop.eup %8246  ;;  %v6815_v1 = vmul.f32 -1.442695, %v4764_v30  ;;  %v4755_v60 = vsub.f32 %v4709_v9, %v14036_v15  ;;  %v14040_v9 = vld [vmem:[#allocation85_spill] sm:$0xff]  ;;  %v14044_v15 = vld [vmem:[#allocation115_spill] sm:$0xff] }
 0x825   : > { %v8249_v47 = vpop.eup %8248  ;;  %v4875_v34 = vadd.f32 1.0, %v8247_v49 }
 0x826   : > { %v4784_v52 = vmul.f32 %v4756_v13, %v14035_v0  ;;  %8258 = vpow2.f32 %v6822_v53  ;;  %v4874_v62 = vadd.f32 1.0, %v8249_v47  ;;  %v4783_v21 = vmul.f32 %v4755_v60, %v14038_v45  ;;  %v14041_v13 = vld [vmem:[#allocation76_spill] sm:$0xff]  ;;  %v14047_v45 = vld [vmem:[#allocation95_spill] sm:$0xff] }
 0x827   : > { %v4628_v20 = vpop.permute.xlu0 %4627  ;;  %v4686_v16 = vpop.permute.xlu1 %4685  ;;  %8260 = vpow2.f32 %v6815_v1  ;;  %v14043_v1 = vld [vmem:[#allocation104_spill] sm:$0xff] }
 0x828   : > { %v6835_v11 = vmul.f32 -1.442695, %v4784_v52  ;;  %v8251_v23 = vpop.eup %8250  ;;  %v4737_v38 = vsub.f32 %v4628_v20, %v14037_v63  ;;  %v4750_v33 = vsub.f32 %v4686_v16, %v14039_v55  ;;  %v6834_v58 = vmul.f32 -1.442695, %v4783_v21  ;;  %v14042_v52 = vld [vmem:[#allocation63_spill] sm:$0xff] }
 0x829   : > { %v8253_v32 = vpop.eup %8252  ;;  %v4882_v28 = vadd.f32 1.0, %v8251_v23  ;;  %v14048_v55 = vld [vmem:[#allocation87_spill] sm:$0xff] }
 0x82a   : > { %8262 = vpow2.f32 %v6835_v11  ;;  %v4881_v7 = vadd.f32 1.0, %v8253_v32  ;;  %v4765_v12 = vmul.f32 %v4737_v38, %v14040_v9  ;;  %v4778_v47 = vmul.f32 %v4750_v33, %v14043_v1  ;;  %v14045_v11 = vld [vmem:[#allocation57_spill] sm:$0xff] }
 0x82b   : > { %v4717_v14 = vpop.permute.xlu0 %4716  ;;  %v4659_v26 = vpop.permute.xlu1 %4658  ;;  %8264 = vrcp.f32 %v4875_v34 }
 0x82c   : > { %v8255_v22 = vpop.eup %8254  ;;  %8266 = vrcp.f32 %v4874_v62  ;;  %v4757_v53 = vsub.f32 %v4717_v14, %v14041_v13  ;;  %v4744_v20 = vsub.f32 %v4659_v26, %v14042_v52  ;;  %v6816_v16 = vmul.f32 -1.442695, %v4765_v12  ;;  %v14046_v62 = vld [vmem:[#allocation70_spill] sm:$0xff]  ;;  %v14050_v13 = vld [vmem:[#allocation77_spill] sm:$0xff] }
 0x82d   : > { %v8257_v27 = vpop.eup %8256  ;;  %v4889_v0 = vadd.f32 1.0, %v8255_v22  ;;  %8268 = vrcp.f32 %v4882_v28  ;;  %v6829_v21 = vmul.f32 -1.442695, %v4778_v47  ;;  %v14051_v52 = vld [vmem:[#allocation142_spill] sm:$0xff] }
 0x82e   : > { %v4888_v49 = vadd.f32 1.0, %v8257_v27  ;;  %8270 = vrcp.f32 %v4881_v7  ;;  %v4785_v60 = vmul.f32 %v4757_v53, %v14044_v15  ;;  %v4772_v26 = vmul.f32 %v4744_v20, %v14047_v45  ;;  %v14049_v7 = vld [vmem:[#allocation105_spill] sm:$0xff]  ;;  %v14056_v45 = vld [vmem:[#allocation106_spill] sm:$0xff] }
 0x82f   : > { %v4632_v4 = vpop.permute.xlu0 %4631  ;;  %v4690_v51 = vpop.permute.xlu1 %4689  ;;  %8272 = vpow2.f32 %v6834_v58  ;;  %v14053_v15 = vld [vmem:[#allocation141_spill] sm:$0xff] }
 0x830   : > { %v8259_v30 = vpop.eup %8258  ;;  %v4738_v34 = vsub.f32 %v4632_v4, %v14045_v11  ;;  %v4751_v63 = vsub.f32 %v4690_v51, %v14046_v62  ;;  %8274 = vrcp.f32 %v4889_v0  ;;  %v6836_v28 = vmul.f32 -1.442695, %v4785_v60 }
 0x831   : > { %v4883_v23 = vadd.f32 1.0, %v8259_v30  ;;  %v8261_v32 = vpop.eup %8260  ;;  %8276 = vrcp.f32 %v4888_v49  ;;  %v6823_v51 = vmul.f32 -1.442695, %v4772_v26  ;;  %v14052_v49 = vld [vmem:[#allocation38_spill] sm:$0xff] }
 0x832   : > { %8278 = vpow2.f32 %v6816_v16  ;;  %v4766_v33 = vmul.f32 %v4738_v34, %v14048_v55  ;;  %v4876_v4 = vadd.f32 1.0, %v8261_v32  ;;  %v4779_v9 = vmul.f32 %v4751_v63, %v14049_v7  ;;  %v14055_v63 = vld [vmem:[#allocation64_spill] sm:$0xff] }
 0x833   : > { %v4721_v14 = vpop.permute.xlu0 %4720  ;;  %v4663_v38 = vpop.permute.xlu1 %4662  ;;  %8280 = vrcp.f32 %v4883_v23  ;;  %v14054_v23 = vld [vmem:[#allocation116_spill] sm:$0xff] }
 0x834   : > { %v8263_v22 = vpop.eup %8262  ;;  %v4758_v53 = vsub.f32 %v4721_v14, %v14050_v13  ;;  %8282 = vpow2.f32 %v6829_v21  ;;  %v6817_v47 = vmul.f32 -1.442695, %v4766_v33  ;;  %v6830_v11 = vmul.f32 -1.442695, %v4779_v9  ;;  %v14057_v21 = vld [vmem:[#allocation58_spill] sm:$0xff]  ;;  %v14058_v9 = vld [vmem:[#allocation152_spill] sm:$0xff] }
 0x835   : > { %v8265_v27 = vpop.eup %8264  ;;  %v4896_v58 = vadd.f32 1.0, %v8263_v22  ;;  %8284 = vpow2.f32 %v6836_v28  ;;  %v4745_v14 = vsub.f32 %v4663_v38, %v14055_v63  ;;  %v14059_v38 = vld [vmem:[#allocation97_spill] sm:$0xff]  ;;  %v14064_v63 = vld [vmem:[#allocation40_spill] sm:$0xff] }
 0x836   : > { %v8267_v12 = vpop.eup %8266  ;;  %v4961_v20 = vmul.f32 %v8265_v27, %v14051_v52  ;;  %v5075_v1 = vmul.f32 %v8265_v27, %v14052_v49  ;;  %8286 = vrcp.f32 %v4876_v4  ;;  %v4786_v62 = vmul.f32 %v4758_v53, %v14054_v23  ;;  %v14061_v49 = vld [vmem:[#allocation88_spill] sm:$0xff] }
 0x837   : > { %v4636_v30 = vpop.permute.xlu0 %4635  ;;  %v4694_v0 = vpop.permute.xlu1 %4693  ;;  %v4960_v60 = vmul.f32 %v8267_v12, %v14053_v15  ;;  %8288 = vpow2.f32 %v6823_v51  ;;  %v5074_v26 = vmul.f32 %v8267_v12, %v14056_v45  ;;  %v4773_v13 = vmul.f32 %v4745_v14, %v14059_v38  ;;  %v14066_v38 = vld [vmem:[#allocation86_spill] sm:$0xff] }
 0x838   : > { %v8269_v16 = vpop.eup %8268  ;;  %8290 = vrcp.f32 %v4896_v58  ;;  %v4739_v22 = vsub.f32 %v4636_v30, %v14057_v21  ;;  %v4989_v28 = vsel %vm1583_vm9, %v4961_v20, 0.0  ;;  %v5103_v33 = vsel %vm1583_vm9, %v5075_v1, 0.0  ;;  %v14060_v30 = vld [vmem:[#allocation120_spill] sm:$0xff] }
 0x839   : > { %v8271_v34 = vpop.eup %8270  ;;  %8292 = vpow2.f32 %v6817_v47  ;;  %v6837_v27 = vmul.f32 -1.442695, %v4786_v62  ;;  %v4988_v7 = vsel %vm1583_vm9, %v4960_v60, 0.0  ;;  %v4968_v51 = vmul.f32 %v8269_v16, %v14058_v9  ;;  %v14062_v47 = vld [vmem:[#allocation71_spill] sm:$0xff] }
 0x83a   : > { %v8273_v32 = vpop.eup %8272  ;;  %8294 = vpow2.f32 %v6830_v11  ;;  %v5082_v52 = vmul.f32 %v8269_v16, %v14060_v30  ;;  %v4767_v1 = vmul.f32 %v4739_v22, %v14061_v49  ;;  %v4752_v15 = vsub.f32 %v4694_v0, %v14062_v47  ;;  %v14063_v62 = vld [vmem:[#allocation151_spill] sm:$0xff]  ;;  %v14065_v11 = vld [vmem:[#allocation92_spill] sm:$0xff]  ;;  %v14068_v49 = vld [vmem:[#allocation42_spill] sm:$0xff] }
 0x83b   : > { %v8275_v55 = vpop.eup %8274  ;;  %v12113_v53 = vpop.permute.xlu0 %4724  ;;  %v4895_v20 = vadd.f32 1.0, %v8273_v32  ;;  %v4967_v60 = vmul.f32 %v8271_v34, %v14063_v62  ;;  %v5081_v45 = vmul.f32 %v8271_v34, %v14064_v63  ;;  %8296 = vpow2.f32 %v6837_v27  ;;  %v14067_v30 = vld [vmem:[#allocation127_spill] sm:$0xff] }
 0x83c   : > { %v8277_v4 = vpop.eup %8276  ;;  %v12115_v12 = vpop.permute.xlu1 %4666  ;;  %v4975_v21 = vmul.f32 %v8275_v55, %v14065_v11  ;;  %v12123_v14 = vadd.f32 %v4989_v28, %v4988_v7  ;;  %v5102_v9 = vsel %vm1583_vm9, %v5074_v26, 0.0  ;;  %v6824_v16 = vmul.f32 -1.442695, %v4773_v13  ;;  %v14069_v34 = vld [vmem:[#allocation27_spill] sm:$0xff] }
 0x83d   : > { %v8279_v58 = vpop.eup %8278  ;;  %v4974_v31 = vmul.f32 %v8277_v4, %v14066_v38  ;;  %v5008_v22 = vsel %vm1583_vm9, %v4968_v51, 0.0  ;;  %v5089_v0 = vmul.f32 %v8275_v55, %v14067_v30  ;;  %v5088_v47 = vmul.f32 %v8277_v4, %v14068_v49  ;;  %v14070_v28 = vld [vmem:[#allocation107_spill] sm:$0xff]  ;;  %v14071_v49 = vld [vmem:[#allocation128_spill] sm:$0xff] }
 0x83e   : > { %v8281_v23 = vpop.eup %8280  ;;  %v4877_v62 = vadd.f32 1.0, %v8279_v58  ;;  %8298 = vrcp.f32 %v4895_v20  ;;  %v6818_v27 = vmul.f32 -1.442695, %v4767_v1  ;;  %v4780_v7 = vmul.f32 %v4752_v15, %v14070_v28 }
 0x83f   : > { %v8283_v32 = vpop.eup %8282  ;;  %v4969_v63 = vmul.f32 %v8281_v23, %v14069_v34  ;;  %v5122_v26 = vsel %vm1583_vm9, %v5082_v52, 0.0  ;;  %v5007_v13 = vsel %vm1583_vm9, %v4967_v60, 0.0  ;;  %v5121_v38 = vsel %vm1583_vm9, %v5081_v45, 0.0  ;;  %v4640_v55 = vpop.permute.xlu0 %4639 }
 0x840   : > { %v8285_v57 = vpop.eup %8284  ;;  %v5027_v51 = vsel %vm1583_vm9, %v4975_v21, 0.0  ;;  %v4698_v30 = vpop.permute.xlu1 %4697  ;;  %v5026_v58 = vsel %vm1583_vm9, %v4974_v31, 0.0  ;;  %v5083_v34 = vmul.f32 %v8281_v23, %v14071_v49  ;;  %v4890_v20 = vadd.f32 1.0, %v8283_v32  ;;  %v14072_v21 = vld [vmem:[#allocation143_spill] sm:$0xff] }
 0x841   : > { %v8287_v11 = vpop.eup %8286  ;;  %8300 = vpow2.f32 %v6824_v16  ;;  %v5141_v15 = vsel %vm1583_vm9, %v5089_v0, 0.0  ;;  %v5140_v52 = vsel %vm1583_vm9, %v5088_v47, 0.0  ;;  %v4897_v60 = vadd.f32 1.0, %v8285_v57 }
 0x842   : > { %v8289_v4 = vpop.eup %8288  ;;  %8302 = vrcp.f32 %v4877_v62  ;;  %v5010_v45 = vsel %vm1583_vm9, %v4969_v63, 0.0  ;;  %v4962_v3 = vmul.f32 %v8287_v11, %v14072_v21  ;;  %v6831_v39 = vmul.f32 -1.442695, %v4780_v7  ;;  %v14079_v21 = vld [vmem:[#allocation93_spill] sm:$0xff] }
 0x843   : > { %v8291_v1 = vpop.eup %8290  ;;  %8304 = vpow2.f32 %v6818_v27  ;;  %v12142_v31 = vadd.f32 %v5103_v33, %v5102_v9  ;;  %v5009_v23 = vadd.f32 %v5008_v22, %v5007_v13  ;;  %v5123_v32 = vadd.f32 %v5122_v26, %v5121_v38  ;;  %v4729_v33 = vpop.permute.xlu0 %4728  ;;  %v14073_v13 = vld [vmem:[#allocation78_spill] sm:$0xff] }
 0x844   : > { %v8293_v28 = vpop.eup %8292  ;;  %v12144_v16 = vadd.f32 %v5027_v51, %v5026_v58  ;;  %v12146_v49 = vadd.f32 %v5141_v15, %v5140_v52  ;;  %v5124_v0 = vsel %vm1583_vm9, %v5083_v34, 0.0  ;;  %8306 = vrcp.f32 %v4890_v20  ;;  %v4671_v9 = vpop.permute.xlu1 %4670  ;;  %v14075_v34 = vld [vmem:[#allocation72_spill] sm:$0xff]  ;;  %v14076_v52 = vld [vmem:[#allocation47_spill] sm:$0xff] }
 0x845   : > { %v8295_v56 = vpop.eup %8294  ;;  %v4884_v57 = vadd.f32 1.0, %v8289_v4  ;;  %v12149_v62 = vadd.f32 %v5010_v45, %v5009_v23  ;;  %v5076_v63 = vmul.f32 %v8287_v11, %v13975_v29  ;;  %v4982_v27 = vmul.f32 %v8291_v1, %v13976_v50  ;;  %v14074_v4 = vld [vmem:[#allocation59_spill] sm:$0xff] }
 0x846   : > { %v8297_v47 = vpop.eup %8296  ;;  %8308 = vrcp.f32 %v4897_v60  ;;  %v4991_v22 = vsel %vm1583_vm9, %v4962_v3, 0.0  ;;  %v4878_v7 = vadd.f32 1.0, %v8293_v28  ;;  %v4891_v26 = vadd.f32 1.0, %v8295_v56  ;;  %v14077_v28 = vld [vmem:[#allocation117_spill] sm:$0xff]  ;;  %v14080_v23 = vld [vmem:[#allocation79_spill] sm:$0xff] }
 0x847   : > { %8310 = vpow2.f32 %v6831_v39  ;;  %v4759_v38 = vsub.f32 %v12113_v53, %v14073_v13  ;;  %v4746_v51 = vsub.f32 %v12115_v12, %v13880_v6  ;;  %v4740_v58 = vsub.f32 %v4640_v55, %v14074_v4  ;;  %v14078_v39 = vld [vmem:[#allocation98_spill] sm:$0xff]  ;;  %v4733_v4 = vpop.permute.xlu0 %4732 }
 0x848   : > { %v4753_v11 = vsub.f32 %v4698_v30, %v14075_v34  ;;  %v8299_v20 = vpop.eup %8298  ;;  %v12160_v15 = vadd.f32 %v5124_v0, %v5123_v32  ;;  %v5096_v60 = vmul.f32 %v8291_v1, %v14076_v52  ;;  %8312 = vrcp.f32 %v4884_v57  ;;  %v14081_v32 = vld [vmem:[#allocation110_spill] sm:$0xff] }
 0x849   : > { %v4898_v3 = vadd.f32 1.0, %v8297_v47  ;;  %v4787_v56 = vmul.f32 %v4759_v38, %v14077_v28  ;;  %v4774_v45 = vmul.f32 %v4746_v51, %v14078_v39  ;;  %v4768_v53 = vmul.f32 %v4740_v58, %v14079_v21  ;;  %v14082_v47 = vld [vmem:[#allocation157_spill] sm:$0xff]  ;;  %v4702_v58 = vpop.permute.xlu1 %4701  ;;  %v14083_v28 = vld [vmem:[#allocation82_spill] sm:$0xff] }
 0x84a   : > { %v4760_v13 = vsub.f32 %v4729_v33, %v14080_v23  ;;  %v12168_v55 = vadd.f32 %v4991_v22, %v12123_v14  ;;  %v5105_v30 = vsel %vm1583_vm9, %v5076_v63, 0.0  ;;  %8314 = vrcp.f32 %v4878_v7  ;;  %v14085_v23 = vld [vmem:[#allocation147_spill] sm:$0xff] }
 0x84b   : > { %v8301_v12 = vpop.eup %8300  ;;  %v4781_v0 = vmul.f32 %v4753_v11, %v14081_v32  ;;  %v5046_v57 = vsel %vm1583_vm9, %v4982_v27, 0.0  ;;  %v4981_v38 = vmul.f32 %v8299_v20, %v14082_v47  ;;  %8316 = vrcp.f32 %v4891_v26  ;;  %v14087_v47 = vld [vmem:[#allocation118_spill] sm:$0xff] }
 0x84c   : > { %v8303_v1 = vpop.eup %8302  ;;  %v6838_v51 = vmul.f32 -1.442695, %v4787_v56  ;;  %8318 = vrcp.f32 %v4898_v3  ;;  %v6825_v33 = vmul.f32 -1.442695, %v4774_v45  ;;  %v6819_v52 = vmul.f32 -1.442695, %v4768_v53 }
 0x84d   : > { %v8305_v34 = vpop.eup %8304  ;;  %v6832_v14 = vmul.f32 -1.442695, %v4781_v0  ;;  %v5095_v22 = vmul.f32 %v8299_v20, %v13789_v8  ;;  %v4885_v63 = vadd.f32 1.0, %v8301_v12  ;;  %v4788_v7 = vmul.f32 %v4760_v13, %v13985_v44  ;;  %v14084_v56 = vld [vmem:[#allocation73_spill] sm:$0xff]  ;;  %v6844_v8 = vld [vmem:[%s14115_s18] ss:$0 sm:$0xff] (%p1385_p1) }
 0x84e   : > { %8320 = vpow2.f32 %v6838_v51  ;;  %v8307_v11 = vpop.eup %8306  ;;  %v4747_v27 = vsub.f32 %v4671_v9, %v13986_v48  ;;  %v4761_v26 = vsub.f32 %v4733_v4, %v14083_v28  ;;  %v4754_v39 = vsub.f32 %v4702_v58, %v14084_v56  ;;  %v14086_v13 = vld [vmem:[#allocation101_spill] sm:$0xff]  ;;  %v14088_v4 = vld [vmem:[#allocation112_spill] sm:$0xff]  ;;  %v14089_v28 = vld [vmem:[#allocation131_spill] sm:$0xff] }
 0x84f   : > { %8322 = vpow2.f32 %v6825_v33  ;;  %v4963_v3 = vmul.f32 %v8303_v1, %v14085_v23  ;;  %v4879_v45 = vadd.f32 1.0, %v8305_v34  ;;  %v6839_v53 = vmul.f32 -1.442695, %v4788_v7  ;;  %v14090_v56 = vld [vmem:[#allocation159_spill] sm:$0xff] }
 0x850   : > { %v8309_v21 = vpop.eup %8308  ;;  %8324 = vpow2.f32 %v6819_v52  ;;  %v5045_v20 = vsel %vm1583_vm9, %v4981_v38, 0.0  ;;  %v5077_v12 = vmul.f32 %v8303_v1, %v13696_v35  ;;  %v4775_v0 = vmul.f32 %v4747_v27, %v14086_v13 }
 0x851   : > { %v8311_v32 = vpop.eup %8310  ;;  %8326 = vpow2.f32 %v6832_v14  ;;  %v4976_v9 = vmul.f32 %v8307_v11, %v14087_v47  ;;  %v4789_v51 = vmul.f32 %v4761_v26, %v13895_v46  ;;  %v4782_v58 = vmul.f32 %v4754_v39, %v14088_v4  ;;  %v14092_v4 = vld [vmem:[#allocation56_spill] sm:$0xff] }
 0x852   : > { %8328 = vpow2.f32 %v6839_v53  ;;  %v8313_v33 = vpop.eup %8312  ;;  %v5090_v34 = vmul.f32 %v8307_v11, %v14089_v28  ;;  %v4892_v52 = vadd.f32 1.0, %v8311_v32  ;;  %v6826_v7 = vmul.f32 -1.442695, %v4775_v0  ;;  %v14091_v53 = vld [vmem:[#allocation48_spill] sm:$0xff] }
 0x853   : > { %8330 = vrcp.f32 %v4885_v63  ;;  %v5160_v38 = vsel %vm1583_vm9, %v5096_v60, 0.0  ;;  %v4983_v1 = vmul.f32 %v8309_v21, %v14090_v56  ;;  %v6840_v14 = vmul.f32 -1.442695, %v4789_v51 }
 0x854   : > { %8332 = vrcp.f32 %v4879_v45  ;;  %v8315_v27 = vpop.eup %8314  ;;  %v5159_v23 = vsel %vm1583_vm9, %v5095_v22, 0.0  ;;  %v5097_v13 = vmul.f32 %v8309_v21, %v14091_v53  ;;  %v6833_v26 = vmul.f32 -1.442695, %v4782_v58 }
 0x855   : > { %8334 = vpow2.f32 %v6826_v7  ;;  %v8317_v39 = vpop.eup %8316  ;;  %v5106_v47 = vadd.f32 %v5105_v30, %v12142_v31  ;;  %v5047_v11 = vadd.f32 %v5046_v57, %v5045_v20  ;;  %v4993_v63 = vsel %vm1583_vm9, %v4963_v3, 0.0  ;;  %v14093_v3 = vld [vmem:[#allocation148_spill] sm:$0xff] }
 0x856   : > { %8336 = vpow2.f32 %v6840_v14  ;;  %v8319_v32 = vpop.eup %8318  ;;  %v5107_v60 = vsel %vm1583_vm9, %v5077_v12, 0.0  ;;  %v5029_v45 = vsel %vm1583_vm9, %v4976_v9, 0.0  ;;  %v5143_v0 = vsel %vm1583_vm9, %v5090_v34, 0.0 }
 0x857   : > { %8338 = vrcp.f32 %v4892_v52  ;;  %v5161_v51 = vadd.f32 %v5160_v38, %v5159_v23  ;;  %v5048_v21 = vsel %vm1583_vm9, %v4983_v1, 0.0  ;;  %v4970_v58 = vmul.f32 %v8313_v33, %v14092_v4 }
 0x858   : > { %v8321_v22 = vpop.eup %8320  ;;  %8340 = vpow2.f32 %v6833_v26  ;;  %v5162_v30 = vsel %vm1583_vm9, %v5097_v13, 0.0  ;;  %v5084_v57 = vmul.f32 %v8313_v33, %v13996_v19  ;;  %v4964_v20 = vmul.f32 %v8315_v27, %v14093_v3 }
 0x859   : > { %v8323_v31 = vpop.eup %8322  ;;  %v4899_v12 = vadd.f32 1.0, %v8321_v22  ;;  %v4994_v9 = vadd.f32 %v4993_v63, %v12168_v55  ;;  %v5108_v34 = vadd.f32 %v5107_v60, %v5106_v47  ;;  %v5030_v52 = vadd.f32 %v5029_v45, %v12144_v16 }
 0x85a   : > { %v8325_v28 = vpop.eup %8324  ;;  %v5144_v7 = vadd.f32 %v5143_v0, %v12146_v49  ;;  %v5049_v56 = vadd.f32 %v5048_v21, %v5047_v11  ;;  %v5078_v1 = vmul.f32 %v8315_v27, %v13806_v40  ;;  %v4886_v14 = vadd.f32 1.0, %v8323_v31 }
 0x85b   : > { %v8327_v38 = vpop.eup %8326  ;;  %8342 = vrcp.f32 %v4899_v12  ;;  %v5163_v53 = vadd.f32 %v5162_v30, %v5161_v51  ;;  %v5012_v33 = vsel %vm1583_vm9, %v4970_v58, 0.0  ;;  %v4880_v13 = vadd.f32 1.0, %v8325_v28 }
 0x85c   : > { %v8329_v23 = vpop.eup %8328  ;;  %v4893_v26 = vadd.f32 1.0, %v8327_v38  ;;  %v5126_v55 = vsel %vm1583_vm9, %v5084_v57, 0.0  ;;  %v4995_v47 = vsel %vm1583_vm9, %v4964_v20, 0.0  ;;  %8344 = vrcp.f32 %v4886_v14 }
 0x85d   : > { %v8331_v22 = vpop.eup %8330  ;;  %v4900_v16 = vadd.f32 1.0, %v8329_v23  ;;  %v4977_v11 = vmul.f32 %v8317_v39, %v13807_v36  ;;  %v5091_v27 = vmul.f32 %v8317_v39, %v13808_v2  ;;  %v4984_v63 = vmul.f32 %v8319_v32, %v13809_v24 }
 0x85e   : > { %v8333_v49 = vpop.eup %8332  ;;  %8346 = vrcp.f32 %v4880_v13  ;;  %v5013_v45 = vadd.f32 %v5012_v33, %v12149_v62  ;;  %v5109_v0 = vsel %vm1583_vm9, %v5078_v1, 0.0  ;;  %v5098_v51 = vmul.f32 %v8319_v32, %v13712_v59 }
 0x85f   : > { %v8335_v60 = vpop.eup %8334  ;;  %8348 = vrcp.f32 %v4893_v26  ;;  %v4971_v4 = vmul.f32 %v8331_v22, %v13903_v43  ;;  %v5085_v58 = vmul.f32 %v8331_v22, %v13714_v54  ;;  %v5127_v39 = vadd.f32 %v5126_v55, %v12160_v15  ;;  %v5378_v54 = vld [vmem:[%s14114_s16] sm:$0xff] (%p1385_p1) }
 0x860   : > { %v8337_v21 = vpop.eup %8336  ;;  %8350 = vrcp.f32 %v4900_v16  ;;  %v4887_v31 = vadd.f32 1.0, %v8335_v60  ;;  %v4996_v57 = vadd.f32 %v4995_v47, %v4994_v9  ;;  %v4965_v3 = vmul.f32 %v8333_v49, %v13904_v5 }
 0x861   : > { %v8339_v30 = vpop.eup %8338  ;;  %v4901_v20 = vadd.f32 1.0, %v8337_v21  ;;  %v5031_v12 = vsel %vm1583_vm9, %v4977_v11, 0.0  ;;  %v5145_v32 = vsel %vm1583_vm9, %v5091_v27, 0.0  ;;  %v5050_v28 = vsel %vm1583_vm9, %v4984_v63, 0.0  ;;  %v14094_v21 = vld [vmem:[#allocation125_spill] sm:$0xff] }
 0x862   : > { %v8341_v62 = vpop.eup %8340  ;;  %8352 = vrcp.f32 %v4887_v31  ;;  %v5110_v38 = vadd.f32 %v5109_v0, %v5108_v34  ;;  %v5079_v1 = vmul.f32 %v8333_v49, %v13812_v41  ;;  %v5164_v23 = vsel %vm1583_vm9, %v5098_v51, 0.0 }
 0x863   : > { %8354 = vrcp.f32 %v4901_v20  ;;  %v4894_v14 = vadd.f32 1.0, %v8341_v62  ;;  %v5014_v15 = vsel %vm1583_vm9, %v4971_v4, 0.0  ;;  %v5128_v9 = vsel %vm1583_vm9, %v5085_v58, 0.0 }
 0x864   : > { %v4978_v33 = vmul.f32 %v8339_v30, %v13905_v25  ;;  %v5032_v26 = vadd.f32 %v5031_v12, %v5030_v52  ;;  %v5146_v22 = vadd.f32 %v5145_v32, %v5144_v7  ;;  %v5051_v55 = vadd.f32 %v5050_v28, %v5049_v56 }
 0x865   : > { %v8343_v13 = vpop.eup %8342  ;;  %v4997_v47 = vsel %vm1583_vm9, %v4965_v3, 0.0  ;;  %v5092_v34 = vmul.f32 %v8339_v30, %v13718_v42  ;;  %8356 = vrcp.f32 %v4894_v14  ;;  %v5165_v27 = vadd.f32 %v5164_v23, %v5163_v53  ;;  %v14095_v3 = vld [vmem:[#allocation150_spill] sm:$0xff]  ;;  %v5379_v42 = vld [vmem:[%s14114_s16 + $0x8] sm:$0xff] (%p1385_p1) }
 0x866   : > { %v4985_v16 = vmul.f32 %v8343_v13, %v13719_v18  ;;  %v5099_v49 = vmul.f32 %v8343_v13, %v13998_v61  ;;  %v8345_v11 = vpop.eup %8344  ;;  %v5015_v63 = vadd.f32 %v5014_v15, %v5013_v45  ;;  %v5129_v60 = vadd.f32 %v5128_v9, %v5127_v39  ;;  %v14096_v53 = vld [vmem:[#allocation126_spill] sm:$0xff] }
 0x867   : > { %v5111_v0 = vsel %vm1583_vm9, %v5079_v1, 0.0  ;;  %v5033_v52 = vsel %vm1583_vm9, %v4978_v33, 0.0  ;;  %v4972_v56 = vmul.f32 %v8345_v11, %v13999_v37  ;;  %v5086_v4 = vmul.f32 %v8345_v11, %v14094_v21  ;;  %v14098_v11 = vld [vmem:[#allocation162_spill] sm:$0xff]  ;;  %v14101_v21 = vld [vmem:[#allocation129_spill] sm:$0xff] }
 0x868   : > { %v8347_v51 = vpop.eup %8346  ;;  %v5052_v7 = vsel %vm1583_vm9, %v4985_v16, 0.0  ;;  %v4998_v31 = vadd.f32 %v4997_v47, %v4996_v57  ;;  %v5166_v30 = vsel %vm1583_vm9, %v5099_v49, 0.0  ;;  %v5112_v62 = vadd.f32 %v5111_v0, %v5110_v38  ;;  %v14097_v47 = vld [vmem:[#allocation130_spill] sm:$0xff] }
 0x869   : > { %v8349_v58 = vpop.eup %8348  ;;  %v4966_v20 = vmul.f32 %v8347_v51, %v14095_v3  ;;  %v5080_v45 = vmul.f32 %v8347_v51, %v14096_v53  ;;  %v5147_v12 = vsel %vm1583_vm9, %v5092_v34, 0.0  ;;  %v5016_v32 = vsel %vm1583_vm9, %v4972_v56, 0.0  ;;  %v14099_v51 = vld [vmem:[#allocation139_spill] sm:$0xff] }
 0x86a   : > { %v8351_v39 = vpop.eup %8350  ;;  %v5130_v28 = vsel %vm1583_vm9, %v5086_v4, 0.0  ;;  %v5034_v1 = vadd.f32 %v5033_v52, %v5032_v26  ;;  %v5053_v14 = vadd.f32 %v5052_v7, %v5051_v55  ;;  %v5167_v9 = vadd.f32 %v5166_v30, %v5165_v27  ;;  %v14100_v52 = vld [vmem:[#allocation32_spill] sm:$0xff]  ;;  %v14102_v3 = vld [vmem:[#allocation163_spill] sm:$0xff] }
 0x86b   : > { %v4999_v23 = vsel %vm2074_vm5, %v4966_v20, 0.0  ;;  %v5113_v57 = vsel %vm2074_vm5, %v5080_v45, 0.0  ;;  %v4979_v13 = vmul.f32 %v8349_v58, %v13725_v17  ;;  %v5093_v16 = vmul.f32 %v8349_v58, %v14097_v47  ;;  %v14103_v58 = vld [vmem:[#allocation49_spill] sm:$0xff] }
 0x86c   : > { %v8353_v15 = vpop.eup %8352  ;;  %v5114_v33 = vadd.f32 %v5113_v57, %v5112_v62  ;;  %v5017_v49 = vadd.f32 %v5016_v32, %v5015_v63  ;;  %v5131_v34 = vadd.f32 %v5130_v28, %v5129_v60  ;;  %v4986_v0 = vmul.f32 %v8351_v39, %v14098_v11  ;;  %v5380_v17 = vld [vmem:[%s14114_s16 + $0x10] sm:$0x1] (%p1385_p1) }
 0x86d   : > { %v8355_v38 = vpop.eup %8354  ;;  %v5100_v56 = vmul.f32 %v8351_v39, %v14099_v51  ;;  %v5000_v26 = vadd.f32 %v4999_v23, %v4998_v31  ;;  %v4973_v7 = vmul.f32 %v8353_v15, %v14100_v52  ;;  %v5087_v4 = vmul.f32 %v8353_v15, %v14101_v21  ;;  %v14104_v51 = vld [vmem:[#allocation156_spill] sm:$0xff] }
 0x86e   : > { %v5115_v55 = vrot.slane %v5114_v33, 4  ;;  %v5054_v27 = vsel %vm1583_vm9, %v4986_v0, 0.0  ;;  %v4987_v20 = vmul.f32 %v8355_v38, %v14102_v3  ;;  %v5101_v53 = vmul.f32 %v8355_v38, %v14103_v58 }
 0x86f   : > { %v5168_v30 = vsel %vm1583_vm9, %v5100_v56, 0.0  ;;  %v8357_v63 = vpop.eup %8356  ;;  %v5035_v60 = vsel %vm1583_vm9, %v4979_v13, 0.0  ;;  %v5149_v45 = vsel %vm1583_vm9, %v5093_v16, 0.0  ;;  %v5055_v39 = vadd.f32 %v5054_v27, %v5053_v14  ;;  %v14105_v56 = vld [vmem:[#allocation45_spill] sm:$0xff] }
 0x870   : > { %v5169_v31 = vadd.f32 %v5168_v30, %v5167_v9  ;;  %v5018_v62 = vsel %vm2074_vm5, %v4973_v7, 0.0  ;;  %v5132_v32 = vsel %vm2074_vm5, %v5087_v4, 0.0  ;;  %v5056_v28 = vsel %vm2074_vm5, %v4987_v20, 0.0 }
 0x871   : > { %v5170_v23 = vsel %vm2074_vm5, %v5101_v53, 0.0  ;;  %v5148_v57 = vadd.f32 %v5147_v12, %v5146_v22  ;;  %v5116_v15 = vadd.f32 %v5115_v55, %v5114_v33  ;;  %v5019_v47 = vadd.f32 %v5018_v62, %v5017_v49 }
 0x872   : > { %v5133_v11 = vadd.f32 %v5132_v32, %v5131_v34  ;;  %v5057_v38 = vadd.f32 %v5056_v28, %v5055_v39  ;;  %v5171_v0 = vadd.f32 %v5170_v23, %v5169_v31  ;;  %v4980_v13 = vmul.f32 %v8357_v63, %v14104_v51 }
 0x873   : > { %v5094_v16 = vmul.f32 %v8357_v63, %v14105_v56  ;;  %v5036_v14 = vadd.f32 %v5035_v60, %v5034_v1  ;;  %v5150_v9 = vadd.f32 %v5149_v45, %v5148_v57  ;;  %v5020_v52 = vrot.slane %v5019_v47, 4 }
 0x874   : > { %v5134_v7 = vrot.slane %v5133_v11, 4  ;;  %v5001_v21 = vrot.slane %v5000_v26, 4  ;;  %v5172_v4 = vrot.slane %v5171_v0, 4  ;;  %v5037_v27 = vsel %vm2074_vm5, %v4980_v13, 0.0 }
 0x875   : > { %v5151_v30 = vsel %vm2074_vm5, %v5094_v16, 0.0  ;;  %v5117_v22 = vrot.slane %v5116_v15, 2  ;;  %v5058_v33 = vrot.slane %v5057_v38, 4  ;;  %v5021_v49 = vadd.f32 %v5020_v52, %v5019_v47 }
 0x876   : > { %v5135_v12 = vadd.f32 %v5134_v7, %v5133_v11  ;;  %v5173_v34 = vadd.f32 %v5172_v4, %v5171_v0  ;;  %v5038_v55 = vadd.f32 %v5037_v27, %v5036_v14  ;;  %v5152_v3 = vadd.f32 %v5151_v30, %v5150_v9 }
 0x877   : > { %v5002_v58 = vadd.f32 %v5001_v21, %v5000_v26  ;;  %v5118_v60 = vadd.f32 %v5117_v22, %v5116_v15  ;;  %v5059_v39 = vadd.f32 %v5058_v33, %v5057_v38  ;;  %v5022_v31 = vrot.slane %v5021_v49, 2 }
 0x878   : > { %v5136_v20 = vrot.slane %v5135_v12, 2  ;;  %v5174_v53 = vrot.slane %v5173_v34, 2  ;;  %v5039_v1 = vrot.slane %v5038_v55, 4  ;;  %v5153_v63 = vrot.slane %v5152_v3, 4 }
 0x879   : > { %v5003_v57 = vrot.slane %v5002_v58, 2  ;;  %v5119_v47 = vrot.slane %v5118_v60, 1  ;;  %v5023_v13 = vadd.f32 %v5022_v31, %v5021_v49  ;;  %v5060_v56 = vrot.slane %v5059_v39, 2 }
 0x87a   : > { %v5137_v45 = vadd.f32 %v5136_v20, %v5135_v12  ;;  %v5175_v62 = vadd.f32 %v5174_v53, %v5173_v34  ;;  %v5040_v32 = vadd.f32 %v5039_v1, %v5038_v55  ;;  %v5154_v28 = vadd.f32 %v5153_v63, %v5152_v3 }
 0x87b   : > { %v5004_v9 = vadd.f32 %v5003_v57, %v5002_v58  ;;  %v5120_v15 = vadd.f32 %v5119_v47, %v5118_v60  ;;  %v5024_v38 = vrot.slane %v5023_v13, 1  ;;  %v5061_v21 = vadd.f32 %v5060_v56, %v5059_v39  ;;  %v14106_v58 = vld [vmem:[#allocation196_spill] sm:$0xff]  ;;  %v14108_v39 = vld [vmem:[#allocation197_spill] sm:$0xff] }
 0x87c   : > { %v5138_v23 = vrot.slane %v5137_v45, 1  ;;  %v5041_v11 = vrot.slane %v5040_v32, 2  ;;  %v5155_v51 = vrot.slane %v5154_v28, 2  ;;  %v5176_v0 = vrot.slane %v5175_v62, 1  ;;  %v14112_v56 = vld [vmem:[#allocation37_spill] sm:$0xff] }
 0x87d   : > { %v5005_v22 = vrot.slane %v5004_v9, 1  ;;  %v5025_v49 = vadd.f32 %v5024_v38, %v5023_v13  ;;  %v5062_v34 = vrot.slane %v5061_v21, 1  ;;  %v7126_v18 = vpack.c.bf16 (%p1385_p1), %v5379_v42, %v5378_v54 }
 0x87e   : > { %v5156_v16 = vadd.f32 %v5155_v51, %v5154_v28  ;;  %v5139_v26 = vadd.f32 %v5138_v23, %v5137_v45  ;;  %v5042_v14 = vadd.f32 %v5041_v11, %v5040_v32  ;;  %v5177_v7 = vadd.f32 %v5176_v0, %v5175_v62  ;;  %v14107_v45 = vld [vmem:[#allocation189_spill] sm:$0xff]  ;;  %v14109_v28 = vld [vmem:[#allocation188_spill] sm:$0xff]  ;;  %v14110_v11 = vld [vmem:[#allocation191_spill] sm:$0xff] }
 0x87f   : > { %v5006_v20 = vadd.f32 %v5005_v22, %v5004_v9  ;;  %v5063_v63 = vadd.f32 %v5062_v34, %v5061_v21  ;;  %v4958_v31 = vmul.f32 %v14108_v39, %v14107_v45  ;;  %v14111_v0 = vld [vmem:[#allocation122_spill] sm:$0xff]  ;;  %7127 = vmatprep.subr.bf16.mxu1 (%p1385_p1), %v7126_v18  ;;  %vm5738_vm9 = vcmask (%p1385_p1), 64512  }
 0x880   : > { %v5157_v52 = vrot.slane %v5156_v16, 1  ;;  %v5182_v27 = vsel %vm2144_vm12, %v5139_v26, %v5120_v15  ;;  %v5043_v30 = vrot.slane %v5042_v14, 1  ;;  %v5214_v26 = vld [vmem:[%s14113_s15] sm:$0xff] (%p1385_p1)  ;;  %v5216_v15 = vld [vmem:[%s14113_s15 + $0x10] sm:$0x1] (%p1385_p1)  ;;  %7129 = vmatpush3.bf16.msra.mxu1 (%p1385_p1), %v7126_v18  ;;  %vm5741_vm5 = vcmask (%p1385_p1), 621568  }
 0x881   : > { %v5068_v1 = vsel %vm2144_vm12, %v5025_v49, %v5006_v20  ;;  %v4959_v23 = vadd.f32 %v4958_v31, %v14109_v28  ;;  %7059 = vmatprep.subr.msk.mxu1 (%p1385_p1), %vm1407_vm11, %v5380_v17  ;;  %v5540_v31 = vld [vmem:[%s14116_s22] sm:$0xff] (%p1385_p1)  ;;  %v5542_v28 = vld [vmem:[%s14116_s22 + $0x10] sm:$0xff] (%p1385_p1)  ;;  %vm5863_vm12 = vcmask (%p1385_p1), 130048  }
 0x882   : > { %v5158_v4 = vadd.f32 %v5157_v52, %v5156_v16  ;;  %v5044_v3 = vadd.f32 %v5043_v30, %v5042_v14  ;;  %v5215_v14 = vld [vmem:[%s14113_s15 + $0x8] sm:$0xff] (%p1385_p1) }
 0x883   :  { %v7122_v9 = vpack.c.bf16 (%p1385_p1), %v5215_v14, %v5214_v26 }
 0x884   : > { %v5183_v12 = vsel %vm2146_vm14, %v5158_v4, %v5182_v27  ;;  %v5069_v62 = vsel %vm2146_vm14, %v5044_v3, %v5068_v1  ;;  %7060 = vmatpush3.msk.msra.mxu1 (%p1385_p1), %vm1407_vm11, %v5380_v17  ;;  %vm14126_vm14 = vmmov (%p1385_p1), %vm14125_vm6 }
 0x885   : > { %v5184_v33 = vsel %vm2148_vm1, %v5177_v7, %v5183_v12  ;;  %v5070_v32 = vsel %vm2148_vm1, %v5063_v63, %v5069_v62  ;;  %7123 = vmatprep.subr.bf16.mxu0 (%p1385_p1), %v7122_v9  ;;  %v5541_v62 = vld [vmem:[%s14116_s22 + $0x8] sm:$0xff] (%p1385_p1)  ;;  %vm14133_vm1 = vmmov (%p1385_p1), %vm14125_vm6 }
 0x886   : > { %v5186_v55 = vadd.f32 %v5184_v33, %v13612_v10  ;;  %v5072_v57 = vadd.f32 %v5070_v32, %v4959_v23  ;;  %7125 = vmatpush3.bf16.msra.mxu0 (%p1385_p1), %v7122_v9  ;;  %v7130_v32 = vpack.c.bf16 (%p1385_p1), %v5541_v62, %v5540_v31  ;;  %v5543_v23 = vld [vmem:[%s14116_s22 + $0x18] sm:$0xff] (%p1385_p1)  ;;  %v5766_v62 = vld [vmem:[%s14120_s26 + $0xb0] sm:$0xff] (%p1385_p1) }
 0x887   :  { %7044 = vmatprep.subr.msk.mxu0 (%p1385_p1), %vm1407_vm11, %v5216_v15  ;;  %v5763_v31 = vld [vmem:[%s14120_s26 + $0x98] sm:$0xff] (%p1385_p1) }
 0x888   : > { %v5187_v53 = vadd.f32 %v5186_v55, %v14106_v58  ;;  %v5073_v51 = vadd.f32 %v5072_v57, %v14110_v11  ;;  %v7134_v57 = vpack.c.bf16 (%p1385_p1), %v5543_v23, %v5542_v28  ;;  %v7156_v28 = vpack.c.bf16 (%p1385_p1), %v5766_v62, %v5763_v31  ;;  %v5762_v23 = vld [vmem:[%s14120_s26 + $0x90] sm:$0xff] (%p1385_p1)  ;;  %v5792_v62 = vld [vmem:[%s14120_s26 + $0x180] sm:$0xff] (%p1385_p1) }
 0x88a   : > { %v5188_v60 = vadd.f32 1e-08, %v5187_v53  ;;  %7045 = vmatpush3.msk.msra.mxu0 (%p1385_p1), %vm1407_vm11, %v5216_v15  ;;  %vm5553_vm11 = vcmask (%p1385_p1), 343040  }
 0x88b   :  { %7131 = vmatprep.subr.bf16.mxu0 (%p1385_p1), %v7130_v32 }
 0x88c   : > { %8358 = vrcp.f32 %v5188_v60 }
 0x896   : > { %v8359_v47 = vpop.eup %8358 }
 0x897   : > { %v5190_v11 = vmul.f32 %v8359_v47, %v5073_v51   ;;  %v5545_v51 = vld [vmem:[%s14116_s22 + $0x28] sm:$0x3] (%p1385_p1) }
 0x899   : > { %v5191_v13 = vmul.f32 %v5190_v11, %v14111_v0  ;;  %v5544_v11 = vld [vmem:[%s14116_s22 + $0x20] sm:$0xff] (%p1385_p1) }
 0x89a   :  { %1387 = sbr.rel (!%p1385_p1) target bundleno = 603 (0x25b), region = 202  ;;  %v7138_v47 = vpack.c.bf16 (%p1385_p1), %v5545_v51, %v5544_v11  ;;  %v5769_v11 = vld [vmem:[%s14120_s26 + $0xc8] sm:$0xff] (%p1385_p1)  ;;  %v5772_v51 = vld [vmem:[%s14120_s26 + $0xe0] sm:$0xff] (%p1385_p1) }
 0x89b   : > { %v5192_v16 = vadd.f32 %v5191_v13, %v14112_v56  ;;  %v6858_v13 = vld [vmem:[%s14117_s23] ss:$0 sm:$0xff] (%p1385_p1) }
 0x89d   : > { %5195 = vst.msk [vmem:[%s5193_s4] sm:$0x1] %vm5194_vm2, %v5192_v16  ;;  %vm6586_vm2 = vcmask (%p1385_p1), 551936  }
 0x89e   : > { %6841 = vst.msk [vmem:[%s5193_s4 + $0xb] sm:$0x2] %vm5198_vm3, %v5192_v16 }
 0x89f   : > { %6842 = vst.msk [vmem:[%s5193_s4 + $0x16] sm:$0x4] %vm5202_vm15, %v5192_v16 }
 0x8a0   : > { %6843 = vst.msk [vmem:[%s5193_s4 + $0x21] sm:$0x8] %vm5206_vm0, %v5192_v16 }
 0x8a7   :  { %v5208_v52 = vld [vmem:[#allocation3] sm:$0xff]  ;;  %v5209_v7 = vld [vmem:[#allocation3 + $0x8] sm:$0xff]  ;;  %v5210_v38 = vld [vmem:[#allocation3 + $0x10] sm:$0xff] }
 0x8a8   :  { %7046 = vmatprep.mubr.msk.f32.mxu0 %vm5224_vm4, %v5208_v52  ;;  %v5211_v10 = vld [vmem:[#allocation3 + $0x18] sm:$0xff]  ;;  %v5212_v35 = vld [vmem:[#allocation3 + $0x20] sm:$0xff]  ;;  %v5213_v59 = vld [vmem:[#allocation3 + $0x28] sm:$0xff] }
 0x8a9   :  { %7047 = vmatmul.mubr.msk.f32.vlgmr.msra.gmra.mrb[2].mxu0 %vm5224_vm4, %v5209_v7 }
 0x8aa   :  { %7049 = vmatprep.mubr.msk.f32.mxu0 %vm5224_vm4, %v5210_v38  ;;  %7133 = vmatpush3.bf16.msra.mxu0 %v7130_v32 }
 0x8ab   :  { %7135 = vmatprep.subr.bf16.mxu0 %v7134_v57 }
 0x8ad   :  { %7050 = vmatmul.mubr.msk.f32.gmra.mrb[4].mxu0 %vm5224_vm4, %v5211_v10 }
 0x8ae   :  { %7052 = vmatprep.mubr.msk.f32.mxu0 %vm5224_vm4, %v5212_v35  ;;  %7137 = vmatpush3.bf16.msra.mxu0 %v7134_v57  ;;  %v5765_v57 = vld [vmem:[%s14120_s26 + $0xa8] sm:$0xff] }
 0x8af   :  { %7140 = vmatprep.subr.msk.bf16.mxu0 %vm12313_vm8, %v7138_v47 }
 0x8b1   :  { %7053 = vmatmul.mubr.msk.f32.gmra.mrb[6].mxu0 %vm5224_vm4, %v5213_v59 }
 0x8b2   :  { %7143 = vmatpush3.bf16.msk.msra.mxu0 %vm12313_vm8, %v7138_v47  ;;  %v7158_v47 = vpack.c.bf16 %v5765_v57, %v5762_v23  ;;  %v5799_v57 = vld [vmem:[%s14120_s26 + $0x1b8] sm:$0xff] }
 0x97c   :  { %v7048_v40 = vpop.f32.mrb[2].mxu0 }
 0x97d   :  { %v5319_v36 = vadd.f32 %v7048_v40, %v6844_v8  ;;  %v5313_v2 = vpop.f32.mrb[3].mxu0 }
 0x97e   :  { %v5314_v24 = vadd.f32 %v6844_v8, %v5313_v2 }
 0x97f   :  { %v6853_v41 = vmul.f32 -1.442695, %v5319_v36 }
 0x980   :  { %v6852_v6 = vmul.f32 -1.442695, %v5314_v24  ;;  %v7051_v46 = vpop.f32.mrb[4].mxu0 }
 0x981   :  { %8365 = vpow2.f32 %v6853_v41  ;;  %v5329_v43 = vadd.f32 %v7051_v46, %v6844_v8  ;;  %v5323_v5 = vpop.f32.mrb[5].mxu0 }
 0x982   :  { %8367 = vpow2.f32 %v6852_v6  ;;  %v5324_v25 = vadd.f32 %v6844_v8, %v5323_v5 }
 0x983   :  { %v6855_v29 = vmul.f32 -1.442695, %v5329_v43 }
 0x984   :  { %v6854_v50 = vmul.f32 -1.442695, %v5324_v25  ;;  %v7054_v44 = vpop.f32.mrb[6].mxu0 }
 0x985   :  { %8369 = vpow2.f32 %v6855_v29  ;;  %v5339_v48 = vadd.f32 %v7054_v44, %v6844_v8  ;;  %v5333_v19 = vpop.f32.mrb[7].mxu0 }
 0x986   :  { %8371 = vpow2.f32 %v6854_v50  ;;  %v5334_v61 = vadd.f32 %v6844_v8, %v5333_v19 }
 0x987   :  { %v6857_v37 = vmul.f32 -1.442695, %v5339_v48 }
 0x988   :  { %v6856_v21 = vmul.f32 -1.442695, %v5334_v61 }
 0x989   :  { %8373 = vpow2.f32 %v6857_v37 }
 0x98a   :  { %8375 = vpow2.f32 %v6856_v21 }
 0x98b   :  { %v8366_v4 = vpop.eup %8365 }
 0x98c   :  { %v8368_v27 = vpop.eup %8367  ;;  %v5361_v30 = vadd.f32 1.0, %v8366_v4 }
 0x98d   :  { %v5360_v22 = vadd.f32 1.0, %v8368_v27  ;;  %v5745_v27 = vld [vmem:[%s14120_s26 + $0x8] sm:$0xff] }
 0x98f   :  { %v8370_v12 = vpop.eup %8369  ;;  %8377 = vrcp.f32 %v5360_v22  ;;  %v5744_v22 = vld [vmem:[%s14120_s26] sm:$0xff] }
 0x990   :  { %v8372_v33 = vpop.eup %8371  ;;  %8379 = vrcp.f32 %v5361_v30  ;;  %v5363_v49 = vadd.f32 1.0, %v8370_v12  ;;  %v5748_v30 = vld [vmem:[%s14120_s26 + $0x20] sm:$0xff] }
 0x991   :  { %v5362_v34 = vadd.f32 1.0, %v8372_v33  ;;  %v7144_v12 = vpack.c.bf16 %v5748_v30, %v5745_v27  ;;  %v5747_v33 = vld [vmem:[%s14120_s26 + $0x18] sm:$0xff] }
 0x992   :  { %v5767_v27 = vld [vmem:[%s14120_s26 + $0xb8] sm:$0xff] }
 0x993   :  { %v8374_v55 = vpop.eup %8373  ;;  %8381 = vrcp.f32 %v5362_v34  ;;  %v5754_v34 = vld [vmem:[%s14120_s26 + $0x50] sm:$0xff]  ;;  %7145 = vmatprep.subr.bf16.mxu1 %v7144_v12  ;;  %v5787_v30 = vld [vmem:[%s14120_s26 + $0x158] sm:$0xff] }
 0x994   :  { %v8376_v3 = vpop.eup %8375  ;;  %8383 = vrcp.f32 %v5363_v49  ;;  %v5365_v20 = vadd.f32 1.0, %v8374_v55  ;;  %v5751_v49 = vld [vmem:[%s14120_s26 + $0x38] sm:$0xff]  ;;  %v7146_v55 = vpack.c.bf16 %v5747_v33, %v5744_v22  ;;  %v5790_v22 = vld [vmem:[%s14120_s26 + $0x170] sm:$0xff]  ;;  %v5821_v33 = vld [vmem:[%s14120_s26 + $0x268] sm:$0xff] }
 0x995   :  { %v5364_v58 = vadd.f32 1.0, %v8376_v3  ;;  %v7148_v3 = vpack.c.bf16 %v5754_v34, %v5751_v49  ;;  %v5818_v12 = vld [vmem:[%s14120_s26 + $0x250] sm:$0xff] }
 0x996   :  { %8385 = vrcp.f32 %v5365_v20  ;;  %v5750_v20 = vld [vmem:[%s14120_s26 + $0x30] sm:$0xff] }
 0x997   :  { %8387 = vrcp.f32 %v5364_v58  ;;  %v5753_v58 = vld [vmem:[%s14120_s26 + $0x48] sm:$0xff]  ;;  %v5786_v34 = vld [vmem:[%s14120_s26 + $0x150] sm:$0xff] }
 0x999   :  { %v8378_v53 = vpop.eup %8377 }
 0x99a   :  { %v8380_v1 = vpop.eup %8379  ;;  %7061 = vmatprep.mubr.msk.f32.mxu1 %vm5224_vm4, %v8378_v53  ;;  %v5757_v53 = vld [vmem:[%s14120_s26 + $0x68] sm:$0xff] }
 0x99b   :  { %7062 = vmatmul.mubr.msk.f32.vlgmr.msra.gmra.mrb[2].mxu1 %vm5224_vm4, %v8380_v1  ;;  %v5760_v1 = vld [vmem:[%s14120_s26 + $0x80] sm:$0xff] }
 0x99c   :  { %7147 = vmatpush1.bf16.msra.mxu1 %v7146_v55  ;;  %v5789_v55 = vld [vmem:[%s14120_s26 + $0x168] sm:$0xff] }
 0x99d   :  { %v8382_v63 = vpop.eup %8381  ;;  %7149 = vmatprep.subr.bf16.mxu1 %v7148_v3  ;;  %v7174_v31 = vpack.c.bf16 %v5789_v55, %v5786_v34 }
 0x99e   :  { %v8384_v60 = vpop.eup %8383  ;;  %7064 = vmatprep.mubr.msk.f32.mxu1 %vm5224_vm4, %v8382_v63  ;;  %v7150_v63 = vpack.c.bf16 %v5753_v58, %v5750_v20  ;;  %v7172_v20 = vpack.c.bf16 %v5790_v22, %v5787_v30  ;;  %v5793_v58 = vld [vmem:[%s14120_s26 + $0x188] sm:$0xff]  ;;  %v5831_v30 = vld [vmem:[%s14120_s26 + $0x2b8] sm:$0xff] }
 0x99f   :  { %7065 = vmatmul.mubr.msk.f32.gmra.mrb[4].mxu1 %vm5224_vm4, %v8384_v60  ;;  %v7152_v60 = vpack.c.bf16 %v5760_v1, %v5757_v53  ;;  %v7228_v53 = vpack.c.bf16 %v5821_v33, %v5818_v12  ;;  %v5770_v1 = vld [vmem:[%s14120_s26 + $0xd0] sm:$0xff]  ;;  %v6872_v12 = vld [vmem:[%s14121_s28] ss:$0 sm:$0xff] }
 0x9a0   :  { %v8386_v45 = vpop.eup %8385  ;;  %7151 = vmatpush1.bf16.msra.mxu1 %v7150_v63  ;;  %v5773_v63 = vld [vmem:[%s14120_s26 + $0xe8] sm:$0xff] }
 0x9a1   :  { %v8388_v39 = vpop.eup %8387  ;;  %7153 = vmatprep.subr.bf16.mxu1 %v7152_v60  ;;  %v5796_v60 = vld [vmem:[%s14120_s26 + $0x1a0] sm:$0xff] }
 0x9a2   :  { %7067 = vmatprep.mubr.msk.f32.mxu1 %vm5224_vm4, %v8388_v39  ;;  %v5759_v39 = vld [vmem:[%s14120_s26 + $0x78] sm:$0xff]  ;;  %v7176_v23 = vpack.c.bf16 %v5796_v60, %v5793_v58 }
 0x9a3   :  { %7068 = vmatmul.mubr.msk.f32.gmra.mrb[6].mxu1 %vm5224_vm4, %v8386_v45  ;;  %v5756_v45 = vld [vmem:[%s14120_s26 + $0x60] sm:$0xff] }
 0x9a4   :  { %v7154_v32 = vpack.c.bf16 %v5759_v39, %v5756_v45  ;;  %v5824_v45 = vld [vmem:[%s14120_s26 + $0x280] sm:$0xff]  ;;  %v5827_v39 = vld [vmem:[%s14120_s26 + $0x298] sm:$0xff] }
 0x9a6   :  { %7155 = vmatpush1.bf16.msra.mxu1 %v7154_v32  ;;  %v5795_v32 = vld [vmem:[%s14120_s26 + $0x198] sm:$0xff] }
 0x9a7   :  { %7157 = vmatprep.subr.bf16.mxu1 %v7156_v28  ;;  %v7230_v28 = vpack.c.bf16 %v5773_v63, %v5770_v1 }
 0x9aa   :  { %7159 = vmatpush1.bf16.msra.mxu1 %v7158_v47  ;;  %v5779_v47 = vld [vmem:[%s14120_s26 + $0x118] sm:$0xff] }
 0xa6e   :  { %v7063_v56 = vpop.f32.mrb[2].mxu1 }
 0xa6f   :  { %v5481_v16 = vadd.f32 %v7063_v56, %v6858_v13  ;;  %v5475_v26 = vpop.f32.mrb[3].mxu1  ;;  %v5797_v56 = vld [vmem:[%s14120_s26 + $0x1a8] sm:$0xff] }
 0xa70   :  { %v5476_v14 = vadd.f32 %v6858_v13, %v5475_v26  ;;  %v7160_v26 = vpack.c.bf16 %v5772_v51, %v5769_v11  ;;  %v7232_v11 = vpack.c.bf16 %v5827_v39, %v5824_v45  ;;  %v5776_v51 = vld [vmem:[%s14120_s26 + $0x100] sm:$0xff] }
 0xa71   :  { %v6867_v9 = vmul.f32 -1.442695, %v5481_v16  ;;  %v5746_v16 = vld [vmem:[%s14120_s26 + $0x10] sm:$0xff] }
 0xa72   :  { %v6866_v52 = vmul.f32 -1.442695, %v5476_v14  ;;  %v7066_v15 = vpop.f32.mrb[4].mxu1  ;;  %v5768_v14 = vld [vmem:[%s14120_s26 + $0xc0] sm:$0xff]  ;;  %7161 = vmatprep.subr.bf16.mxu1 %v7160_v26  ;;  %v7178_v26 = vpack.c.bf16 %v5795_v32, %v5792_v62 }
 0xa73   :  { %8389 = vpow2.f32 %v6867_v9  ;;  %v5491_v7 = vadd.f32 %v7066_v15, %v6858_v13  ;;  %v5485_v38 = vpop.f32.mrb[5].mxu1  ;;  %v5771_v9 = vld [vmem:[%s14120_s26 + $0xd8] sm:$0xff]  ;;  %v5749_v15 = vld [vmem:[%s14120_s26 + $0x28] sm:$0xff] }
 0xa74   :  { %8391 = vpow2.f32 %v6866_v52  ;;  %v5486_v10 = vadd.f32 %v6858_v13, %v5485_v38  ;;  %v5778_v38 = vld [vmem:[%s14120_s26 + $0x110] sm:$0xff] }
 0xa75   :  { %v6869_v35 = vmul.f32 -1.442695, %v5491_v7  ;;  %v5775_v7 = vld [vmem:[%s14120_s26 + $0xf8] sm:$0xff] }
 0xa76   :  { %v6868_v59 = vmul.f32 -1.442695, %v5486_v10  ;;  %v7069_v54 = vpop.f32.mrb[6].mxu1  ;;  %v7214_v10 = vpack.c.bf16 %v5749_v15, %v5746_v16  ;;  %v5833_v16 = vld [vmem:[%s14120_s26 + $0x2c8] sm:$0xff] }
 0xa77   :  { %8393 = vpow2.f32 %v6869_v35  ;;  %v5501_v42 = vadd.f32 %v7069_v54, %v6858_v13  ;;  %v5495_v18 = vpop.f32.mrb[7].mxu1  ;;  %v5800_v35 = vld [vmem:[%s14120_s26 + $0x1c0] sm:$0xff]  ;;  %v5801_v15 = vld [vmem:[%s14120_s26 + $0x1c8] sm:$0xff] }
 0xa78   :  { %8395 = vpow2.f32 %v6868_v59  ;;  %v5496_v17 = vadd.f32 %v6858_v13, %v5495_v18  ;;  %v5794_v13 = vld [vmem:[%s14120_s26 + $0x190] sm:$0xff]  ;;  %v5803_v59 = vld [vmem:[%s14120_s26 + $0x1d8] sm:$0xff]  ;;  %v5752_v54 = vld [vmem:[%s14120_s26 + $0x40] sm:$0xff]  ;;  %v7162_v18 = vpack.c.bf16 %v5771_v9, %v5768_v14  ;;  %v7234_v14 = vpack.c.bf16 %v5779_v47, %v5776_v51 }
 0xa79   :  { %v6871_v8 = vmul.f32 -1.442695, %v5501_v42  ;;  %v7212_v52 = vpack.c.bf16 %v5797_v56, %v5794_v13  ;;  %v5755_v42 = vld [vmem:[%s14120_s26 + $0x58] sm:$0xff]  ;;  %v5802_v13 = vld [vmem:[%s14120_s26 + $0x1d0] sm:$0xff] }
 0xa7a   :  { %v6870_v40 = vmul.f32 -1.442695, %v5496_v17  ;;  %v5774_v17 = vld [vmem:[%s14120_s26 + $0xf0] sm:$0xff]  ;;  %7163 = vmatpush1.bf16.msra.mxu1 %v7162_v18  ;;  %v7180_v9 = vpack.c.bf16 %v5802_v13, %v5799_v57  ;;  %v5811_v18 = vld [vmem:[%s14120_s26 + $0x218] sm:$0xff] }
 0xa7b   :  { %8397 = vpow2.f32 %v6871_v8  ;;  %7213 = vmatprep.subr.bf16.mxu0 %v7212_v52  ;;  %v5777_v8 = vld [vmem:[%s14120_s26 + $0x108] sm:$0xff]  ;;  %v5830_v56 = vld [vmem:[%s14120_s26 + $0x2b0] sm:$0xff] }
 0xa7c   :  { %8399 = vpow2.f32 %v6870_v40  ;;  %v7216_v40 = vpack.c.bf16 %v5803_v59, %v5800_v35  ;;  %v5798_v52 = vld [vmem:[%s14120_s26 + $0x1b0] sm:$0xff] }
 0xa7d   :  { %v8390_v36 = vpop.eup %8389  ;;  %v7182_v35 = vpack.c.bf16 %v5801_v15, %v5798_v52  ;;  %v5782_v13 = vld [vmem:[%s14120_s26 + $0x130] sm:$0xff]  ;;  %v5835_v15 = vld [vmem:[%s14120_s26 + $0x2d8] sm:$0xff] }
 0xa7e   :  { %v8392_v2 = vpop.eup %8391  ;;  %v5523_v24 = vadd.f32 1.0, %v8390_v36  ;;  %v7218_v36 = vpack.c.bf16 %v5755_v42, %v5752_v54  ;;  %v5804_v54 = vld [vmem:[%s14120_s26 + $0x1e0] sm:$0xff]  ;;  %v5807_v42 = vld [vmem:[%s14120_s26 + $0x1f8] sm:$0xff] }
 0xa7f   :  { %v5522_v41 = vadd.f32 1.0, %v8392_v2  ;;  %v7164_v2 = vpack.c.bf16 %v5778_v38, %v5775_v7  ;;  %v7236_v7 = vpack.c.bf16 %v5833_v16, %v5830_v56  ;;  %v5805_v38 = vld [vmem:[%s14120_s26 + $0x1e8] sm:$0xff] }
 0xa80   :  { %v5785_v56 = vld [vmem:[%s14120_s26 + $0x148] sm:$0xff] }
 0xa81   :  { %v8394_v6 = vpop.eup %8393  ;;  %8401 = vrcp.f32 %v5522_v41  ;;  %v5806_v41 = vld [vmem:[%s14120_s26 + $0x1f0] sm:$0xff]  ;;  %7165 = vmatprep.subr.bf16.mxu1 %v7164_v2  ;;  %v5813_v2 = vld [vmem:[%s14120_s26 + $0x228] sm:$0xff] }
 0xa82   :  { %v8396_v46 = vpop.eup %8395  ;;  %8403 = vrcp.f32 %v5523_v24  ;;  %v5525_v43 = vadd.f32 1.0, %v8394_v6  ;;  %v5781_v24 = vld [vmem:[%s14120_s26 + $0x128] sm:$0xff] }
 0xa83   :  { %v5524_v5 = vadd.f32 1.0, %v8396_v46  ;;  %v5809_v6 = vld [vmem:[%s14120_s26 + $0x208] sm:$0xff]  ;;  %v5784_v46 = vld [vmem:[%s14120_s26 + $0x140] sm:$0xff] }
 0xa85   :  { %v8398_v25 = vpop.eup %8397  ;;  %8405 = vrcp.f32 %v5524_v5  ;;  %v5758_v5 = vld [vmem:[%s14120_s26 + $0x70] sm:$0xff] }
 0xa86   :  { %v8400_v29 = vpop.eup %8399  ;;  %8407 = vrcp.f32 %v5525_v43  ;;  %v5527_v50 = vadd.f32 1.0, %v8398_v25  ;;  %v7220_v43 = vpack.c.bf16 %v5809_v6, %v5806_v41  ;;  %v5761_v25 = vld [vmem:[%s14120_s26 + $0x88] sm:$0xff]  ;;  %v5820_v41 = vld [vmem:[%s14120_s26 + $0x260] sm:$0xff] }
 0xa87   :  { %v5526_v44 = vadd.f32 1.0, %v8400_v29  ;;  %v7166_v29 = vpack.c.bf16 %v5777_v8, %v5774_v17  ;;  %v5814_v17 = vld [vmem:[%s14120_s26 + $0x230] sm:$0xff]  ;;  %v7186_v8 = vpack.c.bf16 %v5807_v42, %v5804_v54  ;;  %v5839_v54 = vld [vmem:[%s14120_s26 + $0x2f8] sm:$0xff] }
 0xa89   :  { %8409 = vrcp.f32 %v5526_v44  ;;  %v7222_v44 = vpack.c.bf16 %v5761_v25, %v5758_v5  ;;  %7167 = vmatpush1.bf16.msra.mxu1 %v7166_v29  ;;  %v5819_v5 = vld [vmem:[%s14120_s26 + $0x258] sm:$0xff]  ;;  %v5826_v29 = vld [vmem:[%s14120_s26 + $0x290] sm:$0xff] }
 0xa8a   :  { %8411 = vrcp.f32 %v5527_v50  ;;  %v5780_v50 = vld [vmem:[%s14120_s26 + $0x120] sm:$0xff]  ;;  %v5823_v25 = vld [vmem:[%s14120_s26 + $0x278] sm:$0xff] }
 0xa8b   :  { %v8402_v48 = vpop.eup %8401 }
 0xa8c   :  { %v8404_v19 = vpop.eup %8403  ;;  %7082 = vmatprep.mubr.msk.f32.mxu0 %vm5553_vm11, %v8402_v48  ;;  %v5812_v48 = vld [vmem:[%s14120_s26 + $0x220] sm:$0xff] }
 0xa8d   :  { %7083 = vmatmul.mubr.msk.f32.vlgmr.msra.gmra.mrb[8].mxu0 %vm5553_vm11, %v8404_v19  ;;  %v5815_v19 = vld [vmem:[%s14120_s26 + $0x238] sm:$0xff] }
 0xa8e   :  { %7215 = vmatpush3.bf16.msra.mxu0 %v7214_v10  ;;  %v5808_v10 = vld [vmem:[%s14120_s26 + $0x200] sm:$0xff] }
 0xa8f   :  { %v8406_v61 = vpop.eup %8405  ;;  %7217 = vmatprep.subr.bf16.mxu0 %v7216_v40  ;;  %v7184_v59 = vpack.c.bf16 %v5808_v10, %v5805_v38  ;;  %v7188_v40 = vpack.c.bf16 %v5814_v17, %v5811_v18  ;;  %v5836_v38 = vld [vmem:[%s14120_s26 + $0x2e0] sm:$0xff] }
 0xa90   :  { %v8408_v37 = vpop.eup %8407  ;;  %7085 = vmatprep.mubr.msk.f32.mxu0 %vm5553_vm11, %v8406_v61  ;;  %v7168_v61 = vpack.c.bf16 %v5784_v46, %v5781_v24  ;;  %v5817_v24 = vld [vmem:[%s14120_s26 + $0x248] sm:$0xff]  ;;  %v7240_v17 = vpack.c.bf16 %v5839_v54, %v5836_v38  ;;  %v6219_v38 = vld [vmem:[%s14124_s10 + $0x58] sm:$0xff]  ;;  %v6218_v54 = vld [vmem:[%s14124_s10 + $0x50] sm:$0xff] }
 0xa91   :  { %7086 = vmatmul.mubr.msk.f32.gmra.mrb[10].mxu0 %vm5553_vm11, %v8408_v37  ;;  %v5783_v37 = vld [vmem:[%s14120_s26 + $0x138] sm:$0xff]  ;;  %v7192_v46 = vpack.c.bf16 %v5820_v41, %v5817_v24  ;;  %v5841_v24 = vld [vmem:[%s14120_s26 + $0x308] sm:$0xff]  ;;  %v5844_v41 = vld [vmem:[%s14120_s26 + $0x320] sm:$0xff] }
 0xa92   :  { %7219 = vmatpush3.bf16.msra.mxu0 %v7218_v36  ;;  %v7170_v49 = vpack.c.bf16 %v5783_v37, %v5780_v50  ;;  %7169 = vmatprep.subr.bf16.mxu1 %v7168_v61  ;;  %v5810_v36 = vld [vmem:[%s14120_s26 + $0x210] sm:$0xff]  ;;  %v5829_v61 = vld [vmem:[%s14120_s26 + $0x2a8] sm:$0xff]  ;;  %v5832_v37 = vld [vmem:[%s14120_s26 + $0x2c0] sm:$0xff] }
 0xa93   :  { %v8410_v21 = vpop.eup %8409  ;;  %7221 = vmatprep.subr.bf16.mxu0 %v7220_v43  ;;  %v7190_v6 = vpack.c.bf16 %v5813_v2, %v5810_v36  ;;  %v5816_v43 = vld [vmem:[%s14120_s26 + $0x240] sm:$0xff] }
 0xa94   :  { %v8412_v4 = vpop.eup %8411  ;;  %7088 = vmatprep.mubr.msk.f32.mxu0 %vm5553_vm11, %v8410_v21  ;;  %v7224_v21 = vpack.c.bf16 %v5815_v19, %v5812_v48  ;;  %7171 = vmatpush1.bf16.msra.mxu1 %v7170_v49  ;;  %v7194_v50 = vpack.c.bf16 %v5819_v5, %v5816_v43  ;;  %v5822_v48 = vld [vmem:[%s14120_s26 + $0x270] sm:$0xff]  ;;  %v5825_v19 = vld [vmem:[%s14120_s26 + $0x288] sm:$0xff] }
 0xa95   :  { %7089 = vmatmul.mubr.msk.f32.gmra.mrb[12].mxu0 %vm5553_vm11, %v8412_v4  ;;  %v5764_v4 = vld [vmem:[%s14120_s26 + $0xa0] sm:$0xff]  ;;  %7173 = vmatprep.subr.bf16.mxu1 %v7172_v20 }
 0xa96   :  { %7223 = vmatpush3.bf16.msra.mxu0 %v7222_v44  ;;  %v7226_v3 = vpack.c.bf16 %v5767_v27, %v5764_v4  ;;  %v7196_v44 = vpack.c.bf16 %v5826_v29, %v5823_v25  ;;  %v7200_v4 = vpack.c.bf16 %v5832_v37, %v5829_v61  ;;  %v5828_v27 = vld [vmem:[%s14120_s26 + $0x2a0] sm:$0xff]  ;;  %v5842_v25 = vld [vmem:[%s14120_s26 + $0x310] sm:$0xff]  ;;  %v5845_v29 = vld [vmem:[%s14120_s26 + $0x328] sm:$0xff] }
 0xa97   :  { %7225 = vmatprep.subr.bf16.mxu0 %v7224_v21  ;;  %v7198_v21 = vpack.c.bf16 %v5825_v19, %v5822_v48  ;;  %v7202_v22 = vpack.c.bf16 %v5831_v30, %v5828_v27 }
 0xa98   :  { %7175 = vmatpush1.bf16.msra.mxu1 %v7174_v31 }
 0xa99   :  { %7177 = vmatprep.subr.bf16.mxu1 %v7176_v23 }
 0xa9a   :  { %7227 = vmatpush3.bf16.msra.mxu0 %v7226_v3 }
 0xa9b   :  { %7229 = vmatprep.subr.bf16.mxu0 %v7228_v53 }
 0xa9c   :  { %7179 = vmatpush1.bf16.msra.mxu1 %v7178_v26 }
 0xa9d   :  { %7181 = vmatprep.subr.bf16.mxu1 %v7180_v9 }
 0xa9e   :  { %7231 = vmatpush3.bf16.msra.mxu0 %v7230_v28 }
 0xa9f   :  { %7233 = vmatprep.subr.bf16.mxu0 %v7232_v11 }
 0xaa0   :  { %7183 = vmatpush1.bf16.msra.mxu1 %v7182_v35  ;;  %v5834_v35 = vld [vmem:[%s14120_s26 + $0x2d0] sm:$0xff] }
 0xaa1   :  { %7185 = vmatprep.subr.bf16.mxu1 %v7184_v59  ;;  %v5837_v59 = vld [vmem:[%s14120_s26 + $0x2e8] sm:$0xff] }
 0xaa2   :  { %7235 = vmatpush3.bf16.msra.mxu0 %v7234_v14  ;;  %v7238_v14 = vpack.c.bf16 %v5785_v56, %v5782_v13  ;;  %v7206_v18 = vpack.c.bf16 %v5837_v59, %v5834_v35  ;;  %v6213_v13 = vld [vmem:[%s14124_s10 + $0x28] sm:$0xff]  ;;  %v6215_v56 = vld [vmem:[%s14124_s10 + $0x38] sm:$0xff]  ;;  %v6216_v59 = vld [vmem:[%s14124_s10 + $0x40] sm:$0xff] }
 0xaa3   :  { %7237 = vmatprep.subr.bf16.mxu0 %v7236_v7  ;;  %v5838_v7 = vld [vmem:[%s14120_s26 + $0x2f0] sm:$0xff] }
 0xaa4   :  { %7187 = vmatpush1.bf16.msra.mxu1 %v7186_v8  ;;  %v7204_v10 = vpack.c.bf16 %v5838_v7, %v5835_v15  ;;  %v5788_v8 = vld [vmem:[%s14120_s26 + $0x160] sm:$0xff]  ;;  %v6214_v15 = vld [vmem:[%s14124_s10 + $0x30] sm:$0xff]  ;;  %v6217_v7 = vld [vmem:[%s14124_s10 + $0x48] sm:$0xff] }
 0xaa5   :  { %7189 = vmatprep.subr.bf16.mxu1 %v7188_v40  ;;  %v5791_v40 = vld [vmem:[%s14120_s26 + $0x178] sm:$0xff]  ;;  %v7256_v35 = vpack.c.bf16 %v6219_v38, %v6217_v7  ;;  %v6257_v7 = vld [vmem:[%s14124_s10 + $0x188] sm:$0xff] }
 0xaa6   :  { %7239 = vmatpush3.bf16.msra.mxu0 %v7238_v14  ;;  %v7242_v36 = vpack.c.bf16 %v5791_v40, %v5788_v8  ;;  %v6220_v40 = vld [vmem:[%s14124_s10 + $0x60] sm:$0xff]  ;;  %v6259_v38 = vld [vmem:[%s14124_s10 + $0x198] sm:$0xff] }
 0xaa7   :  { %7241 = vmatprep.subr.bf16.mxu0 %v7240_v17  ;;  %v7258_v17 = vpack.c.bf16 %v6218_v54, %v6216_v59  ;;  %v6258_v59 = vld [vmem:[%s14124_s10 + $0x190] sm:$0xff] }
 0xaa8   :  { %7191 = vmatpush1.bf16.msra.mxu1 %v7190_v6 }
 0xaa9   :  { %7193 = vmatprep.subr.bf16.mxu1 %v7192_v46  ;;  %v7208_v46 = vpack.c.bf16 %v5844_v41, %v5841_v24  ;;  %v6227_v24 = vld [vmem:[%s14124_s10 + $0x98] sm:$0xff] }
 0xaaa   :  { %7243 = vmatpush3.bf16.msra.mxu0 %v7242_v36  ;;  %v6222_v36 = vld [vmem:[%s14124_s10 + $0x70] sm:$0xff] }
 0xaab   :  { %v7262_v41 = vpack.c.bf16 %v6222_v36, %v6220_v40  ;;  %v6262_v40 = vld [vmem:[%s14124_s10 + $0x1b0] sm:$0xff] }
 0xaac   :  { %7195 = vmatpush1.bf16.msra.mxu1 %v7194_v50  ;;  %v7244_v50 = vpack.c.bf16 %v5845_v29, %v5842_v25  ;;  %v6231_v25 = vld [vmem:[%s14124_s10 + $0xb8] sm:$0xff] }
 0xaad   :  { %7197 = vmatprep.subr.bf16.mxu1 %v7196_v44 }
 0xaae   :  { %7245 = vmatprep.subr.bf16.mxu0 %v7244_v50 }
 0xab0   :  { %7199 = vmatpush1.bf16.msra.mxu1 %v7198_v21 }
 0xab1   :  { %7201 = vmatprep.subr.bf16.mxu1 %v7200_v4 }
 0xab4   :  { %7203 = vmatpush1.bf16.msra.mxu1 %v7202_v22 }
 0xab5   :  { %7205 = vmatprep.subr.bf16.mxu1 %v7204_v10 }
 0xab8   :  { %7207 = vmatpush1.bf16.msra.mxu1 %v7206_v18  ;;  %v6223_v18 = vld [vmem:[%s14124_s10 + $0x78] sm:$0xff] }
 0xab9   :  { %7209 = vmatprep.subr.bf16.mxu1 %v7208_v46  ;;  %v6224_v46 = vld [vmem:[%s14124_s10 + $0x80] sm:$0xff] }
 0xb60   :  { %v7084_v33 = vpop.f32.mrb[8].mxu0 }
 0xb61   :  { %v5648_v49 = vadd.f32 %v7084_v33, %v6872_v12  ;;  %v5642_v34 = vpop.f32.mrb[9].mxu0 }
 0xb62   :  { %v12415_v55 = vadd.f32 %v6872_v12, %v5642_v34  ;;  %v5840_v34 = vld [vmem:[%s14120_s26 + $0x300] sm:$0xff] }
 0xb63   :  { %v6881_v3 = vmul.f32 -1.442695, %v5648_v49 }
 0xb64   :  { %v7087_v20 = vpop.f32.mrb[10].mxu0  ;;  %v6880_v30 = vmul.f32 -1.442695, %v12415_v55 }
 0xb65   :  { %8413 = vpow2.f32 %v6881_v3  ;;  %v5652_v58 = vpop.f32.mrb[11].mxu0  ;;  %v5658_v1 = vadd.f32 %v7087_v20, %v6872_v12  ;;  %v5843_v3 = vld [vmem:[%s14120_s26 + $0x318] sm:$0xff] }
 0xb66   :  { %v5653_v53 = vadd.f32 %v6872_v12, %v5652_v58 }
 0xb67   :  { %v6883_v62 = vmul.f32 -1.442695, %v5658_v1  ;;  %v6211_v1 = vld [vmem:[%s14124_s10 + $0x18] sm:$0xff] }
 0xb68   :  { %v6882_v63 = vmul.f32 -1.442695, %v5653_v53  ;;  %v7090_v60 = vpop.f32.mrb[12].mxu0  ;;  %v6209_v53 = vld [vmem:[%s14124_s10 + $0x8] sm:$0xff] }
 0xb69   :  { %v5668_v45 = vadd.f32 %v7090_v60, %v6872_v12  ;;  %v5662_v39 = vpop.f32.mrb[13].mxu0 }
 0xb6a   :  { %8415 = vpow2.f32 %v6882_v63  ;;  %v5663_v31 = vadd.f32 %v6872_v12, %v5662_v39 }
 0xb6b   :  { %v6885_v32 = vmul.f32 -1.442695, %v5668_v45  ;;  %v7210_v45 = vpack.c.bf16 %v5843_v3, %v5840_v34  ;;  %v6238_v34 = vld [vmem:[%s14124_s10 + $0xf0] sm:$0xff] }
 0xb6c   :  { %v6884_v28 = vmul.f32 -1.442695, %v5663_v31 }
 0xb6d   :  { %8417 = vpow2.f32 %v6885_v32 }
 0xb6e   :  { %8419 = vpow2.f32 %v6884_v28  ;;  %v7248_v28 = vpack.c.bf16 %v6211_v1, %v6209_v53  ;;  %v6240_v1 = vld [vmem:[%s14124_s10 + $0x100] sm:$0xff] }
 0xb6f   :  { %v8414_v23 = vpop.eup %8413  ;;  %8421 = vpow2.f32 %v6883_v62 }
 0xb70   :  { %v5690_v57 = vadd.f32 1.0, %v8414_v23 }
 0xb72   :  { %8423 = vrcp.f32 %v5690_v57 }
 0xb74   :  { %v8416_v11 = vpop.eup %8415 }
 0xb75   :  { %v5691_v51 = vadd.f32 1.0, %v8416_v11  ;;  %v6208_v11 = vld [vmem:[%s14124_s10] sm:$0xff] }
 0xb77   :  { %v8418_v47 = vpop.eup %8417  ;;  %8425 = vrcp.f32 %v5691_v51  ;;  %v6210_v51 = vld [vmem:[%s14124_s10 + $0x10] sm:$0xff] }
 0xb78   :  { %v8420_v16 = vpop.eup %8419  ;;  %v5694_v26 = vadd.f32 1.0, %v8418_v47  ;;  %v7250_v14 = vpack.c.bf16 %v6210_v51, %v6208_v11  ;;  %v6248_v11 = vld [vmem:[%s14124_s10 + $0x140] sm:$0xff]  ;;  %v6250_v51 = vld [vmem:[%s14124_s10 + $0x150] sm:$0xff] }
 0xb79   :  { %v8422_v9 = vpop.eup %8421  ;;  %v5693_v52 = vadd.f32 1.0, %v8420_v16  ;;  %v14127_v16 = vmov 0.0|0.0  }
 0xb7a   :  { %8427 = vrcp.f32 %v5694_v26  ;;  %v5692_v42 = vadd.f32 1.0, %v8422_v9  ;;  %v14128_v26 = vmov 0.0   ;;  %v7252_v9 = vpack.c.bf16 %v6215_v56, %v6213_v13  ;;  %v6253_v13 = vld [vmem:[%s14124_s10 + $0x168] sm:$0xff]  ;;  %v6255_v56 = vld [vmem:[%s14124_s10 + $0x178] sm:$0xff] }
 0xb7b   :  { %8429 = vrcp.f32 %v5693_v52  ;;  %v6212_v52 = vld [vmem:[%s14124_s10 + $0x20] sm:$0xff] }
 0xb7c   :  { %v12427_v2 = vpop.eup %8423  ;;  %8431 = vrcp.f32 %v5692_v42  ;;  %v7254_v10 = vpack.c.bf16 %v6214_v15, %v6212_v52  ;;  %v6221_v42 = vld [vmem:[%s14124_s10 + $0x68] sm:$0xff]  ;;  %v6254_v52 = vld [vmem:[%s14124_s10 + $0x170] sm:$0xff] }
 0xb7d   :  { %v5709_v43 = vrot.slane %v12427_v2, 4  ;;  %8433 = vpow2.f32 %v6880_v30  ;;  %v7260_v8 = vpack.c.bf16 %v6223_v18, %v6221_v42  ;;  %v6261_v42 = vld [vmem:[%s14124_s10 + $0x1a8] sm:$0xff]  ;;  %v6263_v18 = vld [vmem:[%s14124_s10 + $0x1b8] sm:$0xff] }
 0xb81   :  { %v8426_v6 = vpop.eup %8425 }
 0xb82   :  { %v5710_v5 = vrot.slane %v8426_v6, 4 }
 0xb84   :  { %v8428_v44 = vpop.eup %8427  ;;  %v5711_v48 = vsel %vm14122_vm10, %v5709_v43, %v5710_v5  ;;  %v6226_v43 = vld [vmem:[%s14124_s10 + $0x90] sm:$0xff] }
 0xb85   :  { %v8430_v19 = vpop.eup %8429  ;;  %v8360_v61 = vpack.i.bf16 %v5710_v5, %v5711_v48  ;;  %v5728_v37 = vrot.slane %v8428_v44, 4  ;;  %v6229_v5 = vld [vmem:[%s14124_s10 + $0xa8] sm:$0xff]  ;;  %v7266_v29 = vpack.c.bf16 %v6226_v43, %v6224_v46  ;;  %v6228_v44 = vld [vmem:[%s14124_s10 + $0xa0] sm:$0xff]  ;;  %v6230_v48 = vld [vmem:[%s14124_s10 + $0xb0] sm:$0xff] }
 0xb86   :  { %v5727_v21 = vrot.slane %v8430_v19, 4  ;;  %v8432_v27 = vpop.eup %8431  ;;  %v6266_v46 = vld [vmem:[%s14124_s10 + $0x1d0] sm:$0xff] }
 0xb87   :  { %8361 = vrot.lane.b32.xlu0 %v8360_v61, %s8558_s1  ;;  %v8434_v22 = vpop.eup %8433  ;;  %v6235_v61 = vld [vmem:[%s14124_s10 + $0xd8] sm:$0xff] }
 0xb88   :  { %v5729_v4 = vsel %vm14123_vm13, %v5727_v21, %v5728_v37  ;;  %v5689_v12 = vadd.f32 1.0, %v8434_v22  ;;  %v6237_v22 = vld [vmem:[%s14124_s10 + $0xe8] sm:$0xff] }
 0xb89   :  { %5730 = vrot.lane.b32.xlu1 %v5729_v4, %s8559_s2  ;;  %v6232_v4 = vld [vmem:[%s14124_s10 + $0xc0] sm:$0xff] }
 0xb8a   :  { %8435 = vrcp.f32 %v5689_v12  ;;  %v6239_v12 = vld [vmem:[%s14124_s10 + $0xf8] sm:$0xff] }
 0xb8b   :  { %5720 = vrot.lane.b32.xlu0 %v8432_v27, %s8560_s7  ;;  %v6234_v27 = vld [vmem:[%s14124_s10 + $0xd0] sm:$0xff] }
 0xb8c   :  { %v7274_v30 = vpack.c.bf16 %v6234_v27, %v6232_v4  ;;  %v6473_v4 = vld [vmem:[%s8731_s3 + $0x8] sm:$0xff]  ;;  %v6474_v27 = vld [vmem:[%s8731_s3 + $0x10] sm:$0xff] }
 0xb8d   :  { %5722 = vrot.lane.b32.xlu1 %v8430_v19, %s8560_s7  ;;  %v6233_v19 = vld [vmem:[%s14124_s10 + $0xc8] sm:$0xff] }
 0xb8e   :  { %v7272_v21 = vpack.c.bf16 %v6235_v61, %v6233_v19  ;;  %v6273_v19 = vld [vmem:[%s14124_s10 + $0x208] sm:$0xff]  ;;  %v6275_v61 = vld [vmem:[%s14124_s10 + $0x218] sm:$0xff] }
 0xb8f   :  { %5732 = vrot.lane.b32.xlu0 %v5728_v37, %s8559_s2  ;;  %v7270_v37 = vpack.c.bf16 %v6230_v48, %v6228_v44  ;;  %v6270_v44 = vld [vmem:[%s14124_s10 + $0x1f0] sm:$0xff] }
 0xb94   :  { %v8436_v39 = vpop.eup %8435 }
 0xbf9   :  { %v8362_v33 = vpop.permute.xlu0 %8361 }
 0xbfa   :  { %v8363_v20 = vunpack.i.l.bf16 %v8362_v33  ;;  %v8364_v63 = vunpack.i.h.bf16 %v8362_v33  ;;  %v7276_v33 = vpack.c.bf16 %v6239_v12, %v6237_v22  ;;  %v6475_v22 = vld [vmem:[%s8731_s3 + $0x18] sm:$0xff] }
 0xbfb   :  { %v5731_v49 = vpop.permute.xlu1 %5730  ;;  %v7320_v12 = vpack.c.bf16 %v6475_v22, %v6474_v27  ;;  %v6478_v27 = vld [vmem:[%s8731_s3 + $0x30] sm:$0xff] }
 0xbfc   :  { %v5736_v62 = vsel %vm14125_vm6, %v8436_v39, %v8363_v20  ;;  %v5737_v47 = vsel %vm14126_vm14, %v12427_v2, %v8364_v63  ;;  %v6225_v2 = vld [vmem:[%s14124_s10 + $0x88] sm:$0xff]  ;;  %v6247_v39 = vld [vmem:[%s14124_s10 + $0x138] sm:$0xff] }
 0xbfd   :  { %v5721_v58 = vpop.permute.xlu0 %5720  ;;  %v7264_v6 = vpack.c.bf16 %v6227_v24, %v6225_v2  ;;  %v6265_v2 = vld [vmem:[%s14124_s10 + $0x1c8] sm:$0xff]  ;;  %v6267_v24 = vld [vmem:[%s14124_s10 + $0x1d8] sm:$0xff] }
 0xbfe   :  { %v5739_v60 = vsel %vm5738_vm9, %v8363_v20, %v5721_v58  ;;  %v6241_v20 = vld [vmem:[%s14124_s10 + $0x108] sm:$0xff]  ;;  %v6243_v58 = vld [vmem:[%s14124_s10 + $0x118] sm:$0xff] }
 0xbff   :  { %v5723_v31 = vpop.permute.xlu1 %5722  ;;  %v5742_v55 = vsel %vm5741_vm5, %v5739_v60, %v5731_v49  ;;  %v7280_v53 = vpack.c.bf16 %v6243_v58, %v6241_v20  ;;  %v5846_v58 = vld [vmem:[%s14129_s11] sm:$0x7] }
 0xc00   :  { %v5740_v32 = vsel %vm5738_vm9, %v8364_v63, %v5723_v31  ;;  %5932 = vmatprep.mubr.f32.mxu1 %v5742_v55  ;;  %6086 = vmatprep.mubr.f32.mxu0 %v5742_v55  ;;  %v6242_v63 = vld [vmem:[%s14124_s10 + $0x110] sm:$0xff]  ;;  %v6244_v55 = vld [vmem:[%s14124_s10 + $0x120] sm:$0xff] }
 0xc01   :  { %v5733_v23 = vpop.permute.xlu0 %5732  ;;  %5933 = vmatmul.mubr.f32.vlgmr.msra.gmra.mrb[8].mxu1 %v5736_v62  ;;  %6087 = vmatmul.mubr.f32.vlgmr.msra.gmra.mrb[14].mxu0 %v5736_v62  ;;  %v7282_v60 = vpack.c.bf16 %v6242_v63, %v6240_v1  ;;  %v6246_v62 = vld [vmem:[%s14124_s10 + $0x130] sm:$0xff] }
 0xc02   :  { %7211 = vmatpush1.bf16.msra.mxu1 %v7210_v45  ;;  %v5743_v57 = vsel %vm5741_vm5, %v5740_v32, %v5733_v23  ;;  %7247 = vmatpush3.bf16.msra.mxu0 %v7244_v50  ;;  %v7268_v50 = vpack.c.bf16 %v6231_v25, %v6229_v5  ;;  %v6245_v45 = vld [vmem:[%s14124_s10 + $0x128] sm:$0xff]  ;;  %v7286_v32 = vpack.c.bf16 %v6246_v62, %v6244_v55  ;;  %v6271_v25 = vld [vmem:[%s14124_s10 + $0x1f8] sm:$0xff]  ;;  %v14130_v63 = vld [vmem:[#allocation194_spill] sm:$0xff] }
 0xc03   :  { %5938 = vmatprep.mubr.f32.mxu1 %v5743_v57  ;;  %6091 = vmatprep.mubr.f32.mxu0 %v5743_v57  ;;  %v7284_v31 = vpack.c.bf16 %v6247_v39, %v6245_v45  ;;  %v6269_v5 = vld [vmem:[%s14124_s10 + $0x1e8] sm:$0xff]  ;;  %v14131_v39 = vld [vmem:[#allocation192_spill] sm:$0xff] }
 0xc04   :  { %7249 = vmatprep.subr.bf16.mxu0 %v7248_v28  ;;  %7316 = vmatprep.subr.bf16.mxu1 %v14127_v16  ;;  %v6249_v28 = vld [vmem:[%s14124_s10 + $0x148] sm:$0xff] }
 0xc05   :  { %5939 = vmatmul.mubr.f32.gmra.mrb[10].mxu1 %v5737_v47  ;;  %6092 = vmatmul.mubr.f32.gmra.mrb[16].mxu0 %v5737_v47  ;;  %v7290_v47 = vpack.c.bf16 %v6250_v51, %v6248_v11  ;;  %v14132_v62 = vld [vmem:[#allocation193_spill] sm:$0xff] }
 0xc06   :  { %7095 = vmatprep.mubr.msk.f32.mxu0 %vm5863_vm12, %v5731_v49  ;;  %6009 = vmatprep.mubr.f32.mxu1 %v14128_v26 }
 0xc09   :  { %6886 = vmatmul.mubr.msk.f32.vlgmr.msra.gmra.mrb[8].mxu1 %vm5863_vm12, %v5731_v49  ;;  %7096 = vmatmul.mubr.msk.f32.vlgmr.msra.gmra.mrb[18].mxu0 %vm5863_vm12, %v5733_v23  ;;  %v6236_v49 = vld [vmem:[%s14124_s10 + $0xe0] sm:$0xff] }
 0xc0a   :  { %6015 = vmatprep.mubr.f32.mxu1 %v14128_v26  ;;  %7251 = vmatpush1.bf16.msra.mxu0 %v7250_v14  ;;  %v7278_v3 = vpack.c.bf16 %v6238_v34, %v6236_v49  ;;  %v7292_v14 = vpack.c.bf16 %v6255_v56, %v6253_v13  ;;  %v6477_v49 = vld [vmem:[%s8731_s3 + $0x28] sm:$0xff] }
 0xc0b   :  { %7253 = vmatprep.subr.bf16.mxu0 %v7252_v9  ;;  %v6252_v9 = vld [vmem:[%s14124_s10 + $0x160] sm:$0xff] }
 0xc0c   :  { %v7294_v15 = vpack.c.bf16 %v6254_v52, %v6252_v9 }
 0xc0d   :  { %6887 = vmatmul.mubr.msk.f32.gmra.mrb[10].mxu1 %vm5863_vm12, %v5733_v23  ;;  %v6251_v23 = vld [vmem:[%s14124_s10 + $0x158] sm:$0xff] }
 0xc0e   :  { %7255 = vmatpush1.bf16.msra.mxu0 %v7254_v10  ;;  %v7288_v57 = vpack.c.bf16 %v6251_v23, %v6249_v28  ;;  %v7296_v10 = vpack.c.bf16 %v6259_v38, %v6257_v7 }
 0xc0f   :  { %7257 = vmatprep.subr.bf16.mxu0 %v7256_v35  ;;  %v6256_v35 = vld [vmem:[%s14124_s10 + $0x180] sm:$0xff] }
 0xc10   :  { %v7298_v54 = vpack.c.bf16 %v6258_v59, %v6256_v35 }
 0xc12   :  { %7259 = vmatpush1.bf16.msra.mxu0 %v7258_v17  ;;  %v7300_v17 = vpack.c.bf16 %v6263_v18, %v6261_v42 }
 0xc13   :  { %7261 = vmatprep.subr.bf16.mxu0 %v7260_v8  ;;  %v6260_v8 = vld [vmem:[%s14124_s10 + $0x1a0] sm:$0xff] }
 0xc14   :  { %v7302_v36 = vpack.c.bf16 %v6262_v40, %v6260_v8 }
 0xc16   :  { %7263 = vmatpush1.bf16.msra.mxu0 %v7262_v41  ;;  %v7304_v41 = vpack.c.bf16 %v6267_v24, %v6265_v2 }
 0xc17   :  { %7265 = vmatprep.subr.bf16.mxu0 %v7264_v6  ;;  %v6264_v6 = vld [vmem:[%s14124_s10 + $0x1c0] sm:$0xff] }
 0xc18   :  { %v7306_v43 = vpack.c.bf16 %v6266_v46, %v6264_v6 }
 0xc1a   :  { %7267 = vmatpush1.bf16.msra.mxu0 %v7266_v29  ;;  %v6268_v29 = vld [vmem:[%s14124_s10 + $0x1e0] sm:$0xff] }
 0xc1b   :  { %7269 = vmatprep.subr.bf16.mxu0 %v7268_v50  ;;  %v7308_v50 = vpack.c.bf16 %v6271_v25, %v6269_v5  ;;  %v7310_v48 = vpack.c.bf16 %v6270_v44, %v6268_v29  ;;  %v6272_v25 = vld [vmem:[%s14124_s10 + $0x200] sm:$0xff]  ;;  %v6274_v29 = vld [vmem:[%s14124_s10 + $0x210] sm:$0xff] }
 0xc1c   :  { %v7314_v44 = vpack.c.bf16 %v6274_v29, %v6272_v25 }
 0xc1e   :  { %7271 = vmatpush1.bf16.msra.mxu0 %v7270_v37  ;;  %v7312_v37 = vpack.c.bf16 %v6275_v61, %v6273_v19 }
 0xc1f   :  { %7273 = vmatprep.subr.bf16.mxu0 %v7272_v21  ;;  %v6472_v21 = vld [vmem:[%s8731_s3] sm:$0xff] }
 0xc22   :  { %7275 = vmatpush1.bf16.msra.mxu0 %v7274_v30  ;;  %v7317_v30 = vpack.c.bf16 %v6473_v4, %v6472_v21 }
 0xc23   :  { %7277 = vmatprep.subr.bf16.mxu0 %v7276_v33  ;;  %v6476_v33 = vld [vmem:[%s8731_s3 + $0x20] sm:$0xff] }
 0xc24   :  { %7318 = vmatpush1.bf16.msra.mxu1 %v7317_v30  ;;  %v7323_v34 = vpack.c.bf16 %v6477_v49, %v6476_v33  ;;  %v6479_v30 = vld [vmem:[%s8731_s3 + $0x38] sm:$0xff]  ;;  %v6481_v33 = vld [vmem:[%s8731_s3 + $0x48] sm:$0xff] }
 0xc25   :  { %7319 = vmatprep.subr.bf16.mxu1 %v14127_v16  ;;  %v7326_v22 = vpack.c.bf16 %v6479_v30, %v6478_v27 }
 0xc26   :  { %7279 = vmatpush1.bf16.msra.mxu0 %v7278_v3 }
 0xc27   :  { %7281 = vmatprep.subr.bf16.mxu0 %v7280_v53 }
 0xc28   :  { %7321 = vmatpush1.bf16.msra.mxu1 %v7320_v12  ;;  %v6480_v12 = vld [vmem:[%s8731_s3 + $0x40] sm:$0xff] }
 0xc29   :  { %7322 = vmatprep.subr.bf16.mxu1 %v14127_v16  ;;  %v7329_v49 = vpack.c.bf16 %v6481_v33, %v6480_v12 }
 0xc2a   :  { %7283 = vmatpush1.bf16.msra.mxu0 %v7282_v60  ;;  %v5859_v60 = vrot.slane %v5846_v58, %v14130_v63  ;;  %v6487_v63 = vld [vmem:[%s8731_s3 + $0x78] sm:$0xff] }
 0xc2b   :  { %7285 = vmatprep.subr.bf16.mxu0 %v7284_v31  ;;  %v5851_v31 = vrot.slane %v5846_v58, %v14131_v39 }
 0xc2c   :  { %7324 = vmatpush1.bf16.msra.mxu1 %v7323_v34  ;;  %v6483_v34 = vld [vmem:[%s8731_s3 + $0x58] sm:$0xff] }
 0xc2d   :  { %7325 = vmatprep.subr.bf16.mxu1 %v14127_v16 }
 0xc2e   :  { %7287 = vmatpush1.bf16.msra.mxu0 %v7286_v32  ;;  %v5855_v32 = vrot.slane %v5846_v58, %v14132_v62  ;;  %v6485_v58 = vld [vmem:[%s8731_s3 + $0x68] sm:$0xff] }
 0xc2f   :  { %7289 = vmatprep.subr.bf16.mxu0 %v7288_v57 }
 0xc30   :  { %7327 = vmatpush1.bf16.msra.mxu1 %v7326_v22 }
 0xc31   :  { %7328 = vmatprep.subr.bf16.mxu1 %v14127_v16 }
 0xc32   :  { %7291 = vmatpush1.bf16.msra.mxu0 %v7290_v47 }
 0xc33   :  { %7293 = vmatprep.subr.bf16.mxu0 %v7292_v14 }
 0xc34   :  { %7330 = vmatpush1.bf16.msra.mxu1 %v7329_v49 }
 0xc35   :  { %7331 = vmatprep.subr.bf16.mxu1 %v14127_v16 }
 0xc36   :  { %7295 = vmatpush1.bf16.msra.mxu0 %v7294_v15 }
 0xc37   :  { %7297 = vmatprep.subr.bf16.mxu0 %v7296_v10 }
 0xc3a   :  { %7299 = vmatpush1.bf16.msra.mxu0 %v7298_v54 }
 0xc3b   :  { %7301 = vmatprep.subr.bf16.mxu0 %v7300_v17 }
 0xc3e   :  { %7303 = vmatpush1.bf16.msra.mxu0 %v7302_v36 }
 0xc3f   :  { %7305 = vmatprep.subr.bf16.mxu0 %v7304_v41 }
 0xc42   :  { %7307 = vmatpush1.bf16.msra.mxu0 %v7306_v43 }
 0xc43   :  { %7309 = vmatprep.subr.bf16.mxu0 %v7308_v50 }
 0xc46   :  { %7311 = vmatpush1.bf16.msra.mxu0 %v7310_v48 }
 0xc47   :  { %7313 = vmatprep.subr.bf16.mxu0 %v7312_v37 }
 0xcd4   :  { %v6988_v3 = vpop.f32.mrb[14].mxu0 }
 0xcd5   :  { %v6989_v20 = vpop.f32.mrb[15].mxu0 }
 0xcd6   :  { %v6990_v53 = vadd.f32 %v6989_v20, %v6988_v3  ;;  %v6484_v20 = vld [vmem:[%s8731_s3 + $0x60] sm:$0xff] }
 0xcd8   :  { %v6991_v1 = vpop.f32.mrb[16].mxu0  ;;  %v6089_v11 = vadd.f32 %v6990_v53, %v5859_v60  ;;  %v7335_v53 = vpack.c.bf16 %v6485_v58, %v6484_v20 }
 0xcd9   :  { %v6992_v45 = vpop.f32.mrb[17].mxu0 }
 0xcda   :  { %v6993_v55 = vadd.f32 %v6992_v45, %v6991_v1  ;;  %v6486_v1 = vld [vmem:[%s8731_s3 + $0x70] sm:$0xff]  ;;  %v6488_v45 = vld [vmem:[%s8731_s3 + $0x80] sm:$0xff] }
 0xcdc   :  { %v6011_v28 = vpop.f32.mrb[8].mxu1  ;;  %v6094_v23 = vadd.f32 %v6993_v55, %v5859_v60  ;;  %v7097_v57 = vpop.f32.mrb[18].mxu0  ;;  %v7338_v60 = vpack.c.bf16 %v6487_v63, %v6486_v1 }
 0xcdd   :  { %v7350_v51 = vadd.f32 %v6011_v28, %v5851_v31  ;;  %v6013_v47 = vpop.f32.mrb[9].mxu1  ;;  %v6163_v13 = vpop.f32.mrb[19].mxu0  ;;  %v6491_v28 = vld [vmem:[%s8731_s3 + $0x98] sm:$0xff] }
 0xcde   :  { %v6169_v56 = vadd.f32 %v7097_v57, %v6094_v23  ;;  %v7351_v14 = vadd.f32 %v6013_v47, %v5855_v32  ;;  %v6164_v9 = vadd.f32 %v6163_v13, %v6089_v11  ;;  %v6492_v57 = vld [vmem:[%s8731_s3 + $0xa0] sm:$0xff]  ;;  %v6493_v11 = vld [vmem:[%s8731_s3 + $0xa8] sm:$0x3] }
 0xcdf   :  { %v6890_v52 = vmul.f32 -1.442695, %v7350_v51  ;;  %v7347_v51 = vpack.c.bf16 %v6493_v11, %v6492_v57  ;;  %v6276_v47 = vld [vmem:[%s8726_s24] sm:$0x3] }
 0xce0   :  { %v6891_v15 = vmul.f32 -1.442695, %v7351_v14  ;;  %v6017_v7 = vpop.f32.mrb[10].mxu1  ;;  %v6892_v59 = vmul.f32 -1.442695, %v6164_v9  ;;  %v6281_v13 = vrot.slane %v6276_v47, %v14131_v39 }
 0xce1   :  { %8437 = vpow2.f32 %v6890_v52  ;;  %v7352_v38 = vadd.f32 %v6017_v7, %v5851_v31  ;;  %v6019_v10 = vpop.f32.mrb[11].mxu1  ;;  %v6895_v18 = vmul.f32 -1.442695, %v6169_v56  ;;  %v6489_v31 = vld [vmem:[%s8731_s3 + $0x88] sm:$0xff]  ;;  %v6285_v56 = vrot.slane %v6276_v47, %v14132_v62 }
 0xce2   :  { %8439 = vpow2.f32 %v6891_v15  ;;  %v7353_v35 = vadd.f32 %v6019_v10, %v5855_v32  ;;  %v7341_v55 = vpack.c.bf16 %v6489_v31, %v6488_v45  ;;  %v6490_v32 = vld [vmem:[%s8731_s3 + $0x90] sm:$0xff] }
 0xce3   :  { %v6893_v54 = vmul.f32 -1.442695, %v7352_v38  ;;  %v7344_v23 = vpack.c.bf16 %v6491_v28, %v6490_v32 }
 0xce4   :  { %v6894_v42 = vmul.f32 -1.442695, %v7353_v35 }
 0xce5   :  { %8441 = vpow2.f32 %v6893_v54 }
 0xce6   :  { %8443 = vpow2.f32 %v6894_v42 }
 0xce7   :  { %8445 = vpow2.f32 %v6892_v59 }
 0xce8   :  { %8447 = vpow2.f32 %v6895_v18 }
 0xceb   :  { %v8438_v17 = vpop.eup %8437 }
 0xcec   :  { %v8440_v8 = vpop.eup %8439  ;;  %v6190_v40 = vadd.f32 1.0, %v8438_v17 }
 0xced   :  { %v6191_v36 = vadd.f32 1.0, %v8440_v8 }
 0xcef   :  { %v8442_v2 = vpop.eup %8441  ;;  %8449 = vrcp.f32 %v6191_v36 }
 0xcf0   :  { %v8444_v24 = vpop.eup %8443  ;;  %8451 = vrcp.f32 %v6190_v40  ;;  %v6193_v41 = vadd.f32 1.0, %v8442_v2 }
 0xcf1   :  { %v8446_v6 = vpop.eup %8445  ;;  %v6194_v46 = vadd.f32 1.0, %v8444_v24 }
 0xcf2   :  { %v6192_v43 = vadd.f32 1.0, %v8446_v6  ;;  %v8448_v5 = vpop.eup %8447 }
 0xcf3   :  { %8453 = vrcp.f32 %v6194_v46  ;;  %v6195_v50 = vadd.f32 1.0, %v8448_v5  ;;  %v6902_v46 = vld [vmem:[%s8736_s20] ss:$0 sm:$0xff] }
 0xcf4   :  { %8455 = vrcp.f32 %v6193_v41 }
 0xcf5   :  { %8457 = vrcp.f32 %v6192_v43 }
 0xcf6   :  { %8459 = vrcp.f32 %v6195_v50 }
 0xcf9   :  { %v8450_v48 = vpop.eup %8449 }
 0xcfa   :  { %v8452_v19 = vpop.eup %8451  ;;  %6358 = vmatprep.mubr.f32.mxu0 %v8450_v48 }
 0xcfb   :  { %6359 = vmatmul.mubr.f32.vlgmr.msra.gmra.mrb[20].mxu0 %v8452_v19 }
 0xcfc   :  { %7315 = vmatpush1.bf16.msra.mxu0 %v7314_v44 }
 0xcfd   :  { %v8454_v61 = vpop.eup %8453 }
 0xcfe   :  { %v8456_v37 = vpop.eup %8455  ;;  %6364 = vmatprep.mubr.f32.mxu0 %v8454_v61 }
 0xcff   :  { %6365 = vmatmul.mubr.f32.gmra.mrb[22].mxu0 %v8456_v37  ;;  %v8458_v21 = vpop.eup %8457 }
 0xd00   :  { %6435 = vmatprep.mubr.f32.mxu0 %v14128_v26  ;;  %v8460_v4 = vpop.eup %8459 }
 0xd03   :  { %6896 = vmatmul.mubr.msk.f32.vlgmr.msra.gmra.mrb[20].mxu0 %vm5863_vm12, %v8458_v21 }
 0xd04   :  { %6441 = vmatprep.mubr.f32.mxu0 %v14128_v26  ;;  %v6482_v26 = vld [vmem:[%s8731_s3 + $0x50] sm:$0xff]  ;;  %s8561_s3 = smov [#allocation4]  }
 0xd05   :  { %v7332_v3 = vpack.c.bf16 %v6483_v34, %v6482_v26  ;;  %s6593_s24 = sshll.u32 %s8561_s3, 4  ;;  %s6594_s24 = int_to_ptr.vmem [resolvable:$true] %s6593_s24 }
 0xd06   :  { %s8477_s0 = scalar_lea.vmem %s6594_s24, 256  ;;  %p8482_p3 = scmp.lt.s32.totalorder %s6594_s24, %s6594_s24 }
 0xd07   :  { %6897 = vmatmul.mubr.msk.f32.gmra.mrb[22].mxu0 %vm5863_vm12, %v8460_v4  ;;  %7333 = vmatpush1.bf16.msra.mxu1 %v7332_v3  ;;  %p8478_p2 = scmp.ne.s32.totalorder %s6594_s24, %s8477_s0  ;;  %p8483_p4 = scmp.lt.s32.totalorder %s8477_s0, %s8477_s0 }
 0xd08   :  { %7334 = vmatprep.subr.bf16.mxu1 %v14127_v16 }
 0xd09   :  { %p8484_p5 = por %p8483_p4, %p8482_p3 }
 0xd0b   :  { %7336 = vmatpush1.bf16.msra.mxu1 %v7335_v53  ;;  %p8485_p6 = pnand %p8484_p5, %p8478_p2 }
 0xd0c   :  { %7337 = vmatprep.subr.bf16.mxu1 %v14127_v16 }
 0xd0f   :  { %7339 = vmatpush1.bf16.msra.mxu1 %v7338_v60 }
 0xd10   :  { %7340 = vmatprep.subr.bf16.mxu1 %v14127_v16 }
 0xd13   :  { %7342 = vmatpush1.bf16.msra.mxu1 %v7341_v55 }
 0xd14   :  { %7343 = vmatprep.subr.bf16.mxu1 %v14127_v16 }
 0xd17   :  { %7345 = vmatpush1.bf16.msra.mxu1 %v7344_v23 }
 0xd18   :  { %7346 = vmatprep.subr.bf16.mxu1 %v14127_v16 }
 0xd1b   :  { %7349 = vmatpush1.bf16.msk.msra.mxu1 %vm12313_vm8, %v7347_v51 }
 0xdd6   :  { %v6437_v14 = vpop.f32.mrb[20].mxu0 }
 0xdd7   :  { %v7354_v9 = vadd.f32 %v6437_v14, %v6281_v13  ;;  %v6439_v52 = vpop.f32.mrb[21].mxu0 }
 0xdd8   :  { %v7355_v15 = vadd.f32 %v6439_v52, %v6285_v56 }
 0xdd9   :  { %v6898_v7 = vmul.f32 -1.442695, %v7354_v9 }
 0xdda   :  { %v6899_v38 = vmul.f32 -1.442695, %v7355_v15  ;;  %v6443_v10 = vpop.f32.mrb[22].mxu0 }
 0xddb   :  { %8461 = vpow2.f32 %v6898_v7  ;;  %v7356_v35 = vadd.f32 %v6443_v10, %v6281_v13  ;;  %v6445_v59 = vpop.f32.mrb[23].mxu0 }
 0xddc   :  { %8463 = vpow2.f32 %v6899_v38  ;;  %v7357_v16 = vadd.f32 %v6445_v59, %v6285_v56 }
 0xddd   :  { %v6900_v54 = vmul.f32 -1.442695, %v7356_v35 }
 0xdde   :  { %v6901_v0 = vmul.f32 -1.442695, %v7357_v16 }
 0xddf   :  { %8465 = vpow2.f32 %v6900_v54 }
 0xde0   :  { %8467 = vpow2.f32 %v6901_v0 }
 0xde5   :  { %v8462_v42 = vpop.eup %8461 }
 0xde6   :  { %v8464_v39 = vpop.eup %8463  ;;  %v6460_v18 = vadd.f32 1.0, %v8462_v42 }
 0xde7   :  { %v6461_v62 = vadd.f32 1.0, %v8464_v39 }
 0xde9   :  { %v8466_v17 = vpop.eup %8465  ;;  %8469 = vrcp.f32 %v6461_v62 }
 0xdea   :  { %v8468_v8 = vpop.eup %8467  ;;  %8471 = vrcp.f32 %v6460_v18  ;;  %v6462_v40 = vadd.f32 1.0, %v8466_v17 }
 0xdeb   :  { %v6463_v36 = vadd.f32 1.0, %v8468_v8 }
 0xded   :  { %8473 = vrcp.f32 %v6463_v36 }
 0xdee   :  { %8475 = vrcp.f32 %v6462_v40 }
 0xdf3   :  { %v8470_v2 = vpop.eup %8469 }
 0xdf4   :  { %v8472_v24 = vpop.eup %8471  ;;  %6904 = vmatprep.mubr.msk.f32.mxu1 %vm5553_vm11, %v8470_v2 }
 0xdf5   :  { %6575 = vmatmul.mubr.f32.vlgmr.msra.gmra.mrb[12].mxu1 %v8472_v24 }
 0xdf7   :  { %v8474_v41 = vpop.eup %8473 }
 0xdf8   :  { %v8476_v6 = vpop.eup %8475  ;;  %6905 = vmatprep.mubr.msk.f32.mxu1 %vm5553_vm11, %v8474_v41 }
 0xdf9   :  { %6580 = vmatmul.mubr.f32.gmra.mrb[14].mxu1 %v8476_v6 }
 0xec8   :  { %v6576_v43 = vpop.f32.mrb[12].mxu1 }
 0xec9   :  { %v6577_v5 = vadd.f32 %v6902_v46, %v6576_v43  ;;  %v6578_v25 = vpop.f32.mrb[13].mxu1 }
 0xecb   :  { %6585 = vst.msk [vmem:[#allocation4] sm:$0xff] %vm14133_vm1, %v6577_v5 }
 0xecc   :  { %v6581_v29 = vpop.f32.mrb[14].mxu1 }
 0xecd   :  { %v6582_v50 = vadd.f32 %v6902_v46, %v6581_v29  ;;  %v6583_v44 = vpop.f32.mrb[15].mxu1 }
 0xecf   :  { %6587 = vst.msk [vmem:[#allocation4 + $0x8] sm:$0xf] %vm6586_vm2, %v6582_v50 }
 0xed0   :  { %8488 = shalt.err (!%p8485_p6)
}
 0xed1   :  { %s8489_s20 = scalar_lea.hbm %s8741_s19, 256 }
 0xed2   :  { %p8490_p7 = scmp.ne.s32.totalorder %s8741_s19, %s8489_s20  ;;  %p8493_p8 = scmp.lt.u32.totalorder %s8489_s20, %s8741_s19 }
 0xed4   :  { %p8495_p9 = pnand %p8493_p8, %p8490_p7 }
 0xed6   :  { %8498 = shalt.err (!%p8495_p9)
}
 0xed7   :  { %s8562_s5 = smov 128  }
 0xed8   :  { %6599 = dma.vmem_to_hbm [thread:$0]  %s6594_s24, 256, %s8741_s19, [#allocation5], %s8562_s5, %s8562_s5, %s8560_s7  }
 0xed9   :  { %8507 = dma.done.wait [#allocation5], 256  }
 0xeda   :  { %8508 = vsyncadd [#allocation5], 4294967040 }
 0xedb   :  { %6603 = vsyncpa [#allocation5], 1 }

</bundles_post_ra>
